<compile_context>
chip_gen: v7x
topology: tpu7x:2x2x1
jax: 0.10.0
libtpu: 0.0.40
codegen_flags: <defaults>
</compile_context>

<pallas_src>
import functools

import numpy as np
import jax
import jax.numpy as jnp
from jax.experimental import pallas as pl
from jax.experimental.pallas import tpu as pltpu


# ------------------------------ geometry helper ------------------------------
# ConvTranspose2d(stride=2, kernel K) in polyphase form, square inputs of side H:
#   Kp = K//2 taps per axis, input padded by Kp-1 -> padded side PH,
#   polyphase block grid side Mo (output image side = 2*Mo),
#   junk-tolerant contiguous slice length L = (Mo-1)*PH + Mo.
def _geom(H, K):
    Kp = K // 2
    pad = Kp - 1
    PH = H + 2 * pad
    Mo = H + Kp - 1
    L = (Mo - 1) * PH + Mo
    return Kp, pad, PH, Mo, L


# --------------------------------- kernels -----------------------------------

def _mlp_ct1_kernel(z_ref, w1_ref, b1_ref, w2_ref, b2_ref, wc_ref, bc_ref,
                    o_ref, xpad_ref, *, B, Cin, Kp, PH, Mo, L):
    # fc1 -> ReLU -> fc2 -> ReLU (fc2 columns pre-permuted to NHWC order).
    h = jnp.dot(z_ref[...], w1_ref[...], preferred_element_type=jnp.float32)
    h = jnp.maximum(h + b1_ref[...], 0.0)
    h = jnp.dot(h, w2_ref[...], preferred_element_type=jnp.float32)
    h = jnp.maximum(h + b2_ref[...], 0.0)            # (B, 4*Cin): the 2x2x256 NHWC image

    # Scatter the 2x2 image into the zero-padded, flattened scratch (B, PH*PH, Cin).
    pad = Kp - 1
    xpad_ref[...] = jnp.zeros_like(xpad_ref)
    for b in range(B):
        for i in range(2):
            for j in range(2):
                row = (pad + i) * PH + (pad + j)
                xpad_ref[b, row:row + 1, :] = h[b:b + 1,
                                                (2 * i + j) * Cin:(2 * i + j + 1) * Cin]

    # ConvT1: Kp^2 accumulated dots over junk-tolerant contiguous slices.
    nout = wc_ref.shape[1]
    for b in range(B):
        acc = None
        for dy in range(Kp):
            for dx in range(Kp):
                t = dy * Kp + dx
                tap = xpad_ref[b, dy * PH + dx:dy * PH + dx + L, :]
                part = jnp.dot(tap, wc_ref[t * Cin:(t + 1) * Cin, :],
                               preferred_element_type=jnp.float32)
                acc = part if acc is None else acc + part
        y = jnp.maximum(acc + bc_ref[...], 0.0)
        o_ref[b, 0:L, :] = y
        o_ref[b, L:Mo * PH, :] = jnp.zeros((Mo * PH - L, nout), jnp.float32)


def _convt_kernel(x_ref, w_ref, b_ref, o_ref, *, Cin, Kp, PH, Mo, L, act):
    # One batch element per grid step.  x_ref: (1, PH*PH, Cin) flattened padded image.
    nout = w_ref.shape[1]
    acc = None
    for dy in range(Kp):
        for dx in range(Kp):
            t = dy * Kp + dx
            tap = x_ref[0, dy * PH + dx:dy * PH + dx + L, :]
            part = jnp.dot(tap, w_ref[t * Cin:(t + 1) * Cin, :],
                           preferred_element_type=jnp.float32)
            acc = part if acc is None else acc + part
    y = act(acc + b_ref[...])
    o_ref[0, 0:L, :] = y
    o_ref[0, L:Mo * PH, :] = jnp.zeros((Mo * PH - L, nout), jnp.float32)


# -------------------------------- wrappers ------------------------------------

def mlp_ct1_forward(z, q):
    B = z.shape[0]
    Kp, _, PH, Mo, L = _geom(2, 4)
    vmem = pl.BlockSpec(memory_space=pltpu.MemorySpace.VMEM)
    kernel = functools.partial(_mlp_ct1_kernel, B=B, Cin=256, Kp=Kp, PH=PH, Mo=Mo, L=L)
    return pl.pallas_call(
        kernel,
        out_shape=jax.ShapeDtypeStruct((B, Mo * PH, q["ct1_w"].shape[1]), jnp.float32),
        in_specs=[vmem] * 7,
        out_specs=vmem,
        scratch_shapes=[pltpu.VMEM((B, PH * PH, 256), jnp.float32)],
    )(z, q["fc1_w"], q["fc1_b"], q["fc2_w"], q["fc2_b"], q["ct1_w"], q["ct1_b"])


def convt_forward(x_flat, w, bias, *, H, K, Cin, act):
    B, S, _ = x_flat.shape
    Kp, _, PH, Mo, L = _geom(H, K)
    assert S == PH * PH
    nout = w.shape[1]
    kernel = functools.partial(_convt_kernel, Cin=Cin, Kp=Kp, PH=PH, Mo=Mo, L=L, act=act)
    return pl.pallas_call(
        kernel,
        out_shape=jax.ShapeDtypeStruct((B, Mo * PH, nout), jnp.float32),
        grid=(B,),
        in_specs=[
            pl.BlockSpec((1, S, Cin), lambda b: (b, 0, 0)),
            pl.BlockSpec(w.shape, lambda b: (0, 0)),
            pl.BlockSpec((1, nout), lambda b: (0, 0)),
        ],
        out_specs=pl.BlockSpec((1, Mo * PH, nout), lambda b: (b, 0, 0)),
        compiler_params=pltpu.CompilerParams(dimension_semantics=("parallel",)),
    )(x_flat, w, bias)


def _phases_to_padded_flat(y, *, H, K, C, next_pad):
    """Phase output (B, Mo*PH, >=4C) -> interleaved NHWC image, optionally padded+flattened
    for the next layer.  Pure index plumbing on <=0.5 MB tensors (single XLA fusion)."""
    B = y.shape[0]
    _, _, PH, Mo, _ = _geom(H, K)
    ph = y[:, :, :4 * C].reshape(B, Mo, PH, 2, 2, C)[:, :, :Mo]      # (B, Mo, No, p, q, C)
    img = ph.transpose(0, 1, 3, 2, 4, 5).reshape(B, 2 * Mo, 2 * Mo, C)
    if next_pad is None:
        return img
    p = next_pad
    img = jnp.pad(img, ((0, 0), (p, p), (p, p), (0, 0)))
    side = 2 * Mo + 2 * p
    return img.reshape(B, side * side, C)


# ------------------------------ decoder forward --------------------------------

def decoder_forward(z, q):
    relu = lambda v: jnp.maximum(v, 0.0)

    y = mlp_ct1_forward(z, q)                                        # (B, 12, 128)
    x = _phases_to_padded_flat(y, H=2, K=4, C=32, next_pad=1)        # (B, 64, 32)

    y = convt_forward(x, q["ct2_w"], q["ct2_b"], H=6, K=4, Cin=32, act=relu)    # (B, 56, 128)
    x = _phases_to_padded_flat(y, H=6, K=4, C=32, next_pad=1)        # (B, 256, 32)

    y = convt_forward(x, q["ct3_w"], q["ct3_b"], H=14, K=4, Cin=32, act=relu)   # (B, 240, 128)
    x = _phases_to_padded_flat(y, H=14, K=4, C=16, next_pad=2)       # (B, 1156, 16)

    y = convt_forward(x, q["ct4_w"], q["ct4_b"], H=30, K=6, Cin=16,
                      act=jax.nn.sigmoid)                            # (B, 1088, 4)
    img = _phases_to_padded_flat(y, H=30, K=6, C=1, next_pad=None)   # (B, 64, 64, 1)
    return img.transpose(0, 3, 1, 2)                                 # NCHW (B, 1, 64, 64)


# --------------------------------- parameters ----------------------------------

def init_params(key, latent_dim=6):
    def uinit(k, shape, fan_in):
        bound = 1.0 / float(np.sqrt(fan_in))
        return jax.random.uniform(k, shape, jnp.float32, -bound, bound)

    ks = jax.random.split(key, 12)
    p = {}
    p["fc1_w"] = uinit(ks[0], (latent_dim, 256), latent_dim)
    p["fc1_b"] = uinit(ks[1], (1, 256), latent_dim)
    p["fc2_w"] = uinit(ks[2], (256, 1024), 256)
    p["fc2_b"] = uinit(ks[3], (1, 1024), 256)
    # ConvTranspose2d weights in PyTorch layout (Cin, Cout, K, K).
    p["ct1_w"] = uinit(ks[4], (256, 32, 4, 4), 256 * 16)
    p["ct1_b"] = uinit(ks[5], (32,), 256 * 16)
    p["ct2_w"] = uinit(ks[6], (32, 32, 4, 4), 32 * 16)
    p["ct2_b"] = uinit(ks[7], (32,), 32 * 16)
    p["ct3_w"] = uinit(ks[8], (32, 16, 4, 4), 32 * 16)
    p["ct3_b"] = uinit(ks[9], (16,), 32 * 16)
    p["ct4_w"] = uinit(ks[10], (16, 1, 6, 6), 16 * 36)
    p["ct4_b"] = uinit(ks[11], (1,), 16 * 36)
    return p


def _poly_weight(w):
    """PyTorch ConvTranspose2d weight (Cin,Cout,K,K) -> polyphase matrix (Kp*Kp*Cin, 4*Cout).

    Rows ordered (dy, dx, ci) over the padded-input taps; columns ordered (p, q, co) over the
    four output phases.  No bias row (bias is a separate kernel input)."""
    Cin, Cout, K, _ = w.shape
    Kp = K // 2
    wp = np.zeros((Kp, Kp, Cin, 2, 2, Cout), np.float32)
    for dy in range(Kp):
        for dx in range(Kp):
            for ph in range(2):
                for qh in range(2):
                    wp[dy, dx, :, ph, qh, :] = w[:, :, ph + 2 * (Kp - 1 - dy),
                                                 qh + 2 * (Kp - 1 - dx)]
    return wp.reshape(Kp * Kp * Cin, 4 * Cout)


def prepare_params(p):
    """One-time weight preprocessing (done at init, NOT per forward call)."""
    pn = {k: np.asarray(v, np.float32) for k, v in p.items()}
    q = {"fc1_w": jnp.asarray(pn["fc1_w"]), "fc1_b": jnp.asarray(pn["fc1_b"])}
    # Permute fc2 columns from PyTorch (c, h, w) flatten order to NHWC (h, w, c) so the MLP
    # output is directly the flattened 2x2x256 image.
    perm = np.arange(1024).reshape(256, 2, 2).transpose(1, 2, 0).reshape(-1)
    q["fc2_w"] = jnp.asarray(pn["fc2_w"][:, perm])
    q["fc2_b"] = jnp.asarray(pn["fc2_b"][:, perm])

    def conv(name, pad_cols=None):
        w = _poly_weight(pn[name + "_w"])
        b = np.tile(pn[name + "_b"], 4).reshape(1, -1)      # keep (p, q, co) column order
        if pad_cols is not None and pad_cols > w.shape[1]:
            w = np.pad(w, ((0, 0), (0, pad_cols - w.shape[1])))
            b = np.pad(b, ((0, 0), (0, pad_cols - b.shape[1])))
        return jnp.asarray(w), jnp.asarray(b)

    q["ct1_w"], q["ct1_b"] = conv("ct1")                 # (1024, 128), (1, 128)
    q["ct2_w"], q["ct2_b"] = conv("ct2")                 # (128, 128),  (1, 128)
    q["ct3_w"], q["ct3_b"] = conv("ct3", pad_cols=128)   # (128, 128) zero-padded to lane-dense
    q["ct4_w"], q["ct4_b"] = conv("ct4")                 # (144, 4),    (1, 4)
    return q


# ---------------------- NumPy reference (PyTorch semantics) ---------------------

def ref_decoder(z, p):
    pn = {k: np.asarray(v, np.float32) for k, v in p.items()}
    z = np.asarray(z, np.float32)
    h = np.maximum(z @ pn["fc1_w"] + pn["fc1_b"], 0.0)
    h = np.maximum(h @ pn["fc2_w"] + pn["fc2_b"], 0.0)
    x = h.reshape(z.shape[0], 256, 2, 2)

    def convt(x, w, b, s):
        B, Cin, H, W = x.shape
        Cout, K = w.shape[1], w.shape[2]
        out = np.zeros((B, Cout, (H - 1) * s + K, (W - 1) * s + K), np.float32)
        for i in range(H):
            for j in range(W):
                out[:, :, i * s:i * s + K, j * s:j * s + K] += np.einsum(
                    "bc,cokl->bokl", x[:, :, i, j], w)
        return out + b.reshape(1, Cout, 1, 1)

    x = np.maximum(convt(x, pn["ct1_w"], pn["ct1_b"], 2), 0.0)
    x = np.maximum(convt(x, pn["ct2_w"], pn["ct2_b"], 2), 0.0)
    x = np.maximum(convt(x, pn["ct3_w"], pn["ct3_b"], 2), 0.0)
    x = convt(x, pn["ct4_w"], pn["ct4_b"], 2)
    return 1.0 / (1.0 + np.exp(-x))


# ------------------------------------ main --------------------------------------

if __name__ == "__main__":
    key = jax.random.PRNGKey(0)
    pkey, zkey = jax.random.split(key)
    params = init_params(pkey, latent_dim=6)
    z = jax.random.normal(zkey, (2, 6), jnp.float32)

    prepared = prepare_params(params)
    fwd = jax.jit(decoder_forward)
    out = jax.block_until_ready(fwd(z, prepared))
    assert out.shape == (2, 1, 64, 64), out.shape

    ref = ref_decoder(np.asarray(z), params)
    if not np.allclose(np.asarray(out), ref, atol=5e-3, rtol=5e-3):
        raise AssertionError("Pallas decoder output does not match reference")

    print("KERNEL_OK")
</pallas_src>

<mosaic_0001>
module attributes {stable_mosaic.version = 11 : i64} {
  func.func @_mlp_ct1_kernel(%arg0: memref<2x6xf32, #tpu.memory_space<vmem>>, %arg1: memref<6x256xf32, #tpu.memory_space<vmem>>, %arg2: memref<1x256xf32, #tpu.memory_space<vmem>>, %arg3: memref<256x1024xf32, #tpu.memory_space<vmem>>, %arg4: memref<1x1024xf32, #tpu.memory_space<vmem>>, %arg5: memref<1024x128xf32, #tpu.memory_space<vmem>>, %arg6: memref<1x128xf32, #tpu.memory_space<vmem>>, %arg7: memref<2x12x128xf32, #tpu.memory_space<vmem>>, %arg8: memref<2x16x256xf32, #tpu.memory_space<vmem>>) attributes {dimension_semantics = [], scalar_prefetch = 0 : i64, scratch_operands = 1 : i64, tpu.core_type = #tpu.core_type<tc>} {
    %c0 = arith.constant 0 : index
    %c0_0 = arith.constant 0 : index
    %0 = vector.load %arg0[%c0, %c0_0] : memref<2x6xf32, #tpu.memory_space<vmem>>, vector<2x6xf32>
    %c0_1 = arith.constant 0 : index
    %c0_2 = arith.constant 0 : index
    %1 = vector.load %arg1[%c0_1, %c0_2] : memref<6x256xf32, #tpu.memory_space<vmem>>, vector<6x256xf32>
    %cst = arith.constant dense<0.000000e+00> : vector<2x256xf32>
    %2 = tpu.matmul %0, %1, %cst {dimension_numbers = #tpu.dot_dimension_numbers<[1], [0], [0], [1], [0, 0, 1, 1], [], []>} : vector<2x6xf32>, vector<6x256xf32>, vector<2x256xf32> -> vector<2x256xf32>
    %c0_3 = arith.constant 0 : index
    %c0_4 = arith.constant 0 : index
    %3 = vector.load %arg2[%c0_3, %c0_4] : memref<1x256xf32, #tpu.memory_space<vmem>>, vector<1x256xf32>
    %4 = vector.broadcast %3 : vector<1x256xf32> to vector<2x256xf32>
    %5 = arith.addf %2, %4 : vector<2x256xf32>
    %cst_5 = arith.constant 0.000000e+00 : f32
    %6 = vector.broadcast %cst_5 : f32 to vector<2x256xf32>
    %7 = arith.maximumf %5, %6 : vector<2x256xf32>
    %c0_6 = arith.constant 0 : index
    %c0_7 = arith.constant 0 : index
    %8 = vector.load %arg3[%c0_6, %c0_7] : memref<256x1024xf32, #tpu.memory_space<vmem>>, vector<256x1024xf32>
    %cst_8 = arith.constant dense<0.000000e+00> : vector<2x1024xf32>
    %9 = tpu.matmul %7, %8, %cst_8 {dimension_numbers = #tpu.dot_dimension_numbers<[1], [0], [0], [1], [0, 0, 1, 1], [], []>} : vector<2x256xf32>, vector<256x1024xf32>, vector<2x1024xf32> -> vector<2x1024xf32>
    %c0_9 = arith.constant 0 : index
    %c0_10 = arith.constant 0 : index
    %10 = vector.load %arg4[%c0_9, %c0_10] : memref<1x1024xf32, #tpu.memory_space<vmem>>, vector<1x1024xf32>
    %11 = vector.broadcast %10 : vector<1x1024xf32> to vector<2x1024xf32>
    %12 = arith.addf %9, %11 : vector<2x1024xf32>
    %cst_11 = arith.constant 0.000000e+00 : f32
    %13 = vector.broadcast %cst_11 : f32 to vector<2x1024xf32>
    %14 = arith.maximumf %12, %13 : vector<2x1024xf32>
    %cst_12 = arith.constant 0.000000e+00 : f32
    %15 = vector.broadcast %cst_12 : f32 to vector<2x16x256xf32>
    %c0_13 = arith.constant 0 : index
    %c0_14 = arith.constant 0 : index
    %c0_15 = arith.constant 0 : index
    %16 = vector.load %arg8[%c0_13, %c0_14, %c0_15] : memref<2x16x256xf32, #tpu.memory_space<vmem>>, vector<2x16x256xf32>
    tpu.vector_store %arg8[%c0_13, %c0_14, %c0_15], %15 {strides = array<i32>} : memref<2x16x256xf32, #tpu.memory_space<vmem>>, vector<2x16x256xf32>,
    %17 = vector.extract_strided_slice %14 {offsets = [0, 0], sizes = [1, 256], strides = [1, 1]} : vector<2x1024xf32> to vector<1x256xf32>
    %c0_16 = arith.constant 0 : index
    %c5 = arith.constant 5 : index
    %c0_17 = arith.constant 0 : index
    %18 = vector.load %arg8[%c0_16, %c5, %c0_17] : memref<2x16x256xf32, #tpu.memory_space<vmem>>, vector<1x1x256xf32>
    %19 = vector.shape_cast %18 : vector<1x1x256xf32> to vector<1x256xf32>
    %20 = vector.shape_cast %17 : vector<1x256xf32> to vector<1x1x256xf32>
    tpu.vector_store %arg8[%c0_16, %c5, %c0_17], %20 {strides = array<i32>} : memref<2x16x256xf32, #tpu.memory_space<vmem>>, vector<1x1x256xf32>,
    %21 = vector.extract_strided_slice %14 {offsets = [0, 256], sizes = [1, 256], strides = [1, 1]} : vector<2x1024xf32> to vector<1x256xf32>
    %c0_18 = arith.constant 0 : index
    %c6 = arith.constant 6 : index
    %c0_19 = arith.constant 0 : index
    %22 = vector.load %arg8[%c0_18, %c6, %c0_19] : memref<2x16x256xf32, #tpu.memory_space<vmem>>, vector<1x1x256xf32>
    %23 = vector.shape_cast %22 : vector<1x1x256xf32> to vector<1x256xf32>
    %24 = vector.shape_cast %21 : vector<1x256xf32> to vector<1x1x256xf32>
    tpu.vector_store %arg8[%c0_18, %c6, %c0_19], %24 {strides = array<i32>} : memref<2x16x256xf32, #tpu.memory_space<vmem>>, vector<1x1x256xf32>,
    %25 = vector.extract_strided_slice %14 {offsets = [0, 512], sizes = [1, 256], strides = [1, 1]} : vector<2x1024xf32> to vector<1x256xf32>
    %c0_20 = arith.constant 0 : index
    %c9 = arith.constant 9 : index
    %c0_21 = arith.constant 0 : index
    %26 = vector.load %arg8[%c0_20, %c9, %c0_21] : memref<2x16x256xf32, #tpu.memory_space<vmem>>, vector<1x1x256xf32>
    %27 = vector.shape_cast %26 : vector<1x1x256xf32> to vector<1x256xf32>
    %28 = vector.shape_cast %25 : vector<1x256xf32> to vector<1x1x256xf32>
    tpu.vector_store %arg8[%c0_20, %c9, %c0_21], %28 {strides = array<i32>} : memref<2x16x256xf32, #tpu.memory_space<vmem>>, vector<1x1x256xf32>,
    %29 = vector.extract_strided_slice %14 {offsets = [0, 768], sizes = [1, 256], strides = [1, 1]} : vector<2x1024xf32> to vector<1x256xf32>
    %c0_22 = arith.constant 0 : index
    %c10 = arith.constant 10 : index
    %c0_23 = arith.constant 0 : index
    %30 = vector.load %arg8[%c0_22, %c10, %c0_23] : memref<2x16x256xf32, #tpu.memory_space<vmem>>, vector<1x1x256xf32>
    %31 = vector.shape_cast %30 : vector<1x1x256xf32> to vector<1x256xf32>
    %32 = vector.shape_cast %29 : vector<1x256xf32> to vector<1x1x256xf32>
    tpu.vector_store %arg8[%c0_22, %c10, %c0_23], %32 {strides = array<i32>} : memref<2x16x256xf32, #tpu.memory_space<vmem>>, vector<1x1x256xf32>,
    %33 = vector.extract_strided_slice %14 {offsets = [1, 0], sizes = [1, 256], strides = [1, 1]} : vector<2x1024xf32> to vector<1x256xf32>
    %c1 = arith.constant 1 : index
    %c5_24 = arith.constant 5 : index
    %c0_25 = arith.constant 0 : index
    %34 = vector.load %arg8[%c1, %c5_24, %c0_25] : memref<2x16x256xf32, #tpu.memory_space<vmem>>, vector<1x1x256xf32>
    %35 = vector.shape_cast %34 : vector<1x1x256xf32> to vector<1x256xf32>
    %36 = vector.shape_cast %33 : vector<1x256xf32> to vector<1x1x256xf32>
    tpu.vector_store %arg8[%c1, %c5_24, %c0_25], %36 {strides = array<i32>} : memref<2x16x256xf32, #tpu.memory_space<vmem>>, vector<1x1x256xf32>,
    %37 = vector.extract_strided_slice %14 {offsets = [1, 256], sizes = [1, 256], strides = [1, 1]} : vector<2x1024xf32> to vector<1x256xf32>
    %c1_26 = arith.constant 1 : index
    %c6_27 = arith.constant 6 : index
    %c0_28 = arith.constant 0 : index
    %38 = vector.load %arg8[%c1_26, %c6_27, %c0_28] : memref<2x16x256xf32, #tpu.memory_space<vmem>>, vector<1x1x256xf32>
    %39 = vector.shape_cast %38 : vector<1x1x256xf32> to vector<1x256xf32>
    %40 = vector.shape_cast %37 : vector<1x256xf32> to vector<1x1x256xf32>
    tpu.vector_store %arg8[%c1_26, %c6_27, %c0_28], %40 {strides = array<i32>} : memref<2x16x256xf32, #tpu.memory_space<vmem>>, vector<1x1x256xf32>,
    %41 = vector.extract_strided_slice %14 {offsets = [1, 512], sizes = [1, 256], strides = [1, 1]} : vector<2x1024xf32> to vector<1x256xf32>
    %c1_29 = arith.constant 1 : index
    %c9_30 = arith.constant 9 : index
    %c0_31 = arith.constant 0 : index
    %42 = vector.load %arg8[%c1_29, %c9_30, %c0_31] : memref<2x16x256xf32, #tpu.memory_space<vmem>>, vector<1x1x256xf32>
    %43 = vector.shape_cast %42 : vector<1x1x256xf32> to vector<1x256xf32>
    %44 = vector.shape_cast %41 : vector<1x256xf32> to vector<1x1x256xf32>
    tpu.vector_store %arg8[%c1_29, %c9_30, %c0_31], %44 {strides = array<i32>} : memref<2x16x256xf32, #tpu.memory_space<vmem>>, vector<1x1x256xf32>,
    %45 = vector.extract_strided_slice %14 {offsets = [1, 768], sizes = [1, 256], strides = [1, 1]} : vector<2x1024xf32> to vector<1x256xf32>
    %c1_32 = arith.constant 1 : index
    %c10_33 = arith.constant 10 : index
    %c0_34 = arith.constant 0 : index
    %46 = vector.load %arg8[%c1_32, %c10_33, %c0_34] : memref<2x16x256xf32, #tpu.memory_space<vmem>>, vector<1x1x256xf32>
    %47 = vector.shape_cast %46 : vector<1x1x256xf32> to vector<1x256xf32>
    %48 = vector.shape_cast %45 : vector<1x256xf32> to vector<1x1x256xf32>
    tpu.vector_store %arg8[%c1_32, %c10_33, %c0_34], %48 {strides = array<i32>} : memref<2x16x256xf32, #tpu.memory_space<vmem>>, vector<1x1x256xf32>,
    %c0_35 = arith.constant 0 : index
    %c0_36 = arith.constant 0 : index
    %c0_37 = arith.constant 0 : index
    %49 = vector.load %arg8[%c0_35, %c0_36, %c0_37] : memref<2x16x256xf32, #tpu.memory_space<vmem>>, vector<1x11x256xf32>
    %50 = vector.shape_cast %49 : vector<1x11x256xf32> to vector<11x256xf32>
    %c0_38 = arith.constant 0 : index
    %c0_39 = arith.constant 0 : index
    %51 = vector.load %arg5[%c0_38, %c0_39] : memref<1024x128xf32, #tpu.memory_space<vmem>>, vector<256x128xf32>
    %cst_40 = arith.constant dense<0.000000e+00> : vector<11x128xf32>
    %52 = tpu.matmul %50, %51, %cst_40 {dimension_numbers = #tpu.dot_dimension_numbers<[1], [0], [0], [1], [0, 0, 1, 1], [], []>} : vector<11x256xf32>, vector<256x128xf32>, vector<11x128xf32> -> vector<11x128xf32>
    %c0_41 = arith.constant 0 : index
    %c1_42 = arith.constant 1 : index
    %c0_43 = arith.constant 0 : index
    %53 = vector.load %arg8[%c0_41, %c1_42, %c0_43] : memref<2x16x256xf32, #tpu.memory_space<vmem>>, vector<1x11x256xf32>
    %54 = vector.shape_cast %53 : vector<1x11x256xf32> to vector<11x256xf32>
    %c256 = arith.constant 256 : index
    %c0_44 = arith.constant 0 : index
    %55 = vector.load %arg5[%c256, %c0_44] : memref<1024x128xf32, #tpu.memory_space<vmem>>, vector<256x128xf32>
    %cst_45 = arith.constant dense<0.000000e+00> : vector<11x128xf32>
    %56 = tpu.matmul %54, %55, %cst_45 {dimension_numbers = #tpu.dot_dimension_numbers<[1], [0], [0], [1], [0, 0, 1, 1], [], []>} : vector<11x256xf32>, vector<256x128xf32>, vector<11x128xf32> -> vector<11x128xf32>
    %57 = arith.addf %52, %56 : vector<11x128xf32>
    %c0_46 = arith.constant 0 : index
    %c4 = arith.constant 4 : index
    %c0_47 = arith.constant 0 : index
    %58 = vector.load %arg8[%c0_46, %c4, %c0_47] : memref<2x16x256xf32, #tpu.memory_space<vmem>>, vector<1x11x256xf32>
    %59 = vector.shape_cast %58 : vector<1x11x256xf32> to vector<11x256xf32>
    %c512 = arith.constant 512 : index
    %c0_48 = arith.constant 0 : index
    %60 = vector.load %arg5[%c512, %c0_48] : memref<1024x128xf32, #tpu.memory_space<vmem>>, vector<256x128xf32>
    %cst_49 = arith.constant dense<0.000000e+00> : vector<11x128xf32>
    %61 = tpu.matmul %59, %60, %cst_49 {dimension_numbers = #tpu.dot_dimension_numbers<[1], [0], [0], [1], [0, 0, 1, 1], [], []>} : vector<11x256xf32>, vector<256x128xf32>, vector<11x128xf32> -> vector<11x128xf32>
    %62 = arith.addf %57, %61 : vector<11x128xf32>
    %c0_50 = arith.constant 0 : index
    %c5_51 = arith.constant 5 : index
    %c0_52 = arith.constant 0 : index
    %63 = vector.load %arg8[%c0_50, %c5_51, %c0_52] : memref<2x16x256xf32, #tpu.memory_space<vmem>>, vector<1x11x256xf32>
    %64 = vector.shape_cast %63 : vector<1x11x256xf32> to vector<11x256xf32>
    %c768 = arith.constant 768 : index
    %c0_53 = arith.constant 0 : index
    %65 = vector.load %arg5[%c768, %c0_53] : memref<1024x128xf32, #tpu.memory_space<vmem>>, vector<256x128xf32>
    %cst_54 = arith.constant dense<0.000000e+00> : vector<11x128xf32>
    %66 = tpu.matmul %64, %65, %cst_54 {dimension_numbers = #tpu.dot_dimension_numbers<[1], [0], [0], [1], [0, 0, 1, 1], [], []>} : vector<11x256xf32>, vector<256x128xf32>, vector<11x128xf32> -> vector<11x128xf32>
    %67 = arith.addf %62, %66 : vector<11x128xf32>
    %c0_55 = arith.constant 0 : index
    %c0_56 = arith.constant 0 : index
    %68 = vector.load %arg6[%c0_55, %c0_56] : memref<1x128xf32, #tpu.memory_space<vmem>>, vector<1x128xf32>
    %69 = vector.broadcast %68 : vector<1x128xf32> to vector<11x128xf32>
    %70 = arith.addf %67, %69 : vector<11x128xf32>
    %cst_57 = arith.constant 0.000000e+00 : f32
    %71 = vector.broadcast %cst_57 : f32 to vector<11x128xf32>
    %72 = arith.maximumf %70, %71 : vector<11x128xf32>
    %c0_58 = arith.constant 0 : index
    %c0_59 = arith.constant 0 : index
    %c0_60 = arith.constant 0 : index
    %73 = vector.load %arg7[%c0_58, %c0_59, %c0_60] : memref<2x12x128xf32, #tpu.memory_space<vmem>>, vector<1x11x128xf32>
    %74 = vector.shape_cast %73 : vector<1x11x128xf32> to vector<11x128xf32>
    %75 = vector.shape_cast %72 : vector<11x128xf32> to vector<1x11x128xf32>
    tpu.vector_store %arg7[%c0_58, %c0_59, %c0_60], %75 {strides = array<i32>} : memref<2x12x128xf32, #tpu.memory_space<vmem>>, vector<1x11x128xf32>,
    %cst_61 = arith.constant 0.000000e+00 : f32
    %76 = vector.broadcast %cst_61 : f32 to vector<1x128xf32>
    %c0_62 = arith.constant 0 : index
    %c11 = arith.constant 11 : index
    %c0_63 = arith.constant 0 : index
    %77 = vector.load %arg7[%c0_62, %c11, %c0_63] : memref<2x12x128xf32, #tpu.memory_space<vmem>>, vector<1x1x128xf32>
    %78 = vector.shape_cast %77 : vector<1x1x128xf32> to vector<1x128xf32>
    %79 = vector.shape_cast %76 : vector<1x128xf32> to vector<1x1x128xf32>
    tpu.vector_store %arg7[%c0_62, %c11, %c0_63], %79 {strides = array<i32>} : memref<2x12x128xf32, #tpu.memory_space<vmem>>, vector<1x1x128xf32>,
    %c1_64 = arith.constant 1 : index
    %c0_65 = arith.constant 0 : index
    %c0_66 = arith.constant 0 : index
    %80 = vector.load %arg8[%c1_64, %c0_65, %c0_66] : memref<2x16x256xf32, #tpu.memory_space<vmem>>, vector<1x11x256xf32>
    %81 = vector.shape_cast %80 : vector<1x11x256xf32> to vector<11x256xf32>
    %c0_67 = arith.constant 0 : index
    %c0_68 = arith.constant 0 : index
    %82 = vector.load %arg5[%c0_67, %c0_68] : memref<1024x128xf32, #tpu.memory_space<vmem>>, vector<256x128xf32>
    %cst_69 = arith.constant dense<0.000000e+00> : vector<11x128xf32>
    %83 = tpu.matmul %81, %82, %cst_69 {dimension_numbers = #tpu.dot_dimension_numbers<[1], [0], [0], [1], [0, 0, 1, 1], [], []>} : vector<11x256xf32>, vector<256x128xf32>, vector<11x128xf32> -> vector<11x128xf32>
    %c1_70 = arith.constant 1 : index
    %c1_71 = arith.constant 1 : index
    %c0_72 = arith.constant 0 : index
    %84 = vector.load %arg8[%c1_70, %c1_71, %c0_72] : memref<2x16x256xf32, #tpu.memory_space<vmem>>, vector<1x11x256xf32>
    %85 = vector.shape_cast %84 : vector<1x11x256xf32> to vector<11x256xf32>
    %c256_73 = arith.constant 256 : index
    %c0_74 = arith.constant 0 : index
    %86 = vector.load %arg5[%c256_73, %c0_74] : memref<1024x128xf32, #tpu.memory_space<vmem>>, vector<256x128xf32>
    %cst_75 = arith.constant dense<0.000000e+00> : vector<11x128xf32>
    %87 = tpu.matmul %85, %86, %cst_75 {dimension_numbers = #tpu.dot_dimension_numbers<[1], [0], [0], [1], [0, 0, 1, 1], [], []>} : vector<11x256xf32>, vector<256x128xf32>, vector<11x128xf32> -> vector<11x128xf32>
    %88 = arith.addf %83, %87 : vector<11x128xf32>
    %c1_76 = arith.constant 1 : index
    %c4_77 = arith.constant 4 : index
    %c0_78 = arith.constant 0 : index
    %89 = vector.load %arg8[%c1_76, %c4_77, %c0_78] : memref<2x16x256xf32, #tpu.memory_space<vmem>>, vector<1x11x256xf32>
    %90 = vector.shape_cast %89 : vector<1x11x256xf32> to vector<11x256xf32>
    %c512_79 = arith.constant 512 : index
    %c0_80 = arith.constant 0 : index
    %91 = vector.load %arg5[%c512_79, %c0_80] : memref<1024x128xf32, #tpu.memory_space<vmem>>, vector<256x128xf32>
    %cst_81 = arith.constant dense<0.000000e+00> : vector<11x128xf32>
    %92 = tpu.matmul %90, %91, %cst_81 {dimension_numbers = #tpu.dot_dimension_numbers<[1], [0], [0], [1], [0, 0, 1, 1], [], []>} : vector<11x256xf32>, vector<256x128xf32>, vector<11x128xf32> -> vector<11x128xf32>
    %93 = arith.addf %88, %92 : vector<11x128xf32>
    %c1_82 = arith.constant 1 : index
    %c5_83 = arith.constant 5 : index
    %c0_84 = arith.constant 0 : index
    %94 = vector.load %arg8[%c1_82, %c5_83, %c0_84] : memref<2x16x256xf32, #tpu.memory_space<vmem>>, vector<1x11x256xf32>
    %95 = vector.shape_cast %94 : vector<1x11x256xf32> to vector<11x256xf32>
    %c768_85 = arith.constant 768 : index
    %c0_86 = arith.constant 0 : index
    %96 = vector.load %arg5[%c768_85, %c0_86] : memref<1024x128xf32, #tpu.memory_space<vmem>>, vector<256x128xf32>
    %cst_87 = arith.constant dense<0.000000e+00> : vector<11x128xf32>
    %97 = tpu.matmul %95, %96, %cst_87 {dimension_numbers = #tpu.dot_dimension_numbers<[1], [0], [0], [1], [0, 0, 1, 1], [], []>} : vector<11x256xf32>, vector<256x128xf32>, vector<11x128xf32> -> vector<11x128xf32>
    %98 = arith.addf %93, %97 : vector<11x128xf32>
    %c0_88 = arith.constant 0 : index
    %c0_89 = arith.constant 0 : index
    %99 = vector.load %arg6[%c0_88, %c0_89] : memref<1x128xf32, #tpu.memory_space<vmem>>, vector<1x128xf32>
    %100 = vector.broadcast %99 : vector<1x128xf32> to vector<11x128xf32>
    %101 = arith.addf %98, %100 : vector<11x128xf32>
    %cst_90 = arith.constant 0.000000e+00 : f32
    %102 = vector.broadcast %cst_90 : f32 to vector<11x128xf32>
    %103 = arith.maximumf %101, %102 : vector<11x128xf32>
    %c1_91 = arith.constant 1 : index
    %c0_92 = arith.constant 0 : index
    %c0_93 = arith.constant 0 : index
    %104 = vector.load %arg7[%c1_91, %c0_92, %c0_93] : memref<2x12x128xf32, #tpu.memory_space<vmem>>, vector<1x11x128xf32>
    %105 = vector.shape_cast %104 : vector<1x11x128xf32> to vector<11x128xf32>
    %106 = vector.shape_cast %103 : vector<11x128xf32> to vector<1x11x128xf32>
    tpu.vector_store %arg7[%c1_91, %c0_92, %c0_93], %106 {strides = array<i32>} : memref<2x12x128xf32, #tpu.memory_space<vmem>>, vector<1x11x128xf32>,
    %cst_94 = arith.constant 0.000000e+00 : f32
    %107 = vector.broadcast %cst_94 : f32 to vector<1x128xf32>
    %c1_95 = arith.constant 1 : index
    %c11_96 = arith.constant 11 : index
    %c0_97 = arith.constant 0 : index
    %108 = vector.load %arg7[%c1_95, %c11_96, %c0_97] : memref<2x12x128xf32, #tpu.memory_space<vmem>>, vector<1x1x128xf32>
    %109 = vector.shape_cast %108 : vector<1x1x128xf32> to vector<1x128xf32>
    %110 = vector.shape_cast %107 : vector<1x128xf32> to vector<1x1x128xf32>
    tpu.vector_store %arg7[%c1_95, %c11_96, %c0_97], %110 {strides = array<i32>} : memref<2x12x128xf32, #tpu.memory_space<vmem>>, vector<1x1x128xf32>,
    return
  }
}

module attributes {stable_mosaic.version = 11 : i64} {
  func.func @_convt_kernel(%arg0: i32, %arg1: memref<1x64x32xf32, #tpu.memory_space<vmem>>, %arg2: memref<128x128xf32, #tpu.memory_space<vmem>>, %arg3: memref<1x128xf32, #tpu.memory_space<vmem>>, %arg4: memref<1x56x128xf32, #tpu.memory_space<vmem>>) attributes {dimension_semantics = [#tpu.dimension_semantics<parallel>], iteration_bounds = array<i64: 2>, scalar_prefetch = 0 : i64, scratch_operands = 0 : i64, tpu.core_type = #tpu.core_type<tc>, window_params = [{transform_indices = @transform_0, window_bounds = array<i64: 1, 64, 32>}, {pipeline_mode = #tpu.pipeline_mode<synchronous>, transform_indices = @transform_1, window_bounds = array<i64: 128, 128>}, {pipeline_mode = #tpu.pipeline_mode<synchronous>, transform_indices = @transform_2, window_bounds = array<i64: 1, 128>}, {transform_indices = @transform_3, window_bounds = array<i64: 1, 56, 128>}]} {
    %c0 = arith.constant 0 : index
    %c0_0 = arith.constant 0 : index
    %c0_1 = arith.constant 0 : index
    %0 = vector.load %arg1[%c0, %c0_0, %c0_1] : memref<1x64x32xf32, #tpu.memory_space<vmem>>, vector<1x55x32xf32>
    %1 = vector.shape_cast %0 : vector<1x55x32xf32> to vector<55x32xf32>
    %c0_2 = arith.constant 0 : index
    %c0_3 = arith.constant 0 : index
    %2 = vector.load %arg2[%c0_2, %c0_3] : memref<128x128xf32, #tpu.memory_space<vmem>>, vector<32x128xf32>
    %cst = arith.constant dense<0.000000e+00> : vector<55x128xf32>
    %3 = tpu.matmul %1, %2, %cst {dimension_numbers = #tpu.dot_dimension_numbers<[1], [0], [0], [1], [0, 0, 1, 1], [], []>} : vector<55x32xf32>, vector<32x128xf32>, vector<55x128xf32> -> vector<55x128xf32>
    %c0_4 = arith.constant 0 : index
    %c1 = arith.constant 1 : index
    %c0_5 = arith.constant 0 : index
    %4 = vector.load %arg1[%c0_4, %c1, %c0_5] : memref<1x64x32xf32, #tpu.memory_space<vmem>>, vector<1x55x32xf32>
    %5 = vector.shape_cast %4 : vector<1x55x32xf32> to vector<55x32xf32>
    %c32 = arith.constant 32 : index
    %c0_6 = arith.constant 0 : index
    %6 = vector.load %arg2[%c32, %c0_6] : memref<128x128xf32, #tpu.memory_space<vmem>>, vector<32x128xf32>
    %cst_7 = arith.constant dense<0.000000e+00> : vector<55x128xf32>
    %7 = tpu.matmul %5, %6, %cst_7 {dimension_numbers = #tpu.dot_dimension_numbers<[1], [0], [0], [1], [0, 0, 1, 1], [], []>} : vector<55x32xf32>, vector<32x128xf32>, vector<55x128xf32> -> vector<55x128xf32>
    %8 = arith.addf %3, %7 : vector<55x128xf32>
    %c0_8 = arith.constant 0 : index
    %c8 = arith.constant 8 : index
    %c0_9 = arith.constant 0 : index
    %9 = vector.load %arg1[%c0_8, %c8, %c0_9] : memref<1x64x32xf32, #tpu.memory_space<vmem>>, vector<1x55x32xf32>
    %10 = vector.shape_cast %9 : vector<1x55x32xf32> to vector<55x32xf32>
    %c64 = arith.constant 64 : index
    %c0_10 = arith.constant 0 : index
    %11 = vector.load %arg2[%c64, %c0_10] : memref<128x128xf32, #tpu.memory_space<vmem>>, vector<32x128xf32>
    %cst_11 = arith.constant dense<0.000000e+00> : vector<55x128xf32>
    %12 = tpu.matmul %10, %11, %cst_11 {dimension_numbers = #tpu.dot_dimension_numbers<[1], [0], [0], [1], [0, 0, 1, 1], [], []>} : vector<55x32xf32>, vector<32x128xf32>, vector<55x128xf32> -> vector<55x128xf32>
    %13 = arith.addf %8, %12 : vector<55x128xf32>
    %c0_12 = arith.constant 0 : index
    %c9 = arith.constant 9 : index
    %c0_13 = arith.constant 0 : index
    %14 = vector.load %arg1[%c0_12, %c9, %c0_13] : memref<1x64x32xf32, #tpu.memory_space<vmem>>, vector<1x55x32xf32>
    %15 = vector.shape_cast %14 : vector<1x55x32xf32> to vector<55x32xf32>
    %c96 = arith.constant 96 : index
    %c0_14 = arith.constant 0 : index
    %16 = vector.load %arg2[%c96, %c0_14] : memref<128x128xf32, #tpu.memory_space<vmem>>, vector<32x128xf32>
    %cst_15 = arith.constant dense<0.000000e+00> : vector<55x128xf32>
    %17 = tpu.matmul %15, %16, %cst_15 {dimension_numbers = #tpu.dot_dimension_numbers<[1], [0], [0], [1], [0, 0, 1, 1], [], []>} : vector<55x32xf32>, vector<32x128xf32>, vector<55x128xf32> -> vector<55x128xf32>
    %18 = arith.addf %13, %17 : vector<55x128xf32>
    %c0_16 = arith.constant 0 : index
    %c0_17 = arith.constant 0 : index
    %19 = vector.load %arg3[%c0_16, %c0_17] : memref<1x128xf32, #tpu.memory_space<vmem>>, vector<1x128xf32>
    %20 = vector.broadcast %19 : vector<1x128xf32> to vector<55x128xf32>
    %21 = arith.addf %18, %20 : vector<55x128xf32>
    %cst_18 = arith.constant 0.000000e+00 : f32
    %22 = vector.broadcast %cst_18 : f32 to vector<55x128xf32>
    %23 = arith.maximumf %21, %22 : vector<55x128xf32>
    %c0_19 = arith.constant 0 : index
    %c0_20 = arith.constant 0 : index
    %c0_21 = arith.constant 0 : index
    %24 = vector.load %arg4[%c0_19, %c0_20, %c0_21] : memref<1x56x128xf32, #tpu.memory_space<vmem>>, vector<1x55x128xf32>
    %25 = vector.shape_cast %24 : vector<1x55x128xf32> to vector<55x128xf32>
    %26 = vector.shape_cast %23 : vector<55x128xf32> to vector<1x55x128xf32>
    tpu.vector_store %arg4[%c0_19, %c0_20, %c0_21], %26 {strides = array<i32>} : memref<1x56x128xf32, #tpu.memory_space<vmem>>, vector<1x55x128xf32>,
    %cst_22 = arith.constant 0.000000e+00 : f32
    %27 = vector.broadcast %cst_22 : f32 to vector<1x128xf32>
    %c0_23 = arith.constant 0 : index
    %c55 = arith.constant 55 : index
    %c0_24 = arith.constant 0 : index
    %28 = vector.load %arg4[%c0_23, %c55, %c0_24] : memref<1x56x128xf32, #tpu.memory_space<vmem>>, vector<1x1x128xf32>
    %29 = vector.shape_cast %28 : vector<1x1x128xf32> to vector<1x128xf32>
    %30 = vector.shape_cast %27 : vector<1x128xf32> to vector<1x1x128xf32>
    tpu.vector_store %arg4[%c0_23, %c55, %c0_24], %30 {strides = array<i32>} : memref<1x56x128xf32, #tpu.memory_space<vmem>>, vector<1x1x128xf32>,
    return
  }
  func.func @transform_0(%arg0: i32) -> (i32, i32, i32) {
    %c0_i32 = arith.constant 0 : i32
    %c0_i32_0 = arith.constant 0 : i32
    %c0_i32_1 = arith.constant 0 : i32
    return %arg0, %c0_i32, %c0_i32_0 : i32, i32, i32
  }
  func.func @transform_1(%arg0: i32) -> (i32, i32) {
    %c0_i32 = arith.constant 0 : i32
    %c0_i32_0 = arith.constant 0 : i32
    %c0_i32_1 = arith.constant 0 : i32
    return %c0_i32, %c0_i32_0 : i32, i32
  }
  func.func @transform_2(%arg0: i32) -> (i32, i32) {
    %c0_i32 = arith.constant 0 : i32
    %c0_i32_0 = arith.constant 0 : i32
    %c0_i32_1 = arith.constant 0 : i32
    return %c0_i32, %c0_i32_0 : i32, i32
  }
  func.func @transform_3(%arg0: i32) -> (i32, i32, i32) {
    %c0_i32 = arith.constant 0 : i32
    %c0_i32_0 = arith.constant 0 : i32
    %c0_i32_1 = arith.constant 0 : i32
    return %arg0, %c0_i32, %c0_i32_0 : i32, i32, i32
  }
}

module attributes {stable_mosaic.version = 11 : i64} {
  func.func @_convt_kernel(%arg0: i32, %arg1: memref<1x256x32xf32, #tpu.memory_space<vmem>>, %arg2: memref<128x128xf32, #tpu.memory_space<vmem>>, %arg3: memref<1x128xf32, #tpu.memory_space<vmem>>, %arg4: memref<1x240x128xf32, #tpu.memory_space<vmem>>) attributes {dimension_semantics = [#tpu.dimension_semantics<parallel>], iteration_bounds = array<i64: 2>, scalar_prefetch = 0 : i64, scratch_operands = 0 : i64, tpu.core_type = #tpu.core_type<tc>, window_params = [{transform_indices = @transform_0, window_bounds = array<i64: 1, 256, 32>}, {pipeline_mode = #tpu.pipeline_mode<synchronous>, transform_indices = @transform_1, window_bounds = array<i64: 128, 128>}, {pipeline_mode = #tpu.pipeline_mode<synchronous>, transform_indices = @transform_2, window_bounds = array<i64: 1, 128>}, {transform_indices = @transform_3, window_bounds = array<i64: 1, 240, 128>}]} {
    %c0 = arith.constant 0 : index
    %c0_0 = arith.constant 0 : index
    %c0_1 = arith.constant 0 : index
    %0 = vector.load %arg1[%c0, %c0_0, %c0_1] : memref<1x256x32xf32, #tpu.memory_space<vmem>>, vector<1x239x32xf32>
    %1 = vector.shape_cast %0 : vector<1x239x32xf32> to vector<239x32xf32>
    %c0_2 = arith.constant 0 : index
    %c0_3 = arith.constant 0 : index
    %2 = vector.load %arg2[%c0_2, %c0_3] : memref<128x128xf32, #tpu.memory_space<vmem>>, vector<32x128xf32>
    %cst = arith.constant dense<0.000000e+00> : vector<239x128xf32>
    %3 = tpu.matmul %1, %2, %cst {dimension_numbers = #tpu.dot_dimension_numbers<[1], [0], [0], [1], [0, 0, 1, 1], [], []>} : vector<239x32xf32>, vector<32x128xf32>, vector<239x128xf32> -> vector<239x128xf32>
    %c0_4 = arith.constant 0 : index
    %c1 = arith.constant 1 : index
    %c0_5 = arith.constant 0 : index
    %4 = vector.load %arg1[%c0_4, %c1, %c0_5] : memref<1x256x32xf32, #tpu.memory_space<vmem>>, vector<1x239x32xf32>
    %5 = vector.shape_cast %4 : vector<1x239x32xf32> to vector<239x32xf32>
    %c32 = arith.constant 32 : index
    %c0_6 = arith.constant 0 : index
    %6 = vector.load %arg2[%c32, %c0_6] : memref<128x128xf32, #tpu.memory_space<vmem>>, vector<32x128xf32>
    %cst_7 = arith.constant dense<0.000000e+00> : vector<239x128xf32>
    %7 = tpu.matmul %5, %6, %cst_7 {dimension_numbers = #tpu.dot_dimension_numbers<[1], [0], [0], [1], [0, 0, 1, 1], [], []>} : vector<239x32xf32>, vector<32x128xf32>, vector<239x128xf32> -> vector<239x128xf32>
    %8 = arith.addf %3, %7 : vector<239x128xf32>
    %c0_8 = arith.constant 0 : index
    %c16 = arith.constant 16 : index
    %c0_9 = arith.constant 0 : index
    %9 = vector.load %arg1[%c0_8, %c16, %c0_9] : memref<1x256x32xf32, #tpu.memory_space<vmem>>, vector<1x239x32xf32>
    %10 = vector.shape_cast %9 : vector<1x239x32xf32> to vector<239x32xf32>
    %c64 = arith.constant 64 : index
    %c0_10 = arith.constant 0 : index
    %11 = vector.load %arg2[%c64, %c0_10] : memref<128x128xf32, #tpu.memory_space<vmem>>, vector<32x128xf32>
    %cst_11 = arith.constant dense<0.000000e+00> : vector<239x128xf32>
    %12 = tpu.matmul %10, %11, %cst_11 {dimension_numbers = #tpu.dot_dimension_numbers<[1], [0], [0], [1], [0, 0, 1, 1], [], []>} : vector<239x32xf32>, vector<32x128xf32>, vector<239x128xf32> -> vector<239x128xf32>
    %13 = arith.addf %8, %12 : vector<239x128xf32>
    %c0_12 = arith.constant 0 : index
    %c17 = arith.constant 17 : index
    %c0_13 = arith.constant 0 : index
    %14 = vector.load %arg1[%c0_12, %c17, %c0_13] : memref<1x256x32xf32, #tpu.memory_space<vmem>>, vector<1x239x32xf32>
    %15 = vector.shape_cast %14 : vector<1x239x32xf32> to vector<239x32xf32>
    %c96 = arith.constant 96 : index
    %c0_14 = arith.constant 0 : index
    %16 = vector.load %arg2[%c96, %c0_14] : memref<128x128xf32, #tpu.memory_space<vmem>>, vector<32x128xf32>
    %cst_15 = arith.constant dense<0.000000e+00> : vector<239x128xf32>
    %17 = tpu.matmul %15, %16, %cst_15 {dimension_numbers = #tpu.dot_dimension_numbers<[1], [0], [0], [1], [0, 0, 1, 1], [], []>} : vector<239x32xf32>, vector<32x128xf32>, vector<239x128xf32> -> vector<239x128xf32>
    %18 = arith.addf %13, %17 : vector<239x128xf32>
    %c0_16 = arith.constant 0 : index
    %c0_17 = arith.constant 0 : index
    %19 = vector.load %arg3[%c0_16, %c0_17] : memref<1x128xf32, #tpu.memory_space<vmem>>, vector<1x128xf32>
    %20 = vector.broadcast %19 : vector<1x128xf32> to vector<239x128xf32>
    %21 = arith.addf %18, %20 : vector<239x128xf32>
    %cst_18 = arith.constant 0.000000e+00 : f32
    %22 = vector.broadcast %cst_18 : f32 to vector<239x128xf32>
    %23 = arith.maximumf %21, %22 : vector<239x128xf32>
    %c0_19 = arith.constant 0 : index
    %c0_20 = arith.constant 0 : index
    %c0_21 = arith.constant 0 : index
    %24 = vector.load %arg4[%c0_19, %c0_20, %c0_21] : memref<1x240x128xf32, #tpu.memory_space<vmem>>, vector<1x239x128xf32>
    %25 = vector.shape_cast %24 : vector<1x239x128xf32> to vector<239x128xf32>
    %26 = vector.shape_cast %23 : vector<239x128xf32> to vector<1x239x128xf32>
    tpu.vector_store %arg4[%c0_19, %c0_20, %c0_21], %26 {strides = array<i32>} : memref<1x240x128xf32, #tpu.memory_space<vmem>>, vector<1x239x128xf32>,
    %cst_22 = arith.constant 0.000000e+00 : f32
    %27 = vector.broadcast %cst_22 : f32 to vector<1x128xf32>
    %c0_23 = arith.constant 0 : index
    %c239 = arith.constant 239 : index
    %c0_24 = arith.constant 0 : index
    %28 = vector.load %arg4[%c0_23, %c239, %c0_24] : memref<1x240x128xf32, #tpu.memory_space<vmem>>, vector<1x1x128xf32>
    %29 = vector.shape_cast %28 : vector<1x1x128xf32> to vector<1x128xf32>
    %30 = vector.shape_cast %27 : vector<1x128xf32> to vector<1x1x128xf32>
    tpu.vector_store %arg4[%c0_23, %c239, %c0_24], %30 {strides = array<i32>} : memref<1x240x128xf32, #tpu.memory_space<vmem>>, vector<1x1x128xf32>,
    return
  }
  func.func @transform_0(%arg0: i32) -> (i32, i32, i32) {
    %c0_i32 = arith.constant 0 : i32
    %c0_i32_0 = arith.constant 0 : i32
    %c0_i32_1 = arith.constant 0 : i32
    return %arg0, %c0_i32, %c0_i32_0 : i32, i32, i32
  }
  func.func @transform_1(%arg0: i32) -> (i32, i32) {
    %c0_i32 = arith.constant 0 : i32
    %c0_i32_0 = arith.constant 0 : i32
    %c0_i32_1 = arith.constant 0 : i32
    return %c0_i32, %c0_i32_0 : i32, i32
  }
  func.func @transform_2(%arg0: i32) -> (i32, i32) {
    %c0_i32 = arith.constant 0 : i32
    %c0_i32_0 = arith.constant 0 : i32
    %c0_i32_1 = arith.constant 0 : i32
    return %c0_i32, %c0_i32_0 : i32, i32
  }
  func.func @transform_3(%arg0: i32) -> (i32, i32, i32) {
    %c0_i32 = arith.constant 0 : i32
    %c0_i32_0 = arith.constant 0 : i32
    %c0_i32_1 = arith.constant 0 : i32
    return %arg0, %c0_i32, %c0_i32_0 : i32, i32, i32
  }
}

module attributes {stable_mosaic.version = 11 : i64} {
  func.func @_convt_kernel(%arg0: i32, %arg1: memref<1x1156x16xf32, #tpu.memory_space<vmem>>, %arg2: memref<144x4xf32, #tpu.memory_space<vmem>>, %arg3: memref<1x4xf32, #tpu.memory_space<vmem>>, %arg4: memref<1x1088x4xf32, #tpu.memory_space<vmem>>) attributes {dimension_semantics = [#tpu.dimension_semantics<parallel>], iteration_bounds = array<i64: 2>, scalar_prefetch = 0 : i64, scratch_operands = 0 : i64, tpu.core_type = #tpu.core_type<tc>, window_params = [{transform_indices = @transform_0, window_bounds = array<i64: 1, 1156, 16>}, {pipeline_mode = #tpu.pipeline_mode<synchronous>, transform_indices = @transform_1, window_bounds = array<i64: 144, 4>}, {pipeline_mode = #tpu.pipeline_mode<synchronous>, transform_indices = @transform_2, window_bounds = array<i64: 1, 4>}, {transform_indices = @transform_3, window_bounds = array<i64: 1, 1088, 4>}]} {
    %c0 = arith.constant 0 : index
    %c0_0 = arith.constant 0 : index
    %c0_1 = arith.constant 0 : index
    %0 = vector.load %arg1[%c0, %c0_0, %c0_1] : memref<1x1156x16xf32, #tpu.memory_space<vmem>>, vector<1x1086x16xf32>
    %1 = vector.shape_cast %0 : vector<1x1086x16xf32> to vector<1086x16xf32>
    %c0_2 = arith.constant 0 : index
    %c0_3 = arith.constant 0 : index
    %2 = vector.load %arg2[%c0_2, %c0_3] : memref<144x4xf32, #tpu.memory_space<vmem>>, vector<16x4xf32>
    %cst = arith.constant dense<0.000000e+00> : vector<1086x4xf32>
    %3 = tpu.matmul %1, %2, %cst {dimension_numbers = #tpu.dot_dimension_numbers<[1], [0], [0], [1], [0, 0, 1, 1], [], []>} : vector<1086x16xf32>, vector<16x4xf32>, vector<1086x4xf32> -> vector<1086x4xf32>
    %c0_4 = arith.constant 0 : index
    %c1 = arith.constant 1 : index
    %c0_5 = arith.constant 0 : index
    %4 = vector.load %arg1[%c0_4, %c1, %c0_5] : memref<1x1156x16xf32, #tpu.memory_space<vmem>>, vector<1x1086x16xf32>
    %5 = vector.shape_cast %4 : vector<1x1086x16xf32> to vector<1086x16xf32>
    %c16 = arith.constant 16 : index
    %c0_6 = arith.constant 0 : index
    %6 = vector.load %arg2[%c16, %c0_6] : memref<144x4xf32, #tpu.memory_space<vmem>>, vector<16x4xf32>
    %cst_7 = arith.constant dense<0.000000e+00> : vector<1086x4xf32>
    %7 = tpu.matmul %5, %6, %cst_7 {dimension_numbers = #tpu.dot_dimension_numbers<[1], [0], [0], [1], [0, 0, 1, 1], [], []>} : vector<1086x16xf32>, vector<16x4xf32>, vector<1086x4xf32> -> vector<1086x4xf32>
    %8 = arith.addf %3, %7 : vector<1086x4xf32>
    %c0_8 = arith.constant 0 : index
    %c2 = arith.constant 2 : index
    %c0_9 = arith.constant 0 : index
    %9 = vector.load %arg1[%c0_8, %c2, %c0_9] : memref<1x1156x16xf32, #tpu.memory_space<vmem>>, vector<1x1086x16xf32>
    %10 = vector.shape_cast %9 : vector<1x1086x16xf32> to vector<1086x16xf32>
    %c32 = arith.constant 32 : index
    %c0_10 = arith.constant 0 : index
    %11 = vector.load %arg2[%c32, %c0_10] : memref<144x4xf32, #tpu.memory_space<vmem>>, vector<16x4xf32>
    %cst_11 = arith.constant dense<0.000000e+00> : vector<1086x4xf32>
    %12 = tpu.matmul %10, %11, %cst_11 {dimension_numbers = #tpu.dot_dimension_numbers<[1], [0], [0], [1], [0, 0, 1, 1], [], []>} : vector<1086x16xf32>, vector<16x4xf32>, vector<1086x4xf32> -> vector<1086x4xf32>
    %13 = arith.addf %8, %12 : vector<1086x4xf32>
    %c0_12 = arith.constant 0 : index
    %c34 = arith.constant 34 : index
    %c0_13 = arith.constant 0 : index
    %14 = vector.load %arg1[%c0_12, %c34, %c0_13] : memref<1x1156x16xf32, #tpu.memory_space<vmem>>, vector<1x1086x16xf32>
    %15 = vector.shape_cast %14 : vector<1x1086x16xf32> to vector<1086x16xf32>
    %c48 = arith.constant 48 : index
    %c0_14 = arith.constant 0 : index
    %16 = vector.load %arg2[%c48, %c0_14] : memref<144x4xf32, #tpu.memory_space<vmem>>, vector<16x4xf32>
    %cst_15 = arith.constant dense<0.000000e+00> : vector<1086x4xf32>
    %17 = tpu.matmul %15, %16, %cst_15 {dimension_numbers = #tpu.dot_dimension_numbers<[1], [0], [0], [1], [0, 0, 1, 1], [], []>} : vector<1086x16xf32>, vector<16x4xf32>, vector<1086x4xf32> -> vector<1086x4xf32>
    %18 = arith.addf %13, %17 : vector<1086x4xf32>
    %c0_16 = arith.constant 0 : index
    %c35 = arith.constant 35 : index
    %c0_17 = arith.constant 0 : index
    %19 = vector.load %arg1[%c0_16, %c35, %c0_17] : memref<1x1156x16xf32, #tpu.memory_space<vmem>>, vector<1x1086x16xf32>
    %20 = vector.shape_cast %19 : vector<1x1086x16xf32> to vector<1086x16xf32>
    %c64 = arith.constant 64 : index
    %c0_18 = arith.constant 0 : index
    %21 = vector.load %arg2[%c64, %c0_18] : memref<144x4xf32, #tpu.memory_space<vmem>>, vector<16x4xf32>
    %cst_19 = arith.constant dense<0.000000e+00> : vector<1086x4xf32>
    %22 = tpu.matmul %20, %21, %cst_19 {dimension_numbers = #tpu.dot_dimension_numbers<[1], [0], [0], [1], [0, 0, 1, 1], [], []>} : vector<1086x16xf32>, vector<16x4xf32>, vector<1086x4xf32> -> vector<1086x4xf32>
    %23 = arith.addf %18, %22 : vector<1086x4xf32>
    %c0_20 = arith.constant 0 : index
    %c36 = arith.constant 36 : index
    %c0_21 = arith.constant 0 : index
    %24 = vector.load %arg1[%c0_20, %c36, %c0_21] : memref<1x1156x16xf32, #tpu.memory_space<vmem>>, vector<1x1086x16xf32>
    %25 = vector.shape_cast %24 : vector<1x1086x16xf32> to vector<1086x16xf32>
    %c80 = arith.constant 80 : index
    %c0_22 = arith.constant 0 : index
    %26 = vector.load %arg2[%c80, %c0_22] : memref<144x4xf32, #tpu.memory_space<vmem>>, vector<16x4xf32>
    %cst_23 = arith.constant dense<0.000000e+00> : vector<1086x4xf32>
    %27 = tpu.matmul %25, %26, %cst_23 {dimension_numbers = #tpu.dot_dimension_numbers<[1], [0], [0], [1], [0, 0, 1, 1], [], []>} : vector<1086x16xf32>, vector<16x4xf32>, vector<1086x4xf32> -> vector<1086x4xf32>
    %28 = arith.addf %23, %27 : vector<1086x4xf32>
    %c0_24 = arith.constant 0 : index
    %c68 = arith.constant 68 : index
    %c0_25 = arith.constant 0 : index
    %29 = vector.load %arg1[%c0_24, %c68, %c0_25] : memref<1x1156x16xf32, #tpu.memory_space<vmem>>, vector<1x1086x16xf32>
    %30 = vector.shape_cast %29 : vector<1x1086x16xf32> to vector<1086x16xf32>
    %c96 = arith.constant 96 : index
    %c0_26 = arith.constant 0 : index
    %31 = vector.load %arg2[%c96, %c0_26] : memref<144x4xf32, #tpu.memory_space<vmem>>, vector<16x4xf32>
    %cst_27 = arith.constant dense<0.000000e+00> : vector<1086x4xf32>
    %32 = tpu.matmul %30, %31, %cst_27 {dimension_numbers = #tpu.dot_dimension_numbers<[1], [0], [0], [1], [0, 0, 1, 1], [], []>} : vector<1086x16xf32>, vector<16x4xf32>, vector<1086x4xf32> -> vector<1086x4xf32>
    %33 = arith.addf %28, %32 : vector<1086x4xf32>
    %c0_28 = arith.constant 0 : index
    %c69 = arith.constant 69 : index
    %c0_29 = arith.constant 0 : index
    %34 = vector.load %arg1[%c0_28, %c69, %c0_29] : memref<1x1156x16xf32, #tpu.memory_space<vmem>>, vector<1x1086x16xf32>
    %35 = vector.shape_cast %34 : vector<1x1086x16xf32> to vector<1086x16xf32>
    %c112 = arith.constant 112 : index
    %c0_30 = arith.constant 0 : index
    %36 = vector.load %arg2[%c112, %c0_30] : memref<144x4xf32, #tpu.memory_space<vmem>>, vector<16x4xf32>
    %cst_31 = arith.constant dense<0.000000e+00> : vector<1086x4xf32>
    %37 = tpu.matmul %35, %36, %cst_31 {dimension_numbers = #tpu.dot_dimension_numbers<[1], [0], [0], [1], [0, 0, 1, 1], [], []>} : vector<1086x16xf32>, vector<16x4xf32>, vector<1086x4xf32> -> vector<1086x4xf32>
    %38 = arith.addf %33, %37 : vector<1086x4xf32>
    %c0_32 = arith.constant 0 : index
    %c70 = arith.constant 70 : index
    %c0_33 = arith.constant 0 : index
    %39 = vector.load %arg1[%c0_32, %c70, %c0_33] : memref<1x1156x16xf32, #tpu.memory_space<vmem>>, vector<1x1086x16xf32>
    %40 = vector.shape_cast %39 : vector<1x1086x16xf32> to vector<1086x16xf32>
    %c128 = arith.constant 128 : index
    %c0_34 = arith.constant 0 : index
    %41 = vector.load %arg2[%c128, %c0_34] : memref<144x4xf32, #tpu.memory_space<vmem>>, vector<16x4xf32>
    %cst_35 = arith.constant dense<0.000000e+00> : vector<1086x4xf32>
    %42 = tpu.matmul %40, %41, %cst_35 {dimension_numbers = #tpu.dot_dimension_numbers<[1], [0], [0], [1], [0, 0, 1, 1], [], []>} : vector<1086x16xf32>, vector<16x4xf32>, vector<1086x4xf32> -> vector<1086x4xf32>
    %43 = arith.addf %38, %42 : vector<1086x4xf32>
    %c0_36 = arith.constant 0 : index
    %c0_37 = arith.constant 0 : index
    %44 = vector.load %arg3[%c0_36, %c0_37] : memref<1x4xf32, #tpu.memory_space<vmem>>, vector<1x4xf32>
    %45 = vector.broadcast %44 : vector<1x4xf32> to vector<1086x4xf32>
    %46 = arith.addf %43, %45 : vector<1086x4xf32>
    %47 = arith.negf %46 : vector<1086x4xf32>
    %48 = math.exp %47 : vector<1086x4xf32>
    %cst_38 = arith.constant 1.000000e+00 : f32
    %49 = vector.broadcast %cst_38 : f32 to vector<1086x4xf32>
    %50 = arith.addf %49, %48 : vector<1086x4xf32>
    %51 = arith.divf %49, %50 : vector<1086x4xf32>
    %c0_39 = arith.constant 0 : index
    %c0_40 = arith.constant 0 : index
    %c0_41 = arith.constant 0 : index
    %52 = vector.load %arg4[%c0_39, %c0_40, %c0_41] : memref<1x1088x4xf32, #tpu.memory_space<vmem>>, vector<1x1086x4xf32>
    %53 = vector.shape_cast %52 : vector<1x1086x4xf32> to vector<1086x4xf32>
    %54 = vector.shape_cast %51 : vector<1086x4xf32> to vector<1x1086x4xf32>
    tpu.vector_store %arg4[%c0_39, %c0_40, %c0_41], %54 {strides = array<i32>} : memref<1x1088x4xf32, #tpu.memory_space<vmem>>, vector<1x1086x4xf32>,
    %cst_42 = arith.constant 0.000000e+00 : f32
    %55 = vector.broadcast %cst_42 : f32 to vector<2x4xf32>
    %c0_43 = arith.constant 0 : index
    %c1086 = arith.constant 1086 : index
    %c0_44 = arith.constant 0 : index
    %56 = vector.load %arg4[%c0_43, %c1086, %c0_44] : memref<1x1088x4xf32, #tpu.memory_space<vmem>>, vector<1x2x4xf32>
    %57 = vector.shape_cast %56 : vector<1x2x4xf32> to vector<2x4xf32>
    %58 = vector.shape_cast %55 : vector<2x4xf32> to vector<1x2x4xf32>
    tpu.vector_store %arg4[%c0_43, %c1086, %c0_44], %58 {strides = array<i32>} : memref<1x1088x4xf32, #tpu.memory_space<vmem>>, vector<1x2x4xf32>,
    return
  }
  func.func @transform_0(%arg0: i32) -> (i32, i32, i32) {
    %c0_i32 = arith.constant 0 : i32
    %c0_i32_0 = arith.constant 0 : i32
    %c0_i32_1 = arith.constant 0 : i32
    return %arg0, %c0_i32, %c0_i32_0 : i32, i32, i32
  }
  func.func @transform_1(%arg0: i32) -> (i32, i32) {
    %c0_i32 = arith.constant 0 : i32
    %c0_i32_0 = arith.constant 0 : i32
    %c0_i32_1 = arith.constant 0 : i32
    return %c0_i32, %c0_i32_0 : i32, i32
  }
  func.func @transform_2(%arg0: i32) -> (i32, i32) {
    %c0_i32 = arith.constant 0 : i32
    %c0_i32_0 = arith.constant 0 : i32
    %c0_i32_1 = arith.constant 0 : i32
    return %c0_i32, %c0_i32_0 : i32, i32
  }
  func.func @transform_3(%arg0: i32) -> (i32, i32, i32) {
    %c0_i32 = arith.constant 0 : i32
    %c0_i32_0 = arith.constant 0 : i32
    %c0_i32_1 = arith.constant 0 : i32
    return %arg0, %c0_i32, %c0_i32_0 : i32, i32, i32
  }
}

</mosaic_0001>

<bundles_post_ra>
// kernel: decoder_forward.5
= control target key start
LH: loop header
LB: loop body
LE: loop exit
PB: predicated region body
PF: predicated region fallthrough
CT: control target
= control target key end

     0   :  { %s1065_s12 = smov 0   ;;  %s1252_s0 = inlined_call_operand.vmem [shape: f32[2,64,32], index: 0, kind: input, shape index: {}]   ;;  %s1253_s1 = inlined_call_operand.vmem [shape: f32[128,128], index: 1, kind: input, shape index: {}]   ;;  %s1254_s2 = inlined_call_operand.vmem [shape: f32[1,128], index: 2, kind: input, shape index: {}]   ;;  %s1255_s3 = inlined_call_operand.vmem [shape: f32[2,56,128], index: 3, kind: output, shape index: {}]  }
   0x1 LB: > { %s798_s13 = sadd.s32 4294967295, %s1040_s12   ;;  %p802_p0 = scmp.ge.s32.totalorder %s1040_s12, 1  ;;  %s1040_s12 = sphi %s1065_s12, %s13_s12  }
   0x2   : > { %p137_p1 = scmp.lt.s32.totalorder %s1040_s12, 3 }
   0x4   : > { %p138_p2 = pnand %p802_p0, %p137_p1 }
   0x5   : > { %v189_v0 = vld [vmem:[%s1253_s1 + $0x20] sm:$0xff] (!%p138_p2)  ;;  %v190_v1 = vld [vmem:[%s1253_s1 + $0x28] sm:$0xff] (!%p138_p2)  ;;  %v1042_v3 = vmov (!%p138_p2), 0.0|0.0   ;;  %v191_v6 = vld [vmem:[%s1253_s1 + $0x30] sm:$0xff] (!%p138_p2)  ;;  %p161_p3 = scmp.lt.s32.totalorder (!%p138_p2), %s798_s13, 1  ;;  %vm1043_vm0 = vmmov (!%p138_p2), 0  }
   0x6   : > { %141 = sbr.rel (%p138_p2) target bundleno = 290 (0x122), region = 32  ;;  %v178_v2 = vld [vmem:[%s1253_s1] sm:$0xff] (!%p138_p2)  ;;  %998 = vmatprep.subr.bf16.mxu0 (!%p138_p2), %v1042_v3  ;;  %v999_v4 = vpack.c.bf16 (!%p138_p2), %v190_v1, %v189_v0  ;;  %1004 = vmatprep.subr.bf16.mxu1 (!%p138_p2), %v1042_v3  ;;  %v179_v5 = vld [vmem:[%s1253_s1 + $0x8] sm:$0xff] (!%p138_p2)  ;;  %v192_v7 = vld [vmem:[%s1253_s1 + $0x38] sm:$0xff] (!%p138_p2)  ;;  %v1044_v11 = vmov (!%p138_p2), 0.0   ;;  %vm193_vm1 = vcmask (!%p138_p2), 261120  }
   0x7   : > { %v1005_v8 = vpack.c.bf16 (!%p138_p2), %v179_v5, %v178_v2  ;;  %v180_v9 = vld [vmem:[%s1253_s1 + $0x10] sm:$0xff] (!%p138_p2)  ;;  %v181_v10 = vld [vmem:[%s1253_s1 + $0x18] sm:$0xff] (!%p138_p2)  ;;  %890 = vmatprep.mubr.msk.f32.mxu0 (!%p138_p2), %vm1043_vm0, %v1044_v11  ;;  %919 = vmatprep.mubr.msk.f32.mxu1 (!%p138_p2), %vm1043_vm0, %v1044_v11  ;;  %v1002_v12 = vpack.c.bf16 (!%p138_p2), %v192_v7, %v191_v6  ;;  %v443_v14 = vld [vmem:[%s1253_s1 + $0x40] sm:$0xff] (!%p138_p2) }
   0x8   : > { %1000 = vmatpush3.bf16.msra.mxu0 (!%p138_p2), %v999_v4  ;;  %v1008_v13 = vpack.c.bf16 (!%p138_p2), %v181_v10, %v180_v9  ;;  %v444_v15 = vld [vmem:[%s1253_s1 + $0x48] sm:$0xff] (!%p138_p2)  ;;  %v582_v16 = vld [vmem:[%s1253_s1 + $0x60] sm:$0xff] (!%p138_p2)  ;;  %v445_v22 = vld [vmem:[%s1253_s1 + $0x50] sm:$0xff] (!%p138_p2) }
   0x9   : > { %1006 = vmatpush3.bf16.msra.mxu1 (!%p138_p2), %v1005_v8  ;;  %1001 = vmatprep.subr.bf16.mxu0 (!%p138_p2), %v1042_v3  ;;  %v583_v17 = vld [vmem:[%s1253_s1 + $0x68] sm:$0xff] (!%p138_p2)  ;;  %v1011_v19 = vpack.c.bf16 (!%p138_p2), %v444_v15, %v443_v14  ;;  %v446_v23 = vld [vmem:[%s1253_s1 + $0x58] sm:$0xff] (!%p138_p2)  ;;  %v584_v24 = vld [vmem:[%s1253_s1 + $0x70] sm:$0xff] (!%p138_p2) }
   0xa   : > { %1007 = vmatprep.subr.bf16.mxu1 (!%p138_p2), %v1042_v3  ;;  %v1017_v21 = vpack.c.bf16 (!%p138_p2), %v583_v17, %v582_v16  ;;  %v585_v25 = vld [vmem:[%s1253_s1 + $0x78] sm:$0xff] (!%p138_p2)  ;;  %v1014_v28 = vpack.c.bf16 (!%p138_p2), %v446_v23, %v445_v22 }
   0xb   : > { %v1020_v29 = vpack.c.bf16 (!%p138_p2), %v585_v25, %v584_v24 }
   0xc   : > { %1003 = vmatpush3.bf16.msra.mxu0 (!%p138_p2), %v1002_v12 }
   0xd   : > { %s1257_s13 = smov (!%p161_p3, %s798_s13), 1  ;;  %1009 = vmatpush3.bf16.msra.mxu1 %v1008_v13  ;;  %1010 = vmatprep.subr.bf16.mxu0 %v1042_v3 }
   0xe   : > { %s837_s7 = sshll.u32 %s1257_s13, 6  ;;  %1016 = vmatprep.subr.bf16.mxu1 %v1042_v3  ;;  %s1022_s25 = smul.u32 56, %s1257_s13 }
   0xf   : > { %s1119_s16 = scalar_lea.vmem %s1252_s0, %s837_s7 }
  0x10   : > { %v182_v18 = vld [vmem:[%s1119_s16 + $0x1] sm:$0xff]  ;;  %v183_v26 = vld [vmem:[%s1119_s16 + $0x9] sm:$0xff]  ;;  %v184_v30 = vld [vmem:[%s1119_s16 + $0x11] sm:$0xff]  ;;  %s1235_s28 = scalar_lea.vmem %s1255_s3, %s1022_s25 }
  0x11   : > { %v171_v20 = vld [vmem:[%s1119_s16] sm:$0xff]  ;;  %891 = vmatmul.mubr.msk.f32.vlgmr.msra.gmra.mrb[0].mxu0 %vm193_vm1, %v182_v18  ;;  %v172_v27 = vld [vmem:[%s1119_s16 + $0x8] sm:$0xff]  ;;  %v173_v31 = vld [vmem:[%s1119_s16 + $0x10] sm:$0xff]  ;;  %742 = vst [vmem:[%s1235_s28 + $0x37] sm:$0x1] %v1044_v11 }
  0x12   : > { %920 = vmatmul.mubr.msk.f32.vlgmr.msra.gmra.mrb[0].mxu1 %vm193_vm1, %v171_v20  ;;  %1012 = vmatpush3.bf16.msra.mxu0 %v1011_v19  ;;  %v185_v32 = vld [vmem:[%s1119_s16 + $0x19] sm:$0xff]  ;;  %v186_v34 = vld [vmem:[%s1119_s16 + $0x21] sm:$0xff]  ;;  %v187_v36 = vld [vmem:[%s1119_s16 + $0x29] sm:$0xff] }
  0x13   : > { %893 = vmatprep.mubr.msk.f32.mxu0 %vm1043_vm0, %v1044_v11  ;;  %1018 = vmatpush3.bf16.msra.mxu1 %v1017_v21  ;;  %v174_v33 = vld [vmem:[%s1119_s16 + $0x18] sm:$0xff]  ;;  %v175_v35 = vld [vmem:[%s1119_s16 + $0x20] sm:$0xff]  ;;  %v176_v37 = vld [vmem:[%s1119_s16 + $0x28] sm:$0xff] }
  0x14   : > { %922 = vmatprep.mubr.msk.f32.mxu1 %vm1043_vm0, %v1044_v11  ;;  %1013 = vmatprep.subr.bf16.mxu0 %v1042_v3  ;;  %v188_v38 = vld [vmem:[%s1119_s16 + $0x31] sm:$0x7f]  ;;  %v442_v42 = vld [vmem:[%s1119_s16 + $0x38] sm:$0x7f]  ;;  %v834_v19 = vld [vmem:[%s1254_s2] ss:$0 sm:$0xff] }
  0x15   : > { %894 = vmatmul.mubr.msk.f32.gmra.mrb[2].mxu0 %vm193_vm1, %v183_v26  ;;  %1019 = vmatprep.subr.bf16.mxu1 %v1042_v3  ;;  %v177_v39 = vld [vmem:[%s1119_s16 + $0x30] sm:$0x7f]  ;;  %v581_v43 = vld [vmem:[%s1119_s16 + $0x39] sm:$0x7f] }
  0x16   : > { %923 = vmatmul.mubr.msk.f32.gmra.mrb[2].mxu1 %vm193_vm1, %v172_v27  ;;  %896 = vmatprep.mubr.msk.f32.mxu0 %vm1043_vm0, %v1044_v11  ;;  %v441_v40 = vld [vmem:[%s1119_s16 + $0x30] sm:$0xff] }
  0x17   : > { %925 = vmatprep.mubr.msk.f32.mxu1 %vm1043_vm0, %v1044_v11  ;;  %1015 = vmatpush3.bf16.msra.mxu0 %v1014_v28  ;;  %v580_v41 = vld [vmem:[%s1119_s16 + $0x31] sm:$0xff] }
  0x18   : > { %1021 = vmatpush3.bf16.msra.mxu1 %v1020_v29 }
  0x19   : > { %897 = vmatmul.mubr.msk.f32.gmra.mrb[4].mxu0 %vm193_vm1, %v184_v30 }
  0x1a   : > { %926 = vmatmul.mubr.msk.f32.gmra.mrb[4].mxu1 %vm193_vm1, %v173_v31  ;;  %899 = vmatprep.mubr.msk.f32.mxu0 %vm1043_vm0, %v1044_v11 }
  0x1b   : > { %928 = vmatprep.mubr.msk.f32.mxu1 %vm1043_vm0, %v1044_v11 }
  0x1d   : > { %900 = vmatmul.mubr.msk.f32.gmra.mrb[6].mxu0 %vm193_vm1, %v185_v32 }
  0x1e   : > { %929 = vmatmul.mubr.msk.f32.gmra.mrb[6].mxu1 %vm193_vm1, %v174_v33  ;;  %902 = vmatprep.mubr.msk.f32.mxu0 %vm1043_vm0, %v1044_v11 }
  0x1f   : > { %931 = vmatprep.mubr.msk.f32.mxu1 %vm1043_vm0, %v1044_v11 }
  0x21   : > { %903 = vmatmul.mubr.msk.f32.gmra.mrb[8].mxu0 %vm193_vm1, %v186_v34 }
  0x22   : > { %932 = vmatmul.mubr.msk.f32.gmra.mrb[8].mxu1 %vm193_vm1, %v175_v35  ;;  %905 = vmatprep.mubr.msk.f32.mxu0 %vm1043_vm0, %v1044_v11 }
  0x23   : > { %934 = vmatprep.mubr.msk.f32.mxu1 %vm1043_vm0, %v1044_v11 }
  0x25   : > { %906 = vmatmul.mubr.msk.f32.gmra.mrb[10].mxu0 %vm193_vm1, %v187_v36 }
  0x26   : > { %935 = vmatmul.mubr.msk.f32.gmra.mrb[10].mxu1 %vm193_vm1, %v176_v37  ;;  %908 = vmatprep.mubr.msk.f32.mxu0 %vm1043_vm0, %v1044_v11 }
  0x27   : > { %937 = vmatprep.mubr.msk.f32.mxu1 %vm1043_vm0, %v1044_v11 }
  0x29   : > { %909 = vmatmul.mubr.msk.f32.gmra.mrb[12].mxu0 %vm193_vm1, %v188_v38 }
  0x2a   : > { %938 = vmatmul.mubr.msk.f32.gmra.mrb[12].mxu1 %vm193_vm1, %v177_v39  ;;  %948 = vmatprep.mubr.msk.f32.mxu0 %vm1043_vm0, %v1044_v11 }
  0x2b   : > { %977 = vmatprep.mubr.msk.f32.mxu1 %vm1043_vm0, %v1044_v11 }
  0x2d   : > { %949 = vmatmul.mubr.msk.f32.vlgmr.msra.gmra.mrb[14].mxu0 %vm193_vm1, %v172_v27 }
  0x2e   : > { %978 = vmatmul.mubr.msk.f32.vlgmr.msra.gmra.mrb[14].mxu1 %vm193_vm1, %v183_v26  ;;  %951 = vmatprep.mubr.msk.f32.mxu0 %vm1043_vm0, %v1044_v11 }
  0x2f   : > { %980 = vmatprep.mubr.msk.f32.mxu1 %vm1043_vm0, %v1044_v11 }
  0x31   : > { %952 = vmatmul.mubr.msk.f32.gmra.mrb[16].mxu0 %vm193_vm1, %v173_v31 }
  0x32   : > { %981 = vmatmul.mubr.msk.f32.gmra.mrb[16].mxu1 %vm193_vm1, %v184_v30  ;;  %954 = vmatprep.mubr.msk.f32.mxu0 %vm1043_vm0, %v1044_v11 }
  0x33   : > { %983 = vmatprep.mubr.msk.f32.mxu1 %vm1043_vm0, %v1044_v11 }
  0x35   : > { %955 = vmatmul.mubr.msk.f32.gmra.mrb[18].mxu0 %vm193_vm1, %v174_v33 }
  0x36   : > { %984 = vmatmul.mubr.msk.f32.gmra.mrb[18].mxu1 %vm193_vm1, %v185_v32  ;;  %957 = vmatprep.mubr.msk.f32.mxu0 %vm1043_vm0, %v1044_v11 }
  0x37   : > { %986 = vmatprep.mubr.msk.f32.mxu1 %vm1043_vm0, %v1044_v11 }
  0x39   : > { %958 = vmatmul.mubr.msk.f32.gmra.mrb[20].mxu0 %vm193_vm1, %v175_v35 }
  0x3a   : > { %987 = vmatmul.mubr.msk.f32.gmra.mrb[20].mxu1 %vm193_vm1, %v186_v34  ;;  %960 = vmatprep.mubr.msk.f32.mxu0 %vm1043_vm0, %v1044_v11 }
  0x3b   : > { %989 = vmatprep.mubr.msk.f32.mxu1 %vm1043_vm0, %v1044_v11 }
  0x3d   : > { %961 = vmatmul.mubr.msk.f32.gmra.mrb[22].mxu0 %vm193_vm1, %v176_v37 }
  0x3e   : > { %990 = vmatmul.mubr.msk.f32.gmra.mrb[22].mxu1 %vm193_vm1, %v187_v36  ;;  %963 = vmatprep.mubr.msk.f32.mxu0 %vm1043_vm0, %v1044_v11 }
  0x3f   : > { %992 = vmatprep.mubr.msk.f32.mxu1 %vm1043_vm0, %v1044_v11 }
  0x41   : > { %964 = vmatmul.mubr.msk.f32.gmra.mrb[24].mxu0 %vm193_vm1, %v441_v40 }
  0x42   : > { %993 = vmatmul.mubr.msk.f32.gmra.mrb[24].mxu1 %vm193_vm1, %v580_v41  ;;  %966 = vmatprep.mubr.msk.f32.mxu0 %vm1043_vm0, %v1044_v11 }
  0x43   : > { %995 = vmatprep.mubr.msk.f32.mxu1 %vm1043_vm0, %v1044_v11 }
  0x45   : > { %967 = vmatmul.mubr.msk.f32.gmra.mrb[26].mxu0 %vm193_vm1, %v442_v42 }
  0x46   : > { %996 = vmatmul.mubr.msk.f32.gmra.mrb[26].mxu1 %vm193_vm1, %v581_v43 }
  0xe4   : > { %v281_v44 = vpop.f32.mrb[0].mxu0 }
  0xe5   : > { %v892_v45 = vpop.f32.mrb[1].mxu0  ;;  %v402_v46 = vpop.f32.mrb[0].mxu1 }
  0xe6   : > { %v403_v47 = vadd.f32 %v402_v46, %v281_v44  ;;  %v921_v48 = vpop.f32.mrb[1].mxu1 }
  0xe8   : > { %v286_v49 = vpop.f32.mrb[2].mxu0 }
  0xe9   : > { %v895_v50 = vpop.f32.mrb[3].mxu0  ;;  %v407_v51 = vpop.f32.mrb[2].mxu1 }
  0xea   : > { %v408_v52 = vadd.f32 %v407_v51, %v286_v49  ;;  %v924_v53 = vpop.f32.mrb[3].mxu1 }
  0xec   : > { %v291_v54 = vpop.f32.mrb[4].mxu0 }
  0xed   : > { %v898_v55 = vpop.f32.mrb[5].mxu0  ;;  %v412_v56 = vpop.f32.mrb[4].mxu1 }
  0xee   : > { %v413_v57 = vadd.f32 %v412_v56, %v291_v54  ;;  %v927_v58 = vpop.f32.mrb[5].mxu1 }
  0xf0   : > { %v296_v59 = vpop.f32.mrb[6].mxu0 }
  0xf1   : > { %v901_v60 = vpop.f32.mrb[7].mxu0  ;;  %v417_v61 = vpop.f32.mrb[6].mxu1 }
  0xf2   : > { %v418_v62 = vadd.f32 %v417_v61, %v296_v59  ;;  %v930_v63 = vpop.f32.mrb[7].mxu1 }
  0xf4   : > { %v301_v0 = vpop.f32.mrb[8].mxu0 }
  0xf5   : > { %v904_v1 = vpop.f32.mrb[9].mxu0  ;;  %v422_v2 = vpop.f32.mrb[8].mxu1 }
  0xf6   : > { %v423_v3 = vadd.f32 %v422_v2, %v301_v0  ;;  %v933_v4 = vpop.f32.mrb[9].mxu1 }
  0xf8   : > { %v306_v5 = vpop.f32.mrb[10].mxu0 }
  0xf9   : > { %v907_v6 = vpop.f32.mrb[11].mxu0  ;;  %v427_v7 = vpop.f32.mrb[10].mxu1 }
  0xfa   : > { %v428_v8 = vadd.f32 %v427_v7, %v306_v5  ;;  %v936_v9 = vpop.f32.mrb[11].mxu1 }
  0xfc   : > { %v311_v10 = vpop.f32.mrb[12].mxu0 }
  0xfd   : > { %v910_v11 = vpop.f32.mrb[13].mxu0  ;;  %v432_v12 = vpop.f32.mrb[12].mxu1 }
  0xfe   : > { %v433_v13 = vadd.f32 %v432_v12, %v311_v10  ;;  %v939_v14 = vpop.f32.mrb[13].mxu1 }
 0x100   : > { %v534_v15 = vpop.f32.mrb[14].mxu0 }
 0x101   : > { %v568_v16 = vadd.f32 %v534_v15, %v403_v47  ;;  %v950_v17 = vpop.f32.mrb[15].mxu0  ;;  %v673_v18 = vpop.f32.mrb[14].mxu1 }
 0x102   : > { %v979_v20 = vpop.f32.mrb[15].mxu1 }
 0x103   : > { %v707_v21 = vadd.f32 %v673_v18, %v568_v16 }
 0x104   : > { %v539_v22 = vpop.f32.mrb[16].mxu0 }
 0x105   : > { %v721_v23 = vadd.f32 %v834_v19, %v707_v21  ;;  %v569_v24 = vadd.f32 %v539_v22, %v408_v52  ;;  %v953_v25 = vpop.f32.mrb[17].mxu0  ;;  %v678_v26 = vpop.f32.mrb[16].mxu1 }
 0x106   : > { %v982_v27 = vpop.f32.mrb[17].mxu1 }
 0x107   : > { %v728_v28 = vmax.f32 %v721_v23, 0.0  ;;  %v708_v29 = vadd.f32 %v678_v26, %v569_v24 }
 0x108   : > { %v544_v30 = vpop.f32.mrb[18].mxu0 }
 0x109   : > { %735 = vst [vmem:[%s1235_s28] sm:$0xff] %v728_v28  ;;  %v722_v31 = vadd.f32 %v834_v19, %v708_v29  ;;  %v570_v32 = vadd.f32 %v544_v30, %v413_v57  ;;  %v956_v33 = vpop.f32.mrb[19].mxu0  ;;  %v683_v34 = vpop.f32.mrb[18].mxu1 }
 0x10a   : > { %v985_v35 = vpop.f32.mrb[19].mxu1 }
 0x10b   : > { %v729_v36 = vmax.f32 %v722_v31, 0.0  ;;  %v709_v37 = vadd.f32 %v683_v34, %v570_v32 }
 0x10c   : > { %v549_v38 = vpop.f32.mrb[20].mxu0 }
 0x10d   : > { %736 = vst [vmem:[%s1235_s28 + $0x8] sm:$0xff] %v729_v36  ;;  %v723_v39 = vadd.f32 %v834_v19, %v709_v37  ;;  %v571_v40 = vadd.f32 %v549_v38, %v418_v62  ;;  %v959_v41 = vpop.f32.mrb[21].mxu0  ;;  %v688_v42 = vpop.f32.mrb[20].mxu1 }
 0x10e   : > { %v988_v43 = vpop.f32.mrb[21].mxu1 }
 0x10f   : > { %v730_v44 = vmax.f32 %v723_v39, 0.0  ;;  %v710_v45 = vadd.f32 %v688_v42, %v571_v40 }
 0x110   : > { %v554_v46 = vpop.f32.mrb[22].mxu0 }
 0x111   : > { %737 = vst [vmem:[%s1235_s28 + $0x10] sm:$0xff] %v730_v44  ;;  %v724_v47 = vadd.f32 %v834_v19, %v710_v45  ;;  %v572_v48 = vadd.f32 %v554_v46, %v423_v3  ;;  %v962_v49 = vpop.f32.mrb[23].mxu0  ;;  %v693_v50 = vpop.f32.mrb[22].mxu1 }
 0x112   : > { %v991_v51 = vpop.f32.mrb[23].mxu1 }
 0x113   : > { %v731_v52 = vmax.f32 %v724_v47, 0.0  ;;  %v711_v53 = vadd.f32 %v693_v50, %v572_v48 }
 0x114   : > { %v559_v54 = vpop.f32.mrb[24].mxu0 }
 0x115   : > { %738 = vst [vmem:[%s1235_s28 + $0x18] sm:$0xff] %v731_v52  ;;  %v725_v55 = vadd.f32 %v834_v19, %v711_v53  ;;  %v573_v56 = vadd.f32 %v559_v54, %v428_v8  ;;  %v965_v57 = vpop.f32.mrb[25].mxu0  ;;  %v698_v58 = vpop.f32.mrb[24].mxu1 }
 0x116   : > { %v994_v59 = vpop.f32.mrb[25].mxu1 }
 0x117   : > { %v732_v60 = vmax.f32 %v725_v55, 0.0  ;;  %v712_v61 = vadd.f32 %v698_v58, %v573_v56 }
 0x118   : > { %v564_v62 = vpop.f32.mrb[26].mxu0 }
 0x119   : > { %739 = vst [vmem:[%s1235_s28 + $0x20] sm:$0xff] %v732_v60  ;;  %v726_v63 = vadd.f32 %v834_v19, %v712_v61  ;;  %v574_v0 = vadd.f32 %v564_v62, %v433_v13  ;;  %v968_v1 = vpop.f32.mrb[27].mxu0  ;;  %v703_v2 = vpop.f32.mrb[26].mxu1 }
 0x11a   : > { %v997_v3 = vpop.f32.mrb[27].mxu1 }
 0x11b   : > { %v733_v4 = vmax.f32 %v726_v63, 0.0  ;;  %v713_v5 = vadd.f32 %v703_v2, %v574_v0 }
 0x11d   : > { %740 = vst [vmem:[%s1235_s28 + $0x28] sm:$0xff] %v733_v4  ;;  %v727_v6 = vadd.f32 %v834_v19, %v713_v5 }
 0x11f   : > { %v734_v7 = vmax.f32 %v727_v6, 0.0 }
 0x121   : > { %741 = vst [vmem:[%s1235_s28 + $0x30] sm:$0x7f] %v734_v7 }
 0x122 PF: > { %s13_s12 = sadd.s32 1, %s1040_s12  }
 0x123   : > { %p10_p4 = scmp.ge.s32.totalorder %s13_s12, 4  }
 0x125   :  { %12 = sbr.rel (!%p10_p4) target bundleno = 1 (0x1), region = 62 }

// kernel: decoder_forward.4
= control target key start
LH: loop header
LB: loop body
LE: loop exit
PB: predicated region body
PF: predicated region fallthrough
CT: control target
= control target key end

     0   :  { %12 = vsyncpa [#allocation4], 0  ;;  %s3482_s0 = inlined_call_operand.hbm [shape: f32[2,6], index: 0, kind: input, shape index: {}]   ;;  %s3483_s1 = inlined_call_operand.hbm [shape: f32[6,256], index: 1, kind: input, shape index: {}]   ;;  %s3484_s2 = inlined_call_operand.hbm [shape: f32[1,256], index: 2, kind: input, shape index: {}]   ;;  %s3485_s3 = inlined_call_operand.hbm [shape: f32[256,1024], index: 3, kind: input, shape index: {}]   ;;  %s3486_s4 = inlined_call_operand.hbm [shape: f32[1,1024], index: 4, kind: input, shape index: {}]   ;;  %s3487_s5 = inlined_call_operand.hbm [shape: f32[1024,128], index: 5, kind: input, shape index: {}]   ;;  %s3488_s6 = inlined_call_operand.hbm [shape: f32[1,128], index: 6, kind: input, shape index: {}]   ;;  %s3489_s7 = inlined_call_operand.vmem [shape: f32[2,12,128], index: 7, kind: output, shape index: {}]  }
   0x1   :  { %13 = vsyncpa [#allocation6], 0 }
   0x2   :  { %14 = vsyncpa [#allocation9], 0 }
   0x3   :  { %15 = vsyncpa [#allocation12], 0  ;;  %s2968_s24 = smov [#allocation5]   ;;  %s2969_s26 = smov [#allocation8]  }
   0x4   :  { %s32_s25 = sshll.u32 %s2968_s24, 4  ;;  %s51_s27 = sshll.u32 %s2969_s26, 4  ;;  %s33_s25 = int_to_ptr.vmem [resolvable:$true] %s32_s25  ;;  %s3021_s27 = int_to_ptr.vmem [resolvable:$true] %s51_s27 }
   0x5   :  { %s2806_s30 = scalar_lea.hbm %s3483_s1, 256 }
   0x6   :  { %p2807_p0 = scmp.ne.s32.totalorder %s3483_s1, %s2806_s30  ;;  %p2810_p1 = scmp.lt.u32.totalorder %s2806_s30, %s3483_s1 }
   0x8   :  { %p2812_p2 = pnand %p2810_p1, %p2807_p0 }
   0xa   :  { %2815 = shalt.err (!%p2812_p2)
}
   0xb   :  { %s2816_s12 = scalar_lea.vmem %s33_s25, 256  ;;  %p2821_p4 = scmp.lt.s32.totalorder %s33_s25, %s33_s25 }
   0xc   :  { %p2817_p3 = scmp.ne.s32.totalorder %s33_s25, %s2816_s12  ;;  %p2822_p5 = scmp.lt.s32.totalorder %s2816_s12, %s2816_s12 }
   0xe   :  { %p2823_p6 = por %p2822_p5, %p2821_p4 }
  0x10   :  { %p2824_p7 = pnand %p2823_p6, %p2817_p3 }
  0x12   :  { %2827 = shalt.err (!%p2824_p7)
}
  0x13   :  { %35 = dma.hbm_to_vmem [thread:$0]  %s3483_s1, 256, %s33_s25, [#allocation6]  }
  0x14   :  { %s2828_s17 = scalar_lea.hbm %s3485_s3, 32768 }
  0x15   :  { %p2829_p8 = scmp.ne.s32.totalorder %s3485_s3, %s2828_s17  ;;  %p2832_p9 = scmp.lt.u32.totalorder %s2828_s17, %s3485_s3 }
  0x17   :  { %p2834_p10 = pnand %p2832_p9, %p2829_p8 }
  0x19   :  { %2837 = shalt.err (!%p2834_p10)
}
  0x1a   :  { %s2838_s22 = scalar_lea.vmem %s3021_s27, 32768  ;;  %p2843_p12 = scmp.lt.s32.totalorder %s3021_s27, %s3021_s27 }
  0x1b   :  { %p2839_p11 = scmp.ne.s32.totalorder %s3021_s27, %s2838_s22  ;;  %p2844_p13 = scmp.lt.s32.totalorder %s2838_s22, %s2838_s22 }
  0x1d   :  { %p2845_p0 = por %p2844_p13, %p2843_p12 }
  0x1f   :  { %p2846_p1 = pnand %p2845_p0, %p2839_p11 }
  0x21   :  { %2849 = shalt.err (!%p2846_p1)
}
  0x22   :  { %s2970_s1 = smov 1024   ;;  %s2971_s23 = smov 64  }
  0x23   :  { %57 = dma.hbm_to_vmem [thread:$0]  %s3485_s3, 32768, %s3021_s27, [#allocation9], %s2970_s1, %s2970_s1, %s2971_s23  }
  0x24   :  { %s2972_s26 = smov [#allocation11]   ;;  %s2850_s8 = scalar_lea.hbm %s3487_s5, 16384 }
  0x25   :  { %s73_s28 = sshll.u32 %s2972_s26, 4  ;;  %p2851_p2 = scmp.ne.s32.totalorder %s3487_s5, %s2850_s8  ;;  %s74_s28 = int_to_ptr.vmem [resolvable:$true] %s73_s28 }
  0x26   :  { %p2854_p3 = scmp.lt.u32.totalorder %s2850_s8, %s3487_s5 }
  0x28   :  { %p2856_p4 = pnand %p2854_p3, %p2851_p2 }
  0x2a   :  { %2859 = shalt.err (!%p2856_p4)
}
  0x2b   :  { %s2860_s13 = scalar_lea.vmem %s74_s28, 16384  ;;  %p2865_p6 = scmp.lt.s32.totalorder %s74_s28, %s74_s28 }
  0x2c   :  { %p2861_p5 = scmp.ne.s32.totalorder %s74_s28, %s2860_s13  ;;  %p2866_p7 = scmp.lt.s32.totalorder %s2860_s13, %s2860_s13 }
  0x2e   :  { %p2867_p8 = por %p2866_p7, %p2865_p6 }
  0x30   :  { %p2868_p9 = pnand %p2867_p8, %p2861_p5 }
  0x32   :  { %2871 = shalt.err (!%p2868_p9)
}
  0x33   :  { %s2973_s3 = smov 128   ;;  %s2974_s27 = smov 8  }
  0x34   :  { %79 = dma.hbm_to_vmem [thread:$0]  %s3487_s5, 16384, %s74_s28, [#allocation12], %s2973_s3, %s2973_s3, %s2974_s27  }
  0x35   :  { %s2975_s16 = smov [#allocation3]   ;;  %s2976_s18 = smov [#allocation7]  }
  0x36   :  { %s22_s17 = sshll.u32 %s2975_s16, 4  ;;  %s42_s19 = sshll.u32 %s2976_s18, 4  ;;  %s23_s17 = int_to_ptr.vmem [resolvable:$true] %s22_s17  ;;  %s43_s19 = int_to_ptr.vmem [resolvable:$true] %s42_s19 }
  0x37   :  { %s2872_s22 = scalar_lea.hbm %s3482_s0, 32 }
  0x38   :  { %p2873_p10 = scmp.ne.s32.totalorder %s3482_s0, %s2872_s22  ;;  %p2876_p11 = scmp.lt.u32.totalorder %s2872_s22, %s3482_s0 }
  0x3a   :  { %p2878_p12 = pnand %p2876_p11, %p2873_p10 }
  0x3c   :  { %2881 = shalt.err (!%p2878_p12)
}
  0x3d   :  { %s2882_s5 = scalar_lea.vmem %s23_s17, 32  ;;  %p2887_p0 = scmp.lt.s32.totalorder %s23_s17, %s23_s17 }
  0x3e   :  { %p2883_p13 = scmp.ne.s32.totalorder %s23_s17, %s2882_s5  ;;  %p2888_p1 = scmp.lt.s32.totalorder %s2882_s5, %s2882_s5 }
  0x40   :  { %p2889_p2 = por %p2888_p1, %p2887_p0 }
  0x42   :  { %p2890_p3 = pnand %p2889_p2, %p2883_p13 }
  0x44   :  { %2893 = shalt.err (!%p2890_p3)
}
  0x45   :  { %25 = dma.hbm_to_vmem [thread:$0]  %s3482_s0, 32, %s23_s17, [#allocation4]  }
  0x46   :  { %s2894_s8 = scalar_lea.hbm %s3484_s2, 32 }
  0x47   :  { %p2895_p4 = scmp.ne.s32.totalorder %s3484_s2, %s2894_s8  ;;  %p2898_p5 = scmp.lt.u32.totalorder %s2894_s8, %s3484_s2 }
  0x49   :  { %p2900_p6 = pnand %p2898_p5, %p2895_p4 }
  0x4b   :  { %2903 = shalt.err (!%p2900_p6)
}
  0x4c   :  { %s2904_s13 = scalar_lea.vmem %s43_s19, 32  ;;  %p2909_p8 = scmp.lt.s32.totalorder %s43_s19, %s43_s19 }
  0x4d   :  { %p2905_p7 = scmp.ne.s32.totalorder %s43_s19, %s2904_s13  ;;  %p2910_p9 = scmp.lt.s32.totalorder %s2904_s13, %s2904_s13 }
  0x4f   :  { %p2911_p10 = por %p2910_p9, %p2909_p8 }
  0x51   :  { %p2912_p11 = pnand %p2911_p10, %p2905_p7 }
  0x53   :  { %2915 = shalt.err (!%p2912_p11)
}
  0x54   :  { %45 = dma.hbm_to_vmem [thread:$0]  %s3484_s2, 32, %s43_s19, [#allocation6]  }
  0x55   :  { %s2977_s27 = smov [#allocation10]   ;;  %s2978_s15 = smov [#allocation13]  }
  0x56   :  { %s64_s14 = sshll.u32 %s2977_s27, 4  ;;  %s86_s16 = sshll.u32 %s2978_s15, 4  ;;  %s65_s14 = int_to_ptr.vmem [resolvable:$true] %s64_s14  ;;  %s87_s16 = int_to_ptr.vmem [resolvable:$true] %s86_s16 }
  0x57   :  { %s2916_s20 = scalar_lea.hbm %s3486_s4, 128 }
  0x58   :  { %p2917_p12 = scmp.ne.s32.totalorder %s3486_s4, %s2916_s20  ;;  %p2920_p13 = scmp.lt.u32.totalorder %s2916_s20, %s3486_s4 }
  0x5a   :  { %p2922_p0 = pnand %p2920_p13, %p2917_p12 }
  0x5c   :  { %2925 = shalt.err (!%p2922_p0)
}
  0x5d   :  { %s2926_s2 = scalar_lea.vmem %s65_s14, 128  ;;  %p2931_p2 = scmp.lt.s32.totalorder %s65_s14, %s65_s14 }
  0x5e   :  { %p2927_p1 = scmp.ne.s32.totalorder %s65_s14, %s2926_s2  ;;  %p2932_p3 = scmp.lt.s32.totalorder %s2926_s2, %s2926_s2 }
  0x60   :  { %p2933_p4 = por %p2932_p3, %p2931_p2 }
  0x62   :  { %p2934_p5 = pnand %p2933_p4, %p2927_p1 }
  0x64   :  { %2937 = shalt.err (!%p2934_p5)
}
  0x65   :  { %67 = dma.hbm_to_vmem [thread:$0]  %s3486_s4, 128, %s65_s14, [#allocation9]  }
  0x66   :  { %s2938_s26 = scalar_lea.hbm %s3488_s6, 16 }
  0x67   :  { %p2939_p6 = scmp.ne.s32.totalorder %s3488_s6, %s2938_s26  ;;  %p2942_p7 = scmp.lt.u32.totalorder %s2938_s26, %s3488_s6 }
  0x69   :  { %p2944_p8 = pnand %p2942_p7, %p2939_p6 }
  0x6b   :  { %2947 = shalt.err (!%p2944_p8)
}
  0x6c   :  { %s2948_s9 = scalar_lea.vmem %s87_s16, 16  ;;  %s2952_s10 = scalar_lea.vmem %s87_s16, 32 }
  0x6d   :  { %p2949_p9 = scmp.ne.s32.totalorder %s87_s16, %s2948_s9  ;;  %p2953_p10 = scmp.lt.s32.totalorder %s87_s16, %s87_s16 }
  0x6e   :  { %p2954_p11 = scmp.lt.s32.totalorder %s2952_s10, %s2948_s9 }
  0x70   :  { %p2955_p12 = por %p2954_p11, %p2953_p10 }
  0x72   :  { %p2956_p13 = pnand %p2955_p12, %p2949_p9 }
  0x74   :  { %2959 = shalt.err (!%p2956_p13)
}
  0x75   :  { %89 = dma.hbm_to_vmem [thread:$0]  %s3488_s6, 16, %s87_s16, [#allocation12]  }
  0x76   :  { %2960 = dma.done.wait [#allocation4], 32  }
  0x77   :  { %2961 = vsyncadd [#allocation4], 4294967264 }
  0x78   :  { %2962 = dma.done.wait [#allocation6], 288  }
  0x79   :  { %2963 = vsyncadd [#allocation6], 4294967008 }
  0x7a   :  { %2964 = dma.done.wait [#allocation9], 32896  }
  0x7b   :  { %2965 = vsyncadd [#allocation9], 4294934400 }
  0x7c   :  { %2966 = dma.done.wait [#allocation12], 16400  }
  0x7d   :  { %2967 = vsyncadd [#allocation12], 4294950896  ;;  %v2979_v0 = vmov 0.0   ;;  %vm130_vm0 = vcmask 1045504   ;;  %vm126_vm1 = vcmask 48128   ;;  %v211_v4 = vld [vmem:[#allocation8 + $0x8] sm:$0xff] }
  0x7e   :  { %201 = vmatprep.mubr.f32.mxu0 %v2979_v0  ;;  %1451 = vst [vmem:[%s3489_s7 + $0xb] sm:$0x1] %v2979_v0  ;;  %1976 = vst [vmem:[%s3489_s7 + $0x1b] sm:$0x1] %v2979_v0  ;;  %v113_v1 = vld [vmem:[#allocation5 + $0x8] sm:$0x3f] }
  0x7f   :  { %800 = vst [vmem:[#allocation2] sm:$0xff] %v2979_v0  ;;  %801 = vst [vmem:[#allocation2 + $0x8] sm:$0xff] %v2979_v0  ;;  %v112_v2 = vld [vmem:[#allocation5] sm:$0x3f]  ;;  %v111_v3 = vld [vmem:[#allocation3] sm:$0x3]  ;;  %1969 = vmatprep.subr.msk.mxu0 %vm130_vm0, %v113_v1 }
  0x80   :  { %802 = vst [vmem:[#allocation2 + $0x10] sm:$0xff] %v2979_v0  ;;  %803 = vst [vmem:[#allocation2 + $0x18] sm:$0xff] %v2979_v0  ;;  %v219_v5 = vld [vmem:[#allocation8 + $0x48] sm:$0xff]  ;;  %v213_v6 = vld [vmem:[#allocation8 + $0x18] sm:$0xff]  ;;  %1970 = vmatpush1.msk.msra.mxu0 %vm130_vm0, %v112_v2  ;;  %vm1021_vm3 = vcmask 1046528   ;;  %vm1350_vm4 = vcmask 1042432  }
  0x81   :  { %804 = vst [vmem:[#allocation2 + $0x20] sm:$0xff] %v2979_v0  ;;  %805 = vst [vmem:[#allocation2 + $0x28] sm:$0xff] %v2979_v0  ;;  %v2281_v7 = vpack.c.bf16 %v219_v5, %v211_v4  ;;  %v221_v8 = vld [vmem:[#allocation8 + $0x58] sm:$0xff]  ;;  %v210_v9 = vld [vmem:[#allocation8] sm:$0xff]  ;;  %1971 = vmatmul.mubr.msk.f32.vlgmr.msra.gmra.mrb[0].mxu0 %vm126_vm1, %v111_v3  ;;  %vm1222_vm5 = vcmask 1043456  }
  0x82   :  { %806 = vst [vmem:[#allocation2 + $0x30] sm:$0xff] %v2979_v0  ;;  %807 = vst [vmem:[#allocation2 + $0x38] sm:$0xff] %v2979_v0  ;;  %v218_v10 = vld [vmem:[#allocation8 + $0x40] sm:$0xff]  ;;  %v2345_v11 = vpack.c.bf16 %v221_v8, %v213_v6  ;;  %v212_v13 = vld [vmem:[#allocation8 + $0x10] sm:$0xff] }
  0x83   :  { %v2283_v12 = vpack.c.bf16 %v218_v10, %v210_v9  ;;  %v220_v14 = vld [vmem:[#allocation8 + $0x50] sm:$0xff]  ;;  %v227_v15 = vld [vmem:[#allocation8 + $0x88] sm:$0xff]  ;;  %2282 = vmatprep.subr.bf16.mxu1 %v2281_v7  ;;  %v229_v18 = vld [vmem:[#allocation8 + $0x98] sm:$0xff] }
  0x84   :  { %v2347_v16 = vpack.c.bf16 %v220_v14, %v212_v13  ;;  %v235_v17 = vld [vmem:[#allocation8 + $0xc8] sm:$0xff]  ;;  %v237_v19 = vld [vmem:[#allocation8 + $0xd8] sm:$0xff]  ;;  %2346 = vmatprep.subr.bf16.mxu0 %v2345_v11  ;;  %v226_v22 = vld [vmem:[#allocation8 + $0x80] sm:$0xff] }
  0x85   :  { %2284 = vmatpush1.bf16.msra.mxu1 %v2283_v12  ;;  %v2285_v20 = vpack.c.bf16 %v235_v17, %v227_v15  ;;  %v2349_v21 = vpack.c.bf16 %v237_v19, %v229_v18  ;;  %v234_v23 = vld [vmem:[#allocation8 + $0xc0] sm:$0xff]  ;;  %v228_v24 = vld [vmem:[#allocation8 + $0x90] sm:$0xff]  ;;  %v243_v27 = vld [vmem:[#allocation8 + $0x108] sm:$0xff] }
  0x86   :  { %2348 = vmatpush1.bf16.msra.mxu0 %v2347_v16  ;;  %v2287_v25 = vpack.c.bf16 %v234_v23, %v226_v22  ;;  %v236_v26 = vld [vmem:[#allocation8 + $0xd0] sm:$0xff]  ;;  %v251_v28 = vld [vmem:[#allocation8 + $0x148] sm:$0xff]  ;;  %v245_v31 = vld [vmem:[#allocation8 + $0x118] sm:$0xff] }
  0x87   :  { %2286 = vmatprep.subr.bf16.mxu1 %v2285_v20  ;;  %2350 = vmatprep.subr.bf16.mxu0 %v2349_v21  ;;  %v2351_v29 = vpack.c.bf16 %v236_v26, %v228_v24  ;;  %v2289_v30 = vpack.c.bf16 %v251_v28, %v243_v27  ;;  %v253_v32 = vld [vmem:[#allocation8 + $0x158] sm:$0xff]  ;;  %v242_v33 = vld [vmem:[#allocation8 + $0x100] sm:$0xff]  ;;  %v244_v36 = vld [vmem:[#allocation8 + $0x110] sm:$0xff] }
  0x88   :  { %v2353_v34 = vpack.c.bf16 %v253_v32, %v245_v31  ;;  %v250_v35 = vld [vmem:[#allocation8 + $0x140] sm:$0xff]  ;;  %v252_v37 = vld [vmem:[#allocation8 + $0x150] sm:$0xff]  ;;  %v259_v39 = vld [vmem:[#allocation8 + $0x188] sm:$0xff] }
  0x89   :  { %2288 = vmatpush1.bf16.msra.mxu1 %v2287_v25  ;;  %v2291_v38 = vpack.c.bf16 %v250_v35, %v242_v33  ;;  %v267_v40 = vld [vmem:[#allocation8 + $0x1c8] sm:$0xff]  ;;  %v261_v41 = vld [vmem:[#allocation8 + $0x198] sm:$0xff]  ;;  %v2355_v42 = vpack.c.bf16 %v252_v37, %v244_v36  ;;  %v258_v45 = vld [vmem:[#allocation8 + $0x180] sm:$0xff] }
  0x8a   :  { %2352 = vmatpush1.bf16.msra.mxu0 %v2351_v29  ;;  %2290 = vmatprep.subr.bf16.mxu1 %v2289_v30  ;;  %v2293_v43 = vpack.c.bf16 %v267_v40, %v259_v39  ;;  %v269_v44 = vld [vmem:[#allocation8 + $0x1d8] sm:$0xff]  ;;  %v266_v46 = vld [vmem:[#allocation8 + $0x1c0] sm:$0xff]  ;;  %v260_v48 = vld [vmem:[#allocation8 + $0x190] sm:$0xff] }
  0x8b   :  { %2354 = vmatprep.subr.bf16.mxu0 %v2353_v34  ;;  %v2357_v47 = vpack.c.bf16 %v269_v44, %v261_v41  ;;  %v268_v49 = vld [vmem:[#allocation8 + $0x1d0] sm:$0xff]  ;;  %v275_v50 = vld [vmem:[#allocation8 + $0x208] sm:$0xff]  ;;  %v277_v52 = vld [vmem:[#allocation8 + $0x218] sm:$0xff]  ;;  %v2295_v54 = vpack.c.bf16 %v266_v46, %v258_v45 }
  0x8c   :  { %v283_v51 = vld [vmem:[#allocation8 + $0x248] sm:$0xff]  ;;  %v285_v53 = vld [vmem:[#allocation8 + $0x258] sm:$0xff]  ;;  %v2359_v55 = vpack.c.bf16 %v268_v49, %v260_v48  ;;  %v274_v57 = vld [vmem:[#allocation8 + $0x200] sm:$0xff] }
  0x8d   :  { %2292 = vmatpush1.bf16.msra.mxu1 %v2291_v38  ;;  %v2297_v56 = vpack.c.bf16 %v283_v51, %v275_v50  ;;  %v282_v58 = vld [vmem:[#allocation8 + $0x240] sm:$0xff]  ;;  %v276_v59 = vld [vmem:[#allocation8 + $0x210] sm:$0xff]  ;;  %v2361_v60 = vpack.c.bf16 %v285_v53, %v277_v52  ;;  %v291_v62 = vld [vmem:[#allocation8 + $0x288] sm:$0xff] }
  0x8e   :  { %2356 = vmatpush1.bf16.msra.mxu0 %v2355_v42  ;;  %2294 = vmatprep.subr.bf16.mxu1 %v2293_v43  ;;  %v284_v61 = vld [vmem:[#allocation8 + $0x250] sm:$0xff]  ;;  %v299_v63 = vld [vmem:[#allocation8 + $0x2c8] sm:$0xff]  ;;  %v293_v0 = vld [vmem:[#allocation8 + $0x298] sm:$0xff]  ;;  %v2299_v2 = vpack.c.bf16 %v282_v58, %v274_v57 }
  0x8f   :  { %2358 = vmatprep.subr.bf16.mxu0 %v2357_v47  ;;  %v301_v1 = vld [vmem:[#allocation8 + $0x2d8] sm:$0xff]  ;;  %v2363_v3 = vpack.c.bf16 %v284_v61, %v276_v59  ;;  %v2301_v4 = vpack.c.bf16 %v299_v63, %v291_v62  ;;  %v290_v5 = vld [vmem:[#allocation8 + $0x280] sm:$0xff]  ;;  %v292_v7 = vld [vmem:[#allocation8 + $0x290] sm:$0xff] }
  0x90   :  { %v298_v6 = vld [vmem:[#allocation8 + $0x2c0] sm:$0xff]  ;;  %v2365_v8 = vpack.c.bf16 %v301_v1, %v293_v0  ;;  %v300_v9 = vld [vmem:[#allocation8 + $0x2d0] sm:$0xff]  ;;  %v307_v10 = vld [vmem:[#allocation8 + $0x308] sm:$0xff] }
  0x91   :  { %2296 = vmatpush1.bf16.msra.mxu1 %v2295_v54  ;;  %v315_v11 = vld [vmem:[#allocation8 + $0x348] sm:$0xff]  ;;  %v309_v12 = vld [vmem:[#allocation8 + $0x318] sm:$0xff]  ;;  %v2303_v14 = vpack.c.bf16 %v298_v6, %v290_v5  ;;  %v2367_v15 = vpack.c.bf16 %v300_v9, %v292_v7  ;;  %v306_v17 = vld [vmem:[#allocation8 + $0x300] sm:$0xff] }
  0x92   :  { %2360 = vmatpush1.bf16.msra.mxu0 %v2359_v55  ;;  %2298 = vmatprep.subr.bf16.mxu1 %v2297_v56  ;;  %v317_v13 = vld [vmem:[#allocation8 + $0x358] sm:$0xff]  ;;  %v2305_v16 = vpack.c.bf16 %v315_v11, %v307_v10  ;;  %v314_v18 = vld [vmem:[#allocation8 + $0x340] sm:$0xff]  ;;  %v308_v19 = vld [vmem:[#allocation8 + $0x310] sm:$0xff] }
  0x93   :  { %2362 = vmatprep.subr.bf16.mxu0 %v2361_v60  ;;  %v2369_v20 = vpack.c.bf16 %v317_v13, %v309_v12  ;;  %v316_v21 = vld [vmem:[#allocation8 + $0x350] sm:$0xff]  ;;  %v323_v22 = vld [vmem:[#allocation8 + $0x388] sm:$0xff]  ;;  %v325_v24 = vld [vmem:[#allocation8 + $0x398] sm:$0xff]  ;;  %v2307_v26 = vpack.c.bf16 %v314_v18, %v306_v17 }
  0x94   :  { %v331_v23 = vld [vmem:[#allocation8 + $0x3c8] sm:$0xff]  ;;  %v333_v25 = vld [vmem:[#allocation8 + $0x3d8] sm:$0xff]  ;;  %v2371_v27 = vpack.c.bf16 %v316_v21, %v308_v19  ;;  %v322_v29 = vld [vmem:[#allocation8 + $0x380] sm:$0xff] }
  0x95   :  { %2300 = vmatpush1.bf16.msra.mxu1 %v2299_v2  ;;  %v2309_v28 = vpack.c.bf16 %v331_v23, %v323_v22  ;;  %v330_v30 = vld [vmem:[#allocation8 + $0x3c0] sm:$0xff]  ;;  %v324_v31 = vld [vmem:[#allocation8 + $0x390] sm:$0xff]  ;;  %v2373_v32 = vpack.c.bf16 %v333_v25, %v325_v24  ;;  %v339_v34 = vld [vmem:[#allocation8 + $0x408] sm:$0xff] }
  0x96   :  { %2364 = vmatpush1.bf16.msra.mxu0 %v2363_v3  ;;  %2302 = vmatprep.subr.bf16.mxu1 %v2301_v4  ;;  %v332_v33 = vld [vmem:[#allocation8 + $0x3d0] sm:$0xff]  ;;  %v347_v35 = vld [vmem:[#allocation8 + $0x448] sm:$0xff]  ;;  %v341_v36 = vld [vmem:[#allocation8 + $0x418] sm:$0xff]  ;;  %v2311_v38 = vpack.c.bf16 %v330_v30, %v322_v29 }
  0x97   :  { %2366 = vmatprep.subr.bf16.mxu0 %v2365_v8  ;;  %v349_v37 = vld [vmem:[#allocation8 + $0x458] sm:$0xff]  ;;  %v2375_v39 = vpack.c.bf16 %v332_v33, %v324_v31  ;;  %v2313_v40 = vpack.c.bf16 %v347_v35, %v339_v34  ;;  %v338_v41 = vld [vmem:[#allocation8 + $0x400] sm:$0xff]  ;;  %v340_v43 = vld [vmem:[#allocation8 + $0x410] sm:$0xff] }
  0x98   :  { %v346_v42 = vld [vmem:[#allocation8 + $0x440] sm:$0xff]  ;;  %v2377_v44 = vpack.c.bf16 %v349_v37, %v341_v36  ;;  %v348_v45 = vld [vmem:[#allocation8 + $0x450] sm:$0xff]  ;;  %v355_v46 = vld [vmem:[#allocation8 + $0x488] sm:$0xff] }
  0x99   :  { %2304 = vmatpush1.bf16.msra.mxu1 %v2303_v14  ;;  %v363_v47 = vld [vmem:[#allocation8 + $0x4c8] sm:$0xff]  ;;  %v357_v48 = vld [vmem:[#allocation8 + $0x498] sm:$0xff]  ;;  %v2315_v50 = vpack.c.bf16 %v346_v42, %v338_v41  ;;  %v2379_v51 = vpack.c.bf16 %v348_v45, %v340_v43  ;;  %v354_v53 = vld [vmem:[#allocation8 + $0x480] sm:$0xff] }
  0x9a   :  { %2368 = vmatpush1.bf16.msra.mxu0 %v2367_v15  ;;  %2306 = vmatprep.subr.bf16.mxu1 %v2305_v16  ;;  %v365_v49 = vld [vmem:[#allocation8 + $0x4d8] sm:$0xff]  ;;  %v2317_v52 = vpack.c.bf16 %v363_v47, %v355_v46  ;;  %v362_v54 = vld [vmem:[#allocation8 + $0x4c0] sm:$0xff]  ;;  %v356_v55 = vld [vmem:[#allocation8 + $0x490] sm:$0xff] }
  0x9b   :  { %2370 = vmatprep.subr.bf16.mxu0 %v2369_v20  ;;  %v2381_v56 = vpack.c.bf16 %v365_v49, %v357_v48  ;;  %v364_v57 = vld [vmem:[#allocation8 + $0x4d0] sm:$0xff]  ;;  %v371_v58 = vld [vmem:[#allocation8 + $0x508] sm:$0xff]  ;;  %v373_v60 = vld [vmem:[#allocation8 + $0x518] sm:$0xff]  ;;  %v2319_v62 = vpack.c.bf16 %v362_v54, %v354_v53 }
  0x9c   :  { %v379_v59 = vld [vmem:[#allocation8 + $0x548] sm:$0xff]  ;;  %v381_v61 = vld [vmem:[#allocation8 + $0x558] sm:$0xff]  ;;  %v2383_v63 = vpack.c.bf16 %v364_v57, %v356_v55  ;;  %v370_v1 = vld [vmem:[#allocation8 + $0x500] sm:$0xff] }
  0x9d   :  { %2308 = vmatpush1.bf16.msra.mxu1 %v2307_v26  ;;  %v2321_v0 = vpack.c.bf16 %v379_v59, %v371_v58  ;;  %v378_v2 = vld [vmem:[#allocation8 + $0x540] sm:$0xff]  ;;  %v372_v3 = vld [vmem:[#allocation8 + $0x510] sm:$0xff]  ;;  %v2385_v4 = vpack.c.bf16 %v381_v61, %v373_v60  ;;  %v387_v6 = vld [vmem:[#allocation8 + $0x588] sm:$0xff] }
  0x9e   :  { %2372 = vmatpush1.bf16.msra.mxu0 %v2371_v27  ;;  %2310 = vmatprep.subr.bf16.mxu1 %v2309_v28  ;;  %v380_v5 = vld [vmem:[#allocation8 + $0x550] sm:$0xff]  ;;  %v395_v7 = vld [vmem:[#allocation8 + $0x5c8] sm:$0xff]  ;;  %v389_v8 = vld [vmem:[#allocation8 + $0x598] sm:$0xff]  ;;  %v2323_v10 = vpack.c.bf16 %v378_v2, %v370_v1 }
  0x9f   :  { %2374 = vmatprep.subr.bf16.mxu0 %v2373_v32  ;;  %v397_v9 = vld [vmem:[#allocation8 + $0x5d8] sm:$0xff]  ;;  %v2387_v11 = vpack.c.bf16 %v380_v5, %v372_v3  ;;  %v2325_v12 = vpack.c.bf16 %v395_v7, %v387_v6  ;;  %v386_v13 = vld [vmem:[#allocation8 + $0x580] sm:$0xff]  ;;  %v388_v15 = vld [vmem:[#allocation8 + $0x590] sm:$0xff] }
  0xa0   :  { %v394_v14 = vld [vmem:[#allocation8 + $0x5c0] sm:$0xff]  ;;  %v2389_v16 = vpack.c.bf16 %v397_v9, %v389_v8  ;;  %v396_v17 = vld [vmem:[#allocation8 + $0x5d0] sm:$0xff]  ;;  %v403_v18 = vld [vmem:[#allocation8 + $0x608] sm:$0xff] }
  0xa1   :  { %2312 = vmatpush1.bf16.msra.mxu1 %v2311_v38  ;;  %v411_v19 = vld [vmem:[#allocation8 + $0x648] sm:$0xff]  ;;  %v405_v20 = vld [vmem:[#allocation8 + $0x618] sm:$0xff]  ;;  %v2327_v22 = vpack.c.bf16 %v394_v14, %v386_v13  ;;  %v2391_v23 = vpack.c.bf16 %v396_v17, %v388_v15  ;;  %v402_v25 = vld [vmem:[#allocation8 + $0x600] sm:$0xff] }
  0xa2   :  { %2376 = vmatpush1.bf16.msra.mxu0 %v2375_v39  ;;  %2314 = vmatprep.subr.bf16.mxu1 %v2313_v40  ;;  %v413_v21 = vld [vmem:[#allocation8 + $0x658] sm:$0xff]  ;;  %v2329_v24 = vpack.c.bf16 %v411_v19, %v403_v18  ;;  %v410_v26 = vld [vmem:[#allocation8 + $0x640] sm:$0xff]  ;;  %v404_v27 = vld [vmem:[#allocation8 + $0x610] sm:$0xff] }
  0xa3   :  { %2378 = vmatprep.subr.bf16.mxu0 %v2377_v44  ;;  %v2393_v28 = vpack.c.bf16 %v413_v21, %v405_v20  ;;  %v412_v29 = vld [vmem:[#allocation8 + $0x650] sm:$0xff]  ;;  %v419_v30 = vld [vmem:[#allocation8 + $0x688] sm:$0xff]  ;;  %v421_v32 = vld [vmem:[#allocation8 + $0x698] sm:$0xff]  ;;  %v2331_v34 = vpack.c.bf16 %v410_v26, %v402_v25 }
  0xa4   :  { %v427_v31 = vld [vmem:[#allocation8 + $0x6c8] sm:$0xff]  ;;  %v429_v33 = vld [vmem:[#allocation8 + $0x6d8] sm:$0xff]  ;;  %v2395_v35 = vpack.c.bf16 %v412_v29, %v404_v27  ;;  %v418_v37 = vld [vmem:[#allocation8 + $0x680] sm:$0xff] }
  0xa5   :  { %2316 = vmatpush1.bf16.msra.mxu1 %v2315_v50  ;;  %v2333_v36 = vpack.c.bf16 %v427_v31, %v419_v30  ;;  %v426_v38 = vld [vmem:[#allocation8 + $0x6c0] sm:$0xff]  ;;  %v420_v39 = vld [vmem:[#allocation8 + $0x690] sm:$0xff]  ;;  %v2397_v40 = vpack.c.bf16 %v429_v33, %v421_v32  ;;  %v435_v42 = vld [vmem:[#allocation8 + $0x708] sm:$0xff] }
  0xa6   :  { %2380 = vmatpush1.bf16.msra.mxu0 %v2379_v51  ;;  %2318 = vmatprep.subr.bf16.mxu1 %v2317_v52  ;;  %v428_v41 = vld [vmem:[#allocation8 + $0x6d0] sm:$0xff]  ;;  %v443_v43 = vld [vmem:[#allocation8 + $0x748] sm:$0xff]  ;;  %v437_v44 = vld [vmem:[#allocation8 + $0x718] sm:$0xff]  ;;  %v2335_v46 = vpack.c.bf16 %v426_v38, %v418_v37 }
  0xa7   :  { %2382 = vmatprep.subr.bf16.mxu0 %v2381_v56  ;;  %v445_v45 = vld [vmem:[#allocation8 + $0x758] sm:$0xff]  ;;  %v2399_v47 = vpack.c.bf16 %v428_v41, %v420_v39  ;;  %v2337_v48 = vpack.c.bf16 %v443_v43, %v435_v42  ;;  %v434_v49 = vld [vmem:[#allocation8 + $0x700] sm:$0xff]  ;;  %v436_v52 = vld [vmem:[#allocation8 + $0x710] sm:$0xff] }
  0xa8   :  { %v442_v50 = vld [vmem:[#allocation8 + $0x740] sm:$0xff]  ;;  %v2401_v51 = vpack.c.bf16 %v445_v45, %v437_v44  ;;  %v444_v53 = vld [vmem:[#allocation8 + $0x750] sm:$0xff]  ;;  %v451_v56 = vld [vmem:[#allocation8 + $0x788] sm:$0xff] }
  0xa9   :  { %2320 = vmatpush1.bf16.msra.mxu1 %v2319_v62  ;;  %v2339_v54 = vpack.c.bf16 %v442_v50, %v434_v49  ;;  %v2403_v55 = vpack.c.bf16 %v444_v53, %v436_v52  ;;  %v459_v57 = vld [vmem:[#allocation8 + $0x7c8] sm:$0xff]  ;;  %v453_v58 = vld [vmem:[#allocation8 + $0x798] sm:$0xff]  ;;  %v450_v61 = vld [vmem:[#allocation8 + $0x780] sm:$0xff] }
  0xaa   :  { %2384 = vmatpush1.bf16.msra.mxu0 %v2383_v63  ;;  %2322 = vmatprep.subr.bf16.mxu1 %v2321_v0  ;;  %v2341_v59 = vpack.c.bf16 %v459_v57, %v451_v56  ;;  %v461_v60 = vld [vmem:[#allocation8 + $0x7d8] sm:$0xff]  ;;  %v458_v62 = vld [vmem:[#allocation8 + $0x7c0] sm:$0xff]  ;;  %v452_v1 = vld [vmem:[#allocation8 + $0x790] sm:$0xff] }
  0xab   :  { %2386 = vmatprep.subr.bf16.mxu0 %v2385_v4  ;;  %v2405_v63 = vpack.c.bf16 %v461_v60, %v453_v58  ;;  %v2343_v0 = vpack.c.bf16 %v458_v62, %v450_v61  ;;  %v460_v2 = vld [vmem:[#allocation8 + $0x7d0] sm:$0xff]  ;;  %v215_v4 = vld [vmem:[#allocation8 + $0x28] sm:$0xff]  ;;  %v217_v6 = vld [vmem:[#allocation8 + $0x38] sm:$0xff] }
  0xac   :  { %v2407_v3 = vpack.c.bf16 %v460_v2, %v452_v1  ;;  %v223_v5 = vld [vmem:[#allocation8 + $0x68] sm:$0xff]  ;;  %v225_v8 = vld [vmem:[#allocation8 + $0x78] sm:$0xff]  ;;  %v214_v18 = vld [vmem:[#allocation8 + $0x20] sm:$0xff] }
  0xad   :  { %2324 = vmatpush1.bf16.msra.mxu1 %v2323_v10  ;;  %v2409_v7 = vpack.c.bf16 %v223_v5, %v215_v4  ;;  %v2473_v9 = vpack.c.bf16 %v225_v8, %v217_v6  ;;  %v116_v10 = vlaneseq  ;;  %v114_v13 = vld [vmem:[#allocation7] sm:$0x3]  ;;  %v222_v21 = vld [vmem:[#allocation8 + $0x60] sm:$0xff]  ;;  %v231_v25 = vld [vmem:[#allocation8 + $0xa8] sm:$0xff] }
  0xae   :  { %2388 = vmatpush1.bf16.msra.mxu0 %v2387_v11  ;;  %2326 = vmatprep.subr.bf16.mxu1 %v2325_v12  ;;  %v239_v26 = vld [vmem:[#allocation8 + $0xe8] sm:$0xff]  ;;  %v233_v27 = vld [vmem:[#allocation8 + $0xb8] sm:$0xff]  ;;  %v2411_v30 = vpack.c.bf16 %v222_v21, %v214_v18  ;;  %v230_v32 = vld [vmem:[#allocation8 + $0xa0] sm:$0xff] }
  0xaf   :  { %2390 = vmatprep.subr.bf16.mxu0 %v2389_v16  ;;  %v3119_v11 = vshrl.u32 %v116_v10, 7  ;;  %v238_v33 = vld [vmem:[#allocation8 + $0xe0] sm:$0xff]  ;;  %v247_v37 = vld [vmem:[#allocation8 + $0x128] sm:$0xff]  ;;  %v2413_v38 = vpack.c.bf16 %v239_v26, %v231_v25  ;;  %v249_v41 = vld [vmem:[#allocation8 + $0x138] sm:$0xff]  ;;  %vm3253_vm2 = vcmp.lt.s32.totalorder %v116_v10, 256 }
  0xb0   :  { %v257_v42 = vld [vmem:[#allocation8 + $0x178] sm:$0xff]  ;;  %v2415_v43 = vpack.c.bf16 %v238_v33, %v230_v32  ;;  %v246_v45 = vld [vmem:[#allocation8 + $0x120] sm:$0xff]  ;;  %v248_v49 = vld [vmem:[#allocation8 + $0x130] sm:$0xff] }
  0xb1   :  { %2328 = vmatpush1.bf16.msra.mxu1 %v2327_v22  ;;  %v118_v12 = vsub.s32 0, %v3119_v11  ;;  %v122_v14 = vsub.s32 1, %v3119_v11  ;;  %v216_v22 = vld [vmem:[#allocation8 + $0x30] sm:$0xff]  ;;  %v271_v52 = vld [vmem:[#allocation8 + $0x1e8] sm:$0xff]  ;;  %v265_v53 = vld [vmem:[#allocation8 + $0x1b8] sm:$0xff] }
  0xb2   :  { %2392 = vmatpush1.bf16.msra.mxu0 %v2391_v23  ;;  %2330 = vmatprep.subr.bf16.mxu1 %v2329_v24  ;;  %v224_v23 = vld [vmem:[#allocation8 + $0x70] sm:$0xff]  ;;  %v262_v57 = vld [vmem:[#allocation8 + $0x1a0] sm:$0xff]  ;;  %v281_v1 = vld [vmem:[#allocation8 + $0x238] sm:$0xff] }
  0xb3   :  { %2394 = vmatprep.subr.bf16.mxu0 %v2393_v28  ;;  %v119_v15 = vrot.slane %v114_v13, %v118_v12  ;;  %v123_v16 = vrot.slane %v114_v13, %v122_v14  ;;  %v241_v28 = vld [vmem:[#allocation8 + $0xf8] sm:$0xff]  ;;  %v2475_v31 = vpack.c.bf16 %v224_v23, %v216_v22  ;;  %v256_v50 = vld [vmem:[#allocation8 + $0x170] sm:$0xff]  ;;  %v270_v58 = vld [vmem:[#allocation8 + $0x1e0] sm:$0xff] }
  0xb4   :  { %v2477_v39 = vpack.c.bf16 %v241_v28, %v233_v27  ;;  %v2483_v56 = vpack.c.bf16 %v256_v50, %v248_v49  ;;  %v264_v61 = vld [vmem:[#allocation8 + $0x1b0] sm:$0xff]  ;;  %v289_v2 = vld [vmem:[#allocation8 + $0x278] sm:$0xff]  ;;  %v278_v5 = vld [vmem:[#allocation8 + $0x220] sm:$0xff] }
  0xb5   :  { %2332 = vmatpush1.bf16.msra.mxu1 %v2331_v34  ;;  %v272_v62 = vld [vmem:[#allocation8 + $0x1f0] sm:$0xff]  ;;  %v286_v6 = vld [vmem:[#allocation8 + $0x260] sm:$0xff]  ;;  %v2489_v8 = vpack.c.bf16 %v289_v2, %v281_v1  ;;  %v305_v18 = vld [vmem:[#allocation8 + $0x2f8] sm:$0xff] }
  0xb6   :  { %2396 = vmatpush1.bf16.msra.mxu0 %v2395_v35  ;;  %2334 = vmatprep.subr.bf16.mxu1 %v2333_v36  ;;  %v232_v35 = vld [vmem:[#allocation8 + $0xb0] sm:$0xff]  ;;  %v2487_v4 = vpack.c.bf16 %v272_v62, %v264_v61  ;;  %v294_v21 = vld [vmem:[#allocation8 + $0x2a0] sm:$0xff]  ;;  %v311_v27 = vld [vmem:[#allocation8 + $0x328] sm:$0xff] }
  0xb7   :  { %2398 = vmatprep.subr.bf16.mxu0 %v2397_v40  ;;  %v240_v36 = vld [vmem:[#allocation8 + $0xf0] sm:$0xff]  ;;  %v255_v40 = vld [vmem:[#allocation8 + $0x168] sm:$0xff]  ;;  %v302_v22 = vld [vmem:[#allocation8 + $0x2e0] sm:$0xff] }
  0xb8   :  { %v2479_v44 = vpack.c.bf16 %v240_v36, %v232_v35  ;;  %v288_v13 = vld [vmem:[#allocation8 + $0x270] sm:$0xff]  ;;  %v319_v28 = vld [vmem:[#allocation8 + $0x368] sm:$0xff]  ;;  %v310_v33 = vld [vmem:[#allocation8 + $0x320] sm:$0xff] }
  0xb9   :  { %2336 = vmatpush1.bf16.msra.mxu1 %v2335_v46  ;;  %v254_v46 = vld [vmem:[#allocation8 + $0x160] sm:$0xff]  ;;  %v296_v25 = vld [vmem:[#allocation8 + $0x2b0] sm:$0xff]  ;;  %v2433_v36 = vpack.c.bf16 %v319_v28, %v311_v27  ;;  %v367_v1 = vld [vmem:[#allocation8 + $0x4e8] sm:$0xff] }
  0xba   :  { %2400 = vmatpush1.bf16.msra.mxu0 %v2399_v47  ;;  %2338 = vmatprep.subr.bf16.mxu1 %v2337_v48  ;;  %v2417_v47 = vpack.c.bf16 %v255_v40, %v247_v37  ;;  %v2481_v48 = vpack.c.bf16 %v257_v42, %v249_v41  ;;  %v304_v26 = vld [vmem:[#allocation8 + $0x2f0] sm:$0xff]  ;;  %v318_v35 = vld [vmem:[#allocation8 + $0x360] sm:$0xff]  ;;  %v327_v40 = vld [vmem:[#allocation8 + $0x3a8] sm:$0xff] }
  0xbb   :  { %2402 = vmatprep.subr.bf16.mxu0 %v2401_v51  ;;  %v263_v51 = vld [vmem:[#allocation8 + $0x1a8] sm:$0xff]  ;;  %v2495_v32 = vpack.c.bf16 %v304_v26, %v296_v25  ;;  %v329_v42 = vld [vmem:[#allocation8 + $0x3b8] sm:$0xff]  ;;  %v328_v50 = vld [vmem:[#allocation8 + $0x3b0] sm:$0xff] }
  0xbc   :  { %v335_v41 = vld [vmem:[#allocation8 + $0x3e8] sm:$0xff]  ;;  %v344_v62 = vld [vmem:[#allocation8 + $0x430] sm:$0xff]  ;;  %v361_v2 = vld [vmem:[#allocation8 + $0x4b8] sm:$0xff] }
  0xbd   :  { %2340 = vmatpush1.bf16.msra.mxu1 %v2339_v54  ;;  %v273_v54 = vld [vmem:[#allocation8 + $0x1f8] sm:$0xff]  ;;  %v376_v26 = vld [vmem:[#allocation8 + $0x530] sm:$0xff]  ;;  %v391_v28 = vld [vmem:[#allocation8 + $0x5a8] sm:$0xff] }
  0xbe   :  { %2404 = vmatpush1.bf16.msra.mxu0 %v2403_v55  ;;  %2342 = vmatprep.subr.bf16.mxu1 %v2341_v59  ;;  %v2419_v55 = vpack.c.bf16 %v254_v46, %v246_v45  ;;  %v2421_v59 = vpack.c.bf16 %v271_v52, %v263_v51  ;;  %v2485_v60 = vpack.c.bf16 %v273_v54, %v265_v53  ;;  %v326_v46 = vld [vmem:[#allocation8 + $0x3a0] sm:$0xff]  ;;  %v336_v51 = vld [vmem:[#allocation8 + $0x3f0] sm:$0xff]  ;;  %v343_v52 = vld [vmem:[#allocation8 + $0x428] sm:$0xff] }
  0xbf   :  { %2406 = vmatprep.subr.bf16.mxu0 %v2405_v63  ;;  %v279_v63 = vld [vmem:[#allocation8 + $0x228] sm:$0xff]  ;;  %v345_v54 = vld [vmem:[#allocation8 + $0x438] sm:$0xff]  ;;  %v384_v27 = vld [vmem:[#allocation8 + $0x570] sm:$0xff] }
  0xc0   :  { %v351_v53 = vld [vmem:[#allocation8 + $0x468] sm:$0xff] }
  0xc1   :  { %2344 = vmatpush1.bf16.msra.mxu1 %v2343_v0  ;;  %v287_v0 = vld [vmem:[#allocation8 + $0x268] sm:$0xff] }
  0xc2   :  { %2408 = vmatpush1.bf16.msra.mxu0 %v2407_v3  ;;  %2410 = vmatprep.subr.bf16.mxu1 %v2409_v7  ;;  %v2423_v3 = vpack.c.bf16 %v270_v58, %v262_v57  ;;  %v2425_v7 = vpack.c.bf16 %v287_v0, %v279_v63  ;;  %v2503_v57 = vpack.c.bf16 %v336_v51, %v328_v50  ;;  %v342_v58 = vld [vmem:[#allocation8 + $0x420] sm:$0xff]  ;;  %v352_v63 = vld [vmem:[#allocation8 + $0x470] sm:$0xff]  ;;  %v359_v0 = vld [vmem:[#allocation8 + $0x4a8] sm:$0xff] }
  0xc3   :  { %2474 = vmatprep.subr.bf16.mxu0 %v2473_v9  ;;  %v280_v9 = vld [vmem:[#allocation8 + $0x230] sm:$0xff]  ;;  %v1314_v10 = vld [vmem:[#allocation11 + $0x300] sm:$0xff] }
  0xc4   :  { %v408_v51 = vld [vmem:[#allocation8 + $0x630] sm:$0xff] }
 0x154   :  { %v203_v17 = vpop.f32.mrb[0].mxu0 }
 0x155   :  { %v204_v19 = vadd.f32 %v203_v17, %v119_v15  ;;  %v205_v20 = vpop.f32.mrb[1].mxu0  ;;  %v295_v15 = vld [vmem:[#allocation8 + $0x2a8] sm:$0xff]  ;;  %v297_v17 = vld [vmem:[#allocation8 + $0x2b8] sm:$0xff] }
 0x156   :  { %v206_v24 = vadd.f32 %v205_v20, %v123_v16  ;;  %v303_v16 = vld [vmem:[#allocation8 + $0x2e8] sm:$0xff]  ;;  %v2491_v20 = vpack.c.bf16 %v288_v13, %v280_v9  ;;  %v360_v13 = vld [vmem:[#allocation8 + $0x4b0] sm:$0xff] }
 0x157   :  { %v3127_v34 = vmax.f32 %v204_v19, 0.0  ;;  %v2427_v19 = vpack.c.bf16 %v286_v6, %v278_v5  ;;  %v2429_v23 = vpack.c.bf16 %v303_v16, %v295_v15  ;;  %v2507_v5 = vpack.c.bf16 %v352_v63, %v344_v62  ;;  %v358_v6 = vld [vmem:[#allocation8 + $0x4a0] sm:$0xff]  ;;  %v368_v15 = vld [vmem:[#allocation8 + $0x4f0] sm:$0xff]  ;;  %v375_v16 = vld [vmem:[#allocation8 + $0x528] sm:$0xff] }
 0x158   :  { %v209_v29 = vmax.f32 %v206_v24, 0.0  ;;  %v2493_v24 = vpack.c.bf16 %v305_v18, %v297_v17  ;;  %v383_v17 = vld [vmem:[#allocation8 + $0x568] sm:$0xff]  ;;  %v377_v18 = vld [vmem:[#allocation8 + $0x538] sm:$0xff]  ;;  %v424_v63 = vld [vmem:[#allocation8 + $0x6b0] sm:$0xff] }
 0x15a   :  { %572 = vmatprep.mubr.f32.mxu1 %v209_v29  ;;  %643 = vmatprep.mubr.f32.mxu0 %v209_v29 }
 0x15b   :  { %573 = vmatmul.mubr.f32.vlgmr.msra.gmra.mrb[0].mxu1 %v3127_v34  ;;  %644 = vmatmul.mubr.f32.vlgmr.msra.gmra.mrb[2].mxu0 %v3127_v34 }
 0x15c   :  { %2412 = vmatpush1.bf16.msra.mxu1 %v2411_v30  ;;  %2476 = vmatpush1.bf16.msra.mxu0 %v2475_v31  ;;  %v321_v30 = vld [vmem:[#allocation8 + $0x378] sm:$0xff]  ;;  %v2431_v31 = vpack.c.bf16 %v302_v22, %v294_v21  ;;  %v2511_v21 = vpack.c.bf16 %v368_v15, %v360_v13  ;;  %v374_v22 = vld [vmem:[#allocation8 + $0x520] sm:$0xff]  ;;  %v440_v15 = vld [vmem:[#allocation8 + $0x730] sm:$0xff] }
 0x15d   :  { %714 = vmatprep.mubr.f32.mxu1 %v209_v29  ;;  %785 = vmatprep.mubr.f32.mxu0 %v209_v29  ;;  %v313_v29 = vld [vmem:[#allocation8 + $0x338] sm:$0xff] }
 0x15e   :  { %2414 = vmatprep.subr.bf16.mxu1 %v2413_v38  ;;  %2478 = vmatprep.subr.bf16.mxu0 %v2477_v39  ;;  %v2497_v37 = vpack.c.bf16 %v321_v30, %v313_v29  ;;  %v312_v38 = vld [vmem:[#allocation8 + $0x330] sm:$0xff]  ;;  %v399_v29 = vld [vmem:[#allocation8 + $0x5e8] sm:$0xff]  ;;  %v393_v30 = vld [vmem:[#allocation8 + $0x5b8] sm:$0xff] }
 0x15f   :  { %v320_v39 = vld [vmem:[#allocation8 + $0x370] sm:$0xff] }
 0x160   :  { %2416 = vmatpush1.bf16.msra.mxu1 %v2415_v43  ;;  %2480 = vmatpush1.bf16.msra.mxu0 %v2479_v44  ;;  %v337_v43 = vld [vmem:[#allocation8 + $0x3f8] sm:$0xff]  ;;  %v2435_v44 = vpack.c.bf16 %v318_v35, %v310_v33  ;;  %v2499_v45 = vpack.c.bf16 %v320_v39, %v312_v38  ;;  %v2515_v33 = vpack.c.bf16 %v384_v27, %v376_v26  ;;  %v390_v35 = vld [vmem:[#allocation8 + $0x5a0] sm:$0xff]  ;;  %v392_v39 = vld [vmem:[#allocation8 + $0x5b0] sm:$0xff] }
 0x161   :  { %2418 = vmatprep.subr.bf16.mxu1 %v2417_v47  ;;  %2482 = vmatprep.subr.bf16.mxu0 %v2481_v48  ;;  %v334_v47 = vld [vmem:[#allocation8 + $0x3e0] sm:$0xff]  ;;  %v2437_v48 = vpack.c.bf16 %v335_v41, %v327_v40  ;;  %v2501_v49 = vpack.c.bf16 %v337_v43, %v329_v42  ;;  %v400_v40 = vld [vmem:[#allocation8 + $0x5f0] sm:$0xff]  ;;  %v407_v41 = vld [vmem:[#allocation8 + $0x628] sm:$0xff] }
 0x162   :  { %v415_v42 = vld [vmem:[#allocation8 + $0x668] sm:$0xff]  ;;  %v409_v43 = vld [vmem:[#allocation8 + $0x638] sm:$0xff]  ;;  %v462_v26 = vld [vmem:[#allocation8 + $0x7e0] sm:$0xff] }
 0x163   :  { %v456_v27 = vld [vmem:[#allocation8 + $0x7b0] sm:$0xff] }
 0x164   :  { %2420 = vmatpush1.bf16.msra.mxu1 %v2419_v55  ;;  %2484 = vmatpush1.bf16.msra.mxu0 %v2483_v56  ;;  %v353_v55 = vld [vmem:[#allocation8 + $0x478] sm:$0xff]  ;;  %v2439_v56 = vpack.c.bf16 %v334_v47, %v326_v46  ;;  %v2519_v46 = vpack.c.bf16 %v400_v40, %v392_v39  ;;  %v406_v47 = vld [vmem:[#allocation8 + $0x620] sm:$0xff] }
 0x165   :  { %2422 = vmatprep.subr.bf16.mxu1 %v2421_v59  ;;  %2486 = vmatprep.subr.bf16.mxu0 %v2485_v60  ;;  %v350_v59 = vld [vmem:[#allocation8 + $0x460] sm:$0xff]  ;;  %v2441_v60 = vpack.c.bf16 %v351_v53, %v343_v52  ;;  %v2505_v61 = vpack.c.bf16 %v353_v55, %v345_v54  ;;  %v416_v52 = vld [vmem:[#allocation8 + $0x670] sm:$0xff]  ;;  %v423_v53 = vld [vmem:[#allocation8 + $0x6a8] sm:$0xff] }
 0x166   :  { %v431_v54 = vld [vmem:[#allocation8 + $0x6e8] sm:$0xff]  ;;  %v425_v55 = vld [vmem:[#allocation8 + $0x6b8] sm:$0xff] }
 0x168   :  { %2424 = vmatpush1.bf16.msra.mxu1 %v2423_v3  ;;  %2488 = vmatpush1.bf16.msra.mxu0 %v2487_v4  ;;  %v369_v3 = vld [vmem:[#allocation8 + $0x4f8] sm:$0xff]  ;;  %v2443_v4 = vpack.c.bf16 %v350_v59, %v342_v58  ;;  %v2523_v58 = vpack.c.bf16 %v416_v52, %v408_v51  ;;  %v422_v59 = vld [vmem:[#allocation8 + $0x6a0] sm:$0xff] }
 0x169   :  { %2426 = vmatprep.subr.bf16.mxu1 %v2425_v7  ;;  %2490 = vmatprep.subr.bf16.mxu0 %v2489_v8  ;;  %v366_v7 = vld [vmem:[#allocation8 + $0x4e0] sm:$0xff]  ;;  %v2445_v8 = vpack.c.bf16 %v367_v1, %v359_v0  ;;  %v2509_v9 = vpack.c.bf16 %v369_v3, %v361_v2  ;;  %v432_v0 = vld [vmem:[#allocation8 + $0x6f0] sm:$0xff]  ;;  %v439_v1 = vld [vmem:[#allocation8 + $0x728] sm:$0xff] }
 0x16a   :  { %v447_v2 = vld [vmem:[#allocation8 + $0x768] sm:$0xff]  ;;  %v441_v3 = vld [vmem:[#allocation8 + $0x738] sm:$0xff] }
 0x16b   :  { %v955_v52 = vld [vmem:[#allocation11 + $0x30] sm:$0xff] }
 0x16c   :  { %2428 = vmatpush1.bf16.msra.mxu1 %v2427_v19  ;;  %2492 = vmatpush1.bf16.msra.mxu0 %v2491_v20  ;;  %v385_v19 = vld [vmem:[#allocation8 + $0x578] sm:$0xff]  ;;  %v2447_v20 = vpack.c.bf16 %v366_v7, %v358_v6  ;;  %v2527_v6 = vpack.c.bf16 %v432_v0, %v424_v63  ;;  %v438_v7 = vld [vmem:[#allocation8 + $0x720] sm:$0xff] }
 0x16d   :  { %2430 = vmatprep.subr.bf16.mxu1 %v2429_v23  ;;  %2494 = vmatprep.subr.bf16.mxu0 %v2493_v24  ;;  %v382_v23 = vld [vmem:[#allocation8 + $0x560] sm:$0xff]  ;;  %v2449_v24 = vpack.c.bf16 %v383_v17, %v375_v16  ;;  %v2513_v25 = vpack.c.bf16 %v385_v19, %v377_v18  ;;  %v448_v16 = vld [vmem:[#allocation8 + $0x770] sm:$0xff]  ;;  %v455_v17 = vld [vmem:[#allocation8 + $0x7a8] sm:$0xff] }
 0x16e   :  { %v463_v18 = vld [vmem:[#allocation8 + $0x7e8] sm:$0xff]  ;;  %v457_v19 = vld [vmem:[#allocation8 + $0x7b8] sm:$0xff] }
 0x16f   :  { %v959_v0 = vld [vmem:[#allocation11 + $0x50] sm:$0xff] }
 0x170   :  { %2432 = vmatpush1.bf16.msra.mxu1 %v2431_v31  ;;  %2496 = vmatpush1.bf16.msra.mxu0 %v2495_v32  ;;  %v401_v31 = vld [vmem:[#allocation8 + $0x5f8] sm:$0xff]  ;;  %v2451_v32 = vpack.c.bf16 %v382_v23, %v374_v22  ;;  %v2531_v22 = vpack.c.bf16 %v448_v16, %v440_v15  ;;  %v454_v23 = vld [vmem:[#allocation8 + $0x7a0] sm:$0xff] }
 0x171   :  { %2434 = vmatprep.subr.bf16.mxu1 %v2433_v36  ;;  %2498 = vmatprep.subr.bf16.mxu0 %v2497_v37  ;;  %v398_v36 = vld [vmem:[#allocation8 + $0x5e0] sm:$0xff]  ;;  %v2453_v37 = vpack.c.bf16 %v399_v29, %v391_v28  ;;  %v2517_v38 = vpack.c.bf16 %v401_v31, %v393_v30  ;;  %v464_v28 = vld [vmem:[#allocation8 + $0x7f0] sm:$0xff]  ;;  %v965_v29 = vld [vmem:[#allocation11 + $0x80] sm:$0xff]  ;;  %v2471_v31 = vpack.c.bf16 %v462_v26, %v454_v23 }
 0x172   :  { %v966_v30 = vld [vmem:[#allocation11 + $0x88] sm:$0xff]  ;;  %v963_v15 = vld [vmem:[#allocation11 + $0x70] sm:$0xff] }
 0x173   :  { %v986_v23 = vld [vmem:[#allocation11 + $0x108] sm:$0xff] }
 0x174   :  { %2436 = vmatpush1.bf16.msra.mxu1 %v2435_v44  ;;  %2500 = vmatpush1.bf16.msra.mxu0 %v2499_v45  ;;  %v417_v44 = vld [vmem:[#allocation8 + $0x678] sm:$0xff]  ;;  %v2455_v45 = vpack.c.bf16 %v398_v36, %v390_v35  ;;  %v949_v35 = vld [vmem:[#allocation11] sm:$0xff]  ;;  %v950_v36 = vld [vmem:[#allocation11 + $0x8] sm:$0xff] }
 0x175   :  { %2438 = vmatprep.subr.bf16.mxu1 %v2437_v48  ;;  %2502 = vmatprep.subr.bf16.mxu0 %v2501_v49  ;;  %v414_v48 = vld [vmem:[#allocation8 + $0x660] sm:$0xff]  ;;  %v2457_v49 = vpack.c.bf16 %v415_v42, %v407_v41  ;;  %v2521_v50 = vpack.c.bf16 %v417_v44, %v409_v43  ;;  %v3133_v39 = vpack.c.bf16 %v950_v36, %v949_v35  ;;  %v951_v41 = vld [vmem:[#allocation11 + $0x10] sm:$0xff]  ;;  %v969_v43 = vld [vmem:[#allocation11 + $0xa0] sm:$0xff] }
 0x176   :  { %v952_v42 = vld [vmem:[#allocation11 + $0x18] sm:$0xff]  ;;  %v970_v44 = vld [vmem:[#allocation11 + $0xa8] sm:$0xff]  ;;  %v1005_v36 = vld [vmem:[#allocation11 + $0x1a0] sm:$0xff] }
 0x178   :  { %2440 = vmatpush1.bf16.msra.mxu1 %v2439_v56  ;;  %2504 = vmatpush1.bf16.msra.mxu0 %v2503_v57  ;;  %v433_v56 = vld [vmem:[#allocation8 + $0x6f8] sm:$0xff]  ;;  %v2459_v57 = vpack.c.bf16 %v414_v48, %v406_v47  ;;  %v953_v47 = vld [vmem:[#allocation11 + $0x20] sm:$0xff]  ;;  %v954_v48 = vld [vmem:[#allocation11 + $0x28] sm:$0xff] }
 0x179   :  { %2442 = vmatprep.subr.bf16.mxu1 %v2441_v60  ;;  %2506 = vmatprep.subr.bf16.mxu0 %v2505_v61  ;;  %v430_v60 = vld [vmem:[#allocation8 + $0x6e0] sm:$0xff]  ;;  %v2461_v61 = vpack.c.bf16 %v431_v54, %v423_v53  ;;  %v2525_v62 = vpack.c.bf16 %v433_v56, %v425_v55  ;;  %v973_v55 = vld [vmem:[#allocation11 + $0xc0] sm:$0xff]  ;;  %v974_v56 = vld [vmem:[#allocation11 + $0xc8] sm:$0xff] }
 0x17a   :  { %v956_v53 = vld [vmem:[#allocation11 + $0x38] sm:$0xff] }
 0x17b   :  { %v3153_v54 = vpack.c.bf16 %v956_v53, %v955_v52  ;;  %v1009_v53 = vld [vmem:[#allocation11 + $0x1c0] sm:$0xff] }
 0x17c   :  { %2444 = vmatpush1.bf16.msra.mxu1 %v2443_v4  ;;  %2508 = vmatpush1.bf16.msra.mxu0 %v2507_v5  ;;  %v449_v4 = vld [vmem:[#allocation8 + $0x778] sm:$0xff]  ;;  %v2463_v5 = vpack.c.bf16 %v430_v60, %v422_v59  ;;  %v958_v59 = vld [vmem:[#allocation11 + $0x48] sm:$0xff] }
 0x17d   :  { %2446 = vmatprep.subr.bf16.mxu1 %v2445_v8  ;;  %2510 = vmatprep.subr.bf16.mxu0 %v2509_v9  ;;  %v446_v8 = vld [vmem:[#allocation8 + $0x760] sm:$0xff]  ;;  %v2465_v9 = vpack.c.bf16 %v447_v2, %v439_v1  ;;  %v2529_v13 = vpack.c.bf16 %v449_v4, %v441_v3  ;;  %v977_v3 = vld [vmem:[#allocation11 + $0xe0] sm:$0xff]  ;;  %v978_v4 = vld [vmem:[#allocation11 + $0xe8] sm:$0xff] }
 0x17e   :  { %v960_v1 = vld [vmem:[#allocation11 + $0x58] sm:$0xff] }
 0x17f   :  { %v3165_v2 = vpack.c.bf16 %v960_v1, %v959_v0  ;;  %v1012_v0 = vld [vmem:[#allocation11 + $0x1d8] sm:$0xff] }
 0x180   :  { %2448 = vmatpush1.bf16.msra.mxu1 %v2447_v20  ;;  %2512 = vmatpush1.bf16.msra.mxu0 %v2511_v21  ;;  %v465_v20 = vld [vmem:[#allocation8 + $0x7f8] sm:$0xff]  ;;  %v2467_v21 = vpack.c.bf16 %v446_v8, %v438_v7  ;;  %v962_v7 = vld [vmem:[#allocation11 + $0x68] sm:$0xff] }
 0x181   :  { %2450 = vmatprep.subr.bf16.mxu1 %v2449_v24  ;;  %2514 = vmatprep.subr.bf16.mxu0 %v2513_v25  ;;  %v2469_v24 = vpack.c.bf16 %v463_v18, %v455_v17  ;;  %v2533_v25 = vpack.c.bf16 %v465_v20, %v457_v19  ;;  %v964_v17 = vld [vmem:[#allocation11 + $0x78] sm:$0xff]  ;;  %v1001_v19 = vld [vmem:[#allocation11 + $0x180] sm:$0xff]  ;;  %v1002_v20 = vld [vmem:[#allocation11 + $0x188] sm:$0xff] }
 0x182   :  { %v3177_v18 = vpack.c.bf16 %v964_v17, %v963_v15  ;;  %v997_v15 = vld [vmem:[#allocation11 + $0x160] sm:$0xff]  ;;  %v998_v17 = vld [vmem:[#allocation11 + $0x168] sm:$0xff] }
 0x184   :  { %2452 = vmatpush1.bf16.msra.mxu1 %v2451_v32  ;;  %2516 = vmatpush1.bf16.msra.mxu0 %v2515_v33  ;;  %v2535_v32 = vpack.c.bf16 %v464_v28, %v456_v27  ;;  %v3131_v33 = vpack.c.bf16 %v966_v30, %v965_v29  ;;  %v1003_v28 = vld [vmem:[#allocation11 + $0x190] sm:$0xff]  ;;  %v1004_v29 = vld [vmem:[#allocation11 + $0x198] sm:$0xff] }
 0x185   :  { %2454 = vmatprep.subr.bf16.mxu1 %v2453_v37  ;;  %2518 = vmatprep.subr.bf16.mxu0 %v2517_v38  ;;  %v967_v37 = vld [vmem:[#allocation11 + $0x90] sm:$0xff]  ;;  %v968_v38 = vld [vmem:[#allocation11 + $0x98] sm:$0xff] }
 0x186   :  { %v3136_v40 = vpack.c.bf16 %v968_v38, %v967_v37  ;;  %v987_v30 = vld [vmem:[#allocation11 + $0x110] sm:$0xff]  ;;  %v1006_v37 = vld [vmem:[#allocation11 + $0x1a8] sm:$0xff] }
 0x187   :  { %v3195_v38 = vpack.c.bf16 %v1006_v37, %v1005_v36  ;;  %v478_v36 = vsub.s32 2, %v3119_v11  ;;  %v3236_v37 = vld [vmem:[#allocation10] sm:$0xff] }
 0x188   :  { %2456 = vmatpush1.bf16.msra.mxu1 %v2455_v45  ;;  %2520 = vmatpush1.bf16.msra.mxu0 %v2519_v46  ;;  %v3141_v45 = vpack.c.bf16 %v952_v42, %v951_v41  ;;  %v3144_v46 = vpack.c.bf16 %v970_v44, %v969_v43  ;;  %v989_v41 = vld [vmem:[#allocation11 + $0x120] sm:$0xff]  ;;  %v990_v42 = vld [vmem:[#allocation11 + $0x128] sm:$0xff]  ;;  %v1007_v44 = vld [vmem:[#allocation11 + $0x1b0] sm:$0xff] }
 0x189   :  { %2458 = vmatprep.subr.bf16.mxu1 %v2457_v49  ;;  %2522 = vmatprep.subr.bf16.mxu0 %v2521_v50  ;;  %v3147_v49 = vpack.c.bf16 %v954_v48, %v953_v47  ;;  %v971_v50 = vld [vmem:[#allocation11 + $0xb0] sm:$0xff]  ;;  %v3199_v43 = vpack.c.bf16 %v990_v42, %v989_v41  ;;  %v1008_v47 = vld [vmem:[#allocation11 + $0x1b8] sm:$0xff]  ;;  %v482_v41 = vsub.s32 3, %v3119_v11  ;;  %v2980_v42 = vmov 1966171168  }
 0x18a   :  { %v3202_v48 = vpack.c.bf16 %v1008_v47, %v1007_v44  ;;  %v812_v44 = vunpack.c.l.s4 %v2980_v42  ;;  %v471_v47 = vrot.slane %v3236_v37, %v118_v12 }
 0x18c   :  { %2460 = vmatpush1.bf16.msra.mxu1 %v2459_v57  ;;  %2524 = vmatpush1.bf16.msra.mxu0 %v2523_v58  ;;  %v3157_v57 = vpack.c.bf16 %v974_v56, %v973_v55  ;;  %v957_v58 = vld [vmem:[#allocation11 + $0x40] sm:$0xff]  ;;  %v1010_v55 = vld [vmem:[#allocation11 + $0x1c8] sm:$0xff] }
 0x18d   :  { %2462 = vmatprep.subr.bf16.mxu1 %v2461_v61  ;;  %2526 = vmatprep.subr.bf16.mxu0 %v2525_v62  ;;  %v3159_v60 = vpack.c.bf16 %v958_v59, %v957_v58  ;;  %v975_v61 = vld [vmem:[#allocation11 + $0xd0] sm:$0xff]  ;;  %v976_v62 = vld [vmem:[#allocation11 + $0xd8] sm:$0xff]  ;;  %v3208_v56 = vpack.c.bf16 %v1010_v55, %v1009_v53  ;;  %v993_v58 = vld [vmem:[#allocation11 + $0x140] sm:$0xff]  ;;  %v483_v53 = vrot.slane %v3236_v37, %v482_v41 }
 0x18e   :  { %v3163_v63 = vpack.c.bf16 %v976_v62, %v975_v61  ;;  %v994_v59 = vld [vmem:[#allocation11 + $0x148] sm:$0xff]  ;;  %v1011_v62 = vld [vmem:[#allocation11 + $0x1d0] sm:$0xff] }
 0x18f   :  { %v3210_v61 = vpack.c.bf16 %v994_v59, %v993_v58  ;;  %v3214_v1 = vpack.c.bf16 %v1012_v0, %v1011_v62  ;;  %v813_v59 = vunpack.c.0.s8 %v812_v44 }
 0x190   :  { %2464 = vmatpush1.bf16.msra.mxu1 %v2463_v5  ;;  %2528 = vmatpush1.bf16.msra.mxu0 %v2527_v6  ;;  %v3169_v5 = vpack.c.bf16 %v978_v4, %v977_v3  ;;  %v961_v6 = vld [vmem:[#allocation11 + $0x60] sm:$0xff]  ;;  %v995_v3 = vld [vmem:[#allocation11 + $0x150] sm:$0xff]  ;;  %v996_v4 = vld [vmem:[#allocation11 + $0x158] sm:$0xff] }
 0x191   :  { %2466 = vmatprep.subr.bf16.mxu1 %v2465_v9  ;;  %2530 = vmatprep.subr.bf16.mxu0 %v2529_v13  ;;  %v3171_v8 = vpack.c.bf16 %v962_v7, %v961_v6  ;;  %v979_v9 = vld [vmem:[#allocation11 + $0xf0] sm:$0xff]  ;;  %v980_v13 = vld [vmem:[#allocation11 + $0xf8] sm:$0xff]  ;;  %v3216_v6 = vpack.c.bf16 %v996_v4, %v995_v3  ;;  %v1013_v7 = vld [vmem:[#allocation11 + $0x1e0] sm:$0xff] }
 0x192   :  { %v3175_v16 = vpack.c.bf16 %v980_v13, %v979_v9  ;;  %v1014_v9 = vld [vmem:[#allocation11 + $0x1e8] sm:$0xff] }
 0x193   :  { %v3220_v13 = vpack.c.bf16 %v1014_v9, %v1013_v7 }
 0x194   :  { %2468 = vmatpush1.bf16.msra.mxu1 %v2467_v21  ;;  %2532 = vmatpush1.bf16.msra.mxu0 %v2531_v22  ;;  %v985_v21 = vld [vmem:[#allocation11 + $0x100] sm:$0xff]  ;;  %v3181_v22 = vpack.c.bf16 %v1002_v20, %v1001_v19  ;;  %v3222_v19 = vpack.c.bf16 %v998_v17, %v997_v15  ;;  %v1015_v20 = vld [vmem:[#allocation11 + $0x1f0] sm:$0xff] }
 0x195   :  { %2470 = vmatprep.subr.bf16.mxu1 %v2469_v24  ;;  %2534 = vmatprep.subr.bf16.mxu0 %v2533_v25  ;;  %v1330_v24 = vld [vmem:[#allocation11 + $0x380] sm:$0xff]  ;;  %v1331_v25 = vld [vmem:[#allocation11 + $0x388] sm:$0xff]  ;;  %v3183_v26 = vpack.c.bf16 %v986_v23, %v985_v21  ;;  %v1016_v21 = vld [vmem:[#allocation11 + $0x1f8] sm:$0xff] }
 0x196   :  { %v3185_v27 = vpack.c.bf16 %v1331_v25, %v1330_v24  ;;  %3499 = vst [vmem:[#allocation18_spill] sm:$0xff] %v3222_v19  ;;  %v999_v23 = vld [vmem:[#allocation11 + $0x170] sm:$0xff]  ;;  %v3226_v24 = vpack.c.bf16 %v1016_v21, %v1015_v20  ;;  %v1000_v25 = vld [vmem:[#allocation11 + $0x178] sm:$0xff]  ;;  %v3248_v20 = vsub.s32 %v813_v59, %v3119_v11 }
 0x197   :  { %v1316_v59 = vld [vmem:[#allocation11 + $0x310] sm:$0xff] }
 0x198   :  { %2472 = vmatpush1.bf16.msra.mxu1 %v2471_v31  ;;  %2536 = vmatpush1.bf16.msra.mxu0 %v2535_v32  ;;  %v988_v31 = vld [vmem:[#allocation11 + $0x118] sm:$0xff]  ;;  %v3190_v32 = vpack.c.bf16 %v1004_v29, %v1003_v28  ;;  %3500 = vst [vmem:[#allocation19_spill] sm:$0xff] %v3226_v24  ;;  %v3228_v28 = vpack.c.bf16 %v1000_v25, %v999_v23  ;;  %v1202_v29 = vld [vmem:[#allocation11 + $0x280] sm:$0xff] }
 0x199   :  { %2570 = vmatprep.subr.bf16.mxu0 %v3131_v33  ;;  %2538 = vmatprep.subr.bf16.mxu1 %v3181_v22  ;;  %v3192_v35 = vpack.c.bf16 %v988_v31, %v987_v30  ;;  %v1203_v30 = vld [vmem:[#allocation11 + $0x288] sm:$0xff] }
 0x19a   :  { %3501 = vst [vmem:[#allocation20_spill] sm:$0xff] %v3228_v28  ;;  %v3232_v31 = vpack.c.bf16 %v1203_v30, %v1202_v29 }
 0x19b   :  { %715 = vmatmul.mubr.f32.vlgmr.msra.gmra.mrb[2].mxu1 %v3127_v34  ;;  %786 = vmatmul.mubr.f32.vlgmr.msra.gmra.mrb[4].mxu0 %v3127_v34  ;;  %v972_v34 = vld [vmem:[#allocation11 + $0xb8] sm:$0xff] }
 0x19c   :  { %2572 = vmatpush3.bf16.msra.mxu0 %v3133_v39  ;;  %v3151_v51 = vpack.c.bf16 %v972_v34, %v971_v50  ;;  %2540 = vmatpush3.bf16.msra.mxu1 %v3183_v26  ;;  %v991_v50 = vld [vmem:[#allocation11 + $0x130] sm:$0xff]  ;;  %v992_v34 = vld [vmem:[#allocation11 + $0x138] sm:$0xff]  ;;  %3502 = vst [vmem:[#allocation21_spill] sm:$0xff] %v3232_v31 }
 0x19d   :  { %2574 = vmatprep.subr.bf16.mxu0 %v3136_v40  ;;  %2542 = vmatprep.subr.bf16.mxu1 %v3190_v32  ;;  %v3204_v52 = vpack.c.bf16 %v992_v34, %v991_v50  ;;  %v479_v50 = vrot.slane %v3236_v37, %v478_v36  ;;  %v475_v34 = vrot.slane %v3236_v37, %v122_v14 }
 0x1a0   :  { %2576 = vmatpush3.bf16.msra.mxu0 %v3141_v45  ;;  %2544 = vmatpush3.bf16.msra.mxu1 %v3192_v35 }
 0x1a1   :  { %2578 = vmatprep.subr.bf16.mxu0 %v3144_v46  ;;  %2546 = vmatprep.subr.bf16.mxu1 %v3195_v38 }
 0x1a4   :  { %2580 = vmatpush3.bf16.msra.mxu0 %v3147_v49  ;;  %2548 = vmatpush3.bf16.msra.mxu1 %v3199_v43 }
 0x1a5   :  { %2582 = vmatprep.subr.bf16.mxu0 %v3151_v51  ;;  %2550 = vmatprep.subr.bf16.mxu1 %v3202_v48 }
 0x1a8   :  { %2584 = vmatpush3.bf16.msra.mxu0 %v3153_v54  ;;  %2552 = vmatpush3.bf16.msra.mxu1 %v3204_v52 }
 0x1a9   :  { %2586 = vmatprep.subr.bf16.mxu0 %v3157_v57  ;;  %2554 = vmatprep.subr.bf16.mxu1 %v3208_v56 }
 0x1ac   :  { %2588 = vmatpush3.bf16.msra.mxu0 %v3159_v60  ;;  %2556 = vmatpush3.bf16.msra.mxu1 %v3210_v61 }
 0x1ad   :  { %2590 = vmatprep.subr.bf16.mxu0 %v3163_v63  ;;  %2558 = vmatprep.subr.bf16.mxu1 %v3214_v1 }
 0x1b0   :  { %2592 = vmatpush3.bf16.msra.mxu0 %v3165_v2  ;;  %2560 = vmatpush3.bf16.msra.mxu1 %v3216_v6 }
 0x1b1   :  { %2594 = vmatprep.subr.bf16.mxu0 %v3169_v5  ;;  %2562 = vmatprep.subr.bf16.mxu1 %v3220_v13 }
 0x1b4   :  { %2596 = vmatpush3.bf16.msra.mxu0 %v3171_v8  ;;  %2564 = vmatpush3.bf16.msra.mxu1 %v3222_v19 }
 0x1b5   :  { %2598 = vmatprep.subr.bf16.mxu0 %v3175_v16  ;;  %2566 = vmatprep.subr.bf16.mxu1 %v3226_v24 }
 0x1b8   :  { %2600 = vmatpush3.bf16.msra.mxu0 %v3177_v18  ;;  %2568 = vmatpush3.bf16.msra.mxu1 %v3228_v28 }
 0x1b9   :  { %2634 = vmatprep.subr.bf16.mxu0 %v3185_v27  ;;  %2602 = vmatprep.subr.bf16.mxu1 %v3232_v31 }
 0x22e   :  { %v574_v55 = vpop.f32.mrb[0].mxu1  ;;  %v645_v58 = vpop.f32.mrb[2].mxu0 }
 0x22f   :  { %v575_v62 = vadd.f32 %v574_v55, %v471_v47  ;;  %v646_v0 = vadd.f32 %v645_v58, %v479_v50  ;;  %v576_v3 = vpop.f32.mrb[1].mxu1  ;;  %v647_v4 = vpop.f32.mrb[3].mxu0  ;;  %v1333_v55 = vld [vmem:[#allocation11 + $0x398] sm:$0xff] }
 0x230   :  { %v577_v7 = vadd.f32 %v576_v3, %v475_v34  ;;  %v648_v9 = vadd.f32 %v647_v4, %v483_v53  ;;  %v1315_v34 = vld [vmem:[#allocation11 + $0x308] sm:$0xff]  ;;  %v1332_v53 = vld [vmem:[#allocation11 + $0x390] sm:$0xff]  ;;  %v1317_v4 = vld [vmem:[#allocation11 + $0x318] sm:$0xff] }
 0x231   :  { %v792_v15 = vmax.f32 %v575_v62, 0.0  ;;  %v794_v17 = vmax.f32 %v646_v0, 0.0  ;;  %v3269_v58 = vpack.c.bf16 %v1315_v34, %v1314_v10  ;;  %v3271_v3 = vpack.c.bf16 %v1333_v55, %v1332_v53  ;;  %v1322_v10 = vld [vmem:[#allocation11 + $0x340] sm:$0xff]  ;;  %v1323_v34 = vld [vmem:[#allocation11 + $0x348] sm:$0xff]  ;;  %v1340_v53 = vld [vmem:[#allocation11 + $0x3d0] sm:$0xff] }
 0x232   :  { %v793_v12 = vmax.f32 %v577_v7, 0.0  ;;  %v795_v21 = vmax.f32 %v648_v9, 0.0  ;;  %v1334_v7 = vld [vmem:[#allocation11 + $0x3a0] sm:$0xff]  ;;  %v1335_v9 = vld [vmem:[#allocation11 + $0x3a8] sm:$0xff]  ;;  %v1341_v55 = vld [vmem:[#allocation11 + $0x3d8] sm:$0xff] }
 0x234   :  { %v810_v23 = vcombine.low %v792_v15, %v793_v12  ;;  %v835_v14 = vcombine.low %v794_v17, %v795_v21  ;;  %v3274_v15 = vpack.c.bf16 %v1317_v4, %v1316_v59  ;;  %v3277_v17 = vpack.c.bf16 %v1335_v9, %v1334_v7  ;;  %v1318_v12 = vld [vmem:[#allocation11 + $0x320] sm:$0xff]  ;;  %v1319_v21 = vld [vmem:[#allocation11 + $0x328] sm:$0xff]  ;;  %v1325_v4 = vld [vmem:[#allocation11 + $0x358] sm:$0xff] }
 0x235   :  { %v3292_v59 = vpack.c.bf16 %v1323_v34, %v1322_v10  ;;  %v1342_v7 = vld [vmem:[#allocation11 + $0x3e0] sm:$0xff]  ;;  %v1343_v9 = vld [vmem:[#allocation11 + $0x3e8] sm:$0xff]  ;;  %v1328_v10 = vld [vmem:[#allocation11 + $0x370] sm:$0xff] }
 0x236   :  { %v817_v25 = vrot.slane %v810_v23, %v3248_v20  ;;  %v842_v29 = vrot.slane %v835_v14, %v3248_v20  ;;  %v1336_v23 = vld [vmem:[#allocation11 + $0x3b0] sm:$0xff]  ;;  %v1337_v14 = vld [vmem:[#allocation11 + $0x3b8] sm:$0xff] }
 0x237   :  { %v1329_v34 = vld [vmem:[#allocation11 + $0x378] sm:$0xff] }
 0x238   :  { %v824_v36 = vrot.slane %v817_v25, %v3248_v20  ;;  %v896_v41 = vcombine.high %v817_v25, %v817_v25  ;;  %v849_v42 = vrot.slane %v842_v29, %v3248_v20  ;;  %v909_v44 = vcombine.high %v842_v29, %v842_v29 }
 0x239   :  { %v3280_v25 = vpack.c.bf16 %v1319_v21, %v1318_v12  ;;  %v3283_v29 = vpack.c.bf16 %v1337_v14, %v1336_v23  ;;  %v3301_v21 = vpack.c.bf16 %v1343_v9, %v1342_v7  ;;  %v1326_v23 = vld [vmem:[#allocation11 + $0x360] sm:$0xff]  ;;  %v1327_v14 = vld [vmem:[#allocation11 + $0x368] sm:$0xff]  ;;  %v498_v7 = vsub.s32 7, %v3119_v11 }
 0x23a   :  { %831 = vst.msk [vmem:[#allocation2 + $0x5] ss:$8 sm:$0x3] %vm3253_vm2, %v824_v36  ;;  %v903_v47 = vrot.slane %v896_v41, %v3248_v20  ;;  %852 = vst.msk [vmem:[#allocation2 + $0x6] ss:$8 sm:$0x3] %vm3253_vm2, %v849_v42  ;;  %v916_v50 = vrot.slane %v909_v44, %v3248_v20 }
 0x23b   :  { %v1320_v36 = vld [vmem:[#allocation11 + $0x330] sm:$0xff]  ;;  %v1321_v41 = vld [vmem:[#allocation11 + $0x338] sm:$0xff]  ;;  %v1338_v42 = vld [vmem:[#allocation11 + $0x3c0] sm:$0xff]  ;;  %3506 = vst [vmem:[#allocation23_spill] sm:$0xff] %v3301_v21 }
 0x23c   :  { %907 = vst.msk [vmem:[#allocation2 + $0x25] ss:$8 sm:$0x3] %vm3253_vm2, %v903_v47  ;;  %919 = vst.msk [vmem:[#allocation2 + $0x26] ss:$8 sm:$0x3] %vm3253_vm2, %v916_v50  ;;  %v3286_v47 = vpack.c.bf16 %v1321_v41, %v1320_v36 }
 0x23d   :  { %v1339_v44 = vld [vmem:[#allocation11 + $0x3c8] sm:$0xff]  ;;  %v1344_v36 = vld [vmem:[#allocation11 + $0x3f0] sm:$0xff]  ;;  %v1345_v41 = vld [vmem:[#allocation11 + $0x3f8] sm:$0xff] }
 0x23e   :  { %v3289_v50 = vpack.c.bf16 %v1339_v44, %v1338_v42  ;;  %v3304_v42 = vpack.c.bf16 %v1327_v14, %v1326_v23  ;;  %v3307_v44 = vpack.c.bf16 %v1345_v41, %v1344_v36  ;;  %v499_v36 = vrot.slane %v3236_v37, %v498_v7 }
 0x240   :  { %3507 = vst [vmem:[#allocation24_spill] sm:$0xff] %v3304_v42  ;;  %3508 = vst [vmem:[#allocation25_spill] sm:$0xff] %v3307_v44 }
 0x241   :  { %v946_v62 = vld [vmem:[#allocation2 + $0x8] sm:$0xff]  ;;  %v945_v0 = vld [vmem:[#allocation2] sm:$0xff] }
 0x242   :  { %1171 = vmatprep.mubr.f32.mxu0 %v946_v62  ;;  %v3295_v62 = vpack.c.bf16 %v1341_v55, %v1340_v53  ;;  %v3310_v53 = vpack.c.bf16 %v1329_v34, %v1328_v10  ;;  %v486_v55 = vsub.s32 4, %v3119_v11 }
 0x243   :  { %1172 = vmatmul.mubr.f32.vlgmr.msra.gmra.mrb[6].mxu0 %v945_v0  ;;  %v1324_v0 = vld [vmem:[#allocation11 + $0x350] sm:$0xff] }
 0x244   :  { %2636 = vmatpush3.bf16.msra.mxu0 %v3269_v58  ;;  %v3298_v12 = vpack.c.bf16 %v1325_v4, %v1324_v0  ;;  %3509 = vst [vmem:[#allocation26_spill] sm:$0xff] %v3310_v53  ;;  %v494_v0 = vsub.s32 6, %v3119_v11  ;;  %v490_v4 = vsub.s32 5, %v3119_v11  ;;  %v487_v9 = vrot.slane %v3236_v37, %v486_v55 }
 0x245   :  { %2638 = vmatprep.subr.bf16.mxu0 %v3271_v3 }
 0x246   :  { %3505 = vst [vmem:[#allocation22_spill] sm:$0xff] %v3298_v12  ;;  %v495_v23 = vrot.slane %v3236_v37, %v494_v0  ;;  %v491_v14 = vrot.slane %v3236_v37, %v490_v4 }
 0x248   :  { %2640 = vmatpush3.bf16.msra.mxu0 %v3274_v15 }
 0x249   :  { %2642 = vmatprep.subr.bf16.mxu0 %v3277_v17 }
 0x24c   :  { %2644 = vmatpush3.bf16.msra.mxu0 %v3280_v25 }
 0x24d   :  { %2646 = vmatprep.subr.bf16.mxu0 %v3283_v29 }
 0x250   :  { %2648 = vmatpush3.bf16.msra.mxu0 %v3286_v47 }
 0x251   :  { %2650 = vmatprep.subr.bf16.mxu0 %v3289_v50 }
 0x254   :  { %2652 = vmatpush3.bf16.msra.mxu0 %v3292_v59 }
 0x255   :  { %2654 = vmatprep.subr.bf16.mxu0 %v3295_v62 }
 0x258   :  { %2656 = vmatpush3.bf16.msra.mxu0 %v3298_v12  ;;  %v1188_v12 = vld [vmem:[#allocation11 + $0x210] sm:$0xff] }
 0x259   :  { %2658 = vmatprep.subr.bf16.mxu0 %v3301_v21 }
 0x25c   :  { %2660 = vmatpush3.bf16.msra.mxu0 %v3304_v42 }
 0x25d   :  { %2662 = vmatprep.subr.bf16.mxu0 %v3307_v44 }
 0x260   :  { %2664 = vmatpush3.bf16.msra.mxu0 %v3310_v53 }
 0x261   :  { %2698 = vmatprep.subr.bf16.mxu0 %v3131_v33 }
 0x26e   :  { %v716_v41 = vpop.f32.mrb[2].mxu1  ;;  %v787_v10 = vpop.f32.mrb[4].mxu0 }
 0x26f   :  { %v717_v34 = vadd.f32 %v716_v41, %v487_v9  ;;  %v788_v33 = vadd.f32 %v787_v10, %v495_v23  ;;  %v718_v53 = vpop.f32.mrb[3].mxu1  ;;  %v789_v31 = vpop.f32.mrb[5].mxu0  ;;  %v1205_v41 = vld [vmem:[#allocation11 + $0x298] sm:$0xff] }
 0x270   :  { %v719_v28 = vadd.f32 %v718_v53, %v491_v14  ;;  %v790_v44 = vadd.f32 %v789_v31, %v499_v36  ;;  %v981_v14 = vld [vmem:[#allocation2] sm:$0xfe] }
 0x271   :  { %v796_v42 = vmax.f32 %v717_v34, 0.0  ;;  %v798_v24 = vmax.f32 %v788_v33, 0.0  ;;  %v1310_v36 = vld [vmem:[#allocation2] sm:$0xe0] }
 0x272   :  { %v797_v19 = vmax.f32 %v719_v28, 0.0  ;;  %v799_v11 = vmax.f32 %v790_v44, 0.0  ;;  %v1186_v28 = vld [vmem:[#allocation11 + $0x200] sm:$0xff]  ;;  %v1204_v44 = vld [vmem:[#allocation11 + $0x290] sm:$0xff] }
 0x274   :  { %v856_v21 = vcombine.low %v796_v42, %v797_v19  ;;  %v877_v55 = vcombine.low %v798_v24, %v799_v11  ;;  %v982_v24 = vld [vmem:[#allocation2 + $0x8] sm:$0xfe] }
 0x275   :  { %v1187_v42 = vld [vmem:[#allocation11 + $0x208] sm:$0xff]  ;;  %v1025_v53 = vrot.slane %v982_v24, 1  ;;  %v3342_v24 = vpack.c.bf16 %v1205_v41, %v1204_v44 }
 0x276   :  { %v863_v0 = vrot.slane %v856_v21, %v3248_v20  ;;  %v884_v4 = vrot.slane %v877_v55, %v3248_v20  ;;  %v1311_v21 = vld [vmem:[#allocation2 + $0x8] sm:$0xe0] }
 0x277   :  { %v1354_v55 = vrot.slane %v1311_v21, 5 }
 0x278   :  { %v870_v37 = vrot.slane %v863_v0, %v3248_v20  ;;  %v921_v7 = vcombine.high %v863_v0, %v863_v0  ;;  %v891_v9 = vrot.slane %v884_v4, %v3248_v20  ;;  %v933_v23 = vcombine.high %v884_v4, %v884_v4 }
 0x279   :  { %v3337_v0 = vpack.c.bf16 %v1187_v42, %v1186_v28  ;;  %v1351_v42 = vrot.slane %v1310_v36, 5 }
 0x27a   :  { %873 = vst.msk [vmem:[#allocation2 + $0x11] ss:$8 sm:$0x3] %vm3253_vm2, %v870_v37  ;;  %v928_v31 = vrot.slane %v921_v7, %v3248_v20  ;;  %894 = vst.msk [vmem:[#allocation2 + $0x12] ss:$8 sm:$0x3] %vm3253_vm2, %v891_v9  ;;  %v940_v19 = vrot.slane %v933_v23, %v3248_v20 }
 0x27b   :  { %v1022_v7 = vrot.slane %v981_v14, 1 }
 0x27c   :  { %931 = vst.msk [vmem:[#allocation2 + $0x31] ss:$8 sm:$0x3] %vm3253_vm2, %v928_v31  ;;  %943 = vst.msk [vmem:[#allocation2 + $0x32] ss:$8 sm:$0x3] %vm3253_vm2, %v940_v19 }
 0x281   :  { %v948_v10 = vld [vmem:[#allocation2 + $0x18] sm:$0x7]  ;;  %v947_v34 = vld [vmem:[#allocation2 + $0x10] sm:$0x7] }
 0x282   :  { %v984_v20 = vld [vmem:[#allocation2 + $0x18] sm:$0xf]  ;;  %1176 = vmatprep.mubr.f32.mxu0 %v948_v10  ;;  %v983_v30 = vld [vmem:[#allocation2 + $0x10] sm:$0xf] }
 0x283   :  { %v1026_v33 = vrot.slane %v984_v20, 1  ;;  %v1313_v11 = vld [vmem:[#allocation2 + $0x18] sm:$0xff]  ;;  %v1312_v4 = vld [vmem:[#allocation2 + $0x10] sm:$0xff]  ;;  %1177 = vmatmul.mubr.f32.gmra.mrb[8].mxu0 %v947_v34  ;;  %v1023_v9 = vrot.slane %v983_v30, 1  ;;  %v1183_v20 = vld [vmem:[#allocation2 + $0x8] sm:$0xf0] }
 0x284   :  { %v1355_v37 = vrot.slane %v1313_v11, 5  ;;  %v1352_v23 = vrot.slane %v1312_v4, 5  ;;  %v3339_v31 = vld [vmem:[#allocation2 + $0x18] sm:$0x7f]  ;;  %v1207_v11 = vld [vmem:[#allocation11 + $0x2a8] sm:$0xff]  ;;  %v1226_v41 = vrot.slane %v1183_v20, 4 }
 0x285   :  { %v1027_v19 = vsel %vm1021_vm3, %v1025_v53, %v1026_v33  ;;  %v1189_v10 = vld [vmem:[#allocation11 + $0x218] sm:$0xff]  ;;  %v1024_v28 = vsel %vm1021_vm3, %v1022_v7, %v1023_v9  ;;  %v1206_v34 = vld [vmem:[#allocation11 + $0x2a0] sm:$0xff]  ;;  %v1227_v14 = vrot.slane %v3339_v31, 4  ;;  %v1191_v30 = vld [vmem:[#allocation11 + $0x228] sm:$0xff] }
 0x286   :  { %1096 = vmatprep.mubr.f32.mxu1 %v1027_v19  ;;  %v1356_v21 = vsel %vm1350_vm4, %v1354_v55, %v1355_v37  ;;  %v1353_v44 = vsel %vm1350_vm4, %v1351_v42, %v1352_v23  ;;  %v3349_v53 = vpack.c.bf16 %v1189_v10, %v1188_v12  ;;  %v3352_v36 = vpack.c.bf16 %v1207_v11, %v1206_v34  ;;  %v1190_v55 = vld [vmem:[#allocation11 + $0x220] sm:$0xff]  ;;  %v1208_v4 = vld [vmem:[#allocation11 + $0x2b0] sm:$0xff]  ;;  %v1209_v7 = vld [vmem:[#allocation11 + $0x2b8] sm:$0xff] }
 0x287   :  { %1425 = vmatprep.mubr.f32.mxu0 %v1356_v21  ;;  %1097 = vmatmul.mubr.f32.vlgmr.msra.gmra.mrb[4].mxu1 %v1024_v28  ;;  %v1228_v12 = vsel %vm1222_vm5, %v1226_v41, %v1227_v14  ;;  %v1453_v19 = vld [vmem:[#allocation2 + $0x28] sm:$0xff]  ;;  %v1193_v10 = vld [vmem:[#allocation11 + $0x238] sm:$0xff]  ;;  %v1194_v28 = vld [vmem:[#allocation11 + $0x240] sm:$0xff] }
 0x288   :  { %2604 = vmatpush3.bf16.msra.mxu1 %v3337_v0  ;;  %1101 = vmatprep.mubr.f32.mxu1 %v1026_v33  ;;  %v3360_v33 = vpack.c.bf16 %v1191_v30, %v1190_v55  ;;  %v1195_v42 = vld [vmem:[#allocation11 + $0x248] sm:$0xff]  ;;  %v1212_v20 = vld [vmem:[#allocation11 + $0x2d0] sm:$0xff]  ;;  %v1213_v34 = vld [vmem:[#allocation11 + $0x2d8] sm:$0xff] }
 0x289   :  { %1426 = vmatmul.mubr.f32.vlgmr.msra.gmra.mrb[10].mxu0 %v1353_v44  ;;  %2606 = vmatprep.subr.bf16.mxu1 %v3342_v24  ;;  %v1196_v11 = vld [vmem:[#allocation11 + $0x250] sm:$0xff]  ;;  %v1197_v44 = vld [vmem:[#allocation11 + $0x258] sm:$0xff]  ;;  %v1214_v41 = vld [vmem:[#allocation11 + $0x2e0] sm:$0xff] }
 0x28a   :  { %2700 = vmatpush3.bf16.msra.mxu0 %v3133_v39  ;;  %1430 = vmatprep.mubr.f32.mxu0 %v1355_v37  ;;  %v3363_v39 = vpack.c.bf16 %v1209_v7, %v1208_v4  ;;  %v1192_v37 = vld [vmem:[#allocation11 + $0x230] sm:$0xff]  ;;  %v1215_v55 = vld [vmem:[#allocation11 + $0x2e8] sm:$0xff]  ;;  %v1198_v30 = vld [vmem:[#allocation11 + $0x260] sm:$0xff] }
 0x28b   :  { %1102 = vmatmul.mubr.f32.gmra.mrb[6].mxu1 %v1023_v9  ;;  %2702 = vmatprep.subr.bf16.mxu0 %v3136_v40  ;;  %v1210_v40 = vld [vmem:[#allocation11 + $0x2c0] sm:$0xff]  ;;  %v1211_v9 = vld [vmem:[#allocation11 + $0x2c8] sm:$0xff]  ;;  %v3368_v21 = vpack.c.bf16 %v1193_v10, %v1192_v37  ;;  %v1216_v7 = vld [vmem:[#allocation11 + $0x2f0] sm:$0xff] }
 0x28c   :  { %2608 = vmatpush3.bf16.msra.mxu1 %v3349_v53  ;;  %1297 = vmatprep.mubr.f32.mxu1 %v1228_v12  ;;  %v1199_v4 = vld [vmem:[#allocation11 + $0x268] sm:$0xff]  ;;  %v1217_v12 = vld [vmem:[#allocation11 + $0x2f8] sm:$0xff] }
 0x28d   :  { %1431 = vmatmul.mubr.f32.gmra.mrb[12].mxu0 %v1352_v23  ;;  %2610 = vmatprep.subr.bf16.mxu1 %v3352_v36  ;;  %v3371_v23 = vpack.c.bf16 %v1211_v9, %v1210_v40  ;;  %v1201_v37 = vld [vmem:[#allocation11 + $0x278] sm:$0xff] }
 0x28e   :  { %2704 = vmatpush3.bf16.msra.mxu0 %v3141_v45  ;;  %1677 = vmatprep.mubr.f32.mxu0 %v1453_v19  ;;  %v3376_v45 = vpack.c.bf16 %v1195_v42, %v1194_v28  ;;  %v1200_v19 = vld [vmem:[#allocation11 + $0x270] sm:$0xff]  ;;  %v3406_v28 = vld [vmem:[#allocation2 + $0x38] sm:$0xf] }
 0x28f   :  { %2706 = vmatprep.subr.bf16.mxu0 %v3144_v46  ;;  %v3379_v46 = vpack.c.bf16 %v1213_v34, %v1212_v20  ;;  %v1184_v10 = vld [vmem:[#allocation2 + $0x10] sm:$0x7f]  ;;  %v3411_v42 = vld [vmem:[#allocation2 + $0x38] sm:$0xff]  ;;  %v1816_v20 = vld [vmem:[#allocation2 + $0x28] sm:$0xe0] }
 0x290   :  { %2612 = vmatpush3.bf16.msra.mxu1 %v3360_v33  ;;  %v1224_v40 = vrot.slane %v1184_v10, 4  ;;  %v1859_v34 = vrot.slane %v3411_v42, 5  ;;  %v1858_v31 = vrot.slane %v1816_v20, 5 }
 0x291   :  { %2614 = vmatprep.subr.bf16.mxu1 %v3363_v39 }
 0x292   :  { %2708 = vmatpush3.bf16.msra.mxu0 %v3147_v49  ;;  %v3384_v49 = vpack.c.bf16 %v1197_v44, %v1196_v11 }
 0x293   :  { %2710 = vmatprep.subr.bf16.mxu0 %v3151_v51  ;;  %v3387_v51 = vpack.c.bf16 %v1215_v55, %v1214_v41 }
 0x294   :  { %2616 = vmatpush3.bf16.msra.mxu1 %v3368_v21 }
 0x295   :  { %2618 = vmatprep.subr.bf16.mxu1 %v3371_v23 }
 0x296   :  { %2712 = vmatpush3.bf16.msra.mxu0 %v3153_v54  ;;  %v3392_v54 = vpack.c.bf16 %v1199_v4, %v1198_v30 }
 0x297   :  { %2714 = vmatprep.subr.bf16.mxu0 %v3157_v57  ;;  %v3395_v57 = vpack.c.bf16 %v1217_v12, %v1216_v7 }
 0x298   :  { %2620 = vmatpush3.bf16.msra.mxu1 %v3376_v45 }
 0x299   :  { %2622 = vmatprep.subr.bf16.mxu1 %v3379_v46 }
 0x29a   :  { %2716 = vmatpush3.bf16.msra.mxu0 %v3159_v60  ;;  %v3400_v60 = vpack.c.bf16 %v1201_v37, %v1200_v19 }
 0x29b   :  { %2718 = vmatprep.subr.bf16.mxu0 %v3163_v63  ;;  %v1182_v63 = vld [vmem:[#allocation2] sm:$0xf0] }
 0x29c   :  { %2624 = vmatpush3.bf16.msra.mxu1 %v3384_v49  ;;  %v1223_v9 = vrot.slane %v1182_v63, 4 }
 0x29d   :  { %2626 = vmatprep.subr.bf16.mxu1 %v3387_v51 }
 0x29e   :  { %2720 = vmatpush3.bf16.msra.mxu0 %v3165_v2  ;;  %v1225_v2 = vsel %vm1222_vm5, %v1223_v9, %v1224_v40 }
 0x29f   :  { %2722 = vmatprep.subr.bf16.mxu0 %v3169_v5  ;;  %v1489_v5 = vld [vmem:[#allocation2 + $0x28] sm:$0xfe] }
 0x2a0   :  { %2628 = vmatpush3.bf16.msra.mxu1 %v3392_v54 }
 0x2a1   :  { %2630 = vmatprep.subr.bf16.mxu1 %v3395_v57 }
 0x2a2   :  { %2724 = vmatpush3.bf16.msra.mxu0 %v3171_v8  ;;  %v1532_v8 = vrot.slane %v3406_v28, 1 }
 0x2a3   :  { %2726 = vmatprep.subr.bf16.mxu0 %v3175_v16  ;;  %v1452_v16 = vld [vmem:[#allocation2 + $0x20] sm:$0xff] }
 0x2a4   :  { %2632 = vmatpush3.bf16.msra.mxu1 %v3400_v60 }
 0x2a5   :  { %2666 = vmatprep.subr.bf16.mxu1 %v3181_v22  ;;  %v1455_v22 = vld [vmem:[#allocation2 + $0x38] sm:$0x7] }
 0x2a6   :  { %2728 = vmatpush3.bf16.msra.mxu0 %v3177_v18  ;;  %v1531_v18 = vrot.slane %v1489_v5, 1 }
 0x2a7   :  { %1298 = vmatmul.mubr.f32.vlgmr.msra.gmra.mrb[8].mxu1 %v1225_v2  ;;  %2762 = vmatprep.subr.bf16.mxu0 %v3185_v27 }
 0x2a8   :  { %1302 = vmatprep.mubr.f32.mxu1 %v1227_v14  ;;  %2668 = vmatpush3.bf16.msra.mxu1 %v3183_v26  ;;  %v1533_v27 = vsel %vm1021_vm3, %v1531_v18, %v1532_v8  ;;  %v1454_v26 = vld [vmem:[#allocation2 + $0x30] sm:$0x7]  ;;  %v1860_v14 = vsel %vm1350_vm4, %v1858_v31, %v1859_v34 }
 0x2a9   :  { %1678 = vmatmul.mubr.f32.vlgmr.msra.gmra.mrb[14].mxu0 %v1452_v16  ;;  %2670 = vmatprep.subr.bf16.mxu1 %v3190_v32  ;;  %v3510_v32 = vld [vmem:[#allocation22_spill] sm:$0xff] }
 0x2aa   :  { %1682 = vmatprep.mubr.f32.mxu0 %v1455_v22  ;;  %2764 = vmatpush3.bf16.msra.mxu0 %v3269_v58  ;;  %v3515_v58 = vld [vmem:[#allocation25_spill] sm:$0xff] }
 0x2ab   :  { %1303 = vmatmul.mubr.f32.gmra.mrb[10].mxu1 %v1224_v40  ;;  %2766 = vmatprep.subr.bf16.mxu0 %v3271_v3  ;;  %v1815_v3 = vld [vmem:[#allocation2 + $0x20] sm:$0xe0]  ;;  %v1972_v22 = vld [vmem:[#allocation13] ss:$0 sm:$0xff] }
 0x2ac   :  { %2672 = vmatpush3.bf16.msra.mxu1 %v3192_v35  ;;  %1602 = vmatprep.mubr.f32.mxu1 %v1533_v27  ;;  %v3511_v35 = vld [vmem:[#allocation23_spill] sm:$0xff] }
 0x2ad   :  { %1683 = vmatmul.mubr.f32.gmra.mrb[16].mxu0 %v1454_v26  ;;  %2674 = vmatprep.subr.bf16.mxu1 %v3195_v38  ;;  %v1490_v38 = vld [vmem:[#allocation2 + $0x30] sm:$0xf] }
 0x2ae   :  { %2768 = vmatpush3.bf16.msra.mxu0 %v3274_v15  ;;  %1929 = vmatprep.mubr.f32.mxu0 %v1860_v14 }
 0x2af   :  { %2770 = vmatprep.subr.bf16.mxu0 %v3277_v17  ;;  %v1691_v17 = vld [vmem:[#allocation2 + $0x38] sm:$0x7f] }
 0x2b0   :  { %2676 = vmatpush3.bf16.msra.mxu1 %v3199_v43  ;;  %v3512_v43 = vld [vmem:[#allocation18_spill] sm:$0xff] }
 0x2b1   :  { %2678 = vmatprep.subr.bf16.mxu1 %v3202_v48  ;;  %v3513_v48 = vld [vmem:[#allocation19_spill] sm:$0xff] }
 0x2b2   :  { %2772 = vmatpush3.bf16.msra.mxu0 %v3280_v25  ;;  %v3517_v25 = vld [vmem:[#allocation21_spill] sm:$0xff] }
 0x2b3   :  { %2774 = vmatprep.subr.bf16.mxu0 %v3283_v29  ;;  %v3518_v29 = vld [vmem:[#allocation26_spill] sm:$0xff] }
 0x2b4   :  { %2680 = vmatpush3.bf16.msra.mxu1 %v3204_v52  ;;  %v1488_v52 = vld [vmem:[#allocation2 + $0x20] sm:$0xfe] }
 0x2b5   :  { %2682 = vmatprep.subr.bf16.mxu1 %v3208_v56  ;;  %v1817_v56 = vld [vmem:[#allocation2 + $0x30] sm:$0xff] }
 0x2b6   :  { %2776 = vmatpush3.bf16.msra.mxu0 %v3286_v47  ;;  %v1856_v15 = vrot.slane %v1817_v56, 5 }
 0x2b7   :  { %2778 = vmatprep.subr.bf16.mxu0 %v3289_v50  ;;  %v1855_v50 = vrot.slane %v1815_v3, 5 }
 0x2b8   :  { %2684 = vmatpush3.bf16.msra.mxu1 %v3210_v61  ;;  %v3514_v61 = vld [vmem:[#allocation24_spill] sm:$0xff] }
 0x2b9   :  { %2686 = vmatprep.subr.bf16.mxu1 %v3214_v1  ;;  %v1529_v1 = vrot.slane %v1490_v38, 1  ;;  %v1857_v11 = vsel %vm1350_vm4, %v1855_v50, %v1856_v15 }
 0x2ba   :  { %2780 = vmatpush3.bf16.msra.mxu0 %v3292_v59  ;;  %v1689_v59 = vld [vmem:[#allocation2 + $0x28] sm:$0xf0] }
 0x2bb   :  { %2782 = vmatprep.subr.bf16.mxu0 %v3295_v62  ;;  %v1732_v62 = vrot.slane %v1691_v17, 4  ;;  %v1731_v44 = vrot.slane %v1689_v59, 4 }
 0x2bc   :  { %2688 = vmatpush3.bf16.msra.mxu1 %v3216_v6  ;;  %v3516_v6 = vld [vmem:[#allocation20_spill] sm:$0xff] }
 0x2bd   :  { %2690 = vmatprep.subr.bf16.mxu1 %v3220_v13  ;;  %v1528_v13 = vrot.slane %v1488_v52, 1  ;;  %v1733_v41 = vsel %vm1222_vm5, %v1731_v44, %v1732_v62 }
 0x2be   :  { %2784 = vmatpush3.bf16.msra.mxu0 %v3510_v32 }
 0x2bf   :  { %2786 = vmatprep.subr.bf16.mxu0 %v3511_v35  ;;  %v1530_v47 = vsel %vm1021_vm3, %v1528_v13, %v1529_v1 }
 0x2c0   :  { %2692 = vmatpush3.bf16.msra.mxu1 %v3512_v43 }
 0x2c1   :  { %2694 = vmatprep.subr.bf16.mxu1 %v3513_v48 }
 0x2c2   :  { %2788 = vmatpush3.bf16.msra.mxu0 %v3514_v61 }
 0x2c3   :  { %2790 = vmatprep.subr.bf16.mxu0 %v3515_v58 }
 0x2c4   :  { %2696 = vmatpush3.bf16.msra.mxu1 %v3516_v6 }
 0x2c5   :  { %2730 = vmatprep.subr.bf16.mxu1 %v3517_v25 }
 0x2c6   :  { %2792 = vmatpush3.bf16.msra.mxu0 %v3518_v29 }
 0x2c7   :  { %1603 = vmatmul.mubr.f32.vlgmr.msra.gmra.mrb[12].mxu1 %v1530_v47 }
 0x2c8   :  { %1607 = vmatprep.mubr.f32.mxu1 %v1532_v8  ;;  %2732 = vmatpush3.bf16.msra.mxu1 %v3337_v0  ;;  %v1690_v0 = vld [vmem:[#allocation2 + $0x30] sm:$0x7f] }
 0x2c9   :  { %1930 = vmatmul.mubr.f32.vlgmr.msra.gmra.mrb[18].mxu0 %v1857_v11  ;;  %2734 = vmatprep.subr.bf16.mxu1 %v3342_v24  ;;  %v1688_v24 = vld [vmem:[#allocation2 + $0x20] sm:$0xf0] }
 0x2ca   :  { %1934 = vmatprep.mubr.f32.mxu0 %v1859_v34 }
 0x2cb   :  { %1608 = vmatmul.mubr.f32.gmra.mrb[14].mxu1 %v1529_v1 }
 0x2cc   :  { %2736 = vmatpush3.bf16.msra.mxu1 %v3349_v53  ;;  %1802 = vmatprep.mubr.f32.mxu1 %v1733_v41  ;;  %v1729_v53 = vrot.slane %v1690_v0, 4 }
 0x2cd   :  { %1935 = vmatmul.mubr.f32.gmra.mrb[20].mxu0 %v1856_v15  ;;  %2738 = vmatprep.subr.bf16.mxu1 %v3352_v36  ;;  %v1728_v36 = vrot.slane %v1688_v24, 4 }
 0x2d0   :  { %2740 = vmatpush3.bf16.msra.mxu1 %v3360_v33  ;;  %v1730_v33 = vsel %vm1222_vm5, %v1728_v36, %v1729_v53 }
 0x2d1   :  { %2742 = vmatprep.subr.bf16.mxu1 %v3363_v39 }
 0x2d4   :  { %2744 = vmatpush3.bf16.msra.mxu1 %v3368_v21 }
 0x2d5   :  { %2746 = vmatprep.subr.bf16.mxu1 %v3371_v23 }
 0x2d8   :  { %2748 = vmatpush3.bf16.msra.mxu1 %v3376_v45 }
 0x2d9   :  { %2750 = vmatprep.subr.bf16.mxu1 %v3379_v46 }
 0x2dc   :  { %2752 = vmatpush3.bf16.msra.mxu1 %v3384_v49 }
 0x2dd   :  { %2754 = vmatprep.subr.bf16.mxu1 %v3387_v51 }
 0x2e0   :  { %2756 = vmatpush3.bf16.msra.mxu1 %v3392_v54 }
 0x2e1   :  { %2758 = vmatprep.subr.bf16.mxu1 %v3395_v57 }
 0x2e4   :  { %2760 = vmatpush3.bf16.msra.mxu1 %v3400_v60 }
 0x2e7   :  { %1803 = vmatmul.mubr.f32.vlgmr.msra.gmra.mrb[16].mxu1 %v1730_v33 }
 0x2e8   :  { %1807 = vmatprep.mubr.f32.mxu1 %v1732_v62 }
 0x2eb   :  { %1808 = vmatmul.mubr.f32.gmra.mrb[18].mxu1 %v1729_v53 }
 0x316   :  { %v2047_v39 = vpop.f32.mrb[6].mxu0 }
 0x317   :  { %v2048_v21 = vpop.f32.mrb[7].mxu0 }
 0x318   :  { %v2049_v23 = vadd.f32 %v2048_v21, %v2047_v39 }
 0x356   :  { %v2050_v45 = vpop.f32.mrb[8].mxu0 }
 0x357   :  { %v2051_v46 = vpop.f32.mrb[9].mxu0 }
 0x358   :  { %v2052_v55 = vadd.f32 %v2051_v46, %v2050_v45 }
 0x35a   :  { %v2009_v49 = vpop.f32.mrb[4].mxu1 }
 0x35b   :  { %v2010_v51 = vpop.f32.mrb[5].mxu1 }
 0x35c   :  { %v2011_v30 = vadd.f32 %v2010_v51, %v2009_v49  ;;  %v2123_v4 = vpop.f32.mrb[10].mxu0 }
 0x35d   :  { %v2124_v7 = vpop.f32.mrb[11].mxu0 }
 0x35e   :  { %v1174_v12 = vadd.f32 %v2049_v23, %v2011_v30  ;;  %v2125_v54 = vadd.f32 %v2124_v7, %v2123_v4  ;;  %v2012_v57 = vpop.f32.mrb[6].mxu1 }
 0x35f   :  { %v2013_v19 = vpop.f32.mrb[7].mxu1 }
 0x360   :  { %v2014_v37 = vadd.f32 %v2013_v19, %v2012_v57  ;;  %v2126_v10 = vpop.f32.mrb[12].mxu0 }
 0x361   :  { %v2127_v60 = vpop.f32.mrb[13].mxu0 }
 0x362   :  { %v1179_v63 = vadd.f32 %v2052_v55, %v2014_v37  ;;  %v2128_v40 = vadd.f32 %v2127_v60, %v2126_v10 }
 0x37a   :  { %v2085_v9 = vpop.f32.mrb[8].mxu1 }
 0x37b   :  { %v2086_v28 = vpop.f32.mrb[9].mxu1 }
 0x37c   :  { %v2087_v2 = vadd.f32 %v2086_v28, %v2085_v9  ;;  %v2199_v5 = vpop.f32.mrb[14].mxu0 }
 0x37d   :  { %v2200_v42 = vpop.f32.mrb[15].mxu0 }
 0x37e   :  { %v1308_v8 = vadd.f32 %v2087_v2, %v1174_v12  ;;  %v2201_v16 = vadd.f32 %v2200_v42, %v2199_v5  ;;  %v2088_v20 = vpop.f32.mrb[10].mxu1 }
 0x37f   :  { %v2089_v18 = vpop.f32.mrb[11].mxu1 }
 0x380   :  { %v1436_v34 = vadd.f32 %v2125_v54, %v1308_v8  ;;  %v2090_v27 = vadd.f32 %v2089_v18, %v2088_v20  ;;  %v2202_v31 = vpop.f32.mrb[16].mxu0 }
 0x381   :  { %v2203_v26 = vpop.f32.mrb[17].mxu0 }
 0x382   :  { %v1445_v14 = vadd.f32 %v1972_v22, %v1436_v34  ;;  %v1309_v32 = vadd.f32 %v2090_v27, %v1179_v63  ;;  %v2204_v35 = vadd.f32 %v2203_v26, %v2202_v31 }
 0x384   :  { %v1447_v38 = vmax.f32 %v1445_v14, 0.0  ;;  %v1437_v43 = vadd.f32 %v2128_v40, %v1309_v32 }
 0x386   :  { %1449 = vst [vmem:[%s3489_s7] sm:$0xff] %v1447_v38  ;;  %v1446_v48 = vadd.f32 %v1972_v22, %v1437_v43 }
 0x388   :  { %v1448_v52 = vmax.f32 %v1446_v48, 0.0 }
 0x38a   :  { %1450 = vst [vmem:[%s3489_s7 + $0x8] sm:$0x7] %v1448_v52 }
 0x39a   :  { %v2161_v56 = vpop.f32.mrb[12].mxu1 }
 0x39b   :  { %v2162_v61 = vpop.f32.mrb[13].mxu1 }
 0x39c   :  { %v2163_v1 = vadd.f32 %v2162_v61, %v2161_v56  ;;  %v2275_v58 = vpop.f32.mrb[18].mxu0 }
 0x39d   :  { %v2276_v3 = vpop.f32.mrb[19].mxu0 }
 0x39e   :  { %v1680_v6 = vadd.f32 %v2201_v16, %v2163_v1  ;;  %v2277_v13 = vadd.f32 %v2276_v3, %v2275_v58  ;;  %v2164_v15 = vpop.f32.mrb[14].mxu1 }
 0x39f   :  { %v2165_v17 = vpop.f32.mrb[15].mxu1 }
 0x3a0   :  { %v2166_v25 = vadd.f32 %v2165_v17, %v2164_v15  ;;  %v2278_v29 = vpop.f32.mrb[20].mxu0 }
 0x3a1   :  { %v2279_v47 = vpop.f32.mrb[21].mxu0 }
 0x3a2   :  { %v1685_v50 = vadd.f32 %v2204_v35, %v2166_v25  ;;  %v2280_v59 = vadd.f32 %v2279_v47, %v2278_v29 }
 0x3ba   :  { %v2237_v62 = vpop.f32.mrb[16].mxu1 }
 0x3bb   :  { %v2238_v11 = vpop.f32.mrb[17].mxu1 }
 0x3bc   :  { %v2239_v44 = vadd.f32 %v2238_v11, %v2237_v62 }
 0x3be   :  { %v1813_v41 = vadd.f32 %v2239_v44, %v1680_v6  ;;  %v2240_v0 = vpop.f32.mrb[18].mxu1 }
 0x3bf   :  { %v2241_v24 = vpop.f32.mrb[19].mxu1 }
 0x3c0   :  { %v1940_v53 = vadd.f32 %v2277_v13, %v1813_v41  ;;  %v2242_v36 = vadd.f32 %v2241_v24, %v2240_v0 }
 0x3c2   :  { %v1949_v33 = vadd.f32 %v1972_v22, %v1940_v53  ;;  %v1814_v39 = vadd.f32 %v2242_v36, %v1685_v50 }
 0x3c4   :  { %v1951_v21 = vmax.f32 %v1949_v33, 0.0  ;;  %v1941_v23 = vadd.f32 %v2280_v59, %v1814_v39 }
 0x3c6   :  { %1974 = vst [vmem:[%s3489_s7 + $0x10] sm:$0xff] %v1951_v21  ;;  %v1950_v45 = vadd.f32 %v1972_v22, %v1941_v23 }
 0x3c8   :  { %v1952_v46 = vmax.f32 %v1950_v45, 0.0 }
 0x3ca   :  { %1975 = vst [vmem:[%s3489_s7 + $0x18] sm:$0x7] %v1952_v46 }
 0x3cb   :  { %1961 = vsyncpa [#allocation4], 1 }
 0x3cc   :  { %1962 = vsyncpa [#allocation6], 1 }
 0x3cd   :  { %1963 = vsyncpa [#allocation9], 1 }
 0x3ce   :  { %1964 = vsyncpa [#allocation12], 1 }

// kernel: decoder_forward.6
= control target key start
LH: loop header
LB: loop body
LE: loop exit
PB: predicated region body
PF: predicated region fallthrough
CT: control target
= control target key end

     0   :  { %s2382_s12 = smov 0   ;;  %s2923_s0 = inlined_call_operand.vmem [shape: f32[2,256,32], index: 0, kind: input, shape index: {}]   ;;  %s2924_s1 = inlined_call_operand.vmem [shape: f32[128,128], index: 1, kind: input, shape index: {}]   ;;  %s2925_s2 = inlined_call_operand.vmem [shape: f32[1,128], index: 2, kind: input, shape index: {}]   ;;  %s2926_s3 = inlined_call_operand.vmem [shape: f32[2,240,128], index: 3, kind: output, shape index: {}]  }
   0x1 LB: > { %s1741_s13 = sadd.s32 4294967295, %s2359_s12   ;;  %p1745_p0 = scmp.ge.s32.totalorder %s2359_s12, 1  ;;  %s2359_s12 = sphi %s2382_s12, %s13_s12  }
   0x2   : > { %p137_p1 = scmp.lt.s32.totalorder %s2359_s12, 3 }
   0x4   : > { %p138_p2 = pnand %p1745_p0, %p137_p1 }
   0x5   : > { %v235_v0 = vld [vmem:[%s2924_s1 + $0x20] sm:$0xff] (!%p138_p2)  ;;  %v236_v1 = vld [vmem:[%s2924_s1 + $0x28] sm:$0xff] (!%p138_p2)  ;;  %p161_p3 = scmp.lt.s32.totalorder (!%p138_p2), %s1741_s13, 1  ;;  %v237_v5 = vld [vmem:[%s2924_s1 + $0x30] sm:$0xff] (!%p138_p2)  ;;  %vm239_vm0 = vcmask (!%p138_p2), 261120  }
   0x6   : > { %141 = sbr.rel (%p138_p2) target bundleno = 354 (0x162), region = 32  ;;  %v880_v2 = vld [vmem:[%s2924_s1 + $0x40] sm:$0xff] (!%p138_p2)  ;;  %v2221_v3 = vpack.c.bf16 (!%p138_p2), %v236_v1, %v235_v0  ;;  %v881_v4 = vld [vmem:[%s2924_s1 + $0x48] sm:$0xff] (!%p138_p2)  ;;  %v238_v6 = vld [vmem:[%s2924_s1 + $0x38] sm:$0xff] (!%p138_p2) }
   0x7   : > { %v2237_v7 = vpack.c.bf16 (!%p138_p2), %v881_v4, %v880_v2  ;;  %v2225_v8 = vpack.c.bf16 (!%p138_p2), %v238_v6, %v237_v5  ;;  %v882_v9 = vld [vmem:[%s2924_s1 + $0x50] sm:$0xff] (!%p138_p2)  ;;  %v883_v10 = vld [vmem:[%s2924_s1 + $0x58] sm:$0xff] (!%p138_p2)  ;;  %v201_v11 = vld [vmem:[%s2924_s1] sm:$0xff] (!%p138_p2) }
   0x8   : > { %2222 = vmatprep.subr.bf16.mxu1 (!%p138_p2), %v2221_v3  ;;  %v2241_v12 = vpack.c.bf16 (!%p138_p2), %v883_v10, %v882_v9  ;;  %v202_v13 = vld [vmem:[%s2924_s1 + $0x8] sm:$0xff] (!%p138_p2)  ;;  %v1249_v14 = vld [vmem:[%s2924_s1 + $0x60] sm:$0xff] (!%p138_p2)  ;;  %v203_v20 = vld [vmem:[%s2924_s1 + $0x10] sm:$0xff] (!%p138_p2) }
   0x9   : > { %v1250_v15 = vld [vmem:[%s2924_s1 + $0x68] sm:$0xff] (!%p138_p2)  ;;  %2238 = vmatprep.subr.bf16.mxu0 (!%p138_p2), %v2237_v7  ;;  %2224 = vmatpush3.bf16.msra.mxu1 (!%p138_p2), %v2221_v3  ;;  %v2229_v16 = vpack.c.bf16 (!%p138_p2), %v202_v13, %v201_v11  ;;  %v204_v21 = vld [vmem:[%s2924_s1 + $0x18] sm:$0xff] (!%p138_p2)  ;;  %v1251_v23 = vld [vmem:[%s2924_s1 + $0x70] sm:$0xff] (!%p138_p2) }
   0xa   : > { %2240 = vmatpush3.bf16.msra.mxu0 (!%p138_p2), %v2237_v7  ;;  %2226 = vmatprep.subr.bf16.mxu1 (!%p138_p2), %v2225_v8  ;;  %v2245_v19 = vpack.c.bf16 (!%p138_p2), %v1250_v15, %v1249_v14  ;;  %v1252_v24 = vld [vmem:[%s2924_s1 + $0x78] sm:$0xff] (!%p138_p2)  ;;  %v2233_v27 = vpack.c.bf16 (!%p138_p2), %v204_v21, %v203_v20 }
   0xb   : > { %2242 = vmatprep.subr.bf16.mxu0 (!%p138_p2), %v2241_v12  ;;  %v2249_v29 = vpack.c.bf16 (!%p138_p2), %v1252_v24, %v1251_v23 }
   0xd   : > { %s2928_s13 = smov (!%p161_p3, %s1741_s13), 1  ;;  %2228 = vmatpush3.bf16.msra.mxu1 %v2225_v8 }
   0xe   : > { %s1872_s11 = sshll.u32 %s2928_s13, 8  ;;  %2244 = vmatpush3.bf16.msra.mxu0 %v2241_v12  ;;  %2230 = vmatprep.subr.bf16.mxu1 %v2229_v16  ;;  %s2343_s25 = smul.u32 240, %s2928_s13 }
   0xf   : > { %s2432_s16 = scalar_lea.vmem %s2923_s0, %s1872_s11  ;;  %2246 = vmatprep.subr.bf16.mxu0 %v2245_v19 }
  0x10   : > { %v205_v17 = vld [vmem:[%s2432_s16 + $0x1] sm:$0xff]  ;;  %v2436_v18 = vld [vmem:[%s2432_s16 + $0x10] sm:$0xff]  ;;  %v2455_v25 = vld [vmem:[%s2432_s16 + $0x18] sm:$0xff]  ;;  %s2852_s28 = scalar_lea.vmem %s2926_s3, %s2343_s25 }
  0x11   : > { %2017 = vmatprep.mubr.msk.f32.mxu1 %vm239_vm0, %v205_v17  ;;  %2123 = vmatprep.mubr.msk.f32.mxu0 %vm239_vm0, %v2436_v18  ;;  %v206_v22 = vld [vmem:[%s2432_s16 + $0x9] sm:$0xff]  ;;  %v2458_v26 = vld [vmem:[%s2432_s16 + $0x11] sm:$0xff]  ;;  %v2462_v28 = vld [vmem:[%s2432_s16 + $0x20] sm:$0xff] }
  0x12   : > { %2018 = vmatmul.mubr.msk.f32.vlgmr.msra.gmra.mrb[0].mxu1 %vm239_vm0, %v206_v22  ;;  %2124 = vmatmul.mubr.msk.f32.vlgmr.msra.gmra.mrb[0].mxu0 %vm239_vm0, %v2455_v25  ;;  %v2467_v30 = vld [vmem:[%s2432_s16 + $0x19] sm:$0xff]  ;;  %v2472_v31 = vld [vmem:[%s2432_s16 + $0x28] sm:$0xff]  ;;  %v2480_v33 = vld [vmem:[%s2432_s16 + $0x30] sm:$0xff] }
  0x13   : > { %2232 = vmatpush3.bf16.msra.mxu1 %v2229_v16  ;;  %2248 = vmatpush3.bf16.msra.mxu0 %v2245_v19  ;;  %v2475_v32 = vld [vmem:[%s2432_s16 + $0x21] sm:$0xff]  ;;  %v2489_v34 = vld [vmem:[%s2432_s16 + $0x29] sm:$0xff]  ;;  %v2494_v35 = vld [vmem:[%s2432_s16 + $0x38] sm:$0xff] }
  0x14   : > { %2020 = vmatprep.mubr.msk.f32.mxu1 %vm239_vm0, %v2458_v26  ;;  %2126 = vmatprep.mubr.msk.f32.mxu0 %vm239_vm0, %v2462_v28  ;;  %v2497_v36 = vld [vmem:[%s2432_s16 + $0x31] sm:$0xff]  ;;  %v2500_v37 = vld [vmem:[%s2432_s16 + $0x40] sm:$0xff]  ;;  %v2514_v39 = vld [vmem:[%s2432_s16 + $0x48] sm:$0xff] }
  0x15   : > { %2234 = vmatprep.subr.bf16.mxu1 %v2233_v27  ;;  %2250 = vmatprep.subr.bf16.mxu0 %v2249_v29  ;;  %v2509_v38 = vld [vmem:[%s2432_s16 + $0x39] sm:$0xff]  ;;  %v2517_v40 = vld [vmem:[%s2432_s16 + $0x41] sm:$0xff]  ;;  %v2520_v41 = vld [vmem:[%s2432_s16 + $0x50] sm:$0xff] }
  0x16   : > { %2021 = vmatmul.mubr.msk.f32.gmra.mrb[2].mxu1 %vm239_vm0, %v2467_v30  ;;  %2127 = vmatmul.mubr.msk.f32.gmra.mrb[2].mxu0 %vm239_vm0, %v2472_v31  ;;  %v2529_v42 = vld [vmem:[%s2432_s16 + $0x49] sm:$0xff]  ;;  %v2534_v43 = vld [vmem:[%s2432_s16 + $0x58] sm:$0xff]  ;;  %v2540_v45 = vld [vmem:[%s2432_s16 + $0x60] sm:$0xff] }
  0x17   : > { %2023 = vmatprep.mubr.msk.f32.mxu1 %vm239_vm0, %v2475_v32  ;;  %2129 = vmatprep.mubr.msk.f32.mxu0 %vm239_vm0, %v2480_v33  ;;  %v2537_v44 = vld [vmem:[%s2432_s16 + $0x51] sm:$0xff]  ;;  %v2549_v46 = vld [vmem:[%s2432_s16 + $0x59] sm:$0xff]  ;;  %v2554_v47 = vld [vmem:[%s2432_s16 + $0x68] sm:$0xff] }
  0x18   : > { %2236 = vmatpush3.bf16.msra.mxu1 %v2233_v27  ;;  %2252 = vmatpush3.bf16.msra.mxu0 %v2249_v29  ;;  %v2557_v48 = vld [vmem:[%s2432_s16 + $0x61] sm:$0xff]  ;;  %v2560_v49 = vld [vmem:[%s2432_s16 + $0x70] sm:$0xff]  ;;  %v2574_v51 = vld [vmem:[%s2432_s16 + $0x78] sm:$0xff] }
  0x19   : > { %v2569_v50 = vld [vmem:[%s2432_s16 + $0x69] sm:$0xff]  ;;  %v2577_v52 = vld [vmem:[%s2432_s16 + $0x71] sm:$0xff]  ;;  %v2580_v53 = vld [vmem:[%s2432_s16 + $0x80] sm:$0xff] }
  0x1a   : > { %2024 = vmatmul.mubr.msk.f32.gmra.mrb[4].mxu1 %vm239_vm0, %v2489_v34  ;;  %2130 = vmatmul.mubr.msk.f32.gmra.mrb[4].mxu0 %vm239_vm0, %v2494_v35  ;;  %v2589_v54 = vld [vmem:[%s2432_s16 + $0x79] sm:$0xff]  ;;  %v2594_v55 = vld [vmem:[%s2432_s16 + $0x88] sm:$0xff]  ;;  %v2600_v57 = vld [vmem:[%s2432_s16 + $0x90] sm:$0xff] }
  0x1b   : > { %2026 = vmatprep.mubr.msk.f32.mxu1 %vm239_vm0, %v2497_v36  ;;  %2132 = vmatprep.mubr.msk.f32.mxu0 %vm239_vm0, %v2500_v37  ;;  %v2597_v56 = vld [vmem:[%s2432_s16 + $0x81] sm:$0xff]  ;;  %v2609_v58 = vld [vmem:[%s2432_s16 + $0x89] sm:$0xff]  ;;  %v2614_v59 = vld [vmem:[%s2432_s16 + $0x98] sm:$0xff] }
  0x1c   : > { %v2617_v60 = vld [vmem:[%s2432_s16 + $0x91] sm:$0xff]  ;;  %v2620_v61 = vld [vmem:[%s2432_s16 + $0xa0] sm:$0xff]  ;;  %v2634_v63 = vld [vmem:[%s2432_s16 + $0xa8] sm:$0xff] }
  0x1d   : > { %v2629_v62 = vld [vmem:[%s2432_s16 + $0x99] sm:$0xff]  ;;  %v2637_v0 = vld [vmem:[%s2432_s16 + $0xa1] sm:$0xff]  ;;  %v2640_v1 = vld [vmem:[%s2432_s16 + $0xb0] sm:$0xff] }
  0x1e   : > { %2027 = vmatmul.mubr.msk.f32.gmra.mrb[6].mxu1 %vm239_vm0, %v2509_v38  ;;  %2133 = vmatmul.mubr.msk.f32.gmra.mrb[6].mxu0 %vm239_vm0, %v2514_v39  ;;  %v2649_v2 = vld [vmem:[%s2432_s16 + $0xa9] sm:$0xff]  ;;  %v2654_v3 = vld [vmem:[%s2432_s16 + $0xb8] sm:$0xff]  ;;  %v2660_v5 = vld [vmem:[%s2432_s16 + $0xc0] sm:$0xff] }
  0x1f   : > { %2029 = vmatprep.mubr.msk.f32.mxu1 %vm239_vm0, %v2517_v40  ;;  %2135 = vmatprep.mubr.msk.f32.mxu0 %vm239_vm0, %v2520_v41  ;;  %v2657_v4 = vld [vmem:[%s2432_s16 + $0xb1] sm:$0xff]  ;;  %v2669_v6 = vld [vmem:[%s2432_s16 + $0xb9] sm:$0xff]  ;;  %v2674_v7 = vld [vmem:[%s2432_s16 + $0xc8] sm:$0xff] }
  0x20   : > { %v2677_v8 = vld [vmem:[%s2432_s16 + $0xc1] sm:$0xff]  ;;  %v2680_v9 = vld [vmem:[%s2432_s16 + $0xd0] sm:$0xff]  ;;  %v2694_v11 = vld [vmem:[%s2432_s16 + $0xd8] sm:$0xff] }
  0x21   : > { %v2689_v10 = vld [vmem:[%s2432_s16 + $0xc9] sm:$0xff]  ;;  %v2697_v12 = vld [vmem:[%s2432_s16 + $0xd1] sm:$0xff]  ;;  %v2700_v13 = vld [vmem:[%s2432_s16 + $0xe0] sm:$0xff] }
  0x22   : > { %2030 = vmatmul.mubr.msk.f32.gmra.mrb[8].mxu1 %vm239_vm0, %v2529_v42  ;;  %2136 = vmatmul.mubr.msk.f32.gmra.mrb[8].mxu0 %vm239_vm0, %v2534_v43  ;;  %v2709_v14 = vld [vmem:[%s2432_s16 + $0xd9] sm:$0xff]  ;;  %v877_v15 = vld [vmem:[%s2432_s16 + $0xe8] sm:$0xff]  ;;  %v878_v17 = vld [vmem:[%s2432_s16 + $0xf0] sm:$0xff] }
  0x23   : > { %2032 = vmatprep.mubr.msk.f32.mxu1 %vm239_vm0, %v2537_v44  ;;  %2138 = vmatprep.mubr.msk.f32.mxu0 %vm239_vm0, %v2540_v45  ;;  %v2715_v16 = vld [vmem:[%s2432_s16 + $0xe1] sm:$0xff]  ;;  %v234_v19 = vld [vmem:[%s2432_s16 + $0xe9] sm:$0x7f]  ;;  %v879_v20 = vld [vmem:[%s2432_s16 + $0xf8] sm:$0x7f] }
  0x24   : > { %v171_v21 = vld [vmem:[%s2432_s16] sm:$0xff]  ;;  %v172_v22 = vld [vmem:[%s2432_s16 + $0x8] sm:$0xff]  ;;  %v1247_v23 = vld [vmem:[%s2432_s16 + $0xf1] sm:$0xff] }
  0x25   : > { %v200_v24 = vld [vmem:[%s2432_s16 + $0xe8] sm:$0x7f]  ;;  %v2858_v29 = vld [vmem:[%s2925_s2] ss:$0 sm:$0xff] }
  0x26   : > { %2033 = vmatmul.mubr.msk.f32.gmra.mrb[10].mxu1 %vm239_vm0, %v2549_v46  ;;  %2139 = vmatmul.mubr.msk.f32.gmra.mrb[10].mxu0 %vm239_vm0, %v2554_v47 }
  0x27   : > { %2035 = vmatprep.mubr.msk.f32.mxu1 %vm239_vm0, %v2557_v48  ;;  %2141 = vmatprep.mubr.msk.f32.mxu0 %vm239_vm0, %v2560_v49 }
  0x2a   : > { %2036 = vmatmul.mubr.msk.f32.gmra.mrb[12].mxu1 %vm239_vm0, %v2569_v50  ;;  %2142 = vmatmul.mubr.msk.f32.gmra.mrb[12].mxu0 %vm239_vm0, %v2574_v51 }
  0x2b   : > { %2038 = vmatprep.mubr.msk.f32.mxu1 %vm239_vm0, %v2577_v52  ;;  %2144 = vmatprep.mubr.msk.f32.mxu0 %vm239_vm0, %v2580_v53 }
  0x2e   : > { %2039 = vmatmul.mubr.msk.f32.gmra.mrb[14].mxu1 %vm239_vm0, %v2589_v54  ;;  %2145 = vmatmul.mubr.msk.f32.gmra.mrb[14].mxu0 %vm239_vm0, %v2594_v55 }
  0x2f   : > { %2041 = vmatprep.mubr.msk.f32.mxu1 %vm239_vm0, %v2597_v56  ;;  %2147 = vmatprep.mubr.msk.f32.mxu0 %vm239_vm0, %v2600_v57 }
  0x32   : > { %2042 = vmatmul.mubr.msk.f32.gmra.mrb[16].mxu1 %vm239_vm0, %v2609_v58  ;;  %2148 = vmatmul.mubr.msk.f32.gmra.mrb[16].mxu0 %vm239_vm0, %v2614_v59 }
  0x33   : > { %2044 = vmatprep.mubr.msk.f32.mxu1 %vm239_vm0, %v2617_v60  ;;  %2150 = vmatprep.mubr.msk.f32.mxu0 %vm239_vm0, %v2620_v61 }
  0x36   : > { %2045 = vmatmul.mubr.msk.f32.gmra.mrb[18].mxu1 %vm239_vm0, %v2629_v62  ;;  %2151 = vmatmul.mubr.msk.f32.gmra.mrb[18].mxu0 %vm239_vm0, %v2634_v63 }
  0x37   : > { %2047 = vmatprep.mubr.msk.f32.mxu1 %vm239_vm0, %v2637_v0  ;;  %2153 = vmatprep.mubr.msk.f32.mxu0 %vm239_vm0, %v2640_v1 }
  0x3a   : > { %2048 = vmatmul.mubr.msk.f32.gmra.mrb[20].mxu1 %vm239_vm0, %v2649_v2  ;;  %2154 = vmatmul.mubr.msk.f32.gmra.mrb[20].mxu0 %vm239_vm0, %v2654_v3 }
  0x3b   : > { %2050 = vmatprep.mubr.msk.f32.mxu1 %vm239_vm0, %v2657_v4  ;;  %2156 = vmatprep.mubr.msk.f32.mxu0 %vm239_vm0, %v2660_v5 }
  0x3e   : > { %2051 = vmatmul.mubr.msk.f32.gmra.mrb[22].mxu1 %vm239_vm0, %v2669_v6  ;;  %2157 = vmatmul.mubr.msk.f32.gmra.mrb[22].mxu0 %vm239_vm0, %v2674_v7 }
  0x3f   : > { %2053 = vmatprep.mubr.msk.f32.mxu1 %vm239_vm0, %v2677_v8  ;;  %2159 = vmatprep.mubr.msk.f32.mxu0 %vm239_vm0, %v2680_v9 }
  0x42   : > { %2054 = vmatmul.mubr.msk.f32.gmra.mrb[24].mxu1 %vm239_vm0, %v2689_v10  ;;  %2160 = vmatmul.mubr.msk.f32.gmra.mrb[24].mxu0 %vm239_vm0, %v2694_v11 }
  0x43   : > { %2056 = vmatprep.mubr.msk.f32.mxu1 %vm239_vm0, %v2697_v12  ;;  %2162 = vmatprep.mubr.msk.f32.mxu0 %vm239_vm0, %v2700_v13 }
  0x46   : > { %2057 = vmatmul.mubr.msk.f32.gmra.mrb[26].mxu1 %vm239_vm0, %v2709_v14  ;;  %2163 = vmatmul.mubr.msk.f32.gmra.mrb[26].mxu0 %vm239_vm0, %v877_v15 }
  0x47   : > { %2059 = vmatprep.mubr.msk.f32.mxu1 %vm239_vm0, %v2715_v16  ;;  %2165 = vmatprep.mubr.msk.f32.mxu0 %vm239_vm0, %v878_v17 }
  0x4a   : > { %2060 = vmatmul.mubr.msk.f32.gmra.mrb[28].mxu1 %vm239_vm0, %v234_v19  ;;  %2166 = vmatmul.mubr.msk.f32.gmra.mrb[28].mxu0 %vm239_vm0, %v879_v20 }
  0x4b   : > { %2070 = vmatprep.mubr.msk.f32.mxu1 %vm239_vm0, %v171_v21  ;;  %2176 = vmatprep.mubr.msk.f32.mxu0 %vm239_vm0, %v2458_v26  ;;  %v2361_v26 = vmov 0.0  }
  0x4c   : > { %1685 = vst [vmem:[%s2852_s28 + $0xef] sm:$0x1] %v2361_v26 }
  0x4e   : > { %2071 = vmatmul.mubr.msk.f32.vlgmr.msra.gmra.mrb[0].mxu1 %vm239_vm0, %v172_v22  ;;  %2177 = vmatmul.mubr.msk.f32.vlgmr.msra.gmra.mrb[0].mxu0 %vm239_vm0, %v2467_v30 }
  0x4f   : > { %2073 = vmatprep.mubr.msk.f32.mxu1 %vm239_vm0, %v2436_v18  ;;  %2179 = vmatprep.mubr.msk.f32.mxu0 %vm239_vm0, %v2475_v32  ;;  %v1246_v18 = vld [vmem:[%s2432_s16 + $0xe9] sm:$0xff] }
  0x52   : > { %2074 = vmatmul.mubr.msk.f32.gmra.mrb[2].mxu1 %vm239_vm0, %v2455_v25  ;;  %2180 = vmatmul.mubr.msk.f32.gmra.mrb[2].mxu0 %vm239_vm0, %v2489_v34  ;;  %v1248_v25 = vld [vmem:[%s2432_s16 + $0xf9] sm:$0x7f] }
  0x53   : > { %2076 = vmatprep.mubr.msk.f32.mxu1 %vm239_vm0, %v2462_v28  ;;  %2182 = vmatprep.mubr.msk.f32.mxu0 %vm239_vm0, %v2497_v36 }
  0x56   : > { %2077 = vmatmul.mubr.msk.f32.gmra.mrb[4].mxu1 %vm239_vm0, %v2472_v31  ;;  %2183 = vmatmul.mubr.msk.f32.gmra.mrb[4].mxu0 %vm239_vm0, %v2509_v38 }
  0x57   : > { %2079 = vmatprep.mubr.msk.f32.mxu1 %vm239_vm0, %v2480_v33  ;;  %2185 = vmatprep.mubr.msk.f32.mxu0 %vm239_vm0, %v2517_v40 }
  0x5a   : > { %2080 = vmatmul.mubr.msk.f32.gmra.mrb[6].mxu1 %vm239_vm0, %v2494_v35  ;;  %2186 = vmatmul.mubr.msk.f32.gmra.mrb[6].mxu0 %vm239_vm0, %v2529_v42 }
  0x5b   : > { %2082 = vmatprep.mubr.msk.f32.mxu1 %vm239_vm0, %v2500_v37  ;;  %2188 = vmatprep.mubr.msk.f32.mxu0 %vm239_vm0, %v2537_v44 }
  0x5e   : > { %2083 = vmatmul.mubr.msk.f32.gmra.mrb[8].mxu1 %vm239_vm0, %v2514_v39  ;;  %2189 = vmatmul.mubr.msk.f32.gmra.mrb[8].mxu0 %vm239_vm0, %v2549_v46 }
  0x5f   : > { %2085 = vmatprep.mubr.msk.f32.mxu1 %vm239_vm0, %v2520_v41  ;;  %2191 = vmatprep.mubr.msk.f32.mxu0 %vm239_vm0, %v2557_v48 }
  0x62   : > { %2086 = vmatmul.mubr.msk.f32.gmra.mrb[10].mxu1 %vm239_vm0, %v2534_v43  ;;  %2192 = vmatmul.mubr.msk.f32.gmra.mrb[10].mxu0 %vm239_vm0, %v2569_v50 }
  0x63   : > { %2088 = vmatprep.mubr.msk.f32.mxu1 %vm239_vm0, %v2540_v45  ;;  %2194 = vmatprep.mubr.msk.f32.mxu0 %vm239_vm0, %v2577_v52 }
  0x66   : > { %2089 = vmatmul.mubr.msk.f32.gmra.mrb[12].mxu1 %vm239_vm0, %v2554_v47  ;;  %2195 = vmatmul.mubr.msk.f32.gmra.mrb[12].mxu0 %vm239_vm0, %v2589_v54 }
  0x67   : > { %2091 = vmatprep.mubr.msk.f32.mxu1 %vm239_vm0, %v2560_v49  ;;  %2197 = vmatprep.mubr.msk.f32.mxu0 %vm239_vm0, %v2597_v56 }
  0x6a   : > { %2092 = vmatmul.mubr.msk.f32.gmra.mrb[14].mxu1 %vm239_vm0, %v2574_v51  ;;  %2198 = vmatmul.mubr.msk.f32.gmra.mrb[14].mxu0 %vm239_vm0, %v2609_v58 }
  0x6b   : > { %2094 = vmatprep.mubr.msk.f32.mxu1 %vm239_vm0, %v2580_v53  ;;  %2200 = vmatprep.mubr.msk.f32.mxu0 %vm239_vm0, %v2617_v60 }
  0x6e   : > { %2095 = vmatmul.mubr.msk.f32.gmra.mrb[16].mxu1 %vm239_vm0, %v2594_v55  ;;  %2201 = vmatmul.mubr.msk.f32.gmra.mrb[16].mxu0 %vm239_vm0, %v2629_v62 }
  0x6f   : > { %2097 = vmatprep.mubr.msk.f32.mxu1 %vm239_vm0, %v2600_v57  ;;  %2203 = vmatprep.mubr.msk.f32.mxu0 %vm239_vm0, %v2637_v0 }
  0x72   : > { %2098 = vmatmul.mubr.msk.f32.gmra.mrb[18].mxu1 %vm239_vm0, %v2614_v59  ;;  %2204 = vmatmul.mubr.msk.f32.gmra.mrb[18].mxu0 %vm239_vm0, %v2649_v2 }
  0x73   : > { %2100 = vmatprep.mubr.msk.f32.mxu1 %vm239_vm0, %v2620_v61  ;;  %2206 = vmatprep.mubr.msk.f32.mxu0 %vm239_vm0, %v2657_v4 }
  0x76   : > { %2101 = vmatmul.mubr.msk.f32.gmra.mrb[20].mxu1 %vm239_vm0, %v2634_v63  ;;  %2207 = vmatmul.mubr.msk.f32.gmra.mrb[20].mxu0 %vm239_vm0, %v2669_v6 }
  0x77   : > { %2103 = vmatprep.mubr.msk.f32.mxu1 %vm239_vm0, %v2640_v1  ;;  %2209 = vmatprep.mubr.msk.f32.mxu0 %vm239_vm0, %v2677_v8 }
  0x7a   : > { %2104 = vmatmul.mubr.msk.f32.gmra.mrb[22].mxu1 %vm239_vm0, %v2654_v3  ;;  %2210 = vmatmul.mubr.msk.f32.gmra.mrb[22].mxu0 %vm239_vm0, %v2689_v10 }
  0x7b   : > { %2106 = vmatprep.mubr.msk.f32.mxu1 %vm239_vm0, %v2660_v5  ;;  %2212 = vmatprep.mubr.msk.f32.mxu0 %vm239_vm0, %v2697_v12 }
  0x7e   : > { %2107 = vmatmul.mubr.msk.f32.gmra.mrb[24].mxu1 %vm239_vm0, %v2674_v7  ;;  %2213 = vmatmul.mubr.msk.f32.gmra.mrb[24].mxu0 %vm239_vm0, %v2709_v14 }
  0x7f   : > { %2109 = vmatprep.mubr.msk.f32.mxu1 %vm239_vm0, %v2680_v9  ;;  %2215 = vmatprep.mubr.msk.f32.mxu0 %vm239_vm0, %v2715_v16 }
  0x82   : > { %2110 = vmatmul.mubr.msk.f32.gmra.mrb[26].mxu1 %vm239_vm0, %v2694_v11  ;;  %2216 = vmatmul.mubr.msk.f32.gmra.mrb[26].mxu0 %vm239_vm0, %v1246_v18 }
  0x83   : > { %2112 = vmatprep.mubr.msk.f32.mxu1 %vm239_vm0, %v2700_v13  ;;  %2218 = vmatprep.mubr.msk.f32.mxu0 %vm239_vm0, %v1247_v23 }
  0x86   : > { %2113 = vmatmul.mubr.msk.f32.gmra.mrb[28].mxu1 %vm239_vm0, %v200_v24  ;;  %2219 = vmatmul.mubr.msk.f32.gmra.mrb[28].mxu0 %vm239_vm0, %v1248_v25 }
 0x121   : > { %v2072_v27 = vpop.f32.mrb[0].mxu1  ;;  %v2178_v28 = vpop.f32.mrb[0].mxu0 }
 0x122   : > { %v701_v30 = vpop.f32.mrb[1].mxu1  ;;  %v2253_v31 = vadd.f32 %v2178_v28, %v2072_v27  ;;  %v1409_v32 = vpop.f32.mrb[1].mxu0 }
 0x123   : > { %v2254_v33 = vadd.f32 %v1409_v32, %v701_v30 }
 0x124   : > { %v1596_v34 = vadd.f32 %v2253_v31, %v2858_v29 }
 0x125   : > { %v2075_v35 = vpop.f32.mrb[2].mxu1  ;;  %v1595_v36 = vadd.f32 %v2254_v33, %v2858_v29  ;;  %v2181_v37 = vpop.f32.mrb[2].mxu0 }
 0x126   : > { %v711_v38 = vpop.f32.mrb[3].mxu1  ;;  %v1626_v39 = vmax.f32 %v1596_v34, 0.0  ;;  %v2255_v40 = vadd.f32 %v2181_v37, %v2075_v35  ;;  %v1419_v41 = vpop.f32.mrb[3].mxu0 }
 0x127   : > { %v1625_v42 = vmax.f32 %v1595_v36, 0.0  ;;  %v2256_v43 = vadd.f32 %v1419_v41, %v711_v38 }
 0x128   : > { %1656 = vst [vmem:[%s2852_s28 + $0x8] sm:$0xff] %v1626_v39  ;;  %v1598_v44 = vadd.f32 %v2255_v40, %v2858_v29 }
 0x129   : > { %v2078_v45 = vpop.f32.mrb[4].mxu1  ;;  %1655 = vst [vmem:[%s2852_s28] sm:$0xff] %v1625_v42  ;;  %v1597_v46 = vadd.f32 %v2256_v43, %v2858_v29  ;;  %v2184_v47 = vpop.f32.mrb[4].mxu0 }
 0x12a   : > { %v721_v48 = vpop.f32.mrb[5].mxu1  ;;  %v1628_v49 = vmax.f32 %v1598_v44, 0.0  ;;  %v2257_v50 = vadd.f32 %v2184_v47, %v2078_v45  ;;  %v1429_v51 = vpop.f32.mrb[5].mxu0 }
 0x12b   : > { %v1627_v52 = vmax.f32 %v1597_v46, 0.0  ;;  %v2258_v53 = vadd.f32 %v1429_v51, %v721_v48 }
 0x12c   : > { %1658 = vst [vmem:[%s2852_s28 + $0x18] sm:$0xff] %v1628_v49  ;;  %v1600_v54 = vadd.f32 %v2257_v50, %v2858_v29 }
 0x12d   : > { %v2081_v55 = vpop.f32.mrb[6].mxu1  ;;  %1657 = vst [vmem:[%s2852_s28 + $0x10] sm:$0xff] %v1627_v52  ;;  %v1599_v56 = vadd.f32 %v2258_v53, %v2858_v29  ;;  %v2187_v57 = vpop.f32.mrb[6].mxu0 }
 0x12e   : > { %v731_v58 = vpop.f32.mrb[7].mxu1  ;;  %v1630_v59 = vmax.f32 %v1600_v54, 0.0  ;;  %v2259_v60 = vadd.f32 %v2187_v57, %v2081_v55  ;;  %v1439_v61 = vpop.f32.mrb[7].mxu0 }
 0x12f   : > { %v1629_v62 = vmax.f32 %v1599_v56, 0.0  ;;  %v2260_v63 = vadd.f32 %v1439_v61, %v731_v58 }
 0x130   : > { %1660 = vst [vmem:[%s2852_s28 + $0x28] sm:$0xff] %v1630_v59  ;;  %v1602_v0 = vadd.f32 %v2259_v60, %v2858_v29 }
 0x131   : > { %v2084_v1 = vpop.f32.mrb[8].mxu1  ;;  %1659 = vst [vmem:[%s2852_s28 + $0x20] sm:$0xff] %v1629_v62  ;;  %v1601_v2 = vadd.f32 %v2260_v63, %v2858_v29  ;;  %v2190_v3 = vpop.f32.mrb[8].mxu0 }
 0x132   : > { %v741_v4 = vpop.f32.mrb[9].mxu1  ;;  %v1632_v5 = vmax.f32 %v1602_v0, 0.0  ;;  %v2261_v6 = vadd.f32 %v2190_v3, %v2084_v1  ;;  %v1449_v7 = vpop.f32.mrb[9].mxu0 }
 0x133   : > { %v1631_v8 = vmax.f32 %v1601_v2, 0.0  ;;  %v2262_v9 = vadd.f32 %v1449_v7, %v741_v4 }
 0x134   : > { %1662 = vst [vmem:[%s2852_s28 + $0x38] sm:$0xff] %v1632_v5  ;;  %v1604_v10 = vadd.f32 %v2261_v6, %v2858_v29 }
 0x135   : > { %v2087_v11 = vpop.f32.mrb[10].mxu1  ;;  %1661 = vst [vmem:[%s2852_s28 + $0x30] sm:$0xff] %v1631_v8  ;;  %v1603_v12 = vadd.f32 %v2262_v9, %v2858_v29  ;;  %v2193_v13 = vpop.f32.mrb[10].mxu0 }
 0x136   : > { %v751_v14 = vpop.f32.mrb[11].mxu1  ;;  %v1634_v15 = vmax.f32 %v1604_v10, 0.0  ;;  %v2263_v16 = vadd.f32 %v2193_v13, %v2087_v11  ;;  %v1459_v17 = vpop.f32.mrb[11].mxu0 }
 0x137   : > { %v1633_v19 = vmax.f32 %v1603_v12, 0.0  ;;  %v2264_v20 = vadd.f32 %v1459_v17, %v751_v14 }
 0x138   : > { %1664 = vst [vmem:[%s2852_s28 + $0x48] sm:$0xff] %v1634_v15  ;;  %v1606_v21 = vadd.f32 %v2263_v16, %v2858_v29 }
 0x139   : > { %v2090_v22 = vpop.f32.mrb[12].mxu1  ;;  %1663 = vst [vmem:[%s2852_s28 + $0x40] sm:$0xff] %v1633_v19  ;;  %v1605_v18 = vadd.f32 %v2264_v20, %v2858_v29  ;;  %v2196_v23 = vpop.f32.mrb[12].mxu0 }
 0x13a   : > { %v761_v24 = vpop.f32.mrb[13].mxu1  ;;  %v1636_v25 = vmax.f32 %v1606_v21, 0.0  ;;  %v2265_v26 = vadd.f32 %v2196_v23, %v2090_v22  ;;  %v1469_v27 = vpop.f32.mrb[13].mxu0 }
 0x13b   : > { %v1635_v28 = vmax.f32 %v1605_v18, 0.0  ;;  %v2266_v30 = vadd.f32 %v1469_v27, %v761_v24 }
 0x13c   : > { %1666 = vst [vmem:[%s2852_s28 + $0x58] sm:$0xff] %v1636_v25  ;;  %v1608_v31 = vadd.f32 %v2265_v26, %v2858_v29 }
 0x13d   : > { %v2093_v32 = vpop.f32.mrb[14].mxu1  ;;  %1665 = vst [vmem:[%s2852_s28 + $0x50] sm:$0xff] %v1635_v28  ;;  %v1607_v33 = vadd.f32 %v2266_v30, %v2858_v29  ;;  %v2199_v34 = vpop.f32.mrb[14].mxu0 }
 0x13e   : > { %v771_v35 = vpop.f32.mrb[15].mxu1  ;;  %v1638_v36 = vmax.f32 %v1608_v31, 0.0  ;;  %v2267_v37 = vadd.f32 %v2199_v34, %v2093_v32  ;;  %v1479_v38 = vpop.f32.mrb[15].mxu0 }
 0x13f   : > { %v1637_v39 = vmax.f32 %v1607_v33, 0.0  ;;  %v2268_v40 = vadd.f32 %v1479_v38, %v771_v35 }
 0x140   : > { %1668 = vst [vmem:[%s2852_s28 + $0x68] sm:$0xff] %v1638_v36  ;;  %v1610_v41 = vadd.f32 %v2267_v37, %v2858_v29 }
 0x141   : > { %v2096_v42 = vpop.f32.mrb[16].mxu1  ;;  %1667 = vst [vmem:[%s2852_s28 + $0x60] sm:$0xff] %v1637_v39  ;;  %v1609_v43 = vadd.f32 %v2268_v40, %v2858_v29  ;;  %v2202_v44 = vpop.f32.mrb[16].mxu0 }
 0x142   : > { %v781_v45 = vpop.f32.mrb[17].mxu1  ;;  %v1640_v46 = vmax.f32 %v1610_v41, 0.0  ;;  %v2269_v47 = vadd.f32 %v2202_v44, %v2096_v42  ;;  %v1489_v48 = vpop.f32.mrb[17].mxu0 }
 0x143   : > { %v1639_v49 = vmax.f32 %v1609_v43, 0.0  ;;  %v2270_v50 = vadd.f32 %v1489_v48, %v781_v45 }
 0x144   : > { %1670 = vst [vmem:[%s2852_s28 + $0x78] sm:$0xff] %v1640_v46  ;;  %v1612_v51 = vadd.f32 %v2269_v47, %v2858_v29 }
 0x145   : > { %v2099_v52 = vpop.f32.mrb[18].mxu1  ;;  %1669 = vst [vmem:[%s2852_s28 + $0x70] sm:$0xff] %v1639_v49  ;;  %v1611_v53 = vadd.f32 %v2270_v50, %v2858_v29  ;;  %v2205_v54 = vpop.f32.mrb[18].mxu0 }
 0x146   : > { %v791_v55 = vpop.f32.mrb[19].mxu1  ;;  %v1642_v56 = vmax.f32 %v1612_v51, 0.0  ;;  %v2271_v57 = vadd.f32 %v2205_v54, %v2099_v52  ;;  %v1499_v58 = vpop.f32.mrb[19].mxu0 }
 0x147   : > { %v1641_v59 = vmax.f32 %v1611_v53, 0.0  ;;  %v2272_v60 = vadd.f32 %v1499_v58, %v791_v55 }
 0x148   : > { %1672 = vst [vmem:[%s2852_s28 + $0x88] sm:$0xff] %v1642_v56  ;;  %v1614_v61 = vadd.f32 %v2271_v57, %v2858_v29 }
 0x149   : > { %v2102_v62 = vpop.f32.mrb[20].mxu1  ;;  %1671 = vst [vmem:[%s2852_s28 + $0x80] sm:$0xff] %v1641_v59  ;;  %v1613_v63 = vadd.f32 %v2272_v60, %v2858_v29  ;;  %v2208_v0 = vpop.f32.mrb[20].mxu0 }
 0x14a   : > { %v801_v1 = vpop.f32.mrb[21].mxu1  ;;  %v1644_v2 = vmax.f32 %v1614_v61, 0.0  ;;  %v2273_v3 = vadd.f32 %v2208_v0, %v2102_v62  ;;  %v1509_v4 = vpop.f32.mrb[21].mxu0 }
 0x14b   : > { %v1643_v5 = vmax.f32 %v1613_v63, 0.0  ;;  %v2274_v6 = vadd.f32 %v1509_v4, %v801_v1 }
 0x14c   : > { %1674 = vst [vmem:[%s2852_s28 + $0x98] sm:$0xff] %v1644_v2  ;;  %v1616_v7 = vadd.f32 %v2273_v3, %v2858_v29 }
 0x14d   : > { %v2105_v8 = vpop.f32.mrb[22].mxu1  ;;  %1673 = vst [vmem:[%s2852_s28 + $0x90] sm:$0xff] %v1643_v5  ;;  %v1615_v9 = vadd.f32 %v2274_v6, %v2858_v29  ;;  %v2211_v10 = vpop.f32.mrb[22].mxu0 }
 0x14e   : > { %v811_v11 = vpop.f32.mrb[23].mxu1  ;;  %v1646_v12 = vmax.f32 %v1616_v7, 0.0  ;;  %v2275_v13 = vadd.f32 %v2211_v10, %v2105_v8  ;;  %v1519_v14 = vpop.f32.mrb[23].mxu0 }
 0x14f   : > { %v1645_v15 = vmax.f32 %v1615_v9, 0.0  ;;  %v2276_v16 = vadd.f32 %v1519_v14, %v811_v11 }
 0x150   : > { %1676 = vst [vmem:[%s2852_s28 + $0xa8] sm:$0xff] %v1646_v12  ;;  %v1618_v17 = vadd.f32 %v2275_v13, %v2858_v29 }
 0x151   : > { %v2108_v19 = vpop.f32.mrb[24].mxu1  ;;  %1675 = vst [vmem:[%s2852_s28 + $0xa0] sm:$0xff] %v1645_v15  ;;  %v1617_v20 = vadd.f32 %v2276_v16, %v2858_v29  ;;  %v2214_v21 = vpop.f32.mrb[24].mxu0 }
 0x152   : > { %v821_v22 = vpop.f32.mrb[25].mxu1  ;;  %v1648_v18 = vmax.f32 %v1618_v17, 0.0  ;;  %v2277_v23 = vadd.f32 %v2214_v21, %v2108_v19  ;;  %v1529_v24 = vpop.f32.mrb[25].mxu0 }
 0x153   : > { %v1647_v25 = vmax.f32 %v1617_v20, 0.0  ;;  %v2278_v26 = vadd.f32 %v1529_v24, %v821_v22 }
 0x154   : > { %1678 = vst [vmem:[%s2852_s28 + $0xb8] sm:$0xff] %v1648_v18  ;;  %v1620_v27 = vadd.f32 %v2277_v23, %v2858_v29 }
 0x155   : > { %v2111_v28 = vpop.f32.mrb[26].mxu1  ;;  %1677 = vst [vmem:[%s2852_s28 + $0xb0] sm:$0xff] %v1647_v25  ;;  %v1619_v30 = vadd.f32 %v2278_v26, %v2858_v29  ;;  %v2217_v31 = vpop.f32.mrb[26].mxu0 }
 0x156   : > { %v831_v32 = vpop.f32.mrb[27].mxu1  ;;  %v1650_v33 = vmax.f32 %v1620_v27, 0.0  ;;  %v2279_v34 = vadd.f32 %v2217_v31, %v2111_v28  ;;  %v1539_v35 = vpop.f32.mrb[27].mxu0 }
 0x157   : > { %v1649_v36 = vmax.f32 %v1619_v30, 0.0  ;;  %v2280_v37 = vadd.f32 %v1539_v35, %v831_v32 }
 0x158   : > { %1680 = vst [vmem:[%s2852_s28 + $0xc8] sm:$0xff] %v1650_v33  ;;  %v1622_v38 = vadd.f32 %v2279_v34, %v2858_v29 }
 0x159   : > { %v2114_v39 = vpop.f32.mrb[28].mxu1  ;;  %1679 = vst [vmem:[%s2852_s28 + $0xc0] sm:$0xff] %v1649_v36  ;;  %v1621_v40 = vadd.f32 %v2280_v37, %v2858_v29  ;;  %v2220_v41 = vpop.f32.mrb[28].mxu0 }
 0x15a   : > { %v841_v42 = vpop.f32.mrb[29].mxu1  ;;  %v1652_v43 = vmax.f32 %v1622_v38, 0.0  ;;  %v2281_v44 = vadd.f32 %v2220_v41, %v2114_v39  ;;  %v1549_v45 = vpop.f32.mrb[29].mxu0 }
 0x15b   : > { %v1651_v46 = vmax.f32 %v1621_v40, 0.0  ;;  %v2282_v47 = vadd.f32 %v1549_v45, %v841_v42 }
 0x15c   : > { %1682 = vst [vmem:[%s2852_s28 + $0xd8] sm:$0xff] %v1652_v43  ;;  %v1624_v48 = vadd.f32 %v2281_v44, %v2858_v29 }
 0x15d   : > { %1681 = vst [vmem:[%s2852_s28 + $0xd0] sm:$0xff] %v1651_v46  ;;  %v1623_v49 = vadd.f32 %v2282_v47, %v2858_v29 }
 0x15e   : > { %v1654_v50 = vmax.f32 %v1624_v48, 0.0 }
 0x15f   : > { %v1653_v51 = vmax.f32 %v1623_v49, 0.0 }
 0x160   : > { %1684 = vst [vmem:[%s2852_s28 + $0xe8] sm:$0x7f] %v1654_v50 }
 0x161   : > { %1683 = vst [vmem:[%s2852_s28 + $0xe0] sm:$0xff] %v1653_v51 }
 0x162 PF: > { %s13_s12 = sadd.s32 1, %s2359_s12  }
 0x163   : > { %p10_p4 = scmp.ge.s32.totalorder %s13_s12, 4  }
 0x165   :  { %12 = sbr.rel (!%p10_p4) target bundleno = 1 (0x1), region = 62 }

// kernel: decoder_forward.7
= control target key start
LH: loop header
LB: loop body
LE: loop exit
PB: predicated region body
PF: predicated region fallthrough
CT: control target
= control target key end

     0   :  { %s20093_s12 = smov 0   ;;  %s23273_s0 = inlined_call_operand.vmem [shape: f32[2,1156,16], index: 0, kind: input, shape index: {}]   ;;  %s23274_s1 = inlined_call_operand.vmem [shape: f32[144,4], index: 1, kind: input, shape index: {}]   ;;  %s23275_s2 = inlined_call_operand.vmem [shape: f32[1,4], index: 2, kind: input, shape index: {}]   ;;  %s23276_s3 = inlined_call_operand.vmem [shape: f32[2,1088,4], index: 3, kind: output, shape index: {}]  }
   0x1 LB: > { %s13897_s13 = sadd.s32 4294967295, %s20070_s12   ;;  %p13901_p0 = scmp.ge.s32.totalorder %s20070_s12, 1  ;;  %s20070_s12 = sphi %s20093_s12, %s13_s12  }
   0x2   : > { %p137_p1 = scmp.lt.s32.totalorder %s20070_s12, 3 }
   0x4   : > { %p138_p2 = pnand %p13901_p0, %p137_p1 }
   0x6   : > { %141 = sbr.rel (%p138_p2) target bundleno = 1490 (0x5d2), region = 32 }
   0xd   : > { %v445_v0 = vld [vmem:[%s23274_s1 + $0x10] sm:$0xff]  ;;  %v446_v1 = vld [vmem:[%s23274_s1 + $0x18] sm:$0xff]  ;;  %v5744_v2 = vld [vmem:[%s23274_s1 + $0x40] sm:$0xff]  ;;  %p161_p3 = scmp.lt.s32.totalorder %s13897_s13, 1  ;;  %vm447_vm0 = vcmask 130048   ;;  %vm13702_vm1 = vcmask 31744  }
   0xe   : > { %v18381_v3 = vpack.c.bf16 %v446_v1, %v445_v0  ;;  %v5745_v4 = vld [vmem:[%s23274_s1 + $0x48] sm:$0xff]  ;;  %v307_v5 = vld [vmem:[%s23274_s1] sm:$0xff]  ;;  %v7171_v9 = vld [vmem:[%s23274_s1 + $0x50] sm:$0xff]  ;;  %vm13840_vm2 = vcmask 25600   ;;  %vm13838_vm3 = vcmask 29696  }
   0xf   : > { %v308_v6 = vld [vmem:[%s23274_s1 + $0x8] sm:$0xff]  ;;  %v20119_v7 = vpack.c.bf16 %v5745_v4, %v5744_v2  ;;  %s23314_s13 = smov (!%p161_p3, %s13897_s13), 1  ;;  %v7172_v10 = vld [vmem:[%s23274_s1 + $0x58] sm:$0xff]  ;;  %v8598_v62 = vld [vmem:[%s23274_s1 + $0x60] sm:$0xff] }
  0x10   : > { %v18385_v8 = vpack.c.bf16 %v308_v6, %v307_v5  ;;  %18382 = vmatprep.subr.bf16.mxu1 %v18381_v3  ;;  %v18401_v11 = vpack.c.bf16 %v7172_v10, %v7171_v9  ;;  %s19507_s30 = smul.u32 1160, %s23314_s13  ;;  %v8599_v63 = vld [vmem:[%s23274_s1 + $0x68] sm:$0xff] }
  0x11   : > { %18398 = vmatprep.subr.bf16.mxu0 %v20119_v7  ;;  %18384 = vmatpush3.bf16.msra.mxu1 %v18381_v3  ;;  %v20245_v2 = vpack.c.bf16 %v8599_v63, %v8598_v62  ;;  %s19508_s4 = smul.u32 1088, %s23314_s13 }
  0x12   : > { %18400 = vmatpush3.bf16.msra.mxu0 %v20119_v7  ;;  %18386 = vmatprep.subr.bf16.mxu1 %v18385_v8  ;;  %s20135_s6 = scalar_lea.vmem %s23273_s0, %s19507_s30 }
  0x13   : > { %18402 = vmatprep.subr.bf16.mxu0 %v18401_v11  ;;  %v309_v12 = vld [vmem:[%s20135_s6 + $0x1] sm:$0xff]  ;;  %v310_v14 = vld [vmem:[%s20135_s6 + $0x9] sm:$0xff]  ;;  %v311_v16 = vld [vmem:[%s20135_s6 + $0x11] sm:$0xff]  ;;  %s22753_s7 = scalar_lea.vmem %s23276_s3, %s19508_s4 }
  0x14   : > { %v5608_v13 = vld [vmem:[%s20135_s6 + $0x23] sm:$0xff]  ;;  %16513 = vmatprep.mubr.msk.f32.mxu1 %vm447_vm0, %v309_v12  ;;  %v5609_v15 = vld [vmem:[%s20135_s6 + $0x2b] sm:$0xff]  ;;  %v5610_v17 = vld [vmem:[%s20135_s6 + $0x33] sm:$0xff] }
  0x15   : > { %17345 = vmatprep.mubr.msk.f32.mxu0 %vm447_vm0, %v5608_v13  ;;  %16514 = vmatmul.mubr.msk.f32.vlgmr.msra.gmra.mrb[0].mxu1 %vm447_vm0, %v310_v14  ;;  %v312_v18 = vld [vmem:[%s20135_s6 + $0x19] sm:$0xff]  ;;  %v313_v20 = vld [vmem:[%s20135_s6 + $0x21] sm:$0xff]  ;;  %v314_v22 = vld [vmem:[%s20135_s6 + $0x29] sm:$0xff] }
  0x16   : > { %17346 = vmatmul.mubr.msk.f32.vlgmr.msra.gmra.mrb[0].mxu0 %vm447_vm0, %v5609_v15  ;;  %18388 = vmatpush3.bf16.msra.mxu1 %v18385_v8  ;;  %v5611_v19 = vld [vmem:[%s20135_s6 + $0x3b] sm:$0xff]  ;;  %v5612_v21 = vld [vmem:[%s20135_s6 + $0x43] sm:$0xff]  ;;  %v5613_v23 = vld [vmem:[%s20135_s6 + $0x4b] sm:$0xff] }
  0x17   : > { %18404 = vmatpush3.bf16.msra.mxu0 %v18401_v11  ;;  %16516 = vmatprep.mubr.msk.f32.mxu1 %vm447_vm0, %v311_v16  ;;  %v315_v24 = vld [vmem:[%s20135_s6 + $0x31] sm:$0xff]  ;;  %v316_v26 = vld [vmem:[%s20135_s6 + $0x39] sm:$0xff]  ;;  %v317_v28 = vld [vmem:[%s20135_s6 + $0x41] sm:$0xff] }
  0x18   : > { %17348 = vmatprep.mubr.msk.f32.mxu0 %vm447_vm0, %v5610_v17  ;;  %v5614_v25 = vld [vmem:[%s20135_s6 + $0x53] sm:$0xff]  ;;  %v5615_v27 = vld [vmem:[%s20135_s6 + $0x5b] sm:$0xff]  ;;  %v5616_v29 = vld [vmem:[%s20135_s6 + $0x63] sm:$0xff]  ;;  %18406 = vmatprep.subr.bf16.mxu0 %v20245_v2 }
  0x19   : > { %16517 = vmatmul.mubr.msk.f32.gmra.mrb[2].mxu1 %vm447_vm0, %v312_v18  ;;  %v318_v30 = vld [vmem:[%s20135_s6 + $0x49] sm:$0xff]  ;;  %v319_v32 = vld [vmem:[%s20135_s6 + $0x51] sm:$0xff]  ;;  %v320_v34 = vld [vmem:[%s20135_s6 + $0x59] sm:$0xff] }
  0x1a   : > { %17349 = vmatmul.mubr.msk.f32.gmra.mrb[2].mxu0 %vm447_vm0, %v5611_v19  ;;  %16519 = vmatprep.mubr.msk.f32.mxu1 %vm447_vm0, %v313_v20  ;;  %v5617_v31 = vld [vmem:[%s20135_s6 + $0x6b] sm:$0xff]  ;;  %v5618_v33 = vld [vmem:[%s20135_s6 + $0x73] sm:$0xff]  ;;  %v5619_v35 = vld [vmem:[%s20135_s6 + $0x7b] sm:$0xff] }
  0x1b   : > { %17351 = vmatprep.mubr.msk.f32.mxu0 %vm447_vm0, %v5612_v21  ;;  %v321_v36 = vld [vmem:[%s20135_s6 + $0x61] sm:$0xff]  ;;  %v322_v38 = vld [vmem:[%s20135_s6 + $0x69] sm:$0xff]  ;;  %v323_v40 = vld [vmem:[%s20135_s6 + $0x71] sm:$0xff] }
  0x1c   : > { %v5620_v37 = vld [vmem:[%s20135_s6 + $0x83] sm:$0xff]  ;;  %v5621_v39 = vld [vmem:[%s20135_s6 + $0x8b] sm:$0xff]  ;;  %v5622_v41 = vld [vmem:[%s20135_s6 + $0x93] sm:$0xff] }
  0x1d   : > { %16520 = vmatmul.mubr.msk.f32.gmra.mrb[4].mxu1 %vm447_vm0, %v314_v22  ;;  %v324_v42 = vld [vmem:[%s20135_s6 + $0x79] sm:$0xff]  ;;  %v325_v44 = vld [vmem:[%s20135_s6 + $0x81] sm:$0xff]  ;;  %v326_v46 = vld [vmem:[%s20135_s6 + $0x89] sm:$0xff] }
  0x1e   : > { %17352 = vmatmul.mubr.msk.f32.gmra.mrb[4].mxu0 %vm447_vm0, %v5613_v23  ;;  %16522 = vmatprep.mubr.msk.f32.mxu1 %vm447_vm0, %v315_v24  ;;  %v5623_v43 = vld [vmem:[%s20135_s6 + $0x9b] sm:$0xff]  ;;  %v5624_v45 = vld [vmem:[%s20135_s6 + $0xa3] sm:$0xff]  ;;  %v5625_v47 = vld [vmem:[%s20135_s6 + $0xab] sm:$0xff] }
  0x1f   : > { %17354 = vmatprep.mubr.msk.f32.mxu0 %vm447_vm0, %v5614_v25  ;;  %v327_v48 = vld [vmem:[%s20135_s6 + $0x91] sm:$0xff]  ;;  %v328_v50 = vld [vmem:[%s20135_s6 + $0x99] sm:$0xff]  ;;  %v329_v52 = vld [vmem:[%s20135_s6 + $0xa1] sm:$0xff] }
  0x20   : > { %v5626_v49 = vld [vmem:[%s20135_s6 + $0xb3] sm:$0xff]  ;;  %v5627_v51 = vld [vmem:[%s20135_s6 + $0xbb] sm:$0xff]  ;;  %v5628_v53 = vld [vmem:[%s20135_s6 + $0xc3] sm:$0xff] }
  0x21   : > { %16523 = vmatmul.mubr.msk.f32.gmra.mrb[6].mxu1 %vm447_vm0, %v316_v26  ;;  %v330_v54 = vld [vmem:[%s20135_s6 + $0xa9] sm:$0xff]  ;;  %v331_v56 = vld [vmem:[%s20135_s6 + $0xb1] sm:$0xff]  ;;  %v332_v58 = vld [vmem:[%s20135_s6 + $0xb9] sm:$0xff] }
  0x22   : > { %17355 = vmatmul.mubr.msk.f32.gmra.mrb[6].mxu0 %vm447_vm0, %v5615_v27  ;;  %16525 = vmatprep.mubr.msk.f32.mxu1 %vm447_vm0, %v317_v28  ;;  %v5629_v55 = vld [vmem:[%s20135_s6 + $0xcb] sm:$0xff]  ;;  %v5630_v57 = vld [vmem:[%s20135_s6 + $0xd3] sm:$0xff]  ;;  %v5631_v59 = vld [vmem:[%s20135_s6 + $0xdb] sm:$0xff] }
  0x23   : > { %17357 = vmatprep.mubr.msk.f32.mxu0 %vm447_vm0, %v5616_v29  ;;  %v333_v60 = vld [vmem:[%s20135_s6 + $0xc1] sm:$0xff]  ;;  %v334_v0 = vld [vmem:[%s20135_s6 + $0xc9] sm:$0xff]  ;;  %v335_v3 = vld [vmem:[%s20135_s6 + $0xd1] sm:$0xff] }
  0x24   : > { %v5632_v61 = vld [vmem:[%s20135_s6 + $0xe3] sm:$0xff]  ;;  %v5633_v1 = vld [vmem:[%s20135_s6 + $0xeb] sm:$0xff]  ;;  %v5634_v4 = vld [vmem:[%s20135_s6 + $0xf3] sm:$0xff] }
  0x25   : > { %16526 = vmatmul.mubr.msk.f32.gmra.mrb[8].mxu1 %vm447_vm0, %v318_v30  ;;  %v336_v5 = vld [vmem:[%s20135_s6 + $0xd9] sm:$0xff]  ;;  %v337_v8 = vld [vmem:[%s20135_s6 + $0xe1] sm:$0xff]  ;;  %v338_v10 = vld [vmem:[%s20135_s6 + $0xe9] sm:$0xff] }
  0x26   : > { %17358 = vmatmul.mubr.msk.f32.gmra.mrb[8].mxu0 %vm447_vm0, %v5617_v31  ;;  %16528 = vmatprep.mubr.msk.f32.mxu1 %vm447_vm0, %v319_v32  ;;  %v5635_v6 = vld [vmem:[%s20135_s6 + $0xfb] sm:$0xff]  ;;  %v5636_v9 = vld [vmem:[%s20135_s6 + $0x103] sm:$0xff]  ;;  %v5637_v11 = vld [vmem:[%s20135_s6 + $0x10b] sm:$0xff] }
  0x27   : > { %17360 = vmatprep.mubr.msk.f32.mxu0 %vm447_vm0, %v5618_v33  ;;  %v339_v12 = vld [vmem:[%s20135_s6 + $0xf1] sm:$0xff]  ;;  %v340_v14 = vld [vmem:[%s20135_s6 + $0xf9] sm:$0xff]  ;;  %v341_v16 = vld [vmem:[%s20135_s6 + $0x101] sm:$0xff] }
  0x28   : > { %v5638_v13 = vld [vmem:[%s20135_s6 + $0x113] sm:$0xff]  ;;  %v5639_v15 = vld [vmem:[%s20135_s6 + $0x11b] sm:$0xff]  ;;  %v5640_v17 = vld [vmem:[%s20135_s6 + $0x123] sm:$0xff] }
  0x29   : > { %16529 = vmatmul.mubr.msk.f32.gmra.mrb[10].mxu1 %vm447_vm0, %v320_v34  ;;  %v342_v18 = vld [vmem:[%s20135_s6 + $0x109] sm:$0xff]  ;;  %v343_v20 = vld [vmem:[%s20135_s6 + $0x111] sm:$0xff]  ;;  %v344_v22 = vld [vmem:[%s20135_s6 + $0x119] sm:$0xff] }
  0x2a   : > { %17361 = vmatmul.mubr.msk.f32.gmra.mrb[10].mxu0 %vm447_vm0, %v5619_v35  ;;  %16531 = vmatprep.mubr.msk.f32.mxu1 %vm447_vm0, %v321_v36  ;;  %v5641_v19 = vld [vmem:[%s20135_s6 + $0x12b] sm:$0xff]  ;;  %v5642_v21 = vld [vmem:[%s20135_s6 + $0x133] sm:$0xff]  ;;  %v5643_v23 = vld [vmem:[%s20135_s6 + $0x13b] sm:$0xff] }
  0x2b   : > { %17363 = vmatprep.mubr.msk.f32.mxu0 %vm447_vm0, %v5620_v37  ;;  %v345_v24 = vld [vmem:[%s20135_s6 + $0x121] sm:$0xff]  ;;  %v346_v26 = vld [vmem:[%s20135_s6 + $0x129] sm:$0xff]  ;;  %v347_v28 = vld [vmem:[%s20135_s6 + $0x131] sm:$0xff] }
  0x2c   : > { %v5644_v25 = vld [vmem:[%s20135_s6 + $0x143] sm:$0xff]  ;;  %v5645_v27 = vld [vmem:[%s20135_s6 + $0x14b] sm:$0xff]  ;;  %v5646_v29 = vld [vmem:[%s20135_s6 + $0x153] sm:$0xff] }
  0x2d   : > { %16532 = vmatmul.mubr.msk.f32.gmra.mrb[12].mxu1 %vm447_vm0, %v322_v38  ;;  %v348_v30 = vld [vmem:[%s20135_s6 + $0x139] sm:$0xff]  ;;  %v349_v32 = vld [vmem:[%s20135_s6 + $0x141] sm:$0xff]  ;;  %v350_v34 = vld [vmem:[%s20135_s6 + $0x149] sm:$0xff] }
  0x2e   : > { %17364 = vmatmul.mubr.msk.f32.gmra.mrb[12].mxu0 %vm447_vm0, %v5621_v39  ;;  %16534 = vmatprep.mubr.msk.f32.mxu1 %vm447_vm0, %v323_v40  ;;  %v5647_v31 = vld [vmem:[%s20135_s6 + $0x15b] sm:$0xff]  ;;  %v5648_v33 = vld [vmem:[%s20135_s6 + $0x163] sm:$0xff]  ;;  %v5649_v35 = vld [vmem:[%s20135_s6 + $0x16b] sm:$0xff] }
  0x2f   : > { %17366 = vmatprep.mubr.msk.f32.mxu0 %vm447_vm0, %v5622_v41  ;;  %v351_v36 = vld [vmem:[%s20135_s6 + $0x151] sm:$0xff]  ;;  %v352_v38 = vld [vmem:[%s20135_s6 + $0x159] sm:$0xff]  ;;  %v353_v40 = vld [vmem:[%s20135_s6 + $0x161] sm:$0xff] }
  0x30   : > { %v5650_v37 = vld [vmem:[%s20135_s6 + $0x173] sm:$0xff]  ;;  %v5651_v39 = vld [vmem:[%s20135_s6 + $0x17b] sm:$0xff]  ;;  %v5652_v41 = vld [vmem:[%s20135_s6 + $0x183] sm:$0xff] }
  0x31   : > { %16535 = vmatmul.mubr.msk.f32.gmra.mrb[14].mxu1 %vm447_vm0, %v324_v42  ;;  %v354_v42 = vld [vmem:[%s20135_s6 + $0x169] sm:$0xff]  ;;  %v364_v62 = vld [vmem:[%s20135_s6 + $0x1b9] sm:$0xff] }
  0x32   : > { %17367 = vmatmul.mubr.msk.f32.gmra.mrb[14].mxu0 %vm447_vm0, %v5623_v43  ;;  %16537 = vmatprep.mubr.msk.f32.mxu1 %vm447_vm0, %v325_v44  ;;  %v5653_v43 = vld [vmem:[%s20135_s6 + $0x18b] sm:$0xff]  ;;  %v5663_v63 = vld [vmem:[%s20135_s6 + $0x1db] sm:$0xff] }
  0x33   : > { %17369 = vmatprep.mubr.msk.f32.mxu0 %vm447_vm0, %v5624_v45  ;;  %v355_v44 = vld [vmem:[%s20135_s6 + $0x171] sm:$0xff] }
  0x34   : > { %v5654_v45 = vld [vmem:[%s20135_s6 + $0x193] sm:$0xff] }
  0x35   : > { %16538 = vmatmul.mubr.msk.f32.gmra.mrb[16].mxu1 %vm447_vm0, %v326_v46  ;;  %v356_v46 = vld [vmem:[%s20135_s6 + $0x179] sm:$0xff] }
  0x36   : > { %17370 = vmatmul.mubr.msk.f32.gmra.mrb[16].mxu0 %vm447_vm0, %v5625_v47  ;;  %16540 = vmatprep.mubr.msk.f32.mxu1 %vm447_vm0, %v327_v48  ;;  %v5655_v47 = vld [vmem:[%s20135_s6 + $0x19b] sm:$0xff] }
  0x37   : > { %17372 = vmatprep.mubr.msk.f32.mxu0 %vm447_vm0, %v5626_v49  ;;  %v357_v48 = vld [vmem:[%s20135_s6 + $0x181] sm:$0xff] }
  0x38   : > { %v5656_v49 = vld [vmem:[%s20135_s6 + $0x1a3] sm:$0xff] }
  0x39   : > { %16541 = vmatmul.mubr.msk.f32.gmra.mrb[18].mxu1 %vm447_vm0, %v328_v50  ;;  %v358_v50 = vld [vmem:[%s20135_s6 + $0x189] sm:$0xff] }
  0x3a   : > { %17373 = vmatmul.mubr.msk.f32.gmra.mrb[18].mxu0 %vm447_vm0, %v5627_v51  ;;  %16543 = vmatprep.mubr.msk.f32.mxu1 %vm447_vm0, %v329_v52  ;;  %v5657_v51 = vld [vmem:[%s20135_s6 + $0x1ab] sm:$0xff] }
  0x3b   : > { %17375 = vmatprep.mubr.msk.f32.mxu0 %vm447_vm0, %v5628_v53  ;;  %v359_v52 = vld [vmem:[%s20135_s6 + $0x191] sm:$0xff] }
  0x3c   : > { %v5658_v53 = vld [vmem:[%s20135_s6 + $0x1b3] sm:$0xff] }
  0x3d   : > { %16544 = vmatmul.mubr.msk.f32.gmra.mrb[20].mxu1 %vm447_vm0, %v330_v54  ;;  %v360_v54 = vld [vmem:[%s20135_s6 + $0x199] sm:$0xff] }
  0x3e   : > { %17376 = vmatmul.mubr.msk.f32.gmra.mrb[20].mxu0 %vm447_vm0, %v5629_v55  ;;  %16546 = vmatprep.mubr.msk.f32.mxu1 %vm447_vm0, %v331_v56  ;;  %v5659_v55 = vld [vmem:[%s20135_s6 + $0x1bb] sm:$0xff] }
  0x3f   : > { %17378 = vmatprep.mubr.msk.f32.mxu0 %vm447_vm0, %v5630_v57  ;;  %v361_v56 = vld [vmem:[%s20135_s6 + $0x1a1] sm:$0xff] }
  0x40   : > { %v5660_v57 = vld [vmem:[%s20135_s6 + $0x1c3] sm:$0xff] }
  0x41   : > { %16547 = vmatmul.mubr.msk.f32.gmra.mrb[22].mxu1 %vm447_vm0, %v332_v58  ;;  %v362_v58 = vld [vmem:[%s20135_s6 + $0x1a9] sm:$0xff] }
  0x42   : > { %17379 = vmatmul.mubr.msk.f32.gmra.mrb[22].mxu0 %vm447_vm0, %v5631_v59  ;;  %16549 = vmatprep.mubr.msk.f32.mxu1 %vm447_vm0, %v333_v60  ;;  %v5661_v59 = vld [vmem:[%s20135_s6 + $0x1cb] sm:$0xff] }
  0x43   : > { %17381 = vmatprep.mubr.msk.f32.mxu0 %vm447_vm0, %v5632_v61  ;;  %v363_v60 = vld [vmem:[%s20135_s6 + $0x1b1] sm:$0xff] }
  0x44   : > { %v5662_v61 = vld [vmem:[%s20135_s6 + $0x1d3] sm:$0xff] }
  0x45   : > { %16550 = vmatmul.mubr.msk.f32.gmra.mrb[24].mxu1 %vm447_vm0, %v334_v0  ;;  %v365_v0 = vld [vmem:[%s20135_s6 + $0x1c1] sm:$0xff] }
  0x46   : > { %17382 = vmatmul.mubr.msk.f32.gmra.mrb[24].mxu0 %vm447_vm0, %v5633_v1  ;;  %16552 = vmatprep.mubr.msk.f32.mxu1 %vm447_vm0, %v335_v3  ;;  %v5664_v1 = vld [vmem:[%s20135_s6 + $0x1e3] sm:$0xff] }
  0x47   : > { %17384 = vmatprep.mubr.msk.f32.mxu0 %vm447_vm0, %v5634_v4  ;;  %v366_v3 = vld [vmem:[%s20135_s6 + $0x1c9] sm:$0xff] }
  0x48   : > { %v5665_v4 = vld [vmem:[%s20135_s6 + $0x1eb] sm:$0xff] }
  0x49   : > { %16553 = vmatmul.mubr.msk.f32.gmra.mrb[26].mxu1 %vm447_vm0, %v336_v5  ;;  %v367_v5 = vld [vmem:[%s20135_s6 + $0x1d1] sm:$0xff] }
  0x4a   : > { %17385 = vmatmul.mubr.msk.f32.gmra.mrb[26].mxu0 %vm447_vm0, %v5635_v6  ;;  %16555 = vmatprep.mubr.msk.f32.mxu1 %vm447_vm0, %v337_v8  ;;  %v5666_v6 = vld [vmem:[%s20135_s6 + $0x1f3] sm:$0xff] }
  0x4b   : > { %17387 = vmatprep.mubr.msk.f32.mxu0 %vm447_vm0, %v5636_v9  ;;  %v368_v8 = vld [vmem:[%s20135_s6 + $0x1d9] sm:$0xff] }
  0x4c   : > { %v5667_v9 = vld [vmem:[%s20135_s6 + $0x1fb] sm:$0xff] }
  0x4d   : > { %16556 = vmatmul.mubr.msk.f32.gmra.mrb[28].mxu1 %vm447_vm0, %v338_v10  ;;  %v369_v10 = vld [vmem:[%s20135_s6 + $0x1e1] sm:$0xff] }
  0x4e   : > { %17388 = vmatmul.mubr.msk.f32.gmra.mrb[28].mxu0 %vm447_vm0, %v5637_v11  ;;  %16558 = vmatprep.mubr.msk.f32.mxu1 %vm447_vm0, %v339_v12  ;;  %v5668_v11 = vld [vmem:[%s20135_s6 + $0x203] sm:$0xff] }
  0x4f   : > { %17390 = vmatprep.mubr.msk.f32.mxu0 %vm447_vm0, %v5638_v13  ;;  %v370_v12 = vld [vmem:[%s20135_s6 + $0x1e9] sm:$0xff] }
  0x50   : > { %v5669_v13 = vld [vmem:[%s20135_s6 + $0x20b] sm:$0xff] }
  0x51   : > { %16559 = vmatmul.mubr.msk.f32.gmra.mrb[30].mxu1 %vm447_vm0, %v340_v14  ;;  %v371_v14 = vld [vmem:[%s20135_s6 + $0x1f1] sm:$0xff] }
  0x52   : > { %17391 = vmatmul.mubr.msk.f32.gmra.mrb[30].mxu0 %vm447_vm0, %v5639_v15  ;;  %16561 = vmatprep.mubr.msk.f32.mxu1 %vm447_vm0, %v341_v16  ;;  %v5670_v15 = vld [vmem:[%s20135_s6 + $0x213] sm:$0xff] }
  0x53   : > { %17393 = vmatprep.mubr.msk.f32.mxu0 %vm447_vm0, %v5640_v17  ;;  %v372_v16 = vld [vmem:[%s20135_s6 + $0x1f9] sm:$0xff] }
  0x54   : > { %v5671_v17 = vld [vmem:[%s20135_s6 + $0x21b] sm:$0xff] }
  0x55   : > { %16562 = vmatmul.mubr.msk.f32.gmra.mrb[32].mxu1 %vm447_vm0, %v342_v18  ;;  %v373_v18 = vld [vmem:[%s20135_s6 + $0x201] sm:$0xff] }
  0x56   : > { %17394 = vmatmul.mubr.msk.f32.gmra.mrb[32].mxu0 %vm447_vm0, %v5641_v19  ;;  %16564 = vmatprep.mubr.msk.f32.mxu1 %vm447_vm0, %v343_v20  ;;  %v5672_v19 = vld [vmem:[%s20135_s6 + $0x223] sm:$0xff] }
  0x57   : > { %17396 = vmatprep.mubr.msk.f32.mxu0 %vm447_vm0, %v5642_v21  ;;  %v374_v20 = vld [vmem:[%s20135_s6 + $0x209] sm:$0xff] }
  0x58   : > { %v5673_v21 = vld [vmem:[%s20135_s6 + $0x22b] sm:$0xff] }
  0x59   : > { %16565 = vmatmul.mubr.msk.f32.gmra.mrb[34].mxu1 %vm447_vm0, %v344_v22  ;;  %v375_v22 = vld [vmem:[%s20135_s6 + $0x211] sm:$0xff] }
  0x5a   : > { %17397 = vmatmul.mubr.msk.f32.gmra.mrb[34].mxu0 %vm447_vm0, %v5643_v23  ;;  %16567 = vmatprep.mubr.msk.f32.mxu1 %vm447_vm0, %v345_v24  ;;  %v5674_v23 = vld [vmem:[%s20135_s6 + $0x233] sm:$0xff] }
  0x5b   : > { %17399 = vmatprep.mubr.msk.f32.mxu0 %vm447_vm0, %v5644_v25  ;;  %v376_v24 = vld [vmem:[%s20135_s6 + $0x219] sm:$0xff] }
  0x5c   : > { %v5675_v25 = vld [vmem:[%s20135_s6 + $0x23b] sm:$0xff] }
  0x5d   : > { %16568 = vmatmul.mubr.msk.f32.gmra.mrb[36].mxu1 %vm447_vm0, %v346_v26  ;;  %v377_v26 = vld [vmem:[%s20135_s6 + $0x221] sm:$0xff] }
  0x5e   : > { %17400 = vmatmul.mubr.msk.f32.gmra.mrb[36].mxu0 %vm447_vm0, %v5645_v27  ;;  %16570 = vmatprep.mubr.msk.f32.mxu1 %vm447_vm0, %v347_v28  ;;  %v7035_v27 = vld [vmem:[%s20135_s6 + $0x24] sm:$0xff] }
  0x5f   : > { %17402 = vmatprep.mubr.msk.f32.mxu0 %vm447_vm0, %v5646_v29  ;;  %v378_v28 = vld [vmem:[%s20135_s6 + $0x229] sm:$0xff] }
  0x60   : > { %v7036_v29 = vld [vmem:[%s20135_s6 + $0x2c] sm:$0xff] }
  0x61   : > { %16571 = vmatmul.mubr.msk.f32.gmra.mrb[38].mxu1 %vm447_vm0, %v348_v30  ;;  %v379_v30 = vld [vmem:[%s20135_s6 + $0x231] sm:$0xff] }
  0x62   : > { %17403 = vmatmul.mubr.msk.f32.gmra.mrb[38].mxu0 %vm447_vm0, %v5647_v31  ;;  %16573 = vmatprep.mubr.msk.f32.mxu1 %vm447_vm0, %v349_v32  ;;  %v7037_v31 = vld [vmem:[%s20135_s6 + $0x34] sm:$0xff] }
  0x63   : > { %17405 = vmatprep.mubr.msk.f32.mxu0 %vm447_vm0, %v5648_v33  ;;  %v380_v32 = vld [vmem:[%s20135_s6 + $0x239] sm:$0xff] }
  0x64   : > { %v7038_v33 = vld [vmem:[%s20135_s6 + $0x3c] sm:$0xff] }
  0x65   : > { %16574 = vmatmul.mubr.msk.f32.gmra.mrb[40].mxu1 %vm447_vm0, %v350_v34  ;;  %v381_v34 = vld [vmem:[%s20135_s6 + $0x241] sm:$0xff] }
  0x66   : > { %17406 = vmatmul.mubr.msk.f32.gmra.mrb[40].mxu0 %vm447_vm0, %v5649_v35  ;;  %16576 = vmatprep.mubr.msk.f32.mxu1 %vm447_vm0, %v351_v36  ;;  %v7039_v35 = vld [vmem:[%s20135_s6 + $0x44] sm:$0xff] }
  0x67   : > { %17408 = vmatprep.mubr.msk.f32.mxu0 %vm447_vm0, %v5650_v37  ;;  %v382_v36 = vld [vmem:[%s20135_s6 + $0x249] sm:$0xff]  ;;  %v2890_v37 = vld [vmem:[%s23274_s1 + $0x20] sm:$0xff] }
  0x69   : > { %16577 = vmatmul.mubr.msk.f32.gmra.mrb[42].mxu1 %vm447_vm0, %v352_v38  ;;  %v2891_v38 = vld [vmem:[%s23274_s1 + $0x28] sm:$0xff] }
  0x6a   : > { %17409 = vmatmul.mubr.msk.f32.gmra.mrb[42].mxu0 %vm447_vm0, %v5651_v39  ;;  %16579 = vmatprep.mubr.msk.f32.mxu1 %vm447_vm0, %v353_v40  ;;  %v383_v39 = vld [vmem:[%s20135_s6 + $0x251] sm:$0xff] }
  0x6b   : > { %17411 = vmatprep.mubr.msk.f32.mxu0 %vm447_vm0, %v5652_v41  ;;  %v7041_v40 = vld [vmem:[%s20135_s6 + $0x54] sm:$0xff]  ;;  %v20449_v41 = vpack.c.bf16 %v2891_v38, %v2890_v37  ;;  %v413_v37 = vld [vmem:[%s20135_s6 + $0x341] sm:$0xff] }
  0x6c   : > { %v7071_v38 = vld [vmem:[%s20135_s6 + $0x144] sm:$0xff] }
  0x6d   : > { %16580 = vmatmul.mubr.msk.f32.gmra.mrb[44].mxu1 %vm447_vm0, %v354_v42  ;;  %v384_v42 = vld [vmem:[%s20135_s6 + $0x259] sm:$0xff]  ;;  %18390 = vmatprep.subr.bf16.mxu1 %v20449_v41 }
  0x6e   : > { %17412 = vmatmul.mubr.msk.f32.gmra.mrb[44].mxu0 %vm447_vm0, %v5653_v43  ;;  %16582 = vmatprep.mubr.msk.f32.mxu1 %vm447_vm0, %v355_v44  ;;  %v7042_v43 = vld [vmem:[%s20135_s6 + $0x5c] sm:$0xff] }
  0x6f   : > { %17414 = vmatprep.mubr.msk.f32.mxu0 %vm447_vm0, %v5654_v45  ;;  %v385_v44 = vld [vmem:[%s20135_s6 + $0x261] sm:$0xff] }
  0x70   : > { %v7043_v45 = vld [vmem:[%s20135_s6 + $0x64] sm:$0xff] }
  0x71   : > { %16583 = vmatmul.mubr.msk.f32.gmra.mrb[46].mxu1 %vm447_vm0, %v356_v46  ;;  %v386_v46 = vld [vmem:[%s20135_s6 + $0x269] sm:$0xff] }
  0x72   : > { %17415 = vmatmul.mubr.msk.f32.gmra.mrb[46].mxu0 %vm447_vm0, %v5655_v47  ;;  %16585 = vmatprep.mubr.msk.f32.mxu1 %vm447_vm0, %v357_v48  ;;  %v7044_v47 = vld [vmem:[%s20135_s6 + $0x6c] sm:$0xff] }
  0x73   : > { %17417 = vmatprep.mubr.msk.f32.mxu0 %vm447_vm0, %v5656_v49  ;;  %v387_v48 = vld [vmem:[%s20135_s6 + $0x271] sm:$0xff] }
  0x74   : > { %v7045_v49 = vld [vmem:[%s20135_s6 + $0x74] sm:$0xff] }
  0x75   : > { %16586 = vmatmul.mubr.msk.f32.gmra.mrb[48].mxu1 %vm447_vm0, %v358_v50  ;;  %v388_v50 = vld [vmem:[%s20135_s6 + $0x279] sm:$0xff] }
  0x76   : > { %17418 = vmatmul.mubr.msk.f32.gmra.mrb[48].mxu0 %vm447_vm0, %v5657_v51  ;;  %16588 = vmatprep.mubr.msk.f32.mxu1 %vm447_vm0, %v359_v52  ;;  %v7046_v51 = vld [vmem:[%s20135_s6 + $0x7c] sm:$0xff] }
  0x77   : > { %17420 = vmatprep.mubr.msk.f32.mxu0 %vm447_vm0, %v5658_v53  ;;  %v389_v52 = vld [vmem:[%s20135_s6 + $0x281] sm:$0xff] }
  0x78   : > { %v7047_v53 = vld [vmem:[%s20135_s6 + $0x84] sm:$0xff] }
  0x79   : > { %16589 = vmatmul.mubr.msk.f32.gmra.mrb[50].mxu1 %vm447_vm0, %v360_v54  ;;  %v390_v54 = vld [vmem:[%s20135_s6 + $0x289] sm:$0xff] }
  0x7a   : > { %17421 = vmatmul.mubr.msk.f32.gmra.mrb[50].mxu0 %vm447_vm0, %v5659_v55  ;;  %16591 = vmatprep.mubr.msk.f32.mxu1 %vm447_vm0, %v361_v56  ;;  %v7048_v55 = vld [vmem:[%s20135_s6 + $0x8c] sm:$0xff] }
  0x7b   : > { %17423 = vmatprep.mubr.msk.f32.mxu0 %vm447_vm0, %v5660_v57  ;;  %v391_v56 = vld [vmem:[%s20135_s6 + $0x291] sm:$0xff] }
  0x7c   : > { %v7049_v57 = vld [vmem:[%s20135_s6 + $0x94] sm:$0xff] }
  0x7d   : > { %16592 = vmatmul.mubr.msk.f32.gmra.mrb[52].mxu1 %vm447_vm0, %v362_v58  ;;  %v392_v58 = vld [vmem:[%s20135_s6 + $0x299] sm:$0xff] }
  0x7e   : > { %17424 = vmatmul.mubr.msk.f32.gmra.mrb[52].mxu0 %vm447_vm0, %v5661_v59  ;;  %16594 = vmatprep.mubr.msk.f32.mxu1 %vm447_vm0, %v363_v60  ;;  %v7050_v59 = vld [vmem:[%s20135_s6 + $0x9c] sm:$0xff] }
  0x7f   : > { %17426 = vmatprep.mubr.msk.f32.mxu0 %vm447_vm0, %v5662_v61  ;;  %v393_v60 = vld [vmem:[%s20135_s6 + $0x2a1] sm:$0xff] }
  0x80   : > { %v7051_v61 = vld [vmem:[%s20135_s6 + $0xa4] sm:$0xff] }
  0x81   : > { %16595 = vmatmul.mubr.msk.f32.gmra.mrb[54].mxu1 %vm447_vm0, %v364_v62  ;;  %v394_v62 = vld [vmem:[%s20135_s6 + $0x2a9] sm:$0xff] }
  0x82   : > { %17427 = vmatmul.mubr.msk.f32.gmra.mrb[54].mxu0 %vm447_vm0, %v5663_v63  ;;  %16597 = vmatprep.mubr.msk.f32.mxu1 %vm447_vm0, %v365_v0  ;;  %v7052_v63 = vld [vmem:[%s20135_s6 + $0xac] sm:$0xff] }
  0x83   : > { %17429 = vmatprep.mubr.msk.f32.mxu0 %vm447_vm0, %v5664_v1  ;;  %v395_v0 = vld [vmem:[%s20135_s6 + $0x2b1] sm:$0xff] }
  0x84   : > { %v7053_v1 = vld [vmem:[%s20135_s6 + $0xb4] sm:$0xff] }
  0x85   : > { %16598 = vmatmul.mubr.msk.f32.gmra.mrb[56].mxu1 %vm447_vm0, %v366_v3  ;;  %v396_v3 = vld [vmem:[%s20135_s6 + $0x2b9] sm:$0xff] }
  0x86   : > { %17430 = vmatmul.mubr.msk.f32.gmra.mrb[56].mxu0 %vm447_vm0, %v5665_v4  ;;  %16600 = vmatprep.mubr.msk.f32.mxu1 %vm447_vm0, %v367_v5  ;;  %v7054_v4 = vld [vmem:[%s20135_s6 + $0xbc] sm:$0xff] }
  0x87   : > { %17432 = vmatprep.mubr.msk.f32.mxu0 %vm447_vm0, %v5666_v6  ;;  %v397_v5 = vld [vmem:[%s20135_s6 + $0x2c1] sm:$0xff] }
  0x88   : > { %v7055_v6 = vld [vmem:[%s20135_s6 + $0xc4] sm:$0xff] }
  0x89   : > { %16601 = vmatmul.mubr.msk.f32.gmra.mrb[58].mxu1 %vm447_vm0, %v368_v8  ;;  %v398_v8 = vld [vmem:[%s20135_s6 + $0x2c9] sm:$0xff] }
  0x8a   : > { %17433 = vmatmul.mubr.msk.f32.gmra.mrb[58].mxu0 %vm447_vm0, %v5667_v9  ;;  %16603 = vmatprep.mubr.msk.f32.mxu1 %vm447_vm0, %v369_v10  ;;  %v7056_v9 = vld [vmem:[%s20135_s6 + $0xcc] sm:$0xff] }
  0x8b   : > { %17435 = vmatprep.mubr.msk.f32.mxu0 %vm447_vm0, %v5668_v11  ;;  %v399_v10 = vld [vmem:[%s20135_s6 + $0x2d1] sm:$0xff] }
  0x8c   : > { %v7057_v11 = vld [vmem:[%s20135_s6 + $0xd4] sm:$0xff] }
  0x8d   : > { %16604 = vmatmul.mubr.msk.f32.gmra.mrb[60].mxu1 %vm447_vm0, %v370_v12  ;;  %v400_v12 = vld [vmem:[%s20135_s6 + $0x2d9] sm:$0xff] }
  0x8e   : > { %17436 = vmatmul.mubr.msk.f32.gmra.mrb[60].mxu0 %vm447_vm0, %v5669_v13  ;;  %16606 = vmatprep.mubr.msk.f32.mxu1 %vm447_vm0, %v371_v14  ;;  %v7058_v13 = vld [vmem:[%s20135_s6 + $0xdc] sm:$0xff] }
  0x8f   : > { %17438 = vmatprep.mubr.msk.f32.mxu0 %vm447_vm0, %v5670_v15  ;;  %v401_v14 = vld [vmem:[%s20135_s6 + $0x2e1] sm:$0xff] }
  0x90   : > { %v7059_v15 = vld [vmem:[%s20135_s6 + $0xe4] sm:$0xff] }
  0x91   : > { %16607 = vmatmul.mubr.msk.f32.gmra.mrb[62].mxu1 %vm447_vm0, %v372_v16  ;;  %v402_v16 = vld [vmem:[%s20135_s6 + $0x2e9] sm:$0xff] }
  0x92   : > { %17439 = vmatmul.mubr.msk.f32.gmra.mrb[62].mxu0 %vm447_vm0, %v5671_v17  ;;  %16609 = vmatprep.mubr.msk.f32.mxu1 %vm447_vm0, %v373_v18  ;;  %v7060_v17 = vld [vmem:[%s20135_s6 + $0xec] sm:$0xff] }
  0x93   : > { %17441 = vmatprep.mubr.msk.f32.mxu0 %vm447_vm0, %v5672_v19  ;;  %v403_v18 = vld [vmem:[%s20135_s6 + $0x2f1] sm:$0xff] }
  0x94   : > { %v7061_v19 = vld [vmem:[%s20135_s6 + $0xf4] sm:$0xff] }
  0x95   : > { %16610 = vmatmul.mubr.msk.f32.gmra.mrb[64].mxu1 %vm447_vm0, %v374_v20  ;;  %v404_v20 = vld [vmem:[%s20135_s6 + $0x2f9] sm:$0xff] }
  0x96   : > { %17442 = vmatmul.mubr.msk.f32.gmra.mrb[64].mxu0 %vm447_vm0, %v5673_v21  ;;  %16612 = vmatprep.mubr.msk.f32.mxu1 %vm447_vm0, %v375_v22  ;;  %v7062_v21 = vld [vmem:[%s20135_s6 + $0xfc] sm:$0xff] }
  0x97   : > { %17444 = vmatprep.mubr.msk.f32.mxu0 %vm447_vm0, %v5674_v23  ;;  %v405_v22 = vld [vmem:[%s20135_s6 + $0x301] sm:$0xff] }
  0x98   : > { %v7063_v23 = vld [vmem:[%s20135_s6 + $0x104] sm:$0xff] }
  0x99   : > { %16613 = vmatmul.mubr.msk.f32.gmra.mrb[66].mxu1 %vm447_vm0, %v376_v24  ;;  %v406_v24 = vld [vmem:[%s20135_s6 + $0x309] sm:$0xff] }
  0x9a   : > { %17445 = vmatmul.mubr.msk.f32.gmra.mrb[66].mxu0 %vm447_vm0, %v5675_v25  ;;  %16615 = vmatprep.mubr.msk.f32.mxu1 %vm447_vm0, %v377_v26  ;;  %v7064_v25 = vld [vmem:[%s20135_s6 + $0x10c] sm:$0xff] }
  0x9b   : > { %17553 = vmatprep.mubr.msk.f32.mxu0 %vm447_vm0, %v7035_v27  ;;  %v407_v26 = vld [vmem:[%s20135_s6 + $0x311] sm:$0xff] }
  0x9c   : > { %v7065_v27 = vld [vmem:[%s20135_s6 + $0x114] sm:$0xff] }
  0x9d   : > { %16616 = vmatmul.mubr.msk.f32.gmra.mrb[68].mxu1 %vm447_vm0, %v378_v28  ;;  %v408_v28 = vld [vmem:[%s20135_s6 + $0x319] sm:$0xff] }
  0x9e   : > { %17554 = vmatmul.mubr.msk.f32.vlgmr.msra.gmra.mrb[0].mxu0 %vm447_vm0, %v7036_v29  ;;  %16618 = vmatprep.mubr.msk.f32.mxu1 %vm447_vm0, %v379_v30  ;;  %v7066_v29 = vld [vmem:[%s20135_s6 + $0x11c] sm:$0xff] }
  0x9f   : > { %18408 = vmatpush3.bf16.msra.mxu0 %v20245_v2  ;;  %17556 = vmatprep.mubr.msk.f32.mxu0 %vm447_vm0, %v7037_v31  ;;  %v7040_v2 = vld [vmem:[%s20135_s6 + $0x4c] sm:$0xff]  ;;  %v409_v30 = vld [vmem:[%s20135_s6 + $0x321] sm:$0xff] }
  0xa0   : > { %v7067_v31 = vld [vmem:[%s20135_s6 + $0x124] sm:$0xff] }
  0xa1   : > { %16619 = vmatmul.mubr.msk.f32.gmra.mrb[70].mxu1 %vm447_vm0, %v380_v32  ;;  %v410_v32 = vld [vmem:[%s20135_s6 + $0x329] sm:$0xff] }
  0xa2   : > { %17557 = vmatmul.mubr.msk.f32.gmra.mrb[2].mxu0 %vm447_vm0, %v7038_v33  ;;  %16621 = vmatprep.mubr.msk.f32.mxu1 %vm447_vm0, %v381_v34  ;;  %v7068_v33 = vld [vmem:[%s20135_s6 + $0x12c] sm:$0xff] }
  0xa3   : > { %17559 = vmatprep.mubr.msk.f32.mxu0 %vm447_vm0, %v7039_v35  ;;  %v411_v34 = vld [vmem:[%s20135_s6 + $0x331] sm:$0xff] }
  0xa4   : > { %v7069_v35 = vld [vmem:[%s20135_s6 + $0x134] sm:$0xff] }
  0xa5   : > { %16622 = vmatmul.mubr.msk.f32.gmra.mrb[72].mxu1 %vm447_vm0, %v382_v36  ;;  %v412_v36 = vld [vmem:[%s20135_s6 + $0x339] sm:$0xff] }
  0xa6   : > { %17560 = vmatmul.mubr.msk.f32.gmra.mrb[4].mxu0 %vm447_vm0, %v7040_v2  ;;  %16624 = vmatprep.mubr.msk.f32.mxu1 %vm447_vm0, %v383_v39  ;;  %v7070_v2 = vld [vmem:[%s20135_s6 + $0x13c] sm:$0xff]  ;;  %v414_v39 = vld [vmem:[%s20135_s6 + $0x349] sm:$0xff] }
  0xa7   : > { %17562 = vmatprep.mubr.msk.f32.mxu0 %vm447_vm0, %v7041_v40  ;;  %v7072_v40 = vld [vmem:[%s20135_s6 + $0x14c] sm:$0xff] }
  0xa9   : > { %16625 = vmatmul.mubr.msk.f32.gmra.mrb[74].mxu1 %vm447_vm0, %v384_v42  ;;  %v415_v42 = vld [vmem:[%s20135_s6 + $0x351] sm:$0xff] }
  0xaa   : > { %17563 = vmatmul.mubr.msk.f32.gmra.mrb[6].mxu0 %vm447_vm0, %v7042_v43  ;;  %16627 = vmatprep.mubr.msk.f32.mxu1 %vm447_vm0, %v385_v44  ;;  %v7073_v43 = vld [vmem:[%s20135_s6 + $0x154] sm:$0xff] }
  0xab   : > { %17565 = vmatprep.mubr.msk.f32.mxu0 %vm447_vm0, %v7043_v45  ;;  %v416_v44 = vld [vmem:[%s20135_s6 + $0x359] sm:$0xff] }
  0xac   : > { %v7074_v45 = vld [vmem:[%s20135_s6 + $0x15c] sm:$0xff] }
  0xad   : > { %16628 = vmatmul.mubr.msk.f32.gmra.mrb[76].mxu1 %vm447_vm0, %v386_v46  ;;  %v417_v46 = vld [vmem:[%s20135_s6 + $0x361] sm:$0xff] }
  0xae   : > { %17566 = vmatmul.mubr.msk.f32.gmra.mrb[8].mxu0 %vm447_vm0, %v7044_v47  ;;  %16630 = vmatprep.mubr.msk.f32.mxu1 %vm447_vm0, %v387_v48  ;;  %v7075_v47 = vld [vmem:[%s20135_s6 + $0x164] sm:$0xff] }
  0xaf   : > { %17568 = vmatprep.mubr.msk.f32.mxu0 %vm447_vm0, %v7045_v49  ;;  %v418_v48 = vld [vmem:[%s20135_s6 + $0x369] sm:$0xff] }
  0xb0   : > { %v7076_v49 = vld [vmem:[%s20135_s6 + $0x16c] sm:$0xff] }
  0xb1   : > { %16631 = vmatmul.mubr.msk.f32.gmra.mrb[78].mxu1 %vm447_vm0, %v388_v50  ;;  %v419_v50 = vld [vmem:[%s20135_s6 + $0x371] sm:$0xff] }
  0xb2   : > { %17569 = vmatmul.mubr.msk.f32.gmra.mrb[10].mxu0 %vm447_vm0, %v7046_v51  ;;  %16633 = vmatprep.mubr.msk.f32.mxu1 %vm447_vm0, %v389_v52  ;;  %v7077_v51 = vld [vmem:[%s20135_s6 + $0x174] sm:$0xff] }
  0xb3   : > { %17571 = vmatprep.mubr.msk.f32.mxu0 %vm447_vm0, %v7047_v53  ;;  %v420_v52 = vld [vmem:[%s20135_s6 + $0x379] sm:$0xff] }
  0xb4   : > { %v7078_v53 = vld [vmem:[%s20135_s6 + $0x17c] sm:$0xff] }
  0xb5   : > { %16634 = vmatmul.mubr.msk.f32.gmra.mrb[80].mxu1 %vm447_vm0, %v390_v54  ;;  %v421_v54 = vld [vmem:[%s20135_s6 + $0x381] sm:$0xff] }
  0xb6   : > { %17572 = vmatmul.mubr.msk.f32.gmra.mrb[12].mxu0 %vm447_vm0, %v7048_v55  ;;  %16636 = vmatprep.mubr.msk.f32.mxu1 %vm447_vm0, %v391_v56  ;;  %v7079_v55 = vld [vmem:[%s20135_s6 + $0x184] sm:$0xff] }
  0xb7   : > { %17574 = vmatprep.mubr.msk.f32.mxu0 %vm447_vm0, %v7049_v57  ;;  %v422_v56 = vld [vmem:[%s20135_s6 + $0x389] sm:$0xff] }
  0xb8   : > { %v7080_v57 = vld [vmem:[%s20135_s6 + $0x18c] sm:$0xff] }
  0xb9   : > { %16637 = vmatmul.mubr.msk.f32.gmra.mrb[82].mxu1 %vm447_vm0, %v392_v58  ;;  %v423_v58 = vld [vmem:[%s20135_s6 + $0x391] sm:$0xff] }
  0xba   : > { %17575 = vmatmul.mubr.msk.f32.gmra.mrb[14].mxu0 %vm447_vm0, %v7050_v59  ;;  %16639 = vmatprep.mubr.msk.f32.mxu1 %vm447_vm0, %v393_v60  ;;  %v7081_v59 = vld [vmem:[%s20135_s6 + $0x194] sm:$0xff] }
  0xbb   : > { %17577 = vmatprep.mubr.msk.f32.mxu0 %vm447_vm0, %v7051_v61  ;;  %v424_v60 = vld [vmem:[%s20135_s6 + $0x399] sm:$0xff] }
  0xbc   : > { %v7082_v61 = vld [vmem:[%s20135_s6 + $0x19c] sm:$0xff] }
  0xbd   : > { %16640 = vmatmul.mubr.msk.f32.gmra.mrb[84].mxu1 %vm447_vm0, %v394_v62  ;;  %v425_v62 = vld [vmem:[%s20135_s6 + $0x3a1] sm:$0xff] }
  0xbe   : > { %17578 = vmatmul.mubr.msk.f32.gmra.mrb[16].mxu0 %vm447_vm0, %v7052_v63  ;;  %16642 = vmatprep.mubr.msk.f32.mxu1 %vm447_vm0, %v395_v0  ;;  %v7083_v63 = vld [vmem:[%s20135_s6 + $0x1a4] sm:$0xff] }
  0xbf   : > { %17580 = vmatprep.mubr.msk.f32.mxu0 %vm447_vm0, %v7053_v1  ;;  %v426_v0 = vld [vmem:[%s20135_s6 + $0x3a9] sm:$0xff] }
  0xc0   : > { %v7084_v1 = vld [vmem:[%s20135_s6 + $0x1ac] sm:$0xff] }
  0xc1   : > { %16643 = vmatmul.mubr.msk.f32.gmra.mrb[86].mxu1 %vm447_vm0, %v396_v3  ;;  %v427_v3 = vld [vmem:[%s20135_s6 + $0x3b1] sm:$0xff] }
  0xc2   : > { %17581 = vmatmul.mubr.msk.f32.gmra.mrb[18].mxu0 %vm447_vm0, %v7054_v4  ;;  %16645 = vmatprep.mubr.msk.f32.mxu1 %vm447_vm0, %v397_v5  ;;  %v7085_v4 = vld [vmem:[%s20135_s6 + $0x1b4] sm:$0xff] }
  0xc3   : > { %17583 = vmatprep.mubr.msk.f32.mxu0 %vm447_vm0, %v7055_v6  ;;  %v428_v5 = vld [vmem:[%s20135_s6 + $0x3b9] sm:$0xff] }
  0xc4   : > { %v7086_v6 = vld [vmem:[%s20135_s6 + $0x1bc] sm:$0xff] }
  0xc5   : > { %16646 = vmatmul.mubr.msk.f32.gmra.mrb[88].mxu1 %vm447_vm0, %v398_v8  ;;  %v429_v8 = vld [vmem:[%s20135_s6 + $0x3c1] sm:$0xff] }
  0xc6   : > { %17584 = vmatmul.mubr.msk.f32.gmra.mrb[20].mxu0 %vm447_vm0, %v7056_v9  ;;  %16648 = vmatprep.mubr.msk.f32.mxu1 %vm447_vm0, %v399_v10  ;;  %v7087_v9 = vld [vmem:[%s20135_s6 + $0x1c4] sm:$0xff] }
  0xc7   : > { %17586 = vmatprep.mubr.msk.f32.mxu0 %vm447_vm0, %v7057_v11  ;;  %v430_v10 = vld [vmem:[%s20135_s6 + $0x3c9] sm:$0xff] }
  0xc8   : > { %v7088_v11 = vld [vmem:[%s20135_s6 + $0x1cc] sm:$0xff] }
  0xc9   : > { %16649 = vmatmul.mubr.msk.f32.gmra.mrb[90].mxu1 %vm447_vm0, %v400_v12  ;;  %v431_v12 = vld [vmem:[%s20135_s6 + $0x3d1] sm:$0xff] }
  0xca   : > { %17587 = vmatmul.mubr.msk.f32.gmra.mrb[22].mxu0 %vm447_vm0, %v7058_v13  ;;  %16651 = vmatprep.mubr.msk.f32.mxu1 %vm447_vm0, %v401_v14  ;;  %v7089_v13 = vld [vmem:[%s20135_s6 + $0x1d4] sm:$0xff] }
  0xcb   : > { %17589 = vmatprep.mubr.msk.f32.mxu0 %vm447_vm0, %v7059_v15  ;;  %v432_v14 = vld [vmem:[%s20135_s6 + $0x3d9] sm:$0xff] }
  0xcc   : > { %v7090_v15 = vld [vmem:[%s20135_s6 + $0x1dc] sm:$0xff] }
  0xcd   : > { %16652 = vmatmul.mubr.msk.f32.gmra.mrb[92].mxu1 %vm447_vm0, %v402_v16  ;;  %v433_v16 = vld [vmem:[%s20135_s6 + $0x3e1] sm:$0xff] }
  0xce   : > { %17590 = vmatmul.mubr.msk.f32.gmra.mrb[24].mxu0 %vm447_vm0, %v7060_v17  ;;  %16654 = vmatprep.mubr.msk.f32.mxu1 %vm447_vm0, %v403_v18  ;;  %v7091_v17 = vld [vmem:[%s20135_s6 + $0x1e4] sm:$0xff] }
  0xcf   : > { %17592 = vmatprep.mubr.msk.f32.mxu0 %vm447_vm0, %v7061_v19  ;;  %v434_v18 = vld [vmem:[%s20135_s6 + $0x3e9] sm:$0xff] }
  0xd0   : > { %v7092_v19 = vld [vmem:[%s20135_s6 + $0x1ec] sm:$0xff] }
  0xd1   : > { %16655 = vmatmul.mubr.msk.f32.gmra.mrb[94].mxu1 %vm447_vm0, %v404_v20  ;;  %v435_v20 = vld [vmem:[%s20135_s6 + $0x3f1] sm:$0xff] }
  0xd2   : > { %17593 = vmatmul.mubr.msk.f32.gmra.mrb[26].mxu0 %vm447_vm0, %v7062_v21  ;;  %16657 = vmatprep.mubr.msk.f32.mxu1 %vm447_vm0, %v405_v22  ;;  %v7093_v21 = vld [vmem:[%s20135_s6 + $0x1f4] sm:$0xff] }
  0xd3   : > { %17595 = vmatprep.mubr.msk.f32.mxu0 %vm447_vm0, %v7063_v23  ;;  %v436_v22 = vld [vmem:[%s20135_s6 + $0x3f9] sm:$0xff] }
  0xd4   : > { %v7094_v23 = vld [vmem:[%s20135_s6 + $0x1fc] sm:$0xff] }
  0xd5   : > { %16658 = vmatmul.mubr.msk.f32.gmra.mrb[96].mxu1 %vm447_vm0, %v406_v24  ;;  %v437_v24 = vld [vmem:[%s20135_s6 + $0x401] sm:$0xff] }
  0xd6   : > { %17596 = vmatmul.mubr.msk.f32.gmra.mrb[28].mxu0 %vm447_vm0, %v7064_v25  ;;  %16660 = vmatprep.mubr.msk.f32.mxu1 %vm447_vm0, %v407_v26  ;;  %v7095_v25 = vld [vmem:[%s20135_s6 + $0x204] sm:$0xff] }
  0xd7   : > { %17598 = vmatprep.mubr.msk.f32.mxu0 %vm447_vm0, %v7065_v27  ;;  %v438_v26 = vld [vmem:[%s20135_s6 + $0x409] sm:$0xff] }
  0xd8   : > { %v7096_v27 = vld [vmem:[%s20135_s6 + $0x20c] sm:$0xff] }
  0xd9   : > { %16661 = vmatmul.mubr.msk.f32.gmra.mrb[98].mxu1 %vm447_vm0, %v408_v28  ;;  %v439_v28 = vld [vmem:[%s20135_s6 + $0x411] sm:$0xff] }
  0xda   : > { %17599 = vmatmul.mubr.msk.f32.gmra.mrb[30].mxu0 %vm447_vm0, %v7066_v29  ;;  %16663 = vmatprep.mubr.msk.f32.mxu1 %vm447_vm0, %v409_v30  ;;  %v7097_v29 = vld [vmem:[%s20135_s6 + $0x214] sm:$0xff] }
  0xdb   : > { %17601 = vmatprep.mubr.msk.f32.mxu0 %vm447_vm0, %v7067_v31  ;;  %v440_v30 = vld [vmem:[%s20135_s6 + $0x419] sm:$0xff] }
  0xdc   : > { %v7098_v31 = vld [vmem:[%s20135_s6 + $0x21c] sm:$0xff] }
  0xdd   : > { %16664 = vmatmul.mubr.msk.f32.gmra.mrb[100].mxu1 %vm447_vm0, %v410_v32  ;;  %v441_v32 = vld [vmem:[%s20135_s6 + $0x421] sm:$0xff] }
  0xde   : > { %17602 = vmatmul.mubr.msk.f32.gmra.mrb[32].mxu0 %vm447_vm0, %v7068_v33  ;;  %16666 = vmatprep.mubr.msk.f32.mxu1 %vm447_vm0, %v411_v34  ;;  %v7099_v33 = vld [vmem:[%s20135_s6 + $0x224] sm:$0xff] }
  0xdf   : > { %17604 = vmatprep.mubr.msk.f32.mxu0 %vm447_vm0, %v7069_v35  ;;  %v442_v34 = vld [vmem:[%s20135_s6 + $0x429] sm:$0xff] }
  0xe0   : > { %v7100_v35 = vld [vmem:[%s20135_s6 + $0x22c] sm:$0xff] }
  0xe1   : > { %16667 = vmatmul.mubr.msk.f32.gmra.mrb[102].mxu1 %vm447_vm0, %v412_v36  ;;  %v443_v36 = vld [vmem:[%s20135_s6 + $0x431] sm:$0xff] }
  0xe2   : > { %17605 = vmatmul.mubr.msk.f32.gmra.mrb[34].mxu0 %vm447_vm0, %v7070_v2  ;;  %16669 = vmatprep.mubr.msk.f32.mxu1 %vm447_vm0, %v413_v37  ;;  %v7101_v2 = vld [vmem:[%s20135_s6 + $0x234] sm:$0xff] }
  0xe3   : > { %17607 = vmatprep.mubr.msk.f32.mxu0 %vm447_vm0, %v7071_v38  ;;  %v444_v37 = vld [vmem:[%s20135_s6 + $0x439] sm:$0x3f] }
  0xe4   : > { %v7102_v38 = vld [vmem:[%s20135_s6 + $0x23c] sm:$0xff] }
  0xe5   : > { %16670 = vmatmul.mubr.msk.f32.gmra.mrb[104].mxu1 %vm447_vm0, %v414_v39  ;;  %v171_v39 = vld [vmem:[%s20135_s6] sm:$0xff] }
  0xe6   : > { %17608 = vmatmul.mubr.msk.f32.gmra.mrb[36].mxu0 %vm447_vm0, %v7072_v40  ;;  %16672 = vmatprep.mubr.msk.f32.mxu1 %vm447_vm0, %v415_v42  ;;  %v7103_v40 = vld [vmem:[%s20135_s6 + $0x244] sm:$0xff] }
  0xe7   : > { %17610 = vmatprep.mubr.msk.f32.mxu0 %vm447_vm0, %v7073_v43  ;;  %v172_v42 = vld [vmem:[%s20135_s6 + $0x8] sm:$0xff] }
  0xe8   : > { %v7104_v43 = vld [vmem:[%s20135_s6 + $0x24c] sm:$0xff] }
  0xe9   : > { %16673 = vmatmul.mubr.msk.f32.gmra.mrb[106].mxu1 %vm447_vm0, %v416_v44  ;;  %v173_v44 = vld [vmem:[%s20135_s6 + $0x10] sm:$0xff] }
  0xea   : > { %17611 = vmatmul.mubr.msk.f32.gmra.mrb[38].mxu0 %vm447_vm0, %v7074_v45  ;;  %16675 = vmatprep.mubr.msk.f32.mxu1 %vm447_vm0, %v417_v46  ;;  %v7105_v45 = vld [vmem:[%s20135_s6 + $0x254] sm:$0xff] }
  0xeb   : > { %17613 = vmatprep.mubr.msk.f32.mxu0 %vm447_vm0, %v7075_v47  ;;  %v174_v46 = vld [vmem:[%s20135_s6 + $0x18] sm:$0xff] }
  0xec   : > { %v7106_v47 = vld [vmem:[%s20135_s6 + $0x25c] sm:$0xff] }
  0xed   : > { %16676 = vmatmul.mubr.msk.f32.gmra.mrb[108].mxu1 %vm447_vm0, %v418_v48  ;;  %v175_v48 = vld [vmem:[%s20135_s6 + $0x20] sm:$0xff] }
  0xee   : > { %17614 = vmatmul.mubr.msk.f32.gmra.mrb[40].mxu0 %vm447_vm0, %v7076_v49  ;;  %16678 = vmatprep.mubr.msk.f32.mxu1 %vm447_vm0, %v419_v50  ;;  %v7107_v49 = vld [vmem:[%s20135_s6 + $0x264] sm:$0xff] }
  0xef   : > { %17616 = vmatprep.mubr.msk.f32.mxu0 %vm447_vm0, %v7077_v51  ;;  %v176_v50 = vld [vmem:[%s20135_s6 + $0x28] sm:$0xff]  ;;  %v10025_v51 = vld [vmem:[%s23274_s1 + $0x70] sm:$0xff] }
  0xf1   : > { %16679 = vmatmul.mubr.msk.f32.gmra.mrb[110].mxu1 %vm447_vm0, %v420_v52  ;;  %v10026_v52 = vld [vmem:[%s23274_s1 + $0x78] sm:$0xff] }
  0xf2   : > { %17617 = vmatmul.mubr.msk.f32.gmra.mrb[42].mxu0 %vm447_vm0, %v7078_v53  ;;  %16681 = vmatprep.mubr.msk.f32.mxu1 %vm447_vm0, %v421_v54  ;;  %v177_v53 = vld [vmem:[%s20135_s6 + $0x30] sm:$0xff] }
  0xf3   : > { %17619 = vmatprep.mubr.msk.f32.mxu0 %vm447_vm0, %v7079_v55  ;;  %v7109_v54 = vld [vmem:[%s20135_s6 + $0x274] sm:$0xff]  ;;  %v20731_v55 = vpack.c.bf16 %v10026_v52, %v10025_v51  ;;  %v207_v51 = vld [vmem:[%s20135_s6 + $0x120] sm:$0xff] }
  0xf4   : > { %v7139_v52 = vld [vmem:[%s20135_s6 + $0x364] sm:$0xff] }
  0xf5   : > { %16682 = vmatmul.mubr.msk.f32.gmra.mrb[112].mxu1 %vm447_vm0, %v422_v56  ;;  %v178_v56 = vld [vmem:[%s20135_s6 + $0x38] sm:$0xff]  ;;  %18410 = vmatprep.subr.bf16.mxu0 %v20731_v55 }
  0xf6   : > { %17620 = vmatmul.mubr.msk.f32.gmra.mrb[44].mxu0 %vm447_vm0, %v7080_v57  ;;  %16684 = vmatprep.mubr.msk.f32.mxu1 %vm447_vm0, %v423_v58  ;;  %v7110_v57 = vld [vmem:[%s20135_s6 + $0x27c] sm:$0xff] }
  0xf7   : > { %17622 = vmatprep.mubr.msk.f32.mxu0 %vm447_vm0, %v7081_v59  ;;  %v179_v58 = vld [vmem:[%s20135_s6 + $0x40] sm:$0xff] }
  0xf8   : > { %v7111_v59 = vld [vmem:[%s20135_s6 + $0x284] sm:$0xff] }
  0xf9   : > { %16685 = vmatmul.mubr.msk.f32.gmra.mrb[114].mxu1 %vm447_vm0, %v424_v60  ;;  %v180_v60 = vld [vmem:[%s20135_s6 + $0x48] sm:$0xff] }
  0xfa   : > { %17623 = vmatmul.mubr.msk.f32.gmra.mrb[46].mxu0 %vm447_vm0, %v7082_v61  ;;  %16687 = vmatprep.mubr.msk.f32.mxu1 %vm447_vm0, %v425_v62  ;;  %v7112_v61 = vld [vmem:[%s20135_s6 + $0x28c] sm:$0xff] }
  0xfb   : > { %17625 = vmatprep.mubr.msk.f32.mxu0 %vm447_vm0, %v7083_v63  ;;  %v181_v62 = vld [vmem:[%s20135_s6 + $0x50] sm:$0xff] }
  0xfc   : > { %v7113_v63 = vld [vmem:[%s20135_s6 + $0x294] sm:$0xff] }
  0xfd   : > { %16688 = vmatmul.mubr.msk.f32.gmra.mrb[116].mxu1 %vm447_vm0, %v426_v0  ;;  %v182_v0 = vld [vmem:[%s20135_s6 + $0x58] sm:$0xff] }
  0xfe   : > { %17626 = vmatmul.mubr.msk.f32.gmra.mrb[48].mxu0 %vm447_vm0, %v7084_v1  ;;  %16690 = vmatprep.mubr.msk.f32.mxu1 %vm447_vm0, %v427_v3  ;;  %v7114_v1 = vld [vmem:[%s20135_s6 + $0x29c] sm:$0xff] }
  0xff   : > { %17628 = vmatprep.mubr.msk.f32.mxu0 %vm447_vm0, %v7085_v4  ;;  %v183_v3 = vld [vmem:[%s20135_s6 + $0x60] sm:$0xff] }
 0x100   : > { %v7115_v4 = vld [vmem:[%s20135_s6 + $0x2a4] sm:$0xff] }
 0x101   : > { %16691 = vmatmul.mubr.msk.f32.gmra.mrb[118].mxu1 %vm447_vm0, %v428_v5  ;;  %v184_v5 = vld [vmem:[%s20135_s6 + $0x68] sm:$0xff] }
 0x102   : > { %17629 = vmatmul.mubr.msk.f32.gmra.mrb[50].mxu0 %vm447_vm0, %v7086_v6  ;;  %16693 = vmatprep.mubr.msk.f32.mxu1 %vm447_vm0, %v429_v8  ;;  %v7116_v6 = vld [vmem:[%s20135_s6 + $0x2ac] sm:$0xff] }
 0x103   : > { %17631 = vmatprep.mubr.msk.f32.mxu0 %vm447_vm0, %v7087_v9  ;;  %v185_v8 = vld [vmem:[%s20135_s6 + $0x70] sm:$0xff] }
 0x104   : > { %v7117_v9 = vld [vmem:[%s20135_s6 + $0x2b4] sm:$0xff] }
 0x105   : > { %16694 = vmatmul.mubr.msk.f32.gmra.mrb[120].mxu1 %vm447_vm0, %v430_v10  ;;  %v186_v10 = vld [vmem:[%s20135_s6 + $0x78] sm:$0xff] }
 0x106   : > { %17632 = vmatmul.mubr.msk.f32.gmra.mrb[52].mxu0 %vm447_vm0, %v7088_v11  ;;  %16696 = vmatprep.mubr.msk.f32.mxu1 %vm447_vm0, %v431_v12  ;;  %v7118_v11 = vld [vmem:[%s20135_s6 + $0x2bc] sm:$0xff] }
 0x107   : > { %17634 = vmatprep.mubr.msk.f32.mxu0 %vm447_vm0, %v7089_v13  ;;  %v187_v12 = vld [vmem:[%s20135_s6 + $0x80] sm:$0xff] }
 0x108   : > { %v7119_v13 = vld [vmem:[%s20135_s6 + $0x2c4] sm:$0xff] }
 0x109   : > { %16697 = vmatmul.mubr.msk.f32.gmra.mrb[122].mxu1 %vm447_vm0, %v432_v14  ;;  %v188_v14 = vld [vmem:[%s20135_s6 + $0x88] sm:$0xff] }
 0x10a   : > { %17635 = vmatmul.mubr.msk.f32.gmra.mrb[54].mxu0 %vm447_vm0, %v7090_v15  ;;  %16699 = vmatprep.mubr.msk.f32.mxu1 %vm447_vm0, %v433_v16  ;;  %v7120_v15 = vld [vmem:[%s20135_s6 + $0x2cc] sm:$0xff] }
 0x10b   : > { %17637 = vmatprep.mubr.msk.f32.mxu0 %vm447_vm0, %v7091_v17  ;;  %v189_v16 = vld [vmem:[%s20135_s6 + $0x90] sm:$0xff] }
 0x10c   : > { %v7121_v17 = vld [vmem:[%s20135_s6 + $0x2d4] sm:$0xff] }
 0x10d   : > { %16700 = vmatmul.mubr.msk.f32.gmra.mrb[124].mxu1 %vm447_vm0, %v434_v18  ;;  %v190_v18 = vld [vmem:[%s20135_s6 + $0x98] sm:$0xff] }
 0x10e   : > { %17638 = vmatmul.mubr.msk.f32.gmra.mrb[56].mxu0 %vm447_vm0, %v7092_v19  ;;  %16702 = vmatprep.mubr.msk.f32.mxu1 %vm447_vm0, %v435_v20  ;;  %v7122_v19 = vld [vmem:[%s20135_s6 + $0x2dc] sm:$0xff] }
 0x10f   : > { %17640 = vmatprep.mubr.msk.f32.mxu0 %vm447_vm0, %v7093_v21  ;;  %v191_v20 = vld [vmem:[%s20135_s6 + $0xa0] sm:$0xff] }
 0x110   : > { %v7123_v21 = vld [vmem:[%s20135_s6 + $0x2e4] sm:$0xff] }
 0x111   : > { %16703 = vmatmul.mubr.msk.f32.gmra.mrb[126].mxu1 %vm447_vm0, %v436_v22  ;;  %v192_v22 = vld [vmem:[%s20135_s6 + $0xa8] sm:$0xff] }
 0x112   : > { %17641 = vmatmul.mubr.msk.f32.gmra.mrb[58].mxu0 %vm447_vm0, %v7094_v23  ;;  %16705 = vmatprep.mubr.msk.f32.mxu1 %vm447_vm0, %v437_v24  ;;  %v7124_v23 = vld [vmem:[%s20135_s6 + $0x2ec] sm:$0xff] }
 0x113   : > { %17643 = vmatprep.mubr.msk.f32.mxu0 %vm447_vm0, %v7095_v25  ;;  %v193_v24 = vld [vmem:[%s20135_s6 + $0xb0] sm:$0xff] }
 0x114   : > { %v7125_v25 = vld [vmem:[%s20135_s6 + $0x2f4] sm:$0xff] }
 0x115   : > { %16706 = vmatmul.mubr.msk.f32.gmra.mrb[128].mxu1 %vm447_vm0, %v438_v26  ;;  %v194_v26 = vld [vmem:[%s20135_s6 + $0xb8] sm:$0xff] }
 0x116   : > { %17644 = vmatmul.mubr.msk.f32.gmra.mrb[60].mxu0 %vm447_vm0, %v7096_v27  ;;  %16708 = vmatprep.mubr.msk.f32.mxu1 %vm447_vm0, %v439_v28  ;;  %v7126_v27 = vld [vmem:[%s20135_s6 + $0x2fc] sm:$0xff] }
 0x117   : > { %17646 = vmatprep.mubr.msk.f32.mxu0 %vm447_vm0, %v7097_v29  ;;  %v195_v28 = vld [vmem:[%s20135_s6 + $0xc0] sm:$0xff] }
 0x118   : > { %v7127_v29 = vld [vmem:[%s20135_s6 + $0x304] sm:$0xff] }
 0x119   : > { %16709 = vmatmul.mubr.msk.f32.gmra.mrb[130].mxu1 %vm447_vm0, %v440_v30  ;;  %v196_v30 = vld [vmem:[%s20135_s6 + $0xc8] sm:$0xff] }
 0x11a   : > { %17647 = vmatmul.mubr.msk.f32.gmra.mrb[62].mxu0 %vm447_vm0, %v7098_v31  ;;  %16711 = vmatprep.mubr.msk.f32.mxu1 %vm447_vm0, %v441_v32  ;;  %v7128_v31 = vld [vmem:[%s20135_s6 + $0x30c] sm:$0xff] }
 0x11b   : > { %17649 = vmatprep.mubr.msk.f32.mxu0 %vm447_vm0, %v7099_v33  ;;  %v197_v32 = vld [vmem:[%s20135_s6 + $0xd0] sm:$0xff] }
 0x11c   : > { %v7129_v33 = vld [vmem:[%s20135_s6 + $0x314] sm:$0xff] }
 0x11d   : > { %16712 = vmatmul.mubr.msk.f32.gmra.mrb[132].mxu1 %vm447_vm0, %v442_v34  ;;  %v198_v34 = vld [vmem:[%s20135_s6 + $0xd8] sm:$0xff] }
 0x11e   : > { %17650 = vmatmul.mubr.msk.f32.gmra.mrb[64].mxu0 %vm447_vm0, %v7100_v35  ;;  %16714 = vmatprep.mubr.msk.f32.mxu1 %vm447_vm0, %v443_v36  ;;  %v7130_v35 = vld [vmem:[%s20135_s6 + $0x31c] sm:$0xff] }
 0x11f   : > { %17652 = vmatprep.mubr.msk.f32.mxu0 %vm447_vm0, %v7101_v2  ;;  %v199_v36 = vld [vmem:[%s20135_s6 + $0xe0] sm:$0xff] }
 0x120   : > { %v7131_v2 = vld [vmem:[%s20135_s6 + $0x324] sm:$0xff] }
 0x121   : > { %16715 = vmatmul.mubr.msk.f32.gmra.mrb[134].mxu1 %vm447_vm0, %v444_v37  ;;  %v200_v37 = vld [vmem:[%s20135_s6 + $0xe8] sm:$0xff] }
 0x122   : > { %17653 = vmatmul.mubr.msk.f32.gmra.mrb[66].mxu0 %vm447_vm0, %v7102_v38  ;;  %16721 = vmatprep.mubr.msk.f32.mxu1 %vm447_vm0, %v171_v39  ;;  %v7132_v38 = vld [vmem:[%s20135_s6 + $0x32c] sm:$0xff] }
 0x123   : > { %17655 = vmatprep.mubr.msk.f32.mxu0 %vm447_vm0, %v7103_v40  ;;  %v201_v39 = vld [vmem:[%s20135_s6 + $0xf0] sm:$0xff] }
 0x124   : > { %v7133_v40 = vld [vmem:[%s20135_s6 + $0x334] sm:$0xff] }
 0x125   : > { %16722 = vmatmul.mubr.msk.f32.vlgmr.msra.gmra.mrb[0].mxu1 %vm447_vm0, %v172_v42  ;;  %v202_v42 = vld [vmem:[%s20135_s6 + $0xf8] sm:$0xff] }
 0x126   : > { %17656 = vmatmul.mubr.msk.f32.gmra.mrb[68].mxu0 %vm447_vm0, %v7104_v43  ;;  %18392 = vmatpush3.bf16.msra.mxu1 %v20449_v41  ;;  %v7108_v41 = vld [vmem:[%s20135_s6 + $0x26c] sm:$0xff]  ;;  %v7134_v43 = vld [vmem:[%s20135_s6 + $0x33c] sm:$0xff] }
 0x127   : > { %16724 = vmatprep.mubr.msk.f32.mxu1 %vm447_vm0, %v173_v44  ;;  %17658 = vmatprep.mubr.msk.f32.mxu0 %vm447_vm0, %v7105_v45  ;;  %v203_v44 = vld [vmem:[%s20135_s6 + $0x100] sm:$0xff] }
 0x128   : > { %v7135_v45 = vld [vmem:[%s20135_s6 + $0x344] sm:$0xff] }
 0x129   : > { %16725 = vmatmul.mubr.msk.f32.gmra.mrb[2].mxu1 %vm447_vm0, %v174_v46  ;;  %v204_v46 = vld [vmem:[%s20135_s6 + $0x108] sm:$0xff] }
 0x12a   : > { %17659 = vmatmul.mubr.msk.f32.gmra.mrb[70].mxu0 %vm447_vm0, %v7106_v47  ;;  %16727 = vmatprep.mubr.msk.f32.mxu1 %vm447_vm0, %v175_v48  ;;  %v7136_v47 = vld [vmem:[%s20135_s6 + $0x34c] sm:$0xff] }
 0x12b   : > { %17661 = vmatprep.mubr.msk.f32.mxu0 %vm447_vm0, %v7107_v49  ;;  %v205_v48 = vld [vmem:[%s20135_s6 + $0x110] sm:$0xff] }
 0x12c   : > { %v7137_v49 = vld [vmem:[%s20135_s6 + $0x354] sm:$0xff] }
 0x12d   : > { %16728 = vmatmul.mubr.msk.f32.gmra.mrb[4].mxu1 %vm447_vm0, %v176_v50  ;;  %v206_v50 = vld [vmem:[%s20135_s6 + $0x118] sm:$0xff] }
 0x12e   : > { %17662 = vmatmul.mubr.msk.f32.gmra.mrb[72].mxu0 %vm447_vm0, %v7108_v41  ;;  %16730 = vmatprep.mubr.msk.f32.mxu1 %vm447_vm0, %v177_v53  ;;  %v7138_v41 = vld [vmem:[%s20135_s6 + $0x35c] sm:$0xff]  ;;  %v208_v53 = vld [vmem:[%s20135_s6 + $0x128] sm:$0xff] }
 0x12f   : > { %17664 = vmatprep.mubr.msk.f32.mxu0 %vm447_vm0, %v7109_v54  ;;  %v7140_v54 = vld [vmem:[%s20135_s6 + $0x36c] sm:$0xff] }
 0x131   : > { %16731 = vmatmul.mubr.msk.f32.gmra.mrb[6].mxu1 %vm447_vm0, %v178_v56  ;;  %v209_v56 = vld [vmem:[%s20135_s6 + $0x130] sm:$0xff] }
 0x132   : > { %17665 = vmatmul.mubr.msk.f32.gmra.mrb[74].mxu0 %vm447_vm0, %v7110_v57  ;;  %16733 = vmatprep.mubr.msk.f32.mxu1 %vm447_vm0, %v179_v58  ;;  %v7141_v57 = vld [vmem:[%s20135_s6 + $0x374] sm:$0xff] }
 0x133   : > { %17667 = vmatprep.mubr.msk.f32.mxu0 %vm447_vm0, %v7111_v59  ;;  %v210_v58 = vld [vmem:[%s20135_s6 + $0x138] sm:$0xff] }
 0x134   : > { %v7142_v59 = vld [vmem:[%s20135_s6 + $0x37c] sm:$0xff] }
 0x135   : > { %16734 = vmatmul.mubr.msk.f32.gmra.mrb[8].mxu1 %vm447_vm0, %v180_v60  ;;  %v211_v60 = vld [vmem:[%s20135_s6 + $0x140] sm:$0xff] }
 0x136   : > { %17668 = vmatmul.mubr.msk.f32.gmra.mrb[76].mxu0 %vm447_vm0, %v7112_v61  ;;  %16736 = vmatprep.mubr.msk.f32.mxu1 %vm447_vm0, %v181_v62  ;;  %v7143_v61 = vld [vmem:[%s20135_s6 + $0x384] sm:$0xff] }
 0x137   : > { %17670 = vmatprep.mubr.msk.f32.mxu0 %vm447_vm0, %v7113_v63  ;;  %v212_v62 = vld [vmem:[%s20135_s6 + $0x148] sm:$0xff] }
 0x138   : > { %v7144_v63 = vld [vmem:[%s20135_s6 + $0x38c] sm:$0xff] }
 0x139   : > { %16737 = vmatmul.mubr.msk.f32.gmra.mrb[10].mxu1 %vm447_vm0, %v182_v0  ;;  %v213_v0 = vld [vmem:[%s20135_s6 + $0x150] sm:$0xff] }
 0x13a   : > { %17671 = vmatmul.mubr.msk.f32.gmra.mrb[78].mxu0 %vm447_vm0, %v7114_v1  ;;  %16739 = vmatprep.mubr.msk.f32.mxu1 %vm447_vm0, %v183_v3  ;;  %v7145_v1 = vld [vmem:[%s20135_s6 + $0x394] sm:$0xff] }
 0x13b   : > { %17673 = vmatprep.mubr.msk.f32.mxu0 %vm447_vm0, %v7115_v4  ;;  %v214_v3 = vld [vmem:[%s20135_s6 + $0x158] sm:$0xff] }
 0x13c   : > { %v7146_v4 = vld [vmem:[%s20135_s6 + $0x39c] sm:$0xff] }
 0x13d   : > { %16740 = vmatmul.mubr.msk.f32.gmra.mrb[12].mxu1 %vm447_vm0, %v184_v5  ;;  %v215_v5 = vld [vmem:[%s20135_s6 + $0x160] sm:$0xff] }
 0x13e   : > { %17674 = vmatmul.mubr.msk.f32.gmra.mrb[80].mxu0 %vm447_vm0, %v7116_v6  ;;  %16742 = vmatprep.mubr.msk.f32.mxu1 %vm447_vm0, %v185_v8  ;;  %v7147_v6 = vld [vmem:[%s20135_s6 + $0x3a4] sm:$0xff] }
 0x13f   : > { %17676 = vmatprep.mubr.msk.f32.mxu0 %vm447_vm0, %v7117_v9  ;;  %v216_v8 = vld [vmem:[%s20135_s6 + $0x168] sm:$0xff] }
 0x140   : > { %v7148_v9 = vld [vmem:[%s20135_s6 + $0x3ac] sm:$0xff] }
 0x141   : > { %16743 = vmatmul.mubr.msk.f32.gmra.mrb[14].mxu1 %vm447_vm0, %v186_v10  ;;  %v217_v10 = vld [vmem:[%s20135_s6 + $0x170] sm:$0xff] }
 0x142   : > { %17677 = vmatmul.mubr.msk.f32.gmra.mrb[82].mxu0 %vm447_vm0, %v7118_v11  ;;  %16745 = vmatprep.mubr.msk.f32.mxu1 %vm447_vm0, %v187_v12  ;;  %v7149_v11 = vld [vmem:[%s20135_s6 + $0x3b4] sm:$0xff] }
 0x143   : > { %17679 = vmatprep.mubr.msk.f32.mxu0 %vm447_vm0, %v7119_v13  ;;  %v218_v12 = vld [vmem:[%s20135_s6 + $0x178] sm:$0xff] }
 0x144   : > { %v7150_v13 = vld [vmem:[%s20135_s6 + $0x3bc] sm:$0xff] }
 0x145   : > { %16746 = vmatmul.mubr.msk.f32.gmra.mrb[16].mxu1 %vm447_vm0, %v188_v14  ;;  %v219_v14 = vld [vmem:[%s20135_s6 + $0x180] sm:$0xff] }
 0x146   : > { %17680 = vmatmul.mubr.msk.f32.gmra.mrb[84].mxu0 %vm447_vm0, %v7120_v15  ;;  %16748 = vmatprep.mubr.msk.f32.mxu1 %vm447_vm0, %v189_v16  ;;  %v7151_v15 = vld [vmem:[%s20135_s6 + $0x3c4] sm:$0xff] }
 0x147   : > { %17682 = vmatprep.mubr.msk.f32.mxu0 %vm447_vm0, %v7121_v17  ;;  %v220_v16 = vld [vmem:[%s20135_s6 + $0x188] sm:$0xff] }
 0x148   : > { %v7152_v17 = vld [vmem:[%s20135_s6 + $0x3cc] sm:$0xff] }
 0x149   : > { %16749 = vmatmul.mubr.msk.f32.gmra.mrb[18].mxu1 %vm447_vm0, %v190_v18  ;;  %v221_v18 = vld [vmem:[%s20135_s6 + $0x190] sm:$0xff] }
 0x14a   : > { %17683 = vmatmul.mubr.msk.f32.gmra.mrb[86].mxu0 %vm447_vm0, %v7122_v19  ;;  %16751 = vmatprep.mubr.msk.f32.mxu1 %vm447_vm0, %v191_v20  ;;  %v7153_v19 = vld [vmem:[%s20135_s6 + $0x3d4] sm:$0xff] }
 0x14b   : > { %17685 = vmatprep.mubr.msk.f32.mxu0 %vm447_vm0, %v7123_v21  ;;  %v222_v20 = vld [vmem:[%s20135_s6 + $0x198] sm:$0xff] }
 0x14c   : > { %v7154_v21 = vld [vmem:[%s20135_s6 + $0x3dc] sm:$0xff] }
 0x14d   : > { %16752 = vmatmul.mubr.msk.f32.gmra.mrb[20].mxu1 %vm447_vm0, %v192_v22  ;;  %v223_v22 = vld [vmem:[%s20135_s6 + $0x1a0] sm:$0xff] }
 0x14e   : > { %17686 = vmatmul.mubr.msk.f32.gmra.mrb[88].mxu0 %vm447_vm0, %v7124_v23  ;;  %16754 = vmatprep.mubr.msk.f32.mxu1 %vm447_vm0, %v193_v24  ;;  %v7155_v23 = vld [vmem:[%s20135_s6 + $0x3e4] sm:$0xff] }
 0x14f   : > { %17688 = vmatprep.mubr.msk.f32.mxu0 %vm447_vm0, %v7125_v25  ;;  %v224_v24 = vld [vmem:[%s20135_s6 + $0x1a8] sm:$0xff] }
 0x150   : > { %v7156_v25 = vld [vmem:[%s20135_s6 + $0x3ec] sm:$0xff] }
 0x151   : > { %16755 = vmatmul.mubr.msk.f32.gmra.mrb[22].mxu1 %vm447_vm0, %v194_v26  ;;  %v225_v26 = vld [vmem:[%s20135_s6 + $0x1b0] sm:$0xff] }
 0x152   : > { %17689 = vmatmul.mubr.msk.f32.gmra.mrb[90].mxu0 %vm447_vm0, %v7126_v27  ;;  %16757 = vmatprep.mubr.msk.f32.mxu1 %vm447_vm0, %v195_v28  ;;  %v7157_v27 = vld [vmem:[%s20135_s6 + $0x3f4] sm:$0xff] }
 0x153   : > { %17691 = vmatprep.mubr.msk.f32.mxu0 %vm447_vm0, %v7127_v29  ;;  %v226_v28 = vld [vmem:[%s20135_s6 + $0x1b8] sm:$0xff] }
 0x154   : > { %v7158_v29 = vld [vmem:[%s20135_s6 + $0x3fc] sm:$0xff] }
 0x155   : > { %16758 = vmatmul.mubr.msk.f32.gmra.mrb[24].mxu1 %vm447_vm0, %v196_v30  ;;  %v227_v30 = vld [vmem:[%s20135_s6 + $0x1c0] sm:$0xff] }
 0x156   : > { %17692 = vmatmul.mubr.msk.f32.gmra.mrb[92].mxu0 %vm447_vm0, %v7128_v31  ;;  %16760 = vmatprep.mubr.msk.f32.mxu1 %vm447_vm0, %v197_v32  ;;  %v7159_v31 = vld [vmem:[%s20135_s6 + $0x404] sm:$0xff] }
 0x157   : > { %17694 = vmatprep.mubr.msk.f32.mxu0 %vm447_vm0, %v7129_v33  ;;  %v228_v32 = vld [vmem:[%s20135_s6 + $0x1c8] sm:$0xff] }
 0x158   : > { %v7160_v33 = vld [vmem:[%s20135_s6 + $0x40c] sm:$0xff] }
 0x159   : > { %16761 = vmatmul.mubr.msk.f32.gmra.mrb[26].mxu1 %vm447_vm0, %v198_v34  ;;  %v229_v34 = vld [vmem:[%s20135_s6 + $0x1d0] sm:$0xff] }
 0x15a   : > { %17695 = vmatmul.mubr.msk.f32.gmra.mrb[94].mxu0 %vm447_vm0, %v7130_v35  ;;  %16763 = vmatprep.mubr.msk.f32.mxu1 %vm447_vm0, %v199_v36  ;;  %v7161_v35 = vld [vmem:[%s20135_s6 + $0x414] sm:$0xff] }
 0x15b   : > { %17697 = vmatprep.mubr.msk.f32.mxu0 %vm447_vm0, %v7131_v2  ;;  %v230_v36 = vld [vmem:[%s20135_s6 + $0x1d8] sm:$0xff] }
 0x15c   : > { %v7162_v2 = vld [vmem:[%s20135_s6 + $0x41c] sm:$0xff] }
 0x15d   : > { %16764 = vmatmul.mubr.msk.f32.gmra.mrb[28].mxu1 %vm447_vm0, %v200_v37  ;;  %v231_v37 = vld [vmem:[%s20135_s6 + $0x1e0] sm:$0xff] }
 0x15e   : > { %17698 = vmatmul.mubr.msk.f32.gmra.mrb[96].mxu0 %vm447_vm0, %v7132_v38  ;;  %16766 = vmatprep.mubr.msk.f32.mxu1 %vm447_vm0, %v201_v39  ;;  %v7163_v38 = vld [vmem:[%s20135_s6 + $0x424] sm:$0xff] }
 0x15f   : > { %17700 = vmatprep.mubr.msk.f32.mxu0 %vm447_vm0, %v7133_v40  ;;  %v232_v39 = vld [vmem:[%s20135_s6 + $0x1e8] sm:$0xff] }
 0x160   : > { %v7164_v40 = vld [vmem:[%s20135_s6 + $0x42c] sm:$0xff] }
 0x161   : > { %16767 = vmatmul.mubr.msk.f32.gmra.mrb[30].mxu1 %vm447_vm0, %v202_v42  ;;  %v233_v42 = vld [vmem:[%s20135_s6 + $0x1f0] sm:$0xff] }
 0x162   : > { %17701 = vmatmul.mubr.msk.f32.gmra.mrb[98].mxu0 %vm447_vm0, %v7134_v43  ;;  %16769 = vmatprep.mubr.msk.f32.mxu1 %vm447_vm0, %v203_v44  ;;  %v7165_v43 = vld [vmem:[%s20135_s6 + $0x434] sm:$0xff] }
 0x163   : > { %17703 = vmatprep.mubr.msk.f32.mxu0 %vm447_vm0, %v7135_v45  ;;  %v234_v44 = vld [vmem:[%s20135_s6 + $0x1f8] sm:$0xff] }
 0x164   : > { %v7166_v45 = vld [vmem:[%s20135_s6 + $0x43c] sm:$0xff] }
 0x165   : > { %16770 = vmatmul.mubr.msk.f32.gmra.mrb[32].mxu1 %vm447_vm0, %v204_v46  ;;  %v235_v46 = vld [vmem:[%s20135_s6 + $0x200] sm:$0xff] }
 0x166   : > { %17704 = vmatmul.mubr.msk.f32.gmra.mrb[100].mxu0 %vm447_vm0, %v7136_v47  ;;  %16772 = vmatprep.mubr.msk.f32.mxu1 %vm447_vm0, %v205_v48  ;;  %v7167_v47 = vld [vmem:[%s20135_s6 + $0x444] sm:$0xff] }
 0x167   : > { %17706 = vmatprep.mubr.msk.f32.mxu0 %vm447_vm0, %v7137_v49  ;;  %v236_v48 = vld [vmem:[%s20135_s6 + $0x208] sm:$0xff] }
 0x168   : > { %v7168_v49 = vld [vmem:[%s20135_s6 + $0x44c] sm:$0xff] }
 0x169   : > { %16773 = vmatmul.mubr.msk.f32.gmra.mrb[34].mxu1 %vm447_vm0, %v206_v50  ;;  %v237_v50 = vld [vmem:[%s20135_s6 + $0x210] sm:$0xff] }
 0x16a   : > { %17707 = vmatmul.mubr.msk.f32.gmra.mrb[102].mxu0 %vm447_vm0, %v7138_v41  ;;  %16775 = vmatprep.mubr.msk.f32.mxu1 %vm447_vm0, %v207_v51  ;;  %v7169_v41 = vld [vmem:[%s20135_s6 + $0x454] sm:$0xff] }
 0x16b   : > { %17709 = vmatprep.mubr.msk.f32.mxu0 %vm447_vm0, %v7139_v52  ;;  %v238_v51 = vld [vmem:[%s20135_s6 + $0x218] sm:$0xff] }
 0x16c   : > { %v7170_v52 = vld [vmem:[%s20135_s6 + $0x45c] sm:$0x3f] }
 0x16d   : > { %16776 = vmatmul.mubr.msk.f32.gmra.mrb[36].mxu1 %vm447_vm0, %v208_v53  ;;  %v239_v53 = vld [vmem:[%s20135_s6 + $0x220] sm:$0xff] }
 0x16e   : > { %17710 = vmatmul.mubr.msk.f32.gmra.mrb[104].mxu0 %vm447_vm0, %v7140_v54  ;;  %16778 = vmatprep.mubr.msk.f32.mxu1 %vm447_vm0, %v209_v56  ;;  %v8462_v54 = vld [vmem:[%s20135_s6 + $0x44] sm:$0xff] }
 0x16f   : > { %17712 = vmatprep.mubr.msk.f32.mxu0 %vm447_vm0, %v7141_v57  ;;  %v240_v56 = vld [vmem:[%s20135_s6 + $0x228] sm:$0xff] }
 0x170   : > { %v8463_v57 = vld [vmem:[%s20135_s6 + $0x4c] sm:$0xff] }
 0x171   : > { %16779 = vmatmul.mubr.msk.f32.gmra.mrb[38].mxu1 %vm447_vm0, %v210_v58  ;;  %v241_v58 = vld [vmem:[%s20135_s6 + $0x230] sm:$0xff] }
 0x172   : > { %17713 = vmatmul.mubr.msk.f32.gmra.mrb[106].mxu0 %vm447_vm0, %v7142_v59  ;;  %16781 = vmatprep.mubr.msk.f32.mxu1 %vm447_vm0, %v211_v60  ;;  %v8464_v59 = vld [vmem:[%s20135_s6 + $0x54] sm:$0xff] }
 0x173   : > { %17715 = vmatprep.mubr.msk.f32.mxu0 %vm447_vm0, %v7143_v61  ;;  %v242_v60 = vld [vmem:[%s20135_s6 + $0x238] sm:$0xff] }
 0x174   : > { %v8465_v61 = vld [vmem:[%s20135_s6 + $0x5c] sm:$0xff] }
 0x175   : > { %16782 = vmatmul.mubr.msk.f32.gmra.mrb[40].mxu1 %vm447_vm0, %v212_v62  ;;  %v243_v62 = vld [vmem:[%s20135_s6 + $0x240] sm:$0xff] }
 0x176   : > { %17716 = vmatmul.mubr.msk.f32.gmra.mrb[108].mxu0 %vm447_vm0, %v7144_v63  ;;  %16784 = vmatprep.mubr.msk.f32.mxu1 %vm447_vm0, %v213_v0  ;;  %v8466_v63 = vld [vmem:[%s20135_s6 + $0x64] sm:$0xff] }
 0x177   : > { %17718 = vmatprep.mubr.msk.f32.mxu0 %vm447_vm0, %v7145_v1  ;;  %v244_v0 = vld [vmem:[%s20135_s6 + $0x248] sm:$0xff]  ;;  %v4317_v1 = vld [vmem:[%s23274_s1 + $0x30] sm:$0xff] }
 0x179   : > { %16785 = vmatmul.mubr.msk.f32.gmra.mrb[42].mxu1 %vm447_vm0, %v214_v3  ;;  %v4318_v3 = vld [vmem:[%s23274_s1 + $0x38] sm:$0xff] }
 0x17a   : > { %17719 = vmatmul.mubr.msk.f32.gmra.mrb[110].mxu0 %vm447_vm0, %v7146_v4  ;;  %16787 = vmatprep.mubr.msk.f32.mxu1 %vm447_vm0, %v215_v5  ;;  %v245_v4 = vld [vmem:[%s20135_s6 + $0x250] sm:$0xff] }
 0x17b   : > { %17721 = vmatprep.mubr.msk.f32.mxu0 %vm447_vm0, %v7147_v6  ;;  %v8468_v5 = vld [vmem:[%s20135_s6 + $0x74] sm:$0xff]  ;;  %v21013_v6 = vpack.c.bf16 %v4318_v3, %v4317_v1  ;;  %v275_v1 = vld [vmem:[%s20135_s6 + $0x340] sm:$0xff] }
 0x17c   : > { %v8498_v3 = vld [vmem:[%s20135_s6 + $0x164] sm:$0xff] }
 0x17d   : > { %16788 = vmatmul.mubr.msk.f32.gmra.mrb[44].mxu1 %vm447_vm0, %v216_v8  ;;  %v246_v8 = vld [vmem:[%s20135_s6 + $0x258] sm:$0xff]  ;;  %18394 = vmatprep.subr.bf16.mxu1 %v21013_v6 }
 0x17e   : > { %17722 = vmatmul.mubr.msk.f32.gmra.mrb[112].mxu0 %vm447_vm0, %v7148_v9  ;;  %16790 = vmatprep.mubr.msk.f32.mxu1 %vm447_vm0, %v217_v10  ;;  %v8469_v9 = vld [vmem:[%s20135_s6 + $0x7c] sm:$0xff] }
 0x17f   : > { %17724 = vmatprep.mubr.msk.f32.mxu0 %vm447_vm0, %v7149_v11  ;;  %v247_v10 = vld [vmem:[%s20135_s6 + $0x260] sm:$0xff] }
 0x180   : > { %v8470_v11 = vld [vmem:[%s20135_s6 + $0x84] sm:$0xff] }
 0x181   : > { %16791 = vmatmul.mubr.msk.f32.gmra.mrb[46].mxu1 %vm447_vm0, %v218_v12  ;;  %v248_v12 = vld [vmem:[%s20135_s6 + $0x268] sm:$0xff] }
 0x182   : > { %17725 = vmatmul.mubr.msk.f32.gmra.mrb[114].mxu0 %vm447_vm0, %v7150_v13  ;;  %16793 = vmatprep.mubr.msk.f32.mxu1 %vm447_vm0, %v219_v14  ;;  %v8471_v13 = vld [vmem:[%s20135_s6 + $0x8c] sm:$0xff] }
 0x183   : > { %17727 = vmatprep.mubr.msk.f32.mxu0 %vm447_vm0, %v7151_v15  ;;  %v249_v14 = vld [vmem:[%s20135_s6 + $0x270] sm:$0xff] }
 0x184   : > { %v8472_v15 = vld [vmem:[%s20135_s6 + $0x94] sm:$0xff] }
 0x185   : > { %16794 = vmatmul.mubr.msk.f32.gmra.mrb[48].mxu1 %vm447_vm0, %v220_v16  ;;  %v250_v16 = vld [vmem:[%s20135_s6 + $0x278] sm:$0xff] }
 0x186   : > { %17728 = vmatmul.mubr.msk.f32.gmra.mrb[116].mxu0 %vm447_vm0, %v7152_v17  ;;  %16796 = vmatprep.mubr.msk.f32.mxu1 %vm447_vm0, %v221_v18  ;;  %v8473_v17 = vld [vmem:[%s20135_s6 + $0x9c] sm:$0xff] }
 0x187   : > { %17730 = vmatprep.mubr.msk.f32.mxu0 %vm447_vm0, %v7153_v19  ;;  %v251_v18 = vld [vmem:[%s20135_s6 + $0x280] sm:$0xff] }
 0x188   : > { %v8474_v19 = vld [vmem:[%s20135_s6 + $0xa4] sm:$0xff] }
 0x189   : > { %16797 = vmatmul.mubr.msk.f32.gmra.mrb[50].mxu1 %vm447_vm0, %v222_v20  ;;  %v252_v20 = vld [vmem:[%s20135_s6 + $0x288] sm:$0xff] }
 0x18a   : > { %17731 = vmatmul.mubr.msk.f32.gmra.mrb[118].mxu0 %vm447_vm0, %v7154_v21  ;;  %16799 = vmatprep.mubr.msk.f32.mxu1 %vm447_vm0, %v223_v22  ;;  %v8475_v21 = vld [vmem:[%s20135_s6 + $0xac] sm:$0xff] }
 0x18b   : > { %17733 = vmatprep.mubr.msk.f32.mxu0 %vm447_vm0, %v7155_v23  ;;  %v253_v22 = vld [vmem:[%s20135_s6 + $0x290] sm:$0xff] }
 0x18c   : > { %v8476_v23 = vld [vmem:[%s20135_s6 + $0xb4] sm:$0xff] }
 0x18d   : > { %16800 = vmatmul.mubr.msk.f32.gmra.mrb[52].mxu1 %vm447_vm0, %v224_v24  ;;  %v254_v24 = vld [vmem:[%s20135_s6 + $0x298] sm:$0xff] }
 0x18e   : > { %17734 = vmatmul.mubr.msk.f32.gmra.mrb[120].mxu0 %vm447_vm0, %v7156_v25  ;;  %16802 = vmatprep.mubr.msk.f32.mxu1 %vm447_vm0, %v225_v26  ;;  %v8477_v25 = vld [vmem:[%s20135_s6 + $0xbc] sm:$0xff] }
 0x18f   : > { %17736 = vmatprep.mubr.msk.f32.mxu0 %vm447_vm0, %v7157_v27  ;;  %v255_v26 = vld [vmem:[%s20135_s6 + $0x2a0] sm:$0xff] }
 0x190   : > { %v8478_v27 = vld [vmem:[%s20135_s6 + $0xc4] sm:$0xff] }
 0x191   : > { %16803 = vmatmul.mubr.msk.f32.gmra.mrb[54].mxu1 %vm447_vm0, %v226_v28  ;;  %v256_v28 = vld [vmem:[%s20135_s6 + $0x2a8] sm:$0xff] }
 0x192   : > { %17737 = vmatmul.mubr.msk.f32.gmra.mrb[122].mxu0 %vm447_vm0, %v7158_v29  ;;  %16805 = vmatprep.mubr.msk.f32.mxu1 %vm447_vm0, %v227_v30  ;;  %v8479_v29 = vld [vmem:[%s20135_s6 + $0xcc] sm:$0xff] }
 0x193   : > { %17739 = vmatprep.mubr.msk.f32.mxu0 %vm447_vm0, %v7159_v31  ;;  %v257_v30 = vld [vmem:[%s20135_s6 + $0x2b0] sm:$0xff] }
 0x194   : > { %v8480_v31 = vld [vmem:[%s20135_s6 + $0xd4] sm:$0xff] }
 0x195   : > { %16806 = vmatmul.mubr.msk.f32.gmra.mrb[56].mxu1 %vm447_vm0, %v228_v32  ;;  %v258_v32 = vld [vmem:[%s20135_s6 + $0x2b8] sm:$0xff] }
 0x196   : > { %17740 = vmatmul.mubr.msk.f32.gmra.mrb[124].mxu0 %vm447_vm0, %v7160_v33  ;;  %16808 = vmatprep.mubr.msk.f32.mxu1 %vm447_vm0, %v229_v34  ;;  %v8481_v33 = vld [vmem:[%s20135_s6 + $0xdc] sm:$0xff] }
 0x197   : > { %17742 = vmatprep.mubr.msk.f32.mxu0 %vm447_vm0, %v7161_v35  ;;  %v259_v34 = vld [vmem:[%s20135_s6 + $0x2c0] sm:$0xff] }
 0x198   : > { %v8482_v35 = vld [vmem:[%s20135_s6 + $0xe4] sm:$0xff] }
 0x199   : > { %16809 = vmatmul.mubr.msk.f32.gmra.mrb[58].mxu1 %vm447_vm0, %v230_v36  ;;  %v260_v36 = vld [vmem:[%s20135_s6 + $0x2c8] sm:$0xff] }
 0x19a   : > { %17743 = vmatmul.mubr.msk.f32.gmra.mrb[126].mxu0 %vm447_vm0, %v7162_v2  ;;  %16811 = vmatprep.mubr.msk.f32.mxu1 %vm447_vm0, %v231_v37  ;;  %v8483_v2 = vld [vmem:[%s20135_s6 + $0xec] sm:$0xff] }
 0x19b   : > { %17745 = vmatprep.mubr.msk.f32.mxu0 %vm447_vm0, %v7163_v38  ;;  %v261_v37 = vld [vmem:[%s20135_s6 + $0x2d0] sm:$0xff] }
 0x19c   : > { %v8484_v38 = vld [vmem:[%s20135_s6 + $0xf4] sm:$0xff] }
 0x19d   : > { %16812 = vmatmul.mubr.msk.f32.gmra.mrb[60].mxu1 %vm447_vm0, %v232_v39  ;;  %v262_v39 = vld [vmem:[%s20135_s6 + $0x2d8] sm:$0xff] }
 0x19e   : > { %17746 = vmatmul.mubr.msk.f32.gmra.mrb[128].mxu0 %vm447_vm0, %v7164_v40  ;;  %16814 = vmatprep.mubr.msk.f32.mxu1 %vm447_vm0, %v233_v42  ;;  %v8485_v40 = vld [vmem:[%s20135_s6 + $0xfc] sm:$0xff] }
 0x19f   : > { %17748 = vmatprep.mubr.msk.f32.mxu0 %vm447_vm0, %v7165_v43  ;;  %v263_v42 = vld [vmem:[%s20135_s6 + $0x2e0] sm:$0xff] }
 0x1a0   : > { %v8486_v43 = vld [vmem:[%s20135_s6 + $0x104] sm:$0xff] }
 0x1a1   : > { %16815 = vmatmul.mubr.msk.f32.gmra.mrb[62].mxu1 %vm447_vm0, %v234_v44  ;;  %v264_v44 = vld [vmem:[%s20135_s6 + $0x2e8] sm:$0xff] }
 0x1a2   : > { %17749 = vmatmul.mubr.msk.f32.gmra.mrb[130].mxu0 %vm447_vm0, %v7166_v45  ;;  %16817 = vmatprep.mubr.msk.f32.mxu1 %vm447_vm0, %v235_v46  ;;  %v8487_v45 = vld [vmem:[%s20135_s6 + $0x10c] sm:$0xff] }
 0x1a3   : > { %17751 = vmatprep.mubr.msk.f32.mxu0 %vm447_vm0, %v7167_v47  ;;  %v265_v46 = vld [vmem:[%s20135_s6 + $0x2f0] sm:$0xff] }
 0x1a4   : > { %v8488_v47 = vld [vmem:[%s20135_s6 + $0x114] sm:$0xff] }
 0x1a5   : > { %16818 = vmatmul.mubr.msk.f32.gmra.mrb[64].mxu1 %vm447_vm0, %v236_v48  ;;  %v266_v48 = vld [vmem:[%s20135_s6 + $0x2f8] sm:$0xff] }
 0x1a6   : > { %17752 = vmatmul.mubr.msk.f32.gmra.mrb[132].mxu0 %vm447_vm0, %v7168_v49  ;;  %16820 = vmatprep.mubr.msk.f32.mxu1 %vm447_vm0, %v237_v50  ;;  %v8489_v49 = vld [vmem:[%s20135_s6 + $0x11c] sm:$0xff] }
 0x1a7   : > { %17754 = vmatprep.mubr.msk.f32.mxu0 %vm447_vm0, %v7169_v41  ;;  %v267_v50 = vld [vmem:[%s20135_s6 + $0x300] sm:$0xff] }
 0x1a8   : > { %v8490_v41 = vld [vmem:[%s20135_s6 + $0x124] sm:$0xff] }
 0x1a9   : > { %16821 = vmatmul.mubr.msk.f32.gmra.mrb[66].mxu1 %vm447_vm0, %v238_v51  ;;  %v268_v51 = vld [vmem:[%s20135_s6 + $0x308] sm:$0xff] }
 0x1aa   : > { %17755 = vmatmul.mubr.msk.f32.gmra.mrb[134].mxu0 %vm447_vm0, %v7170_v52  ;;  %16823 = vmatprep.mubr.msk.f32.mxu1 %vm447_vm0, %v239_v53  ;;  %v8491_v52 = vld [vmem:[%s20135_s6 + $0x12c] sm:$0xff] }
 0x1ab   : > { %17761 = vmatprep.mubr.msk.f32.mxu0 %vm447_vm0, %v8462_v54  ;;  %v269_v53 = vld [vmem:[%s20135_s6 + $0x310] sm:$0xff] }
 0x1ac   : > { %v8492_v54 = vld [vmem:[%s20135_s6 + $0x134] sm:$0xff] }
 0x1ad   : > { %16824 = vmatmul.mubr.msk.f32.gmra.mrb[68].mxu1 %vm447_vm0, %v240_v56  ;;  %v270_v56 = vld [vmem:[%s20135_s6 + $0x318] sm:$0xff] }
 0x1ae   : > { %17762 = vmatmul.mubr.msk.f32.vlgmr.msra.gmra.mrb[0].mxu0 %vm447_vm0, %v8463_v57  ;;  %16826 = vmatprep.mubr.msk.f32.mxu1 %vm447_vm0, %v241_v58  ;;  %v8493_v57 = vld [vmem:[%s20135_s6 + $0x13c] sm:$0xff] }
 0x1af   : > { %18412 = vmatpush3.bf16.msra.mxu0 %v20731_v55  ;;  %17764 = vmatprep.mubr.msk.f32.mxu0 %vm447_vm0, %v8464_v59  ;;  %v8467_v55 = vld [vmem:[%s20135_s6 + $0x6c] sm:$0xff]  ;;  %v271_v58 = vld [vmem:[%s20135_s6 + $0x320] sm:$0xff] }
 0x1b0   : > { %v8494_v59 = vld [vmem:[%s20135_s6 + $0x144] sm:$0xff] }
 0x1b1   : > { %16827 = vmatmul.mubr.msk.f32.gmra.mrb[70].mxu1 %vm447_vm0, %v242_v60  ;;  %v272_v60 = vld [vmem:[%s20135_s6 + $0x328] sm:$0xff] }
 0x1b2   : > { %17765 = vmatmul.mubr.msk.f32.gmra.mrb[2].mxu0 %vm447_vm0, %v8465_v61  ;;  %16829 = vmatprep.mubr.msk.f32.mxu1 %vm447_vm0, %v243_v62  ;;  %v8495_v61 = vld [vmem:[%s20135_s6 + $0x14c] sm:$0xff] }
 0x1b3   : > { %17767 = vmatprep.mubr.msk.f32.mxu0 %vm447_vm0, %v8466_v63  ;;  %v273_v62 = vld [vmem:[%s20135_s6 + $0x330] sm:$0xff] }
 0x1b4   : > { %v8496_v63 = vld [vmem:[%s20135_s6 + $0x154] sm:$0xff] }
 0x1b5   : > { %16830 = vmatmul.mubr.msk.f32.gmra.mrb[72].mxu1 %vm447_vm0, %v244_v0  ;;  %v274_v0 = vld [vmem:[%s20135_s6 + $0x338] sm:$0xff] }
 0x1b6   : > { %17768 = vmatmul.mubr.msk.f32.gmra.mrb[4].mxu0 %vm447_vm0, %v8467_v55  ;;  %16832 = vmatprep.mubr.msk.f32.mxu1 %vm447_vm0, %v245_v4  ;;  %v8497_v55 = vld [vmem:[%s20135_s6 + $0x15c] sm:$0xff]  ;;  %v276_v4 = vld [vmem:[%s20135_s6 + $0x348] sm:$0xff] }
 0x1b7   : > { %17770 = vmatprep.mubr.msk.f32.mxu0 %vm447_vm0, %v8468_v5  ;;  %v8499_v5 = vld [vmem:[%s20135_s6 + $0x16c] sm:$0xff] }
 0x1b9   : > { %16833 = vmatmul.mubr.msk.f32.gmra.mrb[74].mxu1 %vm447_vm0, %v246_v8  ;;  %v277_v8 = vld [vmem:[%s20135_s6 + $0x350] sm:$0xff] }
 0x1ba   : > { %17771 = vmatmul.mubr.msk.f32.gmra.mrb[6].mxu0 %vm447_vm0, %v8469_v9  ;;  %16835 = vmatprep.mubr.msk.f32.mxu1 %vm447_vm0, %v247_v10  ;;  %v8500_v9 = vld [vmem:[%s20135_s6 + $0x174] sm:$0xff] }
 0x1bb   : > { %17773 = vmatprep.mubr.msk.f32.mxu0 %vm447_vm0, %v8470_v11  ;;  %v278_v10 = vld [vmem:[%s20135_s6 + $0x358] sm:$0xff] }
 0x1bc   : > { %v8501_v11 = vld [vmem:[%s20135_s6 + $0x17c] sm:$0xff] }
 0x1bd   : > { %16836 = vmatmul.mubr.msk.f32.gmra.mrb[76].mxu1 %vm447_vm0, %v248_v12  ;;  %v279_v12 = vld [vmem:[%s20135_s6 + $0x360] sm:$0xff] }
 0x1be   : > { %17774 = vmatmul.mubr.msk.f32.gmra.mrb[8].mxu0 %vm447_vm0, %v8471_v13  ;;  %16838 = vmatprep.mubr.msk.f32.mxu1 %vm447_vm0, %v249_v14  ;;  %v8502_v13 = vld [vmem:[%s20135_s6 + $0x184] sm:$0xff] }
 0x1bf   : > { %17776 = vmatprep.mubr.msk.f32.mxu0 %vm447_vm0, %v8472_v15  ;;  %v280_v14 = vld [vmem:[%s20135_s6 + $0x368] sm:$0xff] }
 0x1c0   : > { %v8503_v15 = vld [vmem:[%s20135_s6 + $0x18c] sm:$0xff] }
 0x1c1   : > { %16839 = vmatmul.mubr.msk.f32.gmra.mrb[78].mxu1 %vm447_vm0, %v250_v16  ;;  %v281_v16 = vld [vmem:[%s20135_s6 + $0x370] sm:$0xff] }
 0x1c2   : > { %17777 = vmatmul.mubr.msk.f32.gmra.mrb[10].mxu0 %vm447_vm0, %v8473_v17  ;;  %16841 = vmatprep.mubr.msk.f32.mxu1 %vm447_vm0, %v251_v18  ;;  %v8504_v17 = vld [vmem:[%s20135_s6 + $0x194] sm:$0xff] }
 0x1c3   : > { %17779 = vmatprep.mubr.msk.f32.mxu0 %vm447_vm0, %v8474_v19  ;;  %v282_v18 = vld [vmem:[%s20135_s6 + $0x378] sm:$0xff] }
 0x1c4   : > { %v8505_v19 = vld [vmem:[%s20135_s6 + $0x19c] sm:$0xff] }
 0x1c5   : > { %16842 = vmatmul.mubr.msk.f32.gmra.mrb[80].mxu1 %vm447_vm0, %v252_v20  ;;  %v283_v20 = vld [vmem:[%s20135_s6 + $0x380] sm:$0xff] }
 0x1c6   : > { %17780 = vmatmul.mubr.msk.f32.gmra.mrb[12].mxu0 %vm447_vm0, %v8475_v21  ;;  %16844 = vmatprep.mubr.msk.f32.mxu1 %vm447_vm0, %v253_v22  ;;  %v8506_v21 = vld [vmem:[%s20135_s6 + $0x1a4] sm:$0xff] }
 0x1c7   : > { %17782 = vmatprep.mubr.msk.f32.mxu0 %vm447_vm0, %v8476_v23  ;;  %v284_v22 = vld [vmem:[%s20135_s6 + $0x388] sm:$0xff] }
 0x1c8   : > { %v8507_v23 = vld [vmem:[%s20135_s6 + $0x1ac] sm:$0xff] }
 0x1c9   : > { %16845 = vmatmul.mubr.msk.f32.gmra.mrb[82].mxu1 %vm447_vm0, %v254_v24  ;;  %v285_v24 = vld [vmem:[%s20135_s6 + $0x390] sm:$0xff] }
 0x1ca   : > { %17783 = vmatmul.mubr.msk.f32.gmra.mrb[14].mxu0 %vm447_vm0, %v8477_v25  ;;  %16847 = vmatprep.mubr.msk.f32.mxu1 %vm447_vm0, %v255_v26  ;;  %v8508_v25 = vld [vmem:[%s20135_s6 + $0x1b4] sm:$0xff] }
 0x1cb   : > { %17785 = vmatprep.mubr.msk.f32.mxu0 %vm447_vm0, %v8478_v27  ;;  %v286_v26 = vld [vmem:[%s20135_s6 + $0x398] sm:$0xff] }
 0x1cc   : > { %v8509_v27 = vld [vmem:[%s20135_s6 + $0x1bc] sm:$0xff] }
 0x1cd   : > { %16848 = vmatmul.mubr.msk.f32.gmra.mrb[84].mxu1 %vm447_vm0, %v256_v28  ;;  %v287_v28 = vld [vmem:[%s20135_s6 + $0x3a0] sm:$0xff] }
 0x1ce   : > { %17786 = vmatmul.mubr.msk.f32.gmra.mrb[16].mxu0 %vm447_vm0, %v8479_v29  ;;  %16850 = vmatprep.mubr.msk.f32.mxu1 %vm447_vm0, %v257_v30  ;;  %v8510_v29 = vld [vmem:[%s20135_s6 + $0x1c4] sm:$0xff] }
 0x1cf   : > { %17788 = vmatprep.mubr.msk.f32.mxu0 %vm447_vm0, %v8480_v31  ;;  %v288_v30 = vld [vmem:[%s20135_s6 + $0x3a8] sm:$0xff] }
 0x1d0   : > { %v8511_v31 = vld [vmem:[%s20135_s6 + $0x1cc] sm:$0xff] }
 0x1d1   : > { %16851 = vmatmul.mubr.msk.f32.gmra.mrb[86].mxu1 %vm447_vm0, %v258_v32  ;;  %v289_v32 = vld [vmem:[%s20135_s6 + $0x3b0] sm:$0xff] }
 0x1d2   : > { %17789 = vmatmul.mubr.msk.f32.gmra.mrb[18].mxu0 %vm447_vm0, %v8481_v33  ;;  %16853 = vmatprep.mubr.msk.f32.mxu1 %vm447_vm0, %v259_v34  ;;  %v8512_v33 = vld [vmem:[%s20135_s6 + $0x1d4] sm:$0xff] }
 0x1d3   : > { %17791 = vmatprep.mubr.msk.f32.mxu0 %vm447_vm0, %v8482_v35  ;;  %v290_v34 = vld [vmem:[%s20135_s6 + $0x3b8] sm:$0xff] }
 0x1d4   : > { %v8513_v35 = vld [vmem:[%s20135_s6 + $0x1dc] sm:$0xff] }
 0x1d5   : > { %16854 = vmatmul.mubr.msk.f32.gmra.mrb[88].mxu1 %vm447_vm0, %v260_v36  ;;  %v291_v36 = vld [vmem:[%s20135_s6 + $0x3c0] sm:$0xff] }
 0x1d6   : > { %17792 = vmatmul.mubr.msk.f32.gmra.mrb[20].mxu0 %vm447_vm0, %v8483_v2  ;;  %16856 = vmatprep.mubr.msk.f32.mxu1 %vm447_vm0, %v261_v37  ;;  %v8514_v2 = vld [vmem:[%s20135_s6 + $0x1e4] sm:$0xff] }
 0x1d7   : > { %17794 = vmatprep.mubr.msk.f32.mxu0 %vm447_vm0, %v8484_v38  ;;  %v292_v37 = vld [vmem:[%s20135_s6 + $0x3c8] sm:$0xff] }
 0x1d8   : > { %v8515_v38 = vld [vmem:[%s20135_s6 + $0x1ec] sm:$0xff] }
 0x1d9   : > { %16857 = vmatmul.mubr.msk.f32.gmra.mrb[90].mxu1 %vm447_vm0, %v262_v39  ;;  %v293_v39 = vld [vmem:[%s20135_s6 + $0x3d0] sm:$0xff] }
 0x1da   : > { %17795 = vmatmul.mubr.msk.f32.gmra.mrb[22].mxu0 %vm447_vm0, %v8485_v40  ;;  %16859 = vmatprep.mubr.msk.f32.mxu1 %vm447_vm0, %v263_v42  ;;  %v8516_v40 = vld [vmem:[%s20135_s6 + $0x1f4] sm:$0xff] }
 0x1db   : > { %17797 = vmatprep.mubr.msk.f32.mxu0 %vm447_vm0, %v8486_v43  ;;  %v294_v42 = vld [vmem:[%s20135_s6 + $0x3d8] sm:$0xff] }
 0x1dc   : > { %v8517_v43 = vld [vmem:[%s20135_s6 + $0x1fc] sm:$0xff] }
 0x1dd   : > { %16860 = vmatmul.mubr.msk.f32.gmra.mrb[92].mxu1 %vm447_vm0, %v264_v44  ;;  %v295_v44 = vld [vmem:[%s20135_s6 + $0x3e0] sm:$0xff] }
 0x1de   : > { %17798 = vmatmul.mubr.msk.f32.gmra.mrb[24].mxu0 %vm447_vm0, %v8487_v45  ;;  %16862 = vmatprep.mubr.msk.f32.mxu1 %vm447_vm0, %v265_v46  ;;  %v8518_v45 = vld [vmem:[%s20135_s6 + $0x204] sm:$0xff] }
 0x1df   : > { %17800 = vmatprep.mubr.msk.f32.mxu0 %vm447_vm0, %v8488_v47  ;;  %v296_v46 = vld [vmem:[%s20135_s6 + $0x3e8] sm:$0xff] }
 0x1e0   : > { %v8519_v47 = vld [vmem:[%s20135_s6 + $0x20c] sm:$0xff] }
 0x1e1   : > { %16863 = vmatmul.mubr.msk.f32.gmra.mrb[94].mxu1 %vm447_vm0, %v266_v48  ;;  %v297_v48 = vld [vmem:[%s20135_s6 + $0x3f0] sm:$0xff] }
 0x1e2   : > { %17801 = vmatmul.mubr.msk.f32.gmra.mrb[26].mxu0 %vm447_vm0, %v8489_v49  ;;  %16865 = vmatprep.mubr.msk.f32.mxu1 %vm447_vm0, %v267_v50  ;;  %v8520_v49 = vld [vmem:[%s20135_s6 + $0x214] sm:$0xff] }
 0x1e3   : > { %17803 = vmatprep.mubr.msk.f32.mxu0 %vm447_vm0, %v8490_v41  ;;  %v298_v50 = vld [vmem:[%s20135_s6 + $0x3f8] sm:$0xff] }
 0x1e4   : > { %v8521_v41 = vld [vmem:[%s20135_s6 + $0x21c] sm:$0xff] }
 0x1e5   : > { %16866 = vmatmul.mubr.msk.f32.gmra.mrb[96].mxu1 %vm447_vm0, %v268_v51  ;;  %v299_v51 = vld [vmem:[%s20135_s6 + $0x400] sm:$0xff] }
 0x1e6   : > { %17804 = vmatmul.mubr.msk.f32.gmra.mrb[28].mxu0 %vm447_vm0, %v8491_v52  ;;  %16868 = vmatprep.mubr.msk.f32.mxu1 %vm447_vm0, %v269_v53  ;;  %v8522_v52 = vld [vmem:[%s20135_s6 + $0x224] sm:$0xff] }
 0x1e7   : > { %17806 = vmatprep.mubr.msk.f32.mxu0 %vm447_vm0, %v8492_v54  ;;  %v300_v53 = vld [vmem:[%s20135_s6 + $0x408] sm:$0xff] }
 0x1e8   : > { %v8523_v54 = vld [vmem:[%s20135_s6 + $0x22c] sm:$0xff] }
 0x1e9   : > { %16869 = vmatmul.mubr.msk.f32.gmra.mrb[98].mxu1 %vm447_vm0, %v270_v56  ;;  %v301_v56 = vld [vmem:[%s20135_s6 + $0x410] sm:$0xff] }
 0x1ea   : > { %17807 = vmatmul.mubr.msk.f32.gmra.mrb[30].mxu0 %vm447_vm0, %v8493_v57  ;;  %16871 = vmatprep.mubr.msk.f32.mxu1 %vm447_vm0, %v271_v58  ;;  %v8524_v57 = vld [vmem:[%s20135_s6 + $0x234] sm:$0xff] }
 0x1eb   : > { %17809 = vmatprep.mubr.msk.f32.mxu0 %vm447_vm0, %v8494_v59  ;;  %v302_v58 = vld [vmem:[%s20135_s6 + $0x418] sm:$0xff] }
 0x1ec   : > { %v8525_v59 = vld [vmem:[%s20135_s6 + $0x23c] sm:$0xff] }
 0x1ed   : > { %16872 = vmatmul.mubr.msk.f32.gmra.mrb[100].mxu1 %vm447_vm0, %v272_v60  ;;  %v303_v60 = vld [vmem:[%s20135_s6 + $0x420] sm:$0xff] }
 0x1ee   : > { %17810 = vmatmul.mubr.msk.f32.gmra.mrb[32].mxu0 %vm447_vm0, %v8495_v61  ;;  %16874 = vmatprep.mubr.msk.f32.mxu1 %vm447_vm0, %v273_v62  ;;  %v8526_v61 = vld [vmem:[%s20135_s6 + $0x244] sm:$0xff] }
 0x1ef   : > { %17812 = vmatprep.mubr.msk.f32.mxu0 %vm447_vm0, %v8496_v63  ;;  %v304_v62 = vld [vmem:[%s20135_s6 + $0x428] sm:$0xff] }
 0x1f0   : > { %v8527_v63 = vld [vmem:[%s20135_s6 + $0x24c] sm:$0xff] }
 0x1f1   : > { %16875 = vmatmul.mubr.msk.f32.gmra.mrb[102].mxu1 %vm447_vm0, %v274_v0  ;;  %v305_v0 = vld [vmem:[%s20135_s6 + $0x430] sm:$0xff] }
 0x1f2   : > { %17813 = vmatmul.mubr.msk.f32.gmra.mrb[34].mxu0 %vm447_vm0, %v8497_v55  ;;  %16877 = vmatprep.mubr.msk.f32.mxu1 %vm447_vm0, %v275_v1  ;;  %v8528_v55 = vld [vmem:[%s20135_s6 + $0x254] sm:$0xff] }
 0x1f3   : > { %17815 = vmatprep.mubr.msk.f32.mxu0 %vm447_vm0, %v8498_v3  ;;  %v306_v1 = vld [vmem:[%s20135_s6 + $0x438] sm:$0x3f] }
 0x1f4   : > { %v8529_v3 = vld [vmem:[%s20135_s6 + $0x25c] sm:$0xff] }
 0x1f5   : > { %16878 = vmatmul.mubr.msk.f32.gmra.mrb[104].mxu1 %vm447_vm0, %v276_v4  ;;  %v2754_v4 = vld [vmem:[%s20135_s6 + $0x2] sm:$0xff] }
 0x1f6   : > { %17816 = vmatmul.mubr.msk.f32.gmra.mrb[36].mxu0 %vm447_vm0, %v8499_v5  ;;  %16880 = vmatprep.mubr.msk.f32.mxu1 %vm447_vm0, %v277_v8  ;;  %v8530_v5 = vld [vmem:[%s20135_s6 + $0x264] sm:$0xff] }
 0x1f7   : > { %17818 = vmatprep.mubr.msk.f32.mxu0 %vm447_vm0, %v8500_v9  ;;  %v2755_v8 = vld [vmem:[%s20135_s6 + $0xa] sm:$0xff] }
 0x1f8   : > { %v8531_v9 = vld [vmem:[%s20135_s6 + $0x26c] sm:$0xff] }
 0x1f9   : > { %16881 = vmatmul.mubr.msk.f32.gmra.mrb[106].mxu1 %vm447_vm0, %v278_v10  ;;  %v2756_v10 = vld [vmem:[%s20135_s6 + $0x12] sm:$0xff] }
 0x1fa   : > { %17819 = vmatmul.mubr.msk.f32.gmra.mrb[38].mxu0 %vm447_vm0, %v8501_v11  ;;  %16883 = vmatprep.mubr.msk.f32.mxu1 %vm447_vm0, %v279_v12  ;;  %v8532_v11 = vld [vmem:[%s20135_s6 + $0x274] sm:$0xff] }
 0x1fb   : > { %17821 = vmatprep.mubr.msk.f32.mxu0 %vm447_vm0, %v8502_v13  ;;  %v2757_v12 = vld [vmem:[%s20135_s6 + $0x1a] sm:$0xff] }
 0x1fc   : > { %v8533_v13 = vld [vmem:[%s20135_s6 + $0x27c] sm:$0xff] }
 0x1fd   : > { %16884 = vmatmul.mubr.msk.f32.gmra.mrb[108].mxu1 %vm447_vm0, %v280_v14  ;;  %v2758_v14 = vld [vmem:[%s20135_s6 + $0x22] sm:$0xff] }
 0x1fe   : > { %17822 = vmatmul.mubr.msk.f32.gmra.mrb[40].mxu0 %vm447_vm0, %v8503_v15  ;;  %16886 = vmatprep.mubr.msk.f32.mxu1 %vm447_vm0, %v281_v16  ;;  %v8534_v15 = vld [vmem:[%s20135_s6 + $0x284] sm:$0xff]  ;;  %v8535_v16 = vld [vmem:[%s20135_s6 + $0x28c] sm:$0xff] }
 0x1ff   : > { %17824 = vmatprep.mubr.msk.f32.mxu0 %vm447_vm0, %v8504_v17  ;;  %v11452_v17 = vld [vmem:[%s23274_s1 + $0x80] sm:$0xff] }
 0x201   : > { %16887 = vmatmul.mubr.msk.f32.gmra.mrb[110].mxu1 %vm447_vm0, %v282_v18  ;;  %v11453_v18 = vld [vmem:[%s23274_s1 + $0x88] sm:$0xff] }
 0x202   : > { %17825 = vmatmul.mubr.msk.f32.gmra.mrb[42].mxu0 %vm447_vm0, %v8505_v19  ;;  %16889 = vmatprep.mubr.msk.f32.mxu1 %vm447_vm0, %v283_v20  ;;  %v2760_v19 = vld [vmem:[%s20135_s6 + $0x32] sm:$0xff] }
 0x203   : > { %17827 = vmatprep.mubr.msk.f32.mxu0 %vm447_vm0, %v8506_v21  ;;  %v8536_v20 = vld [vmem:[%s20135_s6 + $0x294] sm:$0xff]  ;;  %v21296_v21 = vpack.c.bf16 %v11453_v18, %v11452_v17  ;;  %v2790_v17 = vld [vmem:[%s20135_s6 + $0x122] sm:$0xff] }
 0x204   : > { %v8566_v18 = vld [vmem:[%s20135_s6 + $0x384] sm:$0xff] }
 0x205   : > { %16890 = vmatmul.mubr.msk.f32.gmra.mrb[112].mxu1 %vm447_vm0, %v284_v22  ;;  %v2761_v22 = vld [vmem:[%s20135_s6 + $0x3a] sm:$0xff]  ;;  %18414 = vmatprep.subr.bf16.mxu0 %v21296_v21 }
 0x206   : > { %17828 = vmatmul.mubr.msk.f32.gmra.mrb[44].mxu0 %vm447_vm0, %v8507_v23  ;;  %16892 = vmatprep.mubr.msk.f32.mxu1 %vm447_vm0, %v285_v24  ;;  %v8537_v23 = vld [vmem:[%s20135_s6 + $0x29c] sm:$0xff] }
 0x207   : > { %17830 = vmatprep.mubr.msk.f32.mxu0 %vm447_vm0, %v8508_v25  ;;  %v2762_v24 = vld [vmem:[%s20135_s6 + $0x42] sm:$0xff] }
 0x208   : > { %v8538_v25 = vld [vmem:[%s20135_s6 + $0x2a4] sm:$0xff] }
 0x209   : > { %16893 = vmatmul.mubr.msk.f32.gmra.mrb[114].mxu1 %vm447_vm0, %v286_v26  ;;  %v2763_v26 = vld [vmem:[%s20135_s6 + $0x4a] sm:$0xff] }
 0x20a   : > { %17831 = vmatmul.mubr.msk.f32.gmra.mrb[46].mxu0 %vm447_vm0, %v8509_v27  ;;  %16895 = vmatprep.mubr.msk.f32.mxu1 %vm447_vm0, %v287_v28  ;;  %v8539_v27 = vld [vmem:[%s20135_s6 + $0x2ac] sm:$0xff] }
 0x20b   : > { %17833 = vmatprep.mubr.msk.f32.mxu0 %vm447_vm0, %v8510_v29  ;;  %v2764_v28 = vld [vmem:[%s20135_s6 + $0x52] sm:$0xff] }
 0x20c   : > { %v8540_v29 = vld [vmem:[%s20135_s6 + $0x2b4] sm:$0xff] }
 0x20d   : > { %16896 = vmatmul.mubr.msk.f32.gmra.mrb[116].mxu1 %vm447_vm0, %v288_v30  ;;  %v2765_v30 = vld [vmem:[%s20135_s6 + $0x5a] sm:$0xff] }
 0x20e   : > { %17834 = vmatmul.mubr.msk.f32.gmra.mrb[48].mxu0 %vm447_vm0, %v8511_v31  ;;  %16898 = vmatprep.mubr.msk.f32.mxu1 %vm447_vm0, %v289_v32  ;;  %v8541_v31 = vld [vmem:[%s20135_s6 + $0x2bc] sm:$0xff] }
 0x20f   : > { %17836 = vmatprep.mubr.msk.f32.mxu0 %vm447_vm0, %v8512_v33  ;;  %v2766_v32 = vld [vmem:[%s20135_s6 + $0x62] sm:$0xff] }
 0x210   : > { %v8542_v33 = vld [vmem:[%s20135_s6 + $0x2c4] sm:$0xff] }
 0x211   : > { %16899 = vmatmul.mubr.msk.f32.gmra.mrb[118].mxu1 %vm447_vm0, %v290_v34  ;;  %v2767_v34 = vld [vmem:[%s20135_s6 + $0x6a] sm:$0xff] }
 0x212   : > { %17837 = vmatmul.mubr.msk.f32.gmra.mrb[50].mxu0 %vm447_vm0, %v8513_v35  ;;  %16901 = vmatprep.mubr.msk.f32.mxu1 %vm447_vm0, %v291_v36  ;;  %v8543_v35 = vld [vmem:[%s20135_s6 + $0x2cc] sm:$0xff] }
 0x213   : > { %17839 = vmatprep.mubr.msk.f32.mxu0 %vm447_vm0, %v8514_v2  ;;  %v2768_v36 = vld [vmem:[%s20135_s6 + $0x72] sm:$0xff] }
 0x214   : > { %v8544_v2 = vld [vmem:[%s20135_s6 + $0x2d4] sm:$0xff] }
 0x215   : > { %16902 = vmatmul.mubr.msk.f32.gmra.mrb[120].mxu1 %vm447_vm0, %v292_v37  ;;  %v2769_v37 = vld [vmem:[%s20135_s6 + $0x7a] sm:$0xff] }
 0x216   : > { %17840 = vmatmul.mubr.msk.f32.gmra.mrb[52].mxu0 %vm447_vm0, %v8515_v38  ;;  %16904 = vmatprep.mubr.msk.f32.mxu1 %vm447_vm0, %v293_v39  ;;  %v8545_v38 = vld [vmem:[%s20135_s6 + $0x2dc] sm:$0xff] }
 0x217   : > { %17842 = vmatprep.mubr.msk.f32.mxu0 %vm447_vm0, %v8516_v40  ;;  %v2770_v39 = vld [vmem:[%s20135_s6 + $0x82] sm:$0xff] }
 0x218   : > { %v8546_v40 = vld [vmem:[%s20135_s6 + $0x2e4] sm:$0xff] }
 0x219   : > { %16905 = vmatmul.mubr.msk.f32.gmra.mrb[122].mxu1 %vm447_vm0, %v294_v42  ;;  %v2771_v42 = vld [vmem:[%s20135_s6 + $0x8a] sm:$0xff] }
 0x21a   : > { %17843 = vmatmul.mubr.msk.f32.gmra.mrb[54].mxu0 %vm447_vm0, %v8517_v43  ;;  %16907 = vmatprep.mubr.msk.f32.mxu1 %vm447_vm0, %v295_v44  ;;  %v8547_v43 = vld [vmem:[%s20135_s6 + $0x2ec] sm:$0xff] }
 0x21b   : > { %17845 = vmatprep.mubr.msk.f32.mxu0 %vm447_vm0, %v8518_v45  ;;  %v2772_v44 = vld [vmem:[%s20135_s6 + $0x92] sm:$0xff] }
 0x21c   : > { %v8548_v45 = vld [vmem:[%s20135_s6 + $0x2f4] sm:$0xff] }
 0x21d   : > { %16908 = vmatmul.mubr.msk.f32.gmra.mrb[124].mxu1 %vm447_vm0, %v296_v46  ;;  %v2773_v46 = vld [vmem:[%s20135_s6 + $0x9a] sm:$0xff] }
 0x21e   : > { %17846 = vmatmul.mubr.msk.f32.gmra.mrb[56].mxu0 %vm447_vm0, %v8519_v47  ;;  %16910 = vmatprep.mubr.msk.f32.mxu1 %vm447_vm0, %v297_v48  ;;  %v8549_v47 = vld [vmem:[%s20135_s6 + $0x2fc] sm:$0xff] }
 0x21f   : > { %17848 = vmatprep.mubr.msk.f32.mxu0 %vm447_vm0, %v8520_v49  ;;  %v2774_v48 = vld [vmem:[%s20135_s6 + $0xa2] sm:$0xff] }
 0x220   : > { %v8550_v49 = vld [vmem:[%s20135_s6 + $0x304] sm:$0xff] }
 0x221   : > { %16911 = vmatmul.mubr.msk.f32.gmra.mrb[126].mxu1 %vm447_vm0, %v298_v50  ;;  %v2775_v50 = vld [vmem:[%s20135_s6 + $0xaa] sm:$0xff] }
 0x222   : > { %17849 = vmatmul.mubr.msk.f32.gmra.mrb[58].mxu0 %vm447_vm0, %v8521_v41  ;;  %16913 = vmatprep.mubr.msk.f32.mxu1 %vm447_vm0, %v299_v51  ;;  %v8551_v41 = vld [vmem:[%s20135_s6 + $0x30c] sm:$0xff] }
 0x223   : > { %17851 = vmatprep.mubr.msk.f32.mxu0 %vm447_vm0, %v8522_v52  ;;  %v2776_v51 = vld [vmem:[%s20135_s6 + $0xb2] sm:$0xff] }
 0x224   : > { %v8552_v52 = vld [vmem:[%s20135_s6 + $0x314] sm:$0xff] }
 0x225   : > { %16914 = vmatmul.mubr.msk.f32.gmra.mrb[128].mxu1 %vm447_vm0, %v300_v53  ;;  %v2777_v53 = vld [vmem:[%s20135_s6 + $0xba] sm:$0xff] }
 0x226   : > { %17852 = vmatmul.mubr.msk.f32.gmra.mrb[60].mxu0 %vm447_vm0, %v8523_v54  ;;  %16916 = vmatprep.mubr.msk.f32.mxu1 %vm447_vm0, %v301_v56  ;;  %v8553_v54 = vld [vmem:[%s20135_s6 + $0x31c] sm:$0xff] }
 0x227   : > { %17854 = vmatprep.mubr.msk.f32.mxu0 %vm447_vm0, %v8524_v57  ;;  %v2778_v56 = vld [vmem:[%s20135_s6 + $0xc2] sm:$0xff] }
 0x228   : > { %v8554_v57 = vld [vmem:[%s20135_s6 + $0x324] sm:$0xff] }
 0x229   : > { %16917 = vmatmul.mubr.msk.f32.gmra.mrb[130].mxu1 %vm447_vm0, %v302_v58  ;;  %v2779_v58 = vld [vmem:[%s20135_s6 + $0xca] sm:$0xff] }
 0x22a   : > { %17855 = vmatmul.mubr.msk.f32.gmra.mrb[62].mxu0 %vm447_vm0, %v8525_v59  ;;  %16919 = vmatprep.mubr.msk.f32.mxu1 %vm447_vm0, %v303_v60  ;;  %v8555_v59 = vld [vmem:[%s20135_s6 + $0x32c] sm:$0xff] }
 0x22b   : > { %17857 = vmatprep.mubr.msk.f32.mxu0 %vm447_vm0, %v8526_v61  ;;  %v2780_v60 = vld [vmem:[%s20135_s6 + $0xd2] sm:$0xff] }
 0x22c   : > { %v8556_v61 = vld [vmem:[%s20135_s6 + $0x334] sm:$0xff] }
 0x22d   : > { %16920 = vmatmul.mubr.msk.f32.gmra.mrb[132].mxu1 %vm447_vm0, %v304_v62  ;;  %v2781_v62 = vld [vmem:[%s20135_s6 + $0xda] sm:$0xff] }
 0x22e   : > { %17858 = vmatmul.mubr.msk.f32.gmra.mrb[64].mxu0 %vm447_vm0, %v8527_v63  ;;  %16922 = vmatprep.mubr.msk.f32.mxu1 %vm447_vm0, %v305_v0  ;;  %v8557_v63 = vld [vmem:[%s20135_s6 + $0x33c] sm:$0xff] }
 0x22f   : > { %17860 = vmatprep.mubr.msk.f32.mxu0 %vm447_vm0, %v8528_v55  ;;  %v2782_v0 = vld [vmem:[%s20135_s6 + $0xe2] sm:$0xff] }
 0x230   : > { %v8558_v55 = vld [vmem:[%s20135_s6 + $0x344] sm:$0xff] }
 0x231   : > { %16923 = vmatmul.mubr.msk.f32.gmra.mrb[134].mxu1 %vm447_vm0, %v306_v1  ;;  %v2783_v1 = vld [vmem:[%s20135_s6 + $0xea] sm:$0xff] }
 0x232   : > { %17861 = vmatmul.mubr.msk.f32.gmra.mrb[66].mxu0 %vm447_vm0, %v8529_v3  ;;  %16929 = vmatprep.mubr.msk.f32.mxu1 %vm447_vm0, %v2754_v4  ;;  %v8559_v3 = vld [vmem:[%s20135_s6 + $0x34c] sm:$0xff] }
 0x233   : > { %17863 = vmatprep.mubr.msk.f32.mxu0 %vm447_vm0, %v8530_v5  ;;  %v2784_v4 = vld [vmem:[%s20135_s6 + $0xf2] sm:$0xff] }
 0x234   : > { %v8560_v5 = vld [vmem:[%s20135_s6 + $0x354] sm:$0xff] }
 0x235   : > { %16930 = vmatmul.mubr.msk.f32.vlgmr.msra.gmra.mrb[0].mxu1 %vm447_vm0, %v2755_v8  ;;  %v2785_v8 = vld [vmem:[%s20135_s6 + $0xfa] sm:$0xff] }
 0x236   : > { %17864 = vmatmul.mubr.msk.f32.gmra.mrb[68].mxu0 %vm447_vm0, %v8531_v9  ;;  %18396 = vmatpush3.bf16.msra.mxu1 %v21013_v6  ;;  %v2759_v6 = vld [vmem:[%s20135_s6 + $0x2a] sm:$0xff]  ;;  %v8561_v9 = vld [vmem:[%s20135_s6 + $0x35c] sm:$0xff] }
 0x237   : > { %16932 = vmatprep.mubr.msk.f32.mxu1 %vm447_vm0, %v2756_v10  ;;  %17866 = vmatprep.mubr.msk.f32.mxu0 %vm447_vm0, %v8532_v11  ;;  %v2786_v10 = vld [vmem:[%s20135_s6 + $0x102] sm:$0xff] }
 0x238   : > { %18417 = vmatprep.subr.bf16.mxu1 %v20119_v7  ;;  %v8562_v11 = vld [vmem:[%s20135_s6 + $0x364] sm:$0xff] }
 0x239   : > { %16933 = vmatmul.mubr.msk.f32.gmra.mrb[2].mxu1 %vm447_vm0, %v2757_v12  ;;  %v2787_v12 = vld [vmem:[%s20135_s6 + $0x10a] sm:$0xff] }
 0x23a   : > { %17867 = vmatmul.mubr.msk.f32.gmra.mrb[70].mxu0 %vm447_vm0, %v8533_v13  ;;  %16935 = vmatprep.mubr.msk.f32.mxu1 %vm447_vm0, %v2758_v14  ;;  %v8563_v13 = vld [vmem:[%s20135_s6 + $0x36c] sm:$0xff] }
 0x23b   : > { %17869 = vmatprep.mubr.msk.f32.mxu0 %vm447_vm0, %v8534_v15  ;;  %v2788_v14 = vld [vmem:[%s20135_s6 + $0x112] sm:$0xff] }
 0x23c   : > { %v8564_v15 = vld [vmem:[%s20135_s6 + $0x374] sm:$0xff] }
 0x23d   : > { %16936 = vmatmul.mubr.msk.f32.gmra.mrb[4].mxu1 %vm447_vm0, %v2759_v6  ;;  %v2789_v6 = vld [vmem:[%s20135_s6 + $0x11a] sm:$0xff] }
 0x23e   : > { %17870 = vmatmul.mubr.msk.f32.gmra.mrb[72].mxu0 %vm447_vm0, %v8535_v16  ;;  %16938 = vmatprep.mubr.msk.f32.mxu1 %vm447_vm0, %v2760_v19  ;;  %v8565_v16 = vld [vmem:[%s20135_s6 + $0x37c] sm:$0xff]  ;;  %v2791_v19 = vld [vmem:[%s20135_s6 + $0x12a] sm:$0xff] }
 0x23f   : > { %17872 = vmatprep.mubr.msk.f32.mxu0 %vm447_vm0, %v8536_v20  ;;  %v8567_v20 = vld [vmem:[%s20135_s6 + $0x38c] sm:$0xff] }
 0x241   : > { %16939 = vmatmul.mubr.msk.f32.gmra.mrb[6].mxu1 %vm447_vm0, %v2761_v22  ;;  %v2792_v22 = vld [vmem:[%s20135_s6 + $0x132] sm:$0xff] }
 0x242   : > { %17873 = vmatmul.mubr.msk.f32.gmra.mrb[74].mxu0 %vm447_vm0, %v8537_v23  ;;  %16941 = vmatprep.mubr.msk.f32.mxu1 %vm447_vm0, %v2762_v24  ;;  %v8568_v23 = vld [vmem:[%s20135_s6 + $0x394] sm:$0xff] }
 0x243   : > { %17875 = vmatprep.mubr.msk.f32.mxu0 %vm447_vm0, %v8538_v25  ;;  %v2793_v24 = vld [vmem:[%s20135_s6 + $0x13a] sm:$0xff] }
 0x244   : > { %v8569_v25 = vld [vmem:[%s20135_s6 + $0x39c] sm:$0xff] }
 0x245   : > { %16942 = vmatmul.mubr.msk.f32.gmra.mrb[8].mxu1 %vm447_vm0, %v2763_v26  ;;  %v2794_v26 = vld [vmem:[%s20135_s6 + $0x142] sm:$0xff] }
 0x246   : > { %17876 = vmatmul.mubr.msk.f32.gmra.mrb[76].mxu0 %vm447_vm0, %v8539_v27  ;;  %16944 = vmatprep.mubr.msk.f32.mxu1 %vm447_vm0, %v2764_v28  ;;  %v8570_v27 = vld [vmem:[%s20135_s6 + $0x3a4] sm:$0xff] }
 0x247   : > { %17878 = vmatprep.mubr.msk.f32.mxu0 %vm447_vm0, %v8540_v29  ;;  %v2795_v28 = vld [vmem:[%s20135_s6 + $0x14a] sm:$0xff] }
 0x248   : > { %v8571_v29 = vld [vmem:[%s20135_s6 + $0x3ac] sm:$0xff] }
 0x249   : > { %16945 = vmatmul.mubr.msk.f32.gmra.mrb[10].mxu1 %vm447_vm0, %v2765_v30  ;;  %v2796_v30 = vld [vmem:[%s20135_s6 + $0x152] sm:$0xff] }
 0x24a   : > { %17879 = vmatmul.mubr.msk.f32.gmra.mrb[78].mxu0 %vm447_vm0, %v8541_v31  ;;  %16947 = vmatprep.mubr.msk.f32.mxu1 %vm447_vm0, %v2766_v32  ;;  %v8572_v31 = vld [vmem:[%s20135_s6 + $0x3b4] sm:$0xff] }
 0x24b   : > { %17881 = vmatprep.mubr.msk.f32.mxu0 %vm447_vm0, %v8542_v33  ;;  %v2797_v32 = vld [vmem:[%s20135_s6 + $0x15a] sm:$0xff] }
 0x24c   : > { %v8573_v33 = vld [vmem:[%s20135_s6 + $0x3bc] sm:$0xff] }
 0x24d   : > { %16948 = vmatmul.mubr.msk.f32.gmra.mrb[12].mxu1 %vm447_vm0, %v2767_v34  ;;  %v2798_v34 = vld [vmem:[%s20135_s6 + $0x162] sm:$0xff] }
 0x24e   : > { %17882 = vmatmul.mubr.msk.f32.gmra.mrb[80].mxu0 %vm447_vm0, %v8543_v35  ;;  %16950 = vmatprep.mubr.msk.f32.mxu1 %vm447_vm0, %v2768_v36  ;;  %v8574_v35 = vld [vmem:[%s20135_s6 + $0x3c4] sm:$0xff] }
 0x24f   : > { %17884 = vmatprep.mubr.msk.f32.mxu0 %vm447_vm0, %v8544_v2  ;;  %v2799_v36 = vld [vmem:[%s20135_s6 + $0x16a] sm:$0xff] }
 0x250   : > { %v8575_v2 = vld [vmem:[%s20135_s6 + $0x3cc] sm:$0xff] }
 0x251   : > { %16951 = vmatmul.mubr.msk.f32.gmra.mrb[14].mxu1 %vm447_vm0, %v2769_v37  ;;  %v2800_v37 = vld [vmem:[%s20135_s6 + $0x172] sm:$0xff] }
 0x252   : > { %17885 = vmatmul.mubr.msk.f32.gmra.mrb[82].mxu0 %vm447_vm0, %v8545_v38  ;;  %16953 = vmatprep.mubr.msk.f32.mxu1 %vm447_vm0, %v2770_v39  ;;  %v8576_v38 = vld [vmem:[%s20135_s6 + $0x3d4] sm:$0xff] }
 0x253   : > { %17887 = vmatprep.mubr.msk.f32.mxu0 %vm447_vm0, %v8546_v40  ;;  %v2801_v39 = vld [vmem:[%s20135_s6 + $0x17a] sm:$0xff] }
 0x254   : > { %v8577_v40 = vld [vmem:[%s20135_s6 + $0x3dc] sm:$0xff] }
 0x255   : > { %16954 = vmatmul.mubr.msk.f32.gmra.mrb[16].mxu1 %vm447_vm0, %v2771_v42  ;;  %v2802_v42 = vld [vmem:[%s20135_s6 + $0x182] sm:$0xff] }
 0x256   : > { %17888 = vmatmul.mubr.msk.f32.gmra.mrb[84].mxu0 %vm447_vm0, %v8547_v43  ;;  %16956 = vmatprep.mubr.msk.f32.mxu1 %vm447_vm0, %v2772_v44  ;;  %v8578_v43 = vld [vmem:[%s20135_s6 + $0x3e4] sm:$0xff] }
 0x257   : > { %17890 = vmatprep.mubr.msk.f32.mxu0 %vm447_vm0, %v8548_v45  ;;  %v2803_v44 = vld [vmem:[%s20135_s6 + $0x18a] sm:$0xff] }
 0x258   : > { %v8579_v45 = vld [vmem:[%s20135_s6 + $0x3ec] sm:$0xff] }
 0x259   : > { %16957 = vmatmul.mubr.msk.f32.gmra.mrb[18].mxu1 %vm447_vm0, %v2773_v46  ;;  %v2804_v46 = vld [vmem:[%s20135_s6 + $0x192] sm:$0xff] }
 0x25a   : > { %17891 = vmatmul.mubr.msk.f32.gmra.mrb[86].mxu0 %vm447_vm0, %v8549_v47  ;;  %16959 = vmatprep.mubr.msk.f32.mxu1 %vm447_vm0, %v2774_v48  ;;  %v8580_v47 = vld [vmem:[%s20135_s6 + $0x3f4] sm:$0xff] }
 0x25b   : > { %17893 = vmatprep.mubr.msk.f32.mxu0 %vm447_vm0, %v8550_v49  ;;  %v2805_v48 = vld [vmem:[%s20135_s6 + $0x19a] sm:$0xff] }
 0x25c   : > { %v8581_v49 = vld [vmem:[%s20135_s6 + $0x3fc] sm:$0xff] }
 0x25d   : > { %16960 = vmatmul.mubr.msk.f32.gmra.mrb[20].mxu1 %vm447_vm0, %v2775_v50  ;;  %v2806_v50 = vld [vmem:[%s20135_s6 + $0x1a2] sm:$0xff] }
 0x25e   : > { %17894 = vmatmul.mubr.msk.f32.gmra.mrb[88].mxu0 %vm447_vm0, %v8551_v41  ;;  %16962 = vmatprep.mubr.msk.f32.mxu1 %vm447_vm0, %v2776_v51  ;;  %v8582_v41 = vld [vmem:[%s20135_s6 + $0x404] sm:$0xff] }
 0x25f   : > { %17896 = vmatprep.mubr.msk.f32.mxu0 %vm447_vm0, %v8552_v52  ;;  %v2807_v51 = vld [vmem:[%s20135_s6 + $0x1aa] sm:$0xff] }
 0x260   : > { %v8583_v52 = vld [vmem:[%s20135_s6 + $0x40c] sm:$0xff] }
 0x261   : > { %16963 = vmatmul.mubr.msk.f32.gmra.mrb[22].mxu1 %vm447_vm0, %v2777_v53  ;;  %v2808_v53 = vld [vmem:[%s20135_s6 + $0x1b2] sm:$0xff] }
 0x262   : > { %17897 = vmatmul.mubr.msk.f32.gmra.mrb[90].mxu0 %vm447_vm0, %v8553_v54  ;;  %16965 = vmatprep.mubr.msk.f32.mxu1 %vm447_vm0, %v2778_v56  ;;  %v8584_v54 = vld [vmem:[%s20135_s6 + $0x414] sm:$0xff] }
 0x263   : > { %17899 = vmatprep.mubr.msk.f32.mxu0 %vm447_vm0, %v8554_v57  ;;  %v2809_v56 = vld [vmem:[%s20135_s6 + $0x1ba] sm:$0xff] }
 0x264   : > { %v8585_v57 = vld [vmem:[%s20135_s6 + $0x41c] sm:$0xff] }
 0x265   : > { %16966 = vmatmul.mubr.msk.f32.gmra.mrb[24].mxu1 %vm447_vm0, %v2779_v58  ;;  %v2810_v58 = vld [vmem:[%s20135_s6 + $0x1c2] sm:$0xff] }
 0x266   : > { %17900 = vmatmul.mubr.msk.f32.gmra.mrb[92].mxu0 %vm447_vm0, %v8555_v59  ;;  %16968 = vmatprep.mubr.msk.f32.mxu1 %vm447_vm0, %v2780_v60  ;;  %v8586_v59 = vld [vmem:[%s20135_s6 + $0x424] sm:$0xff] }
 0x267   : > { %17902 = vmatprep.mubr.msk.f32.mxu0 %vm447_vm0, %v8556_v61  ;;  %v2811_v60 = vld [vmem:[%s20135_s6 + $0x1ca] sm:$0xff] }
 0x268   : > { %v8587_v61 = vld [vmem:[%s20135_s6 + $0x42c] sm:$0xff] }
 0x269   : > { %16969 = vmatmul.mubr.msk.f32.gmra.mrb[26].mxu1 %vm447_vm0, %v2781_v62  ;;  %v2812_v62 = vld [vmem:[%s20135_s6 + $0x1d2] sm:$0xff] }
 0x26a   : > { %17903 = vmatmul.mubr.msk.f32.gmra.mrb[94].mxu0 %vm447_vm0, %v8557_v63  ;;  %16971 = vmatprep.mubr.msk.f32.mxu1 %vm447_vm0, %v2782_v0  ;;  %v8588_v63 = vld [vmem:[%s20135_s6 + $0x434] sm:$0xff] }
 0x26b   : > { %17905 = vmatprep.mubr.msk.f32.mxu0 %vm447_vm0, %v8558_v55  ;;  %v2813_v0 = vld [vmem:[%s20135_s6 + $0x1da] sm:$0xff] }
 0x26c   : > { %v8589_v55 = vld [vmem:[%s20135_s6 + $0x43c] sm:$0xff] }
 0x26d   : > { %16972 = vmatmul.mubr.msk.f32.gmra.mrb[28].mxu1 %vm447_vm0, %v2783_v1  ;;  %v2814_v1 = vld [vmem:[%s20135_s6 + $0x1e2] sm:$0xff] }
 0x26e   : > { %17906 = vmatmul.mubr.msk.f32.gmra.mrb[96].mxu0 %vm447_vm0, %v8559_v3  ;;  %16974 = vmatprep.mubr.msk.f32.mxu1 %vm447_vm0, %v2784_v4  ;;  %v8590_v3 = vld [vmem:[%s20135_s6 + $0x444] sm:$0xff] }
 0x26f   : > { %17908 = vmatprep.mubr.msk.f32.mxu0 %vm447_vm0, %v8560_v5  ;;  %v2815_v4 = vld [vmem:[%s20135_s6 + $0x1ea] sm:$0xff] }
 0x270   : > { %v8591_v5 = vld [vmem:[%s20135_s6 + $0x44c] sm:$0xff] }
 0x271   : > { %16975 = vmatmul.mubr.msk.f32.gmra.mrb[30].mxu1 %vm447_vm0, %v2785_v8  ;;  %v2816_v8 = vld [vmem:[%s20135_s6 + $0x1f2] sm:$0xff] }
 0x272   : > { %17909 = vmatmul.mubr.msk.f32.gmra.mrb[98].mxu0 %vm447_vm0, %v8561_v9  ;;  %16977 = vmatprep.mubr.msk.f32.mxu1 %vm447_vm0, %v2786_v10  ;;  %v8592_v9 = vld [vmem:[%s20135_s6 + $0x454] sm:$0xff] }
 0x273   : > { %17911 = vmatprep.mubr.msk.f32.mxu0 %vm447_vm0, %v8562_v11  ;;  %v2817_v10 = vld [vmem:[%s20135_s6 + $0x1fa] sm:$0xff] }
 0x274   : > { %v8593_v11 = vld [vmem:[%s20135_s6 + $0x45c] sm:$0xff] }
 0x275   : > { %16978 = vmatmul.mubr.msk.f32.gmra.mrb[32].mxu1 %vm447_vm0, %v2787_v12  ;;  %v2818_v12 = vld [vmem:[%s20135_s6 + $0x202] sm:$0xff] }
 0x276   : > { %17912 = vmatmul.mubr.msk.f32.gmra.mrb[100].mxu0 %vm447_vm0, %v8563_v13  ;;  %16980 = vmatprep.mubr.msk.f32.mxu1 %vm447_vm0, %v2788_v14  ;;  %v8594_v13 = vld [vmem:[%s20135_s6 + $0x464] sm:$0xff] }
 0x277   : > { %17914 = vmatprep.mubr.msk.f32.mxu0 %vm447_vm0, %v8564_v15  ;;  %v2819_v14 = vld [vmem:[%s20135_s6 + $0x20a] sm:$0xff] }
 0x278   : > { %v8595_v15 = vld [vmem:[%s20135_s6 + $0x46c] sm:$0xff] }
 0x279   : > { %16981 = vmatmul.mubr.msk.f32.gmra.mrb[34].mxu1 %vm447_vm0, %v2789_v6  ;;  %v2820_v6 = vld [vmem:[%s20135_s6 + $0x212] sm:$0xff] }
 0x27a   : > { %17915 = vmatmul.mubr.msk.f32.gmra.mrb[102].mxu0 %vm447_vm0, %v8565_v16  ;;  %16983 = vmatprep.mubr.msk.f32.mxu1 %vm447_vm0, %v2790_v17  ;;  %v8596_v16 = vld [vmem:[%s20135_s6 + $0x474] sm:$0xff] }
 0x27b   : > { %17917 = vmatprep.mubr.msk.f32.mxu0 %vm447_vm0, %v8566_v18  ;;  %v2821_v17 = vld [vmem:[%s20135_s6 + $0x21a] sm:$0xff] }
 0x27c   : > { %v8597_v18 = vld [vmem:[%s20135_s6 + $0x47c] sm:$0x3f] }
 0x27d   : > { %16984 = vmatmul.mubr.msk.f32.gmra.mrb[36].mxu1 %vm447_vm0, %v2791_v19  ;;  %v2822_v19 = vld [vmem:[%s20135_s6 + $0x222] sm:$0xff] }
 0x27e   : > { %17918 = vmatmul.mubr.msk.f32.gmra.mrb[104].mxu0 %vm447_vm0, %v8567_v20  ;;  %16986 = vmatprep.mubr.msk.f32.mxu1 %vm447_vm0, %v2792_v22  ;;  %v9889_v20 = vld [vmem:[%s20135_s6 + $0x45] sm:$0xff] }
 0x27f   : > { %17920 = vmatprep.mubr.msk.f32.mxu0 %vm447_vm0, %v8568_v23  ;;  %v2823_v22 = vld [vmem:[%s20135_s6 + $0x22a] sm:$0xff] }
 0x280   : > { %v9890_v23 = vld [vmem:[%s20135_s6 + $0x4d] sm:$0xff] }
 0x281   : > { %16987 = vmatmul.mubr.msk.f32.gmra.mrb[38].mxu1 %vm447_vm0, %v2793_v24  ;;  %v2824_v24 = vld [vmem:[%s20135_s6 + $0x232] sm:$0xff] }
 0x282   : > { %17921 = vmatmul.mubr.msk.f32.gmra.mrb[106].mxu0 %vm447_vm0, %v8569_v25  ;;  %16989 = vmatprep.mubr.msk.f32.mxu1 %vm447_vm0, %v2794_v26  ;;  %v9891_v25 = vld [vmem:[%s20135_s6 + $0x55] sm:$0xff] }
 0x283   : > { %17923 = vmatprep.mubr.msk.f32.mxu0 %vm447_vm0, %v8570_v27  ;;  %v2825_v26 = vld [vmem:[%s20135_s6 + $0x23a] sm:$0xff] }
 0x284   : > { %v9892_v27 = vld [vmem:[%s20135_s6 + $0x5d] sm:$0xff] }
 0x285   : > { %16990 = vmatmul.mubr.msk.f32.gmra.mrb[40].mxu1 %vm447_vm0, %v2795_v28  ;;  %v2826_v28 = vld [vmem:[%s20135_s6 + $0x242] sm:$0xff] }
 0x286   : > { %17924 = vmatmul.mubr.msk.f32.gmra.mrb[108].mxu0 %vm447_vm0, %v8571_v29  ;;  %16992 = vmatprep.mubr.msk.f32.mxu1 %vm447_vm0, %v2796_v30  ;;  %v9893_v29 = vld [vmem:[%s20135_s6 + $0x65] sm:$0xff]  ;;  %v9894_v30 = vld [vmem:[%s20135_s6 + $0x6d] sm:$0xff] }
 0x287   : > { %17926 = vmatprep.mubr.msk.f32.mxu0 %vm447_vm0, %v8572_v31  ;;  %v2828_v31 = vld [vmem:[%s20135_s6 + $0x252] sm:$0xff] }
 0x289   : > { %16993 = vmatmul.mubr.msk.f32.gmra.mrb[42].mxu1 %vm447_vm0, %v2797_v32  ;;  %v9895_v32 = vld [vmem:[%s20135_s6 + $0x75] sm:$0xff] }
 0x28a   : > { %17927 = vmatmul.mubr.msk.f32.gmra.mrb[110].mxu0 %vm447_vm0, %v8573_v33  ;;  %16995 = vmatprep.mubr.msk.f32.mxu1 %vm447_vm0, %v2798_v34  ;;  %v2829_v33 = vld [vmem:[%s20135_s6 + $0x25a] sm:$0xff] }
 0x28b   : > { %17929 = vmatprep.mubr.msk.f32.mxu0 %vm447_vm0, %v8574_v35  ;;  %v9896_v34 = vld [vmem:[%s20135_s6 + $0x7d] sm:$0xff] }
 0x28c   : > { %v2830_v35 = vld [vmem:[%s20135_s6 + $0x262] sm:$0xff] }
 0x28d   : > { %16996 = vmatmul.mubr.msk.f32.gmra.mrb[44].mxu1 %vm447_vm0, %v2799_v36  ;;  %v9897_v36 = vld [vmem:[%s20135_s6 + $0x85] sm:$0xff] }
 0x28e   : > { %17930 = vmatmul.mubr.msk.f32.gmra.mrb[112].mxu0 %vm447_vm0, %v8575_v2  ;;  %16998 = vmatprep.mubr.msk.f32.mxu1 %vm447_vm0, %v2800_v37  ;;  %v2831_v2 = vld [vmem:[%s20135_s6 + $0x26a] sm:$0xff] }
 0x28f   : > { %17932 = vmatprep.mubr.msk.f32.mxu0 %vm447_vm0, %v8576_v38  ;;  %v9898_v37 = vld [vmem:[%s20135_s6 + $0x8d] sm:$0xff] }
 0x290   : > { %v2832_v38 = vld [vmem:[%s20135_s6 + $0x272] sm:$0xff] }
 0x291   : > { %16999 = vmatmul.mubr.msk.f32.gmra.mrb[46].mxu1 %vm447_vm0, %v2801_v39  ;;  %v9899_v39 = vld [vmem:[%s20135_s6 + $0x95] sm:$0xff] }
 0x292   : > { %17933 = vmatmul.mubr.msk.f32.gmra.mrb[114].mxu0 %vm447_vm0, %v8577_v40  ;;  %17001 = vmatprep.mubr.msk.f32.mxu1 %vm447_vm0, %v2802_v42  ;;  %v2833_v40 = vld [vmem:[%s20135_s6 + $0x27a] sm:$0xff] }
 0x293   : > { %17935 = vmatprep.mubr.msk.f32.mxu0 %vm447_vm0, %v8578_v43  ;;  %v9900_v42 = vld [vmem:[%s20135_s6 + $0x9d] sm:$0xff] }
 0x294   : > { %v2834_v43 = vld [vmem:[%s20135_s6 + $0x282] sm:$0xff] }
 0x295   : > { %17002 = vmatmul.mubr.msk.f32.gmra.mrb[48].mxu1 %vm447_vm0, %v2803_v44  ;;  %v9901_v44 = vld [vmem:[%s20135_s6 + $0xa5] sm:$0xff] }
 0x296   : > { %17936 = vmatmul.mubr.msk.f32.gmra.mrb[116].mxu0 %vm447_vm0, %v8579_v45  ;;  %17004 = vmatprep.mubr.msk.f32.mxu1 %vm447_vm0, %v2804_v46  ;;  %v2835_v45 = vld [vmem:[%s20135_s6 + $0x28a] sm:$0xff] }
 0x297   : > { %17938 = vmatprep.mubr.msk.f32.mxu0 %vm447_vm0, %v8580_v47  ;;  %v9902_v46 = vld [vmem:[%s20135_s6 + $0xad] sm:$0xff] }
 0x298   : > { %v2836_v47 = vld [vmem:[%s20135_s6 + $0x292] sm:$0xff] }
 0x299   : > { %17005 = vmatmul.mubr.msk.f32.gmra.mrb[50].mxu1 %vm447_vm0, %v2805_v48  ;;  %v9903_v48 = vld [vmem:[%s20135_s6 + $0xb5] sm:$0xff] }
 0x29a   : > { %17939 = vmatmul.mubr.msk.f32.gmra.mrb[118].mxu0 %vm447_vm0, %v8581_v49  ;;  %17007 = vmatprep.mubr.msk.f32.mxu1 %vm447_vm0, %v2806_v50  ;;  %v2837_v49 = vld [vmem:[%s20135_s6 + $0x29a] sm:$0xff] }
 0x29b   : > { %17941 = vmatprep.mubr.msk.f32.mxu0 %vm447_vm0, %v8582_v41  ;;  %v9904_v50 = vld [vmem:[%s20135_s6 + $0xbd] sm:$0xff] }
 0x29c   : > { %v2838_v41 = vld [vmem:[%s20135_s6 + $0x2a2] sm:$0xff] }
 0x29d   : > { %17008 = vmatmul.mubr.msk.f32.gmra.mrb[52].mxu1 %vm447_vm0, %v2807_v51  ;;  %v9905_v51 = vld [vmem:[%s20135_s6 + $0xc5] sm:$0xff] }
 0x29e   : > { %17942 = vmatmul.mubr.msk.f32.gmra.mrb[120].mxu0 %vm447_vm0, %v8583_v52  ;;  %17010 = vmatprep.mubr.msk.f32.mxu1 %vm447_vm0, %v2808_v53  ;;  %v2839_v52 = vld [vmem:[%s20135_s6 + $0x2aa] sm:$0xff] }
 0x29f   : > { %17944 = vmatprep.mubr.msk.f32.mxu0 %vm447_vm0, %v8584_v54  ;;  %v9906_v53 = vld [vmem:[%s20135_s6 + $0xcd] sm:$0xff] }
 0x2a0   : > { %v2840_v54 = vld [vmem:[%s20135_s6 + $0x2b2] sm:$0xff] }
 0x2a1   : > { %17011 = vmatmul.mubr.msk.f32.gmra.mrb[54].mxu1 %vm447_vm0, %v2809_v56  ;;  %v9907_v56 = vld [vmem:[%s20135_s6 + $0xd5] sm:$0xff] }
 0x2a2   : > { %17945 = vmatmul.mubr.msk.f32.gmra.mrb[122].mxu0 %vm447_vm0, %v8585_v57  ;;  %17013 = vmatprep.mubr.msk.f32.mxu1 %vm447_vm0, %v2810_v58  ;;  %v2841_v57 = vld [vmem:[%s20135_s6 + $0x2ba] sm:$0xff] }
 0x2a3   : > { %17947 = vmatprep.mubr.msk.f32.mxu0 %vm447_vm0, %v8586_v59  ;;  %v9908_v58 = vld [vmem:[%s20135_s6 + $0xdd] sm:$0xff] }
 0x2a4   : > { %v2842_v59 = vld [vmem:[%s20135_s6 + $0x2c2] sm:$0xff] }
 0x2a5   : > { %17014 = vmatmul.mubr.msk.f32.gmra.mrb[56].mxu1 %vm447_vm0, %v2811_v60  ;;  %v9909_v60 = vld [vmem:[%s20135_s6 + $0xe5] sm:$0xff] }
 0x2a6   : > { %17948 = vmatmul.mubr.msk.f32.gmra.mrb[124].mxu0 %vm447_vm0, %v8587_v61  ;;  %17016 = vmatprep.mubr.msk.f32.mxu1 %vm447_vm0, %v2812_v62  ;;  %v2843_v61 = vld [vmem:[%s20135_s6 + $0x2ca] sm:$0xff] }
 0x2a7   : > { %17950 = vmatprep.mubr.msk.f32.mxu0 %vm447_vm0, %v8588_v63  ;;  %v9910_v62 = vld [vmem:[%s20135_s6 + $0xed] sm:$0xff] }
 0x2a8   : > { %v2844_v63 = vld [vmem:[%s20135_s6 + $0x2d2] sm:$0xff] }
 0x2a9   : > { %17017 = vmatmul.mubr.msk.f32.gmra.mrb[58].mxu1 %vm447_vm0, %v2813_v0  ;;  %v9911_v0 = vld [vmem:[%s20135_s6 + $0xf5] sm:$0xff] }
 0x2aa   : > { %17951 = vmatmul.mubr.msk.f32.gmra.mrb[126].mxu0 %vm447_vm0, %v8589_v55  ;;  %17019 = vmatprep.mubr.msk.f32.mxu1 %vm447_vm0, %v2814_v1  ;;  %v2845_v55 = vld [vmem:[%s20135_s6 + $0x2da] sm:$0xff] }
 0x2ab   : > { %17953 = vmatprep.mubr.msk.f32.mxu0 %vm447_vm0, %v8590_v3  ;;  %v9912_v1 = vld [vmem:[%s20135_s6 + $0xfd] sm:$0xff] }
 0x2ac   : > { %v2846_v3 = vld [vmem:[%s20135_s6 + $0x2e2] sm:$0xff] }
 0x2ad   : > { %17020 = vmatmul.mubr.msk.f32.gmra.mrb[60].mxu1 %vm447_vm0, %v2815_v4  ;;  %v9913_v4 = vld [vmem:[%s20135_s6 + $0x105] sm:$0xff] }
 0x2ae   : > { %17954 = vmatmul.mubr.msk.f32.gmra.mrb[128].mxu0 %vm447_vm0, %v8591_v5  ;;  %17022 = vmatprep.mubr.msk.f32.mxu1 %vm447_vm0, %v2816_v8  ;;  %v2847_v5 = vld [vmem:[%s20135_s6 + $0x2ea] sm:$0xff] }
 0x2af   : > { %17956 = vmatprep.mubr.msk.f32.mxu0 %vm447_vm0, %v8592_v9  ;;  %v9914_v8 = vld [vmem:[%s20135_s6 + $0x10d] sm:$0xff] }
 0x2b0   : > { %v2848_v9 = vld [vmem:[%s20135_s6 + $0x2f2] sm:$0xff] }
 0x2b1   : > { %17023 = vmatmul.mubr.msk.f32.gmra.mrb[62].mxu1 %vm447_vm0, %v2817_v10  ;;  %v9915_v10 = vld [vmem:[%s20135_s6 + $0x115] sm:$0xff] }
 0x2b2   : > { %17957 = vmatmul.mubr.msk.f32.gmra.mrb[130].mxu0 %vm447_vm0, %v8593_v11  ;;  %17025 = vmatprep.mubr.msk.f32.mxu1 %vm447_vm0, %v2818_v12  ;;  %v2849_v11 = vld [vmem:[%s20135_s6 + $0x2fa] sm:$0xff] }
 0x2b3   : > { %17959 = vmatprep.mubr.msk.f32.mxu0 %vm447_vm0, %v8594_v13  ;;  %v9916_v12 = vld [vmem:[%s20135_s6 + $0x11d] sm:$0xff] }
 0x2b4   : > { %v2850_v13 = vld [vmem:[%s20135_s6 + $0x302] sm:$0xff] }
 0x2b5   : > { %17026 = vmatmul.mubr.msk.f32.gmra.mrb[64].mxu1 %vm447_vm0, %v2819_v14  ;;  %v9917_v14 = vld [vmem:[%s20135_s6 + $0x125] sm:$0xff] }
 0x2b6   : > { %17960 = vmatmul.mubr.msk.f32.gmra.mrb[132].mxu0 %vm447_vm0, %v8595_v15  ;;  %17028 = vmatprep.mubr.msk.f32.mxu1 %vm447_vm0, %v2820_v6  ;;  %v2851_v15 = vld [vmem:[%s20135_s6 + $0x30a] sm:$0xff] }
 0x2b7   : > { %17962 = vmatprep.mubr.msk.f32.mxu0 %vm447_vm0, %v8596_v16  ;;  %v9918_v6 = vld [vmem:[%s20135_s6 + $0x12d] sm:$0xff] }
 0x2b8   : > { %v2852_v16 = vld [vmem:[%s20135_s6 + $0x312] sm:$0xff] }
 0x2b9   : > { %17029 = vmatmul.mubr.msk.f32.gmra.mrb[66].mxu1 %vm447_vm0, %v2821_v17  ;;  %v9919_v17 = vld [vmem:[%s20135_s6 + $0x135] sm:$0xff] }
 0x2ba   : > { %17963 = vmatmul.mubr.msk.f32.gmra.mrb[134].mxu0 %vm447_vm0, %v8597_v18  ;;  %17031 = vmatprep.mubr.msk.f32.mxu1 %vm447_vm0, %v2822_v19  ;;  %v2853_v18 = vld [vmem:[%s20135_s6 + $0x31a] sm:$0xff] }
 0x2bb   : > { %17969 = vmatprep.mubr.msk.f32.mxu0 %vm447_vm0, %v9889_v20  ;;  %v9920_v19 = vld [vmem:[%s20135_s6 + $0x13d] sm:$0xff] }
 0x2bc   : > { %v2854_v20 = vld [vmem:[%s20135_s6 + $0x322] sm:$0xff] }
 0x2bd   : > { %17032 = vmatmul.mubr.msk.f32.gmra.mrb[68].mxu1 %vm447_vm0, %v2823_v22  ;;  %v9921_v22 = vld [vmem:[%s20135_s6 + $0x145] sm:$0xff] }
 0x2be   : > { %17970 = vmatmul.mubr.msk.f32.vlgmr.msra.gmra.mrb[0].mxu0 %vm447_vm0, %v9890_v23  ;;  %17034 = vmatprep.mubr.msk.f32.mxu1 %vm447_vm0, %v2824_v24  ;;  %v2855_v23 = vld [vmem:[%s20135_s6 + $0x32a] sm:$0xff] }
 0x2bf   : > { %18416 = vmatpush3.bf16.msra.mxu0 %v21296_v21  ;;  %17972 = vmatprep.mubr.msk.f32.mxu0 %vm447_vm0, %v9891_v25  ;;  %v2827_v21 = vld [vmem:[%s20135_s6 + $0x24a] sm:$0xff]  ;;  %v2856_v25 = vld [vmem:[%s20135_s6 + $0x332] sm:$0xff] }
 0x2c0   : > { %v9922_v24 = vld [vmem:[%s20135_s6 + $0x14d] sm:$0xff] }
 0x2c1   : > { %17035 = vmatmul.mubr.msk.f32.gmra.mrb[70].mxu1 %vm447_vm0, %v2825_v26  ;;  %v9923_v26 = vld [vmem:[%s20135_s6 + $0x155] sm:$0xff] }
 0x2c2   : > { %17973 = vmatmul.mubr.msk.f32.gmra.mrb[2].mxu0 %vm447_vm0, %v9892_v27  ;;  %17037 = vmatprep.mubr.msk.f32.mxu1 %vm447_vm0, %v2826_v28  ;;  %v2857_v27 = vld [vmem:[%s20135_s6 + $0x33a] sm:$0xff] }
 0x2c3   : > { %17975 = vmatprep.mubr.msk.f32.mxu0 %vm447_vm0, %v9893_v29  ;;  %v9924_v28 = vld [vmem:[%s20135_s6 + $0x15d] sm:$0xff] }
 0x2c4   : > { %v2858_v29 = vld [vmem:[%s20135_s6 + $0x342] sm:$0xff] }
 0x2c5   : > { %17038 = vmatmul.mubr.msk.f32.gmra.mrb[72].mxu1 %vm447_vm0, %v2827_v21  ;;  %v9925_v21 = vld [vmem:[%s20135_s6 + $0x165] sm:$0xff] }
 0x2c6   : > { %17976 = vmatmul.mubr.msk.f32.gmra.mrb[4].mxu0 %vm447_vm0, %v9894_v30  ;;  %17040 = vmatprep.mubr.msk.f32.mxu1 %vm447_vm0, %v2828_v31  ;;  %v2859_v30 = vld [vmem:[%s20135_s6 + $0x34a] sm:$0xff] }
 0x2c7   : > { %17978 = vmatprep.mubr.msk.f32.mxu0 %vm447_vm0, %v9895_v32  ;;  %v9926_v31 = vld [vmem:[%s20135_s6 + $0x16d] sm:$0xff] }
 0x2c8   : > { %v2860_v32 = vld [vmem:[%s20135_s6 + $0x352] sm:$0xff] }
 0x2c9   : > { %17041 = vmatmul.mubr.msk.f32.gmra.mrb[74].mxu1 %vm447_vm0, %v2829_v33  ;;  %v9927_v33 = vld [vmem:[%s20135_s6 + $0x175] sm:$0xff] }
 0x2ca   : > { %17979 = vmatmul.mubr.msk.f32.gmra.mrb[6].mxu0 %vm447_vm0, %v9896_v34  ;;  %17043 = vmatprep.mubr.msk.f32.mxu1 %vm447_vm0, %v2830_v35  ;;  %v2861_v34 = vld [vmem:[%s20135_s6 + $0x35a] sm:$0xff] }
 0x2cb   : > { %17981 = vmatprep.mubr.msk.f32.mxu0 %vm447_vm0, %v9897_v36  ;;  %v9928_v35 = vld [vmem:[%s20135_s6 + $0x17d] sm:$0xff] }
 0x2cc   : > { %v2862_v36 = vld [vmem:[%s20135_s6 + $0x362] sm:$0xff] }
 0x2cd   : > { %17044 = vmatmul.mubr.msk.f32.gmra.mrb[76].mxu1 %vm447_vm0, %v2831_v2  ;;  %v9929_v2 = vld [vmem:[%s20135_s6 + $0x185] sm:$0xff] }
 0x2ce   : > { %17982 = vmatmul.mubr.msk.f32.gmra.mrb[8].mxu0 %vm447_vm0, %v9898_v37  ;;  %17046 = vmatprep.mubr.msk.f32.mxu1 %vm447_vm0, %v2832_v38  ;;  %v2863_v37 = vld [vmem:[%s20135_s6 + $0x36a] sm:$0xff] }
 0x2cf   : > { %17984 = vmatprep.mubr.msk.f32.mxu0 %vm447_vm0, %v9899_v39  ;;  %v9930_v38 = vld [vmem:[%s20135_s6 + $0x18d] sm:$0xff] }
 0x2d0   : > { %v2864_v39 = vld [vmem:[%s20135_s6 + $0x372] sm:$0xff] }
 0x2d1   : > { %17047 = vmatmul.mubr.msk.f32.gmra.mrb[78].mxu1 %vm447_vm0, %v2833_v40  ;;  %v9931_v40 = vld [vmem:[%s20135_s6 + $0x195] sm:$0xff] }
 0x2d2   : > { %17985 = vmatmul.mubr.msk.f32.gmra.mrb[10].mxu0 %vm447_vm0, %v9900_v42  ;;  %17049 = vmatprep.mubr.msk.f32.mxu1 %vm447_vm0, %v2834_v43  ;;  %v2865_v42 = vld [vmem:[%s20135_s6 + $0x37a] sm:$0xff] }
 0x2d3   : > { %17987 = vmatprep.mubr.msk.f32.mxu0 %vm447_vm0, %v9901_v44  ;;  %v9932_v43 = vld [vmem:[%s20135_s6 + $0x19d] sm:$0xff] }
 0x2d4   : > { %v2866_v44 = vld [vmem:[%s20135_s6 + $0x382] sm:$0xff] }
 0x2d5   : > { %17050 = vmatmul.mubr.msk.f32.gmra.mrb[80].mxu1 %vm447_vm0, %v2835_v45  ;;  %v9933_v45 = vld [vmem:[%s20135_s6 + $0x1a5] sm:$0xff] }
 0x2d6   : > { %17988 = vmatmul.mubr.msk.f32.gmra.mrb[12].mxu0 %vm447_vm0, %v9902_v46  ;;  %17052 = vmatprep.mubr.msk.f32.mxu1 %vm447_vm0, %v2836_v47  ;;  %v2867_v46 = vld [vmem:[%s20135_s6 + $0x38a] sm:$0xff] }
 0x2d7   : > { %17990 = vmatprep.mubr.msk.f32.mxu0 %vm447_vm0, %v9903_v48  ;;  %v9934_v47 = vld [vmem:[%s20135_s6 + $0x1ad] sm:$0xff] }
 0x2d8   : > { %v2868_v48 = vld [vmem:[%s20135_s6 + $0x392] sm:$0xff] }
 0x2d9   : > { %17053 = vmatmul.mubr.msk.f32.gmra.mrb[82].mxu1 %vm447_vm0, %v2837_v49  ;;  %v9935_v49 = vld [vmem:[%s20135_s6 + $0x1b5] sm:$0xff] }
 0x2da   : > { %17991 = vmatmul.mubr.msk.f32.gmra.mrb[14].mxu0 %vm447_vm0, %v9904_v50  ;;  %17055 = vmatprep.mubr.msk.f32.mxu1 %vm447_vm0, %v2838_v41  ;;  %v2869_v50 = vld [vmem:[%s20135_s6 + $0x39a] sm:$0xff] }
 0x2db   : > { %17993 = vmatprep.mubr.msk.f32.mxu0 %vm447_vm0, %v9905_v51  ;;  %v9936_v41 = vld [vmem:[%s20135_s6 + $0x1bd] sm:$0xff] }
 0x2dc   : > { %v2870_v51 = vld [vmem:[%s20135_s6 + $0x3a2] sm:$0xff] }
 0x2dd   : > { %17056 = vmatmul.mubr.msk.f32.gmra.mrb[84].mxu1 %vm447_vm0, %v2839_v52  ;;  %v9937_v52 = vld [vmem:[%s20135_s6 + $0x1c5] sm:$0xff] }
 0x2de   : > { %17994 = vmatmul.mubr.msk.f32.gmra.mrb[16].mxu0 %vm447_vm0, %v9906_v53  ;;  %17058 = vmatprep.mubr.msk.f32.mxu1 %vm447_vm0, %v2840_v54  ;;  %v2871_v53 = vld [vmem:[%s20135_s6 + $0x3aa] sm:$0xff] }
 0x2df   : > { %17996 = vmatprep.mubr.msk.f32.mxu0 %vm447_vm0, %v9907_v56  ;;  %v9938_v54 = vld [vmem:[%s20135_s6 + $0x1cd] sm:$0xff] }
 0x2e0   : > { %v2872_v56 = vld [vmem:[%s20135_s6 + $0x3b2] sm:$0xff] }
 0x2e1   : > { %17059 = vmatmul.mubr.msk.f32.gmra.mrb[86].mxu1 %vm447_vm0, %v2841_v57  ;;  %v9939_v57 = vld [vmem:[%s20135_s6 + $0x1d5] sm:$0xff] }
 0x2e2   : > { %17997 = vmatmul.mubr.msk.f32.gmra.mrb[18].mxu0 %vm447_vm0, %v9908_v58  ;;  %17061 = vmatprep.mubr.msk.f32.mxu1 %vm447_vm0, %v2842_v59  ;;  %v2873_v58 = vld [vmem:[%s20135_s6 + $0x3ba] sm:$0xff] }
 0x2e3   : > { %17999 = vmatprep.mubr.msk.f32.mxu0 %vm447_vm0, %v9909_v60  ;;  %v9940_v59 = vld [vmem:[%s20135_s6 + $0x1dd] sm:$0xff] }
 0x2e4   : > { %v2874_v60 = vld [vmem:[%s20135_s6 + $0x3c2] sm:$0xff] }
 0x2e5   : > { %17062 = vmatmul.mubr.msk.f32.gmra.mrb[88].mxu1 %vm447_vm0, %v2843_v61  ;;  %v9941_v61 = vld [vmem:[%s20135_s6 + $0x1e5] sm:$0xff] }
 0x2e6   : > { %18000 = vmatmul.mubr.msk.f32.gmra.mrb[20].mxu0 %vm447_vm0, %v9910_v62  ;;  %17064 = vmatprep.mubr.msk.f32.mxu1 %vm447_vm0, %v2844_v63  ;;  %v2875_v62 = vld [vmem:[%s20135_s6 + $0x3ca] sm:$0xff] }
 0x2e7   : > { %18002 = vmatprep.mubr.msk.f32.mxu0 %vm447_vm0, %v9911_v0  ;;  %v9942_v63 = vld [vmem:[%s20135_s6 + $0x1ed] sm:$0xff] }
 0x2e8   : > { %v2876_v0 = vld [vmem:[%s20135_s6 + $0x3d2] sm:$0xff] }
 0x2e9   : > { %17065 = vmatmul.mubr.msk.f32.gmra.mrb[90].mxu1 %vm447_vm0, %v2845_v55  ;;  %v9943_v55 = vld [vmem:[%s20135_s6 + $0x1f5] sm:$0xff] }
 0x2ea   : > { %18003 = vmatmul.mubr.msk.f32.gmra.mrb[22].mxu0 %vm447_vm0, %v9912_v1  ;;  %17067 = vmatprep.mubr.msk.f32.mxu1 %vm447_vm0, %v2846_v3  ;;  %v2877_v1 = vld [vmem:[%s20135_s6 + $0x3da] sm:$0xff] }
 0x2eb   : > { %18005 = vmatprep.mubr.msk.f32.mxu0 %vm447_vm0, %v9913_v4  ;;  %v9944_v3 = vld [vmem:[%s20135_s6 + $0x1fd] sm:$0xff] }
 0x2ec   : > { %v2878_v4 = vld [vmem:[%s20135_s6 + $0x3e2] sm:$0xff] }
 0x2ed   : > { %17068 = vmatmul.mubr.msk.f32.gmra.mrb[92].mxu1 %vm447_vm0, %v2847_v5  ;;  %v9945_v5 = vld [vmem:[%s20135_s6 + $0x205] sm:$0xff] }
 0x2ee   : > { %18006 = vmatmul.mubr.msk.f32.gmra.mrb[24].mxu0 %vm447_vm0, %v9914_v8  ;;  %17070 = vmatprep.mubr.msk.f32.mxu1 %vm447_vm0, %v2848_v9  ;;  %v2879_v8 = vld [vmem:[%s20135_s6 + $0x3ea] sm:$0xff] }
 0x2ef   : > { %18008 = vmatprep.mubr.msk.f32.mxu0 %vm447_vm0, %v9915_v10  ;;  %v9946_v9 = vld [vmem:[%s20135_s6 + $0x20d] sm:$0xff] }
 0x2f0   : > { %v2880_v10 = vld [vmem:[%s20135_s6 + $0x3f2] sm:$0xff] }
 0x2f1   : > { %17071 = vmatmul.mubr.msk.f32.gmra.mrb[94].mxu1 %vm447_vm0, %v2849_v11  ;;  %v9947_v11 = vld [vmem:[%s20135_s6 + $0x215] sm:$0xff] }
 0x2f2   : > { %18009 = vmatmul.mubr.msk.f32.gmra.mrb[26].mxu0 %vm447_vm0, %v9916_v12  ;;  %17073 = vmatprep.mubr.msk.f32.mxu1 %vm447_vm0, %v2850_v13  ;;  %v2881_v12 = vld [vmem:[%s20135_s6 + $0x3fa] sm:$0xff] }
 0x2f3   : > { %18011 = vmatprep.mubr.msk.f32.mxu0 %vm447_vm0, %v9917_v14  ;;  %v9948_v13 = vld [vmem:[%s20135_s6 + $0x21d] sm:$0xff] }
 0x2f4   : > { %v2882_v14 = vld [vmem:[%s20135_s6 + $0x402] sm:$0xff] }
 0x2f5   : > { %17074 = vmatmul.mubr.msk.f32.gmra.mrb[96].mxu1 %vm447_vm0, %v2851_v15  ;;  %v9949_v15 = vld [vmem:[%s20135_s6 + $0x225] sm:$0xff] }
 0x2f6   : > { %18012 = vmatmul.mubr.msk.f32.gmra.mrb[28].mxu0 %vm447_vm0, %v9918_v6  ;;  %17076 = vmatprep.mubr.msk.f32.mxu1 %vm447_vm0, %v2852_v16  ;;  %v2883_v6 = vld [vmem:[%s20135_s6 + $0x40a] sm:$0xff] }
 0x2f7   : > { %18014 = vmatprep.mubr.msk.f32.mxu0 %vm447_vm0, %v9919_v17  ;;  %v9950_v16 = vld [vmem:[%s20135_s6 + $0x22d] sm:$0xff] }
 0x2f8   : > { %v2884_v17 = vld [vmem:[%s20135_s6 + $0x412] sm:$0xff] }
 0x2f9   : > { %17077 = vmatmul.mubr.msk.f32.gmra.mrb[98].mxu1 %vm447_vm0, %v2853_v18  ;;  %v9951_v18 = vld [vmem:[%s20135_s6 + $0x235] sm:$0xff] }
 0x2fa   : > { %18015 = vmatmul.mubr.msk.f32.gmra.mrb[30].mxu0 %vm447_vm0, %v9920_v19  ;;  %17079 = vmatprep.mubr.msk.f32.mxu1 %vm447_vm0, %v2854_v20  ;;  %v2885_v19 = vld [vmem:[%s20135_s6 + $0x41a] sm:$0xff] }
 0x2fb   : > { %18017 = vmatprep.mubr.msk.f32.mxu0 %vm447_vm0, %v9921_v22  ;;  %v9952_v20 = vld [vmem:[%s20135_s6 + $0x23d] sm:$0xff] }
 0x2fc   : > { %v2886_v22 = vld [vmem:[%s20135_s6 + $0x422] sm:$0xff] }
 0x2fd   : > { %17080 = vmatmul.mubr.msk.f32.gmra.mrb[100].mxu1 %vm447_vm0, %v2855_v23  ;;  %v9953_v23 = vld [vmem:[%s20135_s6 + $0x245] sm:$0xff] }
 0x2fe   : > { %18018 = vmatmul.mubr.msk.f32.gmra.mrb[32].mxu0 %vm447_vm0, %v9922_v24  ;;  %17082 = vmatprep.mubr.msk.f32.mxu1 %vm447_vm0, %v2856_v25  ;;  %v2887_v24 = vld [vmem:[%s20135_s6 + $0x42a] sm:$0xff] }
 0x2ff   : > { %18020 = vmatprep.mubr.msk.f32.mxu0 %vm447_vm0, %v9923_v26  ;;  %v9954_v25 = vld [vmem:[%s20135_s6 + $0x24d] sm:$0xff] }
 0x300   : > { %v2888_v26 = vld [vmem:[%s20135_s6 + $0x432] sm:$0xff] }
 0x301   : > { %17083 = vmatmul.mubr.msk.f32.gmra.mrb[102].mxu1 %vm447_vm0, %v2857_v27  ;;  %v9955_v27 = vld [vmem:[%s20135_s6 + $0x255] sm:$0xff] }
 0x302   : > { %18021 = vmatmul.mubr.msk.f32.gmra.mrb[34].mxu0 %vm447_vm0, %v9924_v28  ;;  %17085 = vmatprep.mubr.msk.f32.mxu1 %vm447_vm0, %v2858_v29  ;;  %v2889_v28 = vld [vmem:[%s20135_s6 + $0x43a] sm:$0x3f] }
 0x303   : > { %18023 = vmatprep.mubr.msk.f32.mxu0 %vm447_vm0, %v9925_v21  ;;  %v9956_v29 = vld [vmem:[%s20135_s6 + $0x25d] sm:$0xff] }
 0x304   : > { %v4181_v21 = vld [vmem:[%s20135_s6 + $0x22] sm:$0xff] }
 0x305   : > { %17086 = vmatmul.mubr.msk.f32.gmra.mrb[104].mxu1 %vm447_vm0, %v2859_v30  ;;  %v9957_v30 = vld [vmem:[%s20135_s6 + $0x265] sm:$0xff] }
 0x306   : > { %18024 = vmatmul.mubr.msk.f32.gmra.mrb[36].mxu0 %vm447_vm0, %v9926_v31  ;;  %17088 = vmatprep.mubr.msk.f32.mxu1 %vm447_vm0, %v2860_v32  ;;  %v4182_v31 = vld [vmem:[%s20135_s6 + $0x2a] sm:$0xff] }
 0x307   : > { %18026 = vmatprep.mubr.msk.f32.mxu0 %vm447_vm0, %v9927_v33  ;;  %v9958_v32 = vld [vmem:[%s20135_s6 + $0x26d] sm:$0xff] }
 0x308   : > { %v4183_v33 = vld [vmem:[%s20135_s6 + $0x32] sm:$0xff] }
 0x309   : > { %17089 = vmatmul.mubr.msk.f32.gmra.mrb[106].mxu1 %vm447_vm0, %v2861_v34  ;;  %v9959_v34 = vld [vmem:[%s20135_s6 + $0x275] sm:$0xff] }
 0x30a   : > { %18027 = vmatmul.mubr.msk.f32.gmra.mrb[38].mxu0 %vm447_vm0, %v9928_v35  ;;  %17091 = vmatprep.mubr.msk.f32.mxu1 %vm447_vm0, %v2862_v36  ;;  %v4184_v35 = vld [vmem:[%s20135_s6 + $0x3a] sm:$0xff] }
 0x30b   : > { %18029 = vmatprep.mubr.msk.f32.mxu0 %vm447_vm0, %v9929_v2  ;;  %v9960_v36 = vld [vmem:[%s20135_s6 + $0x27d] sm:$0xff] }
 0x30c   : > { %v4185_v2 = vld [vmem:[%s20135_s6 + $0x42] sm:$0xff] }
 0x30d   : > { %17092 = vmatmul.mubr.msk.f32.gmra.mrb[108].mxu1 %vm447_vm0, %v2863_v37  ;;  %v9961_v37 = vld [vmem:[%s20135_s6 + $0x285] sm:$0xff] }
 0x30e   : > { %18030 = vmatmul.mubr.msk.f32.gmra.mrb[40].mxu0 %vm447_vm0, %v9930_v38  ;;  %17094 = vmatprep.mubr.msk.f32.mxu1 %vm447_vm0, %v2864_v39  ;;  %v9962_v38 = vld [vmem:[%s20135_s6 + $0x28d] sm:$0xff] }
 0x30f   : > { %18032 = vmatprep.mubr.msk.f32.mxu0 %vm447_vm0, %v9931_v40  ;;  %v4187_v39 = vld [vmem:[%s20135_s6 + $0x52] sm:$0xff] }
 0x310   : > { %v9963_v40 = vld [vmem:[%s20135_s6 + $0x295] sm:$0xff] }
 0x311   : > { %17095 = vmatmul.mubr.msk.f32.gmra.mrb[110].mxu1 %vm447_vm0, %v2865_v42  ;;  %v4188_v42 = vld [vmem:[%s20135_s6 + $0x5a] sm:$0xff] }
 0x312   : > { %18033 = vmatmul.mubr.msk.f32.gmra.mrb[42].mxu0 %vm447_vm0, %v9932_v43  ;;  %17097 = vmatprep.mubr.msk.f32.mxu1 %vm447_vm0, %v2866_v44  ;;  %v9964_v43 = vld [vmem:[%s20135_s6 + $0x29d] sm:$0xff] }
 0x313   : > { %18035 = vmatprep.mubr.msk.f32.mxu0 %vm447_vm0, %v9933_v45  ;;  %v4189_v44 = vld [vmem:[%s20135_s6 + $0x62] sm:$0xff] }
 0x314   : > { %v9965_v45 = vld [vmem:[%s20135_s6 + $0x2a5] sm:$0xff] }
 0x315   : > { %17098 = vmatmul.mubr.msk.f32.gmra.mrb[112].mxu1 %vm447_vm0, %v2867_v46  ;;  %v4190_v46 = vld [vmem:[%s20135_s6 + $0x6a] sm:$0xff] }
 0x316   : > { %18036 = vmatmul.mubr.msk.f32.gmra.mrb[44].mxu0 %vm447_vm0, %v9934_v47  ;;  %17100 = vmatprep.mubr.msk.f32.mxu1 %vm447_vm0, %v2868_v48  ;;  %v9966_v47 = vld [vmem:[%s20135_s6 + $0x2ad] sm:$0xff] }
 0x317   : > { %18038 = vmatprep.mubr.msk.f32.mxu0 %vm447_vm0, %v9935_v49  ;;  %v4191_v48 = vld [vmem:[%s20135_s6 + $0x72] sm:$0xff] }
 0x318   : > { %v9967_v49 = vld [vmem:[%s20135_s6 + $0x2b5] sm:$0xff] }
 0x319   : > { %17101 = vmatmul.mubr.msk.f32.gmra.mrb[114].mxu1 %vm447_vm0, %v2869_v50  ;;  %v4192_v50 = vld [vmem:[%s20135_s6 + $0x7a] sm:$0xff] }
 0x31a   : > { %18039 = vmatmul.mubr.msk.f32.gmra.mrb[46].mxu0 %vm447_vm0, %v9936_v41  ;;  %17103 = vmatprep.mubr.msk.f32.mxu1 %vm447_vm0, %v2870_v51  ;;  %v9968_v41 = vld [vmem:[%s20135_s6 + $0x2bd] sm:$0xff] }
 0x31b   : > { %18041 = vmatprep.mubr.msk.f32.mxu0 %vm447_vm0, %v9937_v52  ;;  %v4193_v51 = vld [vmem:[%s20135_s6 + $0x82] sm:$0xff] }
 0x31c   : > { %v9969_v52 = vld [vmem:[%s20135_s6 + $0x2c5] sm:$0xff] }
 0x31d   : > { %17104 = vmatmul.mubr.msk.f32.gmra.mrb[116].mxu1 %vm447_vm0, %v2871_v53  ;;  %v4194_v53 = vld [vmem:[%s20135_s6 + $0x8a] sm:$0xff] }
 0x31e   : > { %18042 = vmatmul.mubr.msk.f32.gmra.mrb[48].mxu0 %vm447_vm0, %v9938_v54  ;;  %17106 = vmatprep.mubr.msk.f32.mxu1 %vm447_vm0, %v2872_v56  ;;  %v9970_v54 = vld [vmem:[%s20135_s6 + $0x2cd] sm:$0xff] }
 0x31f   : > { %18044 = vmatprep.mubr.msk.f32.mxu0 %vm447_vm0, %v9939_v57  ;;  %v4195_v56 = vld [vmem:[%s20135_s6 + $0x92] sm:$0xff] }
 0x320   : > { %v9971_v57 = vld [vmem:[%s20135_s6 + $0x2d5] sm:$0xff] }
 0x321   : > { %17107 = vmatmul.mubr.msk.f32.gmra.mrb[118].mxu1 %vm447_vm0, %v2873_v58  ;;  %v4196_v58 = vld [vmem:[%s20135_s6 + $0x9a] sm:$0xff] }
 0x322   : > { %18045 = vmatmul.mubr.msk.f32.gmra.mrb[50].mxu0 %vm447_vm0, %v9940_v59  ;;  %17109 = vmatprep.mubr.msk.f32.mxu1 %vm447_vm0, %v2874_v60  ;;  %v9972_v59 = vld [vmem:[%s20135_s6 + $0x2dd] sm:$0xff] }
 0x323   : > { %18047 = vmatprep.mubr.msk.f32.mxu0 %vm447_vm0, %v9941_v61  ;;  %v4197_v60 = vld [vmem:[%s20135_s6 + $0xa2] sm:$0xff] }
 0x324   : > { %v9973_v61 = vld [vmem:[%s20135_s6 + $0x2e5] sm:$0xff] }
 0x325   : > { %17110 = vmatmul.mubr.msk.f32.gmra.mrb[120].mxu1 %vm447_vm0, %v2875_v62  ;;  %v4198_v62 = vld [vmem:[%s20135_s6 + $0xaa] sm:$0xff] }
 0x326   : > { %18048 = vmatmul.mubr.msk.f32.gmra.mrb[52].mxu0 %vm447_vm0, %v9942_v63  ;;  %17112 = vmatprep.mubr.msk.f32.mxu1 %vm447_vm0, %v2876_v0  ;;  %v9974_v63 = vld [vmem:[%s20135_s6 + $0x2ed] sm:$0xff] }
 0x327   : > { %18050 = vmatprep.mubr.msk.f32.mxu0 %vm447_vm0, %v9943_v55  ;;  %v4199_v0 = vld [vmem:[%s20135_s6 + $0xb2] sm:$0xff] }
 0x328   : > { %v9975_v55 = vld [vmem:[%s20135_s6 + $0x2f5] sm:$0xff] }
 0x329   : > { %17113 = vmatmul.mubr.msk.f32.gmra.mrb[122].mxu1 %vm447_vm0, %v2877_v1  ;;  %v4200_v1 = vld [vmem:[%s20135_s6 + $0xba] sm:$0xff] }
 0x32a   : > { %18051 = vmatmul.mubr.msk.f32.gmra.mrb[54].mxu0 %vm447_vm0, %v9944_v3  ;;  %17115 = vmatprep.mubr.msk.f32.mxu1 %vm447_vm0, %v2878_v4  ;;  %v9976_v3 = vld [vmem:[%s20135_s6 + $0x2fd] sm:$0xff] }
 0x32b   : > { %18053 = vmatprep.mubr.msk.f32.mxu0 %vm447_vm0, %v9945_v5  ;;  %v4201_v4 = vld [vmem:[%s20135_s6 + $0xc2] sm:$0xff] }
 0x32c   : > { %v9977_v5 = vld [vmem:[%s20135_s6 + $0x305] sm:$0xff] }
 0x32d   : > { %17116 = vmatmul.mubr.msk.f32.gmra.mrb[124].mxu1 %vm447_vm0, %v2879_v8  ;;  %v4202_v8 = vld [vmem:[%s20135_s6 + $0xca] sm:$0xff] }
 0x32e   : > { %18054 = vmatmul.mubr.msk.f32.gmra.mrb[56].mxu0 %vm447_vm0, %v9946_v9  ;;  %17118 = vmatprep.mubr.msk.f32.mxu1 %vm447_vm0, %v2880_v10  ;;  %v9978_v9 = vld [vmem:[%s20135_s6 + $0x30d] sm:$0xff] }
 0x32f   : > { %18056 = vmatprep.mubr.msk.f32.mxu0 %vm447_vm0, %v9947_v11  ;;  %v4203_v10 = vld [vmem:[%s20135_s6 + $0xd2] sm:$0xff] }
 0x330   : > { %v9979_v11 = vld [vmem:[%s20135_s6 + $0x315] sm:$0xff] }
 0x331   : > { %17119 = vmatmul.mubr.msk.f32.gmra.mrb[126].mxu1 %vm447_vm0, %v2881_v12  ;;  %v4204_v12 = vld [vmem:[%s20135_s6 + $0xda] sm:$0xff] }
 0x332   : > { %18057 = vmatmul.mubr.msk.f32.gmra.mrb[58].mxu0 %vm447_vm0, %v9948_v13  ;;  %17121 = vmatprep.mubr.msk.f32.mxu1 %vm447_vm0, %v2882_v14  ;;  %v9980_v13 = vld [vmem:[%s20135_s6 + $0x31d] sm:$0xff] }
 0x333   : > { %18059 = vmatprep.mubr.msk.f32.mxu0 %vm447_vm0, %v9949_v15  ;;  %v4205_v14 = vld [vmem:[%s20135_s6 + $0xe2] sm:$0xff] }
 0x334   : > { %v9981_v15 = vld [vmem:[%s20135_s6 + $0x325] sm:$0xff] }
 0x335   : > { %17122 = vmatmul.mubr.msk.f32.gmra.mrb[128].mxu1 %vm447_vm0, %v2883_v6  ;;  %v4206_v6 = vld [vmem:[%s20135_s6 + $0xea] sm:$0xff] }
 0x336   : > { %18060 = vmatmul.mubr.msk.f32.gmra.mrb[60].mxu0 %vm447_vm0, %v9950_v16  ;;  %17124 = vmatprep.mubr.msk.f32.mxu1 %vm447_vm0, %v2884_v17  ;;  %v9982_v16 = vld [vmem:[%s20135_s6 + $0x32d] sm:$0xff] }
 0x337   : > { %18062 = vmatprep.mubr.msk.f32.mxu0 %vm447_vm0, %v9951_v18  ;;  %v4207_v17 = vld [vmem:[%s20135_s6 + $0xf2] sm:$0xff] }
 0x338   : > { %v9983_v18 = vld [vmem:[%s20135_s6 + $0x335] sm:$0xff] }
 0x339   : > { %17125 = vmatmul.mubr.msk.f32.gmra.mrb[130].mxu1 %vm447_vm0, %v2885_v19  ;;  %v4208_v19 = vld [vmem:[%s20135_s6 + $0xfa] sm:$0xff] }
 0x33a   : > { %18063 = vmatmul.mubr.msk.f32.gmra.mrb[62].mxu0 %vm447_vm0, %v9952_v20  ;;  %17127 = vmatprep.mubr.msk.f32.mxu1 %vm447_vm0, %v2886_v22  ;;  %v9984_v20 = vld [vmem:[%s20135_s6 + $0x33d] sm:$0xff] }
 0x33b   : > { %18065 = vmatprep.mubr.msk.f32.mxu0 %vm447_vm0, %v9953_v23  ;;  %v4209_v22 = vld [vmem:[%s20135_s6 + $0x102] sm:$0xff] }
 0x33c   : > { %v9985_v23 = vld [vmem:[%s20135_s6 + $0x345] sm:$0xff] }
 0x33d   : > { %17128 = vmatmul.mubr.msk.f32.gmra.mrb[132].mxu1 %vm447_vm0, %v2887_v24  ;;  %v4210_v24 = vld [vmem:[%s20135_s6 + $0x10a] sm:$0xff] }
 0x33e   : > { %18066 = vmatmul.mubr.msk.f32.gmra.mrb[64].mxu0 %vm447_vm0, %v9954_v25  ;;  %17130 = vmatprep.mubr.msk.f32.mxu1 %vm447_vm0, %v2888_v26  ;;  %v9986_v25 = vld [vmem:[%s20135_s6 + $0x34d] sm:$0xff] }
 0x33f   : > { %18068 = vmatprep.mubr.msk.f32.mxu0 %vm447_vm0, %v9955_v27  ;;  %v4211_v26 = vld [vmem:[%s20135_s6 + $0x112] sm:$0xff] }
 0x340   : > { %v9987_v27 = vld [vmem:[%s20135_s6 + $0x355] sm:$0xff] }
 0x341   : > { %17131 = vmatmul.mubr.msk.f32.gmra.mrb[134].mxu1 %vm447_vm0, %v2889_v28  ;;  %v4212_v28 = vld [vmem:[%s20135_s6 + $0x11a] sm:$0xff] }
 0x342   : > { %18069 = vmatmul.mubr.msk.f32.gmra.mrb[66].mxu0 %vm447_vm0, %v9956_v29  ;;  %17137 = vmatprep.mubr.msk.f32.mxu1 %vm447_vm0, %v4181_v21  ;;  %v9988_v29 = vld [vmem:[%s20135_s6 + $0x35d] sm:$0xff] }
 0x343   : > { %18071 = vmatprep.mubr.msk.f32.mxu0 %vm447_vm0, %v9957_v30  ;;  %v4213_v21 = vld [vmem:[%s20135_s6 + $0x122] sm:$0xff] }
 0x344   : > { %v9989_v30 = vld [vmem:[%s20135_s6 + $0x365] sm:$0xff] }
 0x345   : > { %17138 = vmatmul.mubr.msk.f32.vlgmr.msra.gmra.mrb[0].mxu1 %vm447_vm0, %v4182_v31  ;;  %v4214_v31 = vld [vmem:[%s20135_s6 + $0x12a] sm:$0xff] }
 0x346   : > { %18072 = vmatmul.mubr.msk.f32.gmra.mrb[68].mxu0 %vm447_vm0, %v9958_v32  ;;  %18418 = vmatpush3.bf16.msra.mxu1 %v20119_v7  ;;  %v4186_v7 = vld [vmem:[%s20135_s6 + $0x4a] sm:$0xff] }
 0x347   : > { %17140 = vmatprep.mubr.msk.f32.mxu1 %vm447_vm0, %v4183_v33  ;;  %18074 = vmatprep.mubr.msk.f32.mxu0 %vm447_vm0, %v9959_v34  ;;  %v9990_v32 = vld [vmem:[%s20135_s6 + $0x36d] sm:$0xff]  ;;  %v9991_v34 = vld [vmem:[%s20135_s6 + $0x375] sm:$0xff] }
 0x348   : > { %v4215_v33 = vld [vmem:[%s20135_s6 + $0x132] sm:$0xff] }
 0x349   : > { %17141 = vmatmul.mubr.msk.f32.gmra.mrb[2].mxu1 %vm447_vm0, %v4184_v35  ;;  %v4216_v35 = vld [vmem:[%s20135_s6 + $0x13a] sm:$0xff] }
 0x34a   : > { %18075 = vmatmul.mubr.msk.f32.gmra.mrb[70].mxu0 %vm447_vm0, %v9960_v36  ;;  %17143 = vmatprep.mubr.msk.f32.mxu1 %vm447_vm0, %v4185_v2  ;;  %v9992_v36 = vld [vmem:[%s20135_s6 + $0x37d] sm:$0xff] }
 0x34b   : > { %18077 = vmatprep.mubr.msk.f32.mxu0 %vm447_vm0, %v9961_v37  ;;  %v4217_v2 = vld [vmem:[%s20135_s6 + $0x142] sm:$0xff] }
 0x34c   : > { %v9993_v37 = vld [vmem:[%s20135_s6 + $0x385] sm:$0xff] }
 0x34d   : > { %17144 = vmatmul.mubr.msk.f32.gmra.mrb[4].mxu1 %vm447_vm0, %v4186_v7  ;;  %v4218_v7 = vld [vmem:[%s20135_s6 + $0x14a] sm:$0xff] }
 0x34e   : > { %18078 = vmatmul.mubr.msk.f32.gmra.mrb[72].mxu0 %vm447_vm0, %v9962_v38  ;;  %17146 = vmatprep.mubr.msk.f32.mxu1 %vm447_vm0, %v4187_v39  ;;  %v9994_v38 = vld [vmem:[%s20135_s6 + $0x38d] sm:$0xff] }
 0x34f   : > { %18080 = vmatprep.mubr.msk.f32.mxu0 %vm447_vm0, %v9963_v40  ;;  %v4219_v39 = vld [vmem:[%s20135_s6 + $0x152] sm:$0xff] }
 0x350   : > { %v9995_v40 = vld [vmem:[%s20135_s6 + $0x395] sm:$0xff] }
 0x351   : > { %17147 = vmatmul.mubr.msk.f32.gmra.mrb[6].mxu1 %vm447_vm0, %v4188_v42  ;;  %v4220_v42 = vld [vmem:[%s20135_s6 + $0x15a] sm:$0xff] }
 0x352   : > { %18081 = vmatmul.mubr.msk.f32.gmra.mrb[74].mxu0 %vm447_vm0, %v9964_v43  ;;  %17149 = vmatprep.mubr.msk.f32.mxu1 %vm447_vm0, %v4189_v44  ;;  %v9996_v43 = vld [vmem:[%s20135_s6 + $0x39d] sm:$0xff] }
 0x353   : > { %18083 = vmatprep.mubr.msk.f32.mxu0 %vm447_vm0, %v9965_v45  ;;  %v4221_v44 = vld [vmem:[%s20135_s6 + $0x162] sm:$0xff] }
 0x354   : > { %v9997_v45 = vld [vmem:[%s20135_s6 + $0x3a5] sm:$0xff] }
 0x355   : > { %17150 = vmatmul.mubr.msk.f32.gmra.mrb[8].mxu1 %vm447_vm0, %v4190_v46  ;;  %v4222_v46 = vld [vmem:[%s20135_s6 + $0x16a] sm:$0xff] }
 0x356   : > { %18084 = vmatmul.mubr.msk.f32.gmra.mrb[76].mxu0 %vm447_vm0, %v9966_v47  ;;  %17152 = vmatprep.mubr.msk.f32.mxu1 %vm447_vm0, %v4191_v48  ;;  %v9998_v47 = vld [vmem:[%s20135_s6 + $0x3ad] sm:$0xff] }
 0x357   : > { %18086 = vmatprep.mubr.msk.f32.mxu0 %vm447_vm0, %v9967_v49  ;;  %v4223_v48 = vld [vmem:[%s20135_s6 + $0x172] sm:$0xff] }
 0x358   : > { %v9999_v49 = vld [vmem:[%s20135_s6 + $0x3b5] sm:$0xff] }
 0x359   : > { %17153 = vmatmul.mubr.msk.f32.gmra.mrb[10].mxu1 %vm447_vm0, %v4192_v50  ;;  %v4224_v50 = vld [vmem:[%s20135_s6 + $0x17a] sm:$0xff] }
 0x35a   : > { %18087 = vmatmul.mubr.msk.f32.gmra.mrb[78].mxu0 %vm447_vm0, %v9968_v41  ;;  %17155 = vmatprep.mubr.msk.f32.mxu1 %vm447_vm0, %v4193_v51  ;;  %v10000_v41 = vld [vmem:[%s20135_s6 + $0x3bd] sm:$0xff] }
 0x35b   : > { %18089 = vmatprep.mubr.msk.f32.mxu0 %vm447_vm0, %v9969_v52  ;;  %v4225_v51 = vld [vmem:[%s20135_s6 + $0x182] sm:$0xff] }
 0x35c   : > { %v10001_v52 = vld [vmem:[%s20135_s6 + $0x3c5] sm:$0xff] }
 0x35d   : > { %17156 = vmatmul.mubr.msk.f32.gmra.mrb[12].mxu1 %vm447_vm0, %v4194_v53  ;;  %v4226_v53 = vld [vmem:[%s20135_s6 + $0x18a] sm:$0xff] }
 0x35e   : > { %18090 = vmatmul.mubr.msk.f32.gmra.mrb[80].mxu0 %vm447_vm0, %v9970_v54  ;;  %17158 = vmatprep.mubr.msk.f32.mxu1 %vm447_vm0, %v4195_v56  ;;  %v10002_v54 = vld [vmem:[%s20135_s6 + $0x3cd] sm:$0xff] }
 0x35f   : > { %18092 = vmatprep.mubr.msk.f32.mxu0 %vm447_vm0, %v9971_v57  ;;  %v4227_v56 = vld [vmem:[%s20135_s6 + $0x192] sm:$0xff] }
 0x360   : > { %v10003_v57 = vld [vmem:[%s20135_s6 + $0x3d5] sm:$0xff] }
 0x361   : > { %17159 = vmatmul.mubr.msk.f32.gmra.mrb[14].mxu1 %vm447_vm0, %v4196_v58  ;;  %v4228_v58 = vld [vmem:[%s20135_s6 + $0x19a] sm:$0xff] }
 0x362   : > { %18093 = vmatmul.mubr.msk.f32.gmra.mrb[82].mxu0 %vm447_vm0, %v9972_v59  ;;  %17161 = vmatprep.mubr.msk.f32.mxu1 %vm447_vm0, %v4197_v60  ;;  %v10004_v59 = vld [vmem:[%s20135_s6 + $0x3dd] sm:$0xff] }
 0x363   : > { %18095 = vmatprep.mubr.msk.f32.mxu0 %vm447_vm0, %v9973_v61  ;;  %v4229_v60 = vld [vmem:[%s20135_s6 + $0x1a2] sm:$0xff] }
 0x364   : > { %v10005_v61 = vld [vmem:[%s20135_s6 + $0x3e5] sm:$0xff] }
 0x365   : > { %17162 = vmatmul.mubr.msk.f32.gmra.mrb[16].mxu1 %vm447_vm0, %v4198_v62  ;;  %v4230_v62 = vld [vmem:[%s20135_s6 + $0x1aa] sm:$0xff] }
 0x366   : > { %18096 = vmatmul.mubr.msk.f32.gmra.mrb[84].mxu0 %vm447_vm0, %v9974_v63  ;;  %17164 = vmatprep.mubr.msk.f32.mxu1 %vm447_vm0, %v4199_v0  ;;  %v10006_v63 = vld [vmem:[%s20135_s6 + $0x3ed] sm:$0xff] }
 0x367   : > { %18098 = vmatprep.mubr.msk.f32.mxu0 %vm447_vm0, %v9975_v55  ;;  %v4231_v0 = vld [vmem:[%s20135_s6 + $0x1b2] sm:$0xff] }
 0x368   : > { %v10007_v55 = vld [vmem:[%s20135_s6 + $0x3f5] sm:$0xff] }
 0x369   : > { %17165 = vmatmul.mubr.msk.f32.gmra.mrb[18].mxu1 %vm447_vm0, %v4200_v1  ;;  %v4232_v1 = vld [vmem:[%s20135_s6 + $0x1ba] sm:$0xff] }
 0x36a   : > { %18099 = vmatmul.mubr.msk.f32.gmra.mrb[86].mxu0 %vm447_vm0, %v9976_v3  ;;  %17167 = vmatprep.mubr.msk.f32.mxu1 %vm447_vm0, %v4201_v4  ;;  %v10008_v3 = vld [vmem:[%s20135_s6 + $0x3fd] sm:$0xff] }
 0x36b   : > { %18101 = vmatprep.mubr.msk.f32.mxu0 %vm447_vm0, %v9977_v5  ;;  %v4233_v4 = vld [vmem:[%s20135_s6 + $0x1c2] sm:$0xff] }
 0x36c   : > { %v10009_v5 = vld [vmem:[%s20135_s6 + $0x405] sm:$0xff] }
 0x36d   : > { %17168 = vmatmul.mubr.msk.f32.gmra.mrb[20].mxu1 %vm447_vm0, %v4202_v8  ;;  %v4234_v8 = vld [vmem:[%s20135_s6 + $0x1ca] sm:$0xff] }
 0x36e   : > { %18102 = vmatmul.mubr.msk.f32.gmra.mrb[88].mxu0 %vm447_vm0, %v9978_v9  ;;  %17170 = vmatprep.mubr.msk.f32.mxu1 %vm447_vm0, %v4203_v10  ;;  %v10010_v9 = vld [vmem:[%s20135_s6 + $0x40d] sm:$0xff] }
 0x36f   : > { %18104 = vmatprep.mubr.msk.f32.mxu0 %vm447_vm0, %v9979_v11  ;;  %v4235_v10 = vld [vmem:[%s20135_s6 + $0x1d2] sm:$0xff] }
 0x370   : > { %v10011_v11 = vld [vmem:[%s20135_s6 + $0x415] sm:$0xff] }
 0x371   : > { %17171 = vmatmul.mubr.msk.f32.gmra.mrb[22].mxu1 %vm447_vm0, %v4204_v12  ;;  %v4236_v12 = vld [vmem:[%s20135_s6 + $0x1da] sm:$0xff] }
 0x372   : > { %18105 = vmatmul.mubr.msk.f32.gmra.mrb[90].mxu0 %vm447_vm0, %v9980_v13  ;;  %17173 = vmatprep.mubr.msk.f32.mxu1 %vm447_vm0, %v4205_v14  ;;  %v10012_v13 = vld [vmem:[%s20135_s6 + $0x41d] sm:$0xff] }
 0x373   : > { %18107 = vmatprep.mubr.msk.f32.mxu0 %vm447_vm0, %v9981_v15  ;;  %v4237_v14 = vld [vmem:[%s20135_s6 + $0x1e2] sm:$0xff] }
 0x374   : > { %v10013_v15 = vld [vmem:[%s20135_s6 + $0x425] sm:$0xff] }
 0x375   : > { %17174 = vmatmul.mubr.msk.f32.gmra.mrb[24].mxu1 %vm447_vm0, %v4206_v6  ;;  %v4238_v6 = vld [vmem:[%s20135_s6 + $0x1ea] sm:$0xff] }
 0x376   : > { %18108 = vmatmul.mubr.msk.f32.gmra.mrb[92].mxu0 %vm447_vm0, %v9982_v16  ;;  %17176 = vmatprep.mubr.msk.f32.mxu1 %vm447_vm0, %v4207_v17  ;;  %v10014_v16 = vld [vmem:[%s20135_s6 + $0x42d] sm:$0xff] }
 0x377   : > { %18110 = vmatprep.mubr.msk.f32.mxu0 %vm447_vm0, %v9983_v18  ;;  %v4239_v17 = vld [vmem:[%s20135_s6 + $0x1f2] sm:$0xff] }
 0x378   : > { %v10015_v18 = vld [vmem:[%s20135_s6 + $0x435] sm:$0xff] }
 0x379   : > { %17177 = vmatmul.mubr.msk.f32.gmra.mrb[26].mxu1 %vm447_vm0, %v4208_v19  ;;  %v4240_v19 = vld [vmem:[%s20135_s6 + $0x1fa] sm:$0xff] }
 0x37a   : > { %18111 = vmatmul.mubr.msk.f32.gmra.mrb[94].mxu0 %vm447_vm0, %v9984_v20  ;;  %17179 = vmatprep.mubr.msk.f32.mxu1 %vm447_vm0, %v4209_v22  ;;  %v10016_v20 = vld [vmem:[%s20135_s6 + $0x43d] sm:$0xff] }
 0x37b   : > { %18113 = vmatprep.mubr.msk.f32.mxu0 %vm447_vm0, %v9985_v23  ;;  %v4241_v22 = vld [vmem:[%s20135_s6 + $0x202] sm:$0xff] }
 0x37c   : > { %v10017_v23 = vld [vmem:[%s20135_s6 + $0x445] sm:$0xff] }
 0x37d   : > { %17180 = vmatmul.mubr.msk.f32.gmra.mrb[28].mxu1 %vm447_vm0, %v4210_v24  ;;  %v4242_v24 = vld [vmem:[%s20135_s6 + $0x20a] sm:$0xff] }
 0x37e   : > { %18114 = vmatmul.mubr.msk.f32.gmra.mrb[96].mxu0 %vm447_vm0, %v9986_v25  ;;  %17182 = vmatprep.mubr.msk.f32.mxu1 %vm447_vm0, %v4211_v26  ;;  %v10018_v25 = vld [vmem:[%s20135_s6 + $0x44d] sm:$0xff] }
 0x37f   : > { %18116 = vmatprep.mubr.msk.f32.mxu0 %vm447_vm0, %v9987_v27  ;;  %v4243_v26 = vld [vmem:[%s20135_s6 + $0x212] sm:$0xff] }
 0x380   : > { %v10019_v27 = vld [vmem:[%s20135_s6 + $0x455] sm:$0xff] }
 0x381   : > { %17183 = vmatmul.mubr.msk.f32.gmra.mrb[30].mxu1 %vm447_vm0, %v4212_v28  ;;  %v4244_v28 = vld [vmem:[%s20135_s6 + $0x21a] sm:$0xff] }
 0x382   : > { %18117 = vmatmul.mubr.msk.f32.gmra.mrb[98].mxu0 %vm447_vm0, %v9988_v29  ;;  %17185 = vmatprep.mubr.msk.f32.mxu1 %vm447_vm0, %v4213_v21  ;;  %v10020_v29 = vld [vmem:[%s20135_s6 + $0x45d] sm:$0xff] }
 0x383   : > { %18119 = vmatprep.mubr.msk.f32.mxu0 %vm447_vm0, %v9989_v30  ;;  %v4245_v21 = vld [vmem:[%s20135_s6 + $0x222] sm:$0xff] }
 0x384   : > { %v10021_v30 = vld [vmem:[%s20135_s6 + $0x465] sm:$0xff] }
 0x385   : > { %17186 = vmatmul.mubr.msk.f32.gmra.mrb[32].mxu1 %vm447_vm0, %v4214_v31  ;;  %v4246_v31 = vld [vmem:[%s20135_s6 + $0x22a] sm:$0xff] }
 0x386   : > { %18120 = vmatmul.mubr.msk.f32.gmra.mrb[100].mxu0 %vm447_vm0, %v9990_v32  ;;  %17188 = vmatprep.mubr.msk.f32.mxu1 %vm447_vm0, %v4215_v33  ;;  %v10022_v32 = vld [vmem:[%s20135_s6 + $0x46d] sm:$0xff] }
 0x387   : > { %18122 = vmatprep.mubr.msk.f32.mxu0 %vm447_vm0, %v9991_v34  ;;  %v4247_v33 = vld [vmem:[%s20135_s6 + $0x232] sm:$0xff] }
 0x388   : > { %v10023_v34 = vld [vmem:[%s20135_s6 + $0x475] sm:$0xff] }
 0x389   : > { %17189 = vmatmul.mubr.msk.f32.gmra.mrb[34].mxu1 %vm447_vm0, %v4216_v35  ;;  %v4248_v35 = vld [vmem:[%s20135_s6 + $0x23a] sm:$0xff] }
 0x38a   : > { %18123 = vmatmul.mubr.msk.f32.gmra.mrb[102].mxu0 %vm447_vm0, %v9992_v36  ;;  %17191 = vmatprep.mubr.msk.f32.mxu1 %vm447_vm0, %v4217_v2  ;;  %v10024_v36 = vld [vmem:[%s20135_s6 + $0x47d] sm:$0x3f] }
 0x38b   : > { %18125 = vmatprep.mubr.msk.f32.mxu0 %vm447_vm0, %v9993_v37  ;;  %v4249_v2 = vld [vmem:[%s20135_s6 + $0x242] sm:$0xff] }
 0x38c   : > { %v11316_v37 = vld [vmem:[%s20135_s6 + $0x46] sm:$0xff] }
 0x38d   : > { %17192 = vmatmul.mubr.msk.f32.gmra.mrb[36].mxu1 %vm447_vm0, %v4218_v7  ;;  %v4250_v7 = vld [vmem:[%s20135_s6 + $0x24a] sm:$0xff] }
 0x38e   : > { %18126 = vmatmul.mubr.msk.f32.gmra.mrb[104].mxu0 %vm447_vm0, %v9994_v38  ;;  %17194 = vmatprep.mubr.msk.f32.mxu1 %vm447_vm0, %v4219_v39  ;;  %v11317_v38 = vld [vmem:[%s20135_s6 + $0x4e] sm:$0xff] }
 0x38f   : > { %18128 = vmatprep.mubr.msk.f32.mxu0 %vm447_vm0, %v9995_v40  ;;  %v4251_v39 = vld [vmem:[%s20135_s6 + $0x252] sm:$0xff] }
 0x390   : > { %v11318_v40 = vld [vmem:[%s20135_s6 + $0x56] sm:$0xff] }
 0x391   : > { %17195 = vmatmul.mubr.msk.f32.gmra.mrb[38].mxu1 %vm447_vm0, %v4220_v42  ;;  %v4252_v42 = vld [vmem:[%s20135_s6 + $0x25a] sm:$0xff] }
 0x392   : > { %18129 = vmatmul.mubr.msk.f32.gmra.mrb[106].mxu0 %vm447_vm0, %v9996_v43  ;;  %17197 = vmatprep.mubr.msk.f32.mxu1 %vm447_vm0, %v4221_v44  ;;  %v11319_v43 = vld [vmem:[%s20135_s6 + $0x5e] sm:$0xff] }
 0x393   : > { %18131 = vmatprep.mubr.msk.f32.mxu0 %vm447_vm0, %v9997_v45  ;;  %v4253_v44 = vld [vmem:[%s20135_s6 + $0x262] sm:$0xff] }
 0x394   : > { %v11320_v45 = vld [vmem:[%s20135_s6 + $0x66] sm:$0xff] }
 0x395   : > { %17198 = vmatmul.mubr.msk.f32.gmra.mrb[40].mxu1 %vm447_vm0, %v4222_v46  ;;  %v4254_v46 = vld [vmem:[%s20135_s6 + $0x26a] sm:$0xff] }
 0x396   : > { %18132 = vmatmul.mubr.msk.f32.gmra.mrb[108].mxu0 %vm447_vm0, %v9998_v47  ;;  %17200 = vmatprep.mubr.msk.f32.mxu1 %vm447_vm0, %v4223_v48  ;;  %v11321_v47 = vld [vmem:[%s20135_s6 + $0x6e] sm:$0xff] }
 0x397   : > { %18134 = vmatprep.mubr.msk.f32.mxu0 %vm447_vm0, %v9999_v49  ;;  %v4255_v48 = vld [vmem:[%s20135_s6 + $0x272] sm:$0xff] }
 0x398   : > { %v11322_v49 = vld [vmem:[%s20135_s6 + $0x76] sm:$0xff] }
 0x399   : > { %17201 = vmatmul.mubr.msk.f32.gmra.mrb[42].mxu1 %vm447_vm0, %v4224_v50  ;;  %v4256_v50 = vld [vmem:[%s20135_s6 + $0x27a] sm:$0xff] }
 0x39a   : > { %18135 = vmatmul.mubr.msk.f32.gmra.mrb[110].mxu0 %vm447_vm0, %v10000_v41  ;;  %17203 = vmatprep.mubr.msk.f32.mxu1 %vm447_vm0, %v4225_v51  ;;  %v11323_v41 = vld [vmem:[%s20135_s6 + $0x7e] sm:$0xff] }
 0x39b   : > { %18137 = vmatprep.mubr.msk.f32.mxu0 %vm447_vm0, %v10001_v52  ;;  %v4257_v51 = vld [vmem:[%s20135_s6 + $0x282] sm:$0xff] }
 0x39c   : > { %v11324_v52 = vld [vmem:[%s20135_s6 + $0x86] sm:$0xff] }
 0x39d   : > { %17204 = vmatmul.mubr.msk.f32.gmra.mrb[44].mxu1 %vm447_vm0, %v4226_v53  ;;  %v4258_v53 = vld [vmem:[%s20135_s6 + $0x28a] sm:$0xff] }
 0x39e   : > { %18138 = vmatmul.mubr.msk.f32.gmra.mrb[112].mxu0 %vm447_vm0, %v10002_v54  ;;  %17206 = vmatprep.mubr.msk.f32.mxu1 %vm447_vm0, %v4227_v56  ;;  %v11325_v54 = vld [vmem:[%s20135_s6 + $0x8e] sm:$0xff] }
 0x39f   : > { %18140 = vmatprep.mubr.msk.f32.mxu0 %vm447_vm0, %v10003_v57  ;;  %v4259_v56 = vld [vmem:[%s20135_s6 + $0x292] sm:$0xff] }
 0x3a0   : > { %v11326_v57 = vld [vmem:[%s20135_s6 + $0x96] sm:$0xff] }
 0x3a1   : > { %17207 = vmatmul.mubr.msk.f32.gmra.mrb[46].mxu1 %vm447_vm0, %v4228_v58  ;;  %v4260_v58 = vld [vmem:[%s20135_s6 + $0x29a] sm:$0xff] }
 0x3a2   : > { %18141 = vmatmul.mubr.msk.f32.gmra.mrb[114].mxu0 %vm447_vm0, %v10004_v59  ;;  %17209 = vmatprep.mubr.msk.f32.mxu1 %vm447_vm0, %v4229_v60  ;;  %v11327_v59 = vld [vmem:[%s20135_s6 + $0x9e] sm:$0xff] }
 0x3a3   : > { %18143 = vmatprep.mubr.msk.f32.mxu0 %vm447_vm0, %v10005_v61  ;;  %v4261_v60 = vld [vmem:[%s20135_s6 + $0x2a2] sm:$0xff] }
 0x3a4   : > { %v11328_v61 = vld [vmem:[%s20135_s6 + $0xa6] sm:$0xff] }
 0x3a5   : > { %17210 = vmatmul.mubr.msk.f32.gmra.mrb[48].mxu1 %vm447_vm0, %v4230_v62  ;;  %v4262_v62 = vld [vmem:[%s20135_s6 + $0x2aa] sm:$0xff] }
 0x3a6   : > { %18144 = vmatmul.mubr.msk.f32.gmra.mrb[116].mxu0 %vm447_vm0, %v10006_v63  ;;  %17212 = vmatprep.mubr.msk.f32.mxu1 %vm447_vm0, %v4231_v0  ;;  %v11329_v63 = vld [vmem:[%s20135_s6 + $0xae] sm:$0xff] }
 0x3a7   : > { %18146 = vmatprep.mubr.msk.f32.mxu0 %vm447_vm0, %v10007_v55  ;;  %v4263_v0 = vld [vmem:[%s20135_s6 + $0x2b2] sm:$0xff] }
 0x3a8   : > { %v11330_v55 = vld [vmem:[%s20135_s6 + $0xb6] sm:$0xff] }
 0x3a9   : > { %17213 = vmatmul.mubr.msk.f32.gmra.mrb[50].mxu1 %vm447_vm0, %v4232_v1  ;;  %v4264_v1 = vld [vmem:[%s20135_s6 + $0x2ba] sm:$0xff] }
 0x3aa   : > { %18147 = vmatmul.mubr.msk.f32.gmra.mrb[118].mxu0 %vm447_vm0, %v10008_v3  ;;  %17215 = vmatprep.mubr.msk.f32.mxu1 %vm447_vm0, %v4233_v4  ;;  %v11331_v3 = vld [vmem:[%s20135_s6 + $0xbe] sm:$0xff] }
 0x3ab   : > { %18149 = vmatprep.mubr.msk.f32.mxu0 %vm447_vm0, %v10009_v5  ;;  %v4265_v4 = vld [vmem:[%s20135_s6 + $0x2c2] sm:$0xff] }
 0x3ac   : > { %v11332_v5 = vld [vmem:[%s20135_s6 + $0xc6] sm:$0xff] }
 0x3ad   : > { %17216 = vmatmul.mubr.msk.f32.gmra.mrb[52].mxu1 %vm447_vm0, %v4234_v8  ;;  %v4266_v8 = vld [vmem:[%s20135_s6 + $0x2ca] sm:$0xff] }
 0x3ae   : > { %18150 = vmatmul.mubr.msk.f32.gmra.mrb[120].mxu0 %vm447_vm0, %v10010_v9  ;;  %17218 = vmatprep.mubr.msk.f32.mxu1 %vm447_vm0, %v4235_v10  ;;  %v11333_v9 = vld [vmem:[%s20135_s6 + $0xce] sm:$0xff] }
 0x3af   : > { %18152 = vmatprep.mubr.msk.f32.mxu0 %vm447_vm0, %v10011_v11  ;;  %v4267_v10 = vld [vmem:[%s20135_s6 + $0x2d2] sm:$0xff] }
 0x3b0   : > { %v11334_v11 = vld [vmem:[%s20135_s6 + $0xd6] sm:$0xff] }
 0x3b1   : > { %17219 = vmatmul.mubr.msk.f32.gmra.mrb[54].mxu1 %vm447_vm0, %v4236_v12  ;;  %v4268_v12 = vld [vmem:[%s20135_s6 + $0x2da] sm:$0xff] }
 0x3b2   : > { %18153 = vmatmul.mubr.msk.f32.gmra.mrb[122].mxu0 %vm447_vm0, %v10012_v13  ;;  %17221 = vmatprep.mubr.msk.f32.mxu1 %vm447_vm0, %v4237_v14  ;;  %v11335_v13 = vld [vmem:[%s20135_s6 + $0xde] sm:$0xff] }
 0x3b3   : > { %18155 = vmatprep.mubr.msk.f32.mxu0 %vm447_vm0, %v10013_v15  ;;  %v4269_v14 = vld [vmem:[%s20135_s6 + $0x2e2] sm:$0xff] }
 0x3b4   : > { %v11336_v15 = vld [vmem:[%s20135_s6 + $0xe6] sm:$0xff] }
 0x3b5   : > { %17222 = vmatmul.mubr.msk.f32.gmra.mrb[56].mxu1 %vm447_vm0, %v4238_v6  ;;  %v4270_v6 = vld [vmem:[%s20135_s6 + $0x2ea] sm:$0xff] }
 0x3b6   : > { %18156 = vmatmul.mubr.msk.f32.gmra.mrb[124].mxu0 %vm447_vm0, %v10014_v16  ;;  %17224 = vmatprep.mubr.msk.f32.mxu1 %vm447_vm0, %v4239_v17  ;;  %v11337_v16 = vld [vmem:[%s20135_s6 + $0xee] sm:$0xff] }
 0x3b7   : > { %18158 = vmatprep.mubr.msk.f32.mxu0 %vm447_vm0, %v10015_v18  ;;  %v4271_v17 = vld [vmem:[%s20135_s6 + $0x2f2] sm:$0xff] }
 0x3b8   : > { %v11338_v18 = vld [vmem:[%s20135_s6 + $0xf6] sm:$0xff] }
 0x3b9   : > { %17225 = vmatmul.mubr.msk.f32.gmra.mrb[58].mxu1 %vm447_vm0, %v4240_v19  ;;  %v4272_v19 = vld [vmem:[%s20135_s6 + $0x2fa] sm:$0xff] }
 0x3ba   : > { %18159 = vmatmul.mubr.msk.f32.gmra.mrb[126].mxu0 %vm447_vm0, %v10016_v20  ;;  %17227 = vmatprep.mubr.msk.f32.mxu1 %vm447_vm0, %v4241_v22  ;;  %v11339_v20 = vld [vmem:[%s20135_s6 + $0xfe] sm:$0xff] }
 0x3bb   : > { %18161 = vmatprep.mubr.msk.f32.mxu0 %vm447_vm0, %v10017_v23  ;;  %v4273_v22 = vld [vmem:[%s20135_s6 + $0x302] sm:$0xff] }
 0x3bc   : > { %v11340_v23 = vld [vmem:[%s20135_s6 + $0x106] sm:$0xff] }
 0x3bd   : > { %17228 = vmatmul.mubr.msk.f32.gmra.mrb[60].mxu1 %vm447_vm0, %v4242_v24  ;;  %v4274_v24 = vld [vmem:[%s20135_s6 + $0x30a] sm:$0xff] }
 0x3be   : > { %18162 = vmatmul.mubr.msk.f32.gmra.mrb[128].mxu0 %vm447_vm0, %v10018_v25  ;;  %17230 = vmatprep.mubr.msk.f32.mxu1 %vm447_vm0, %v4243_v26  ;;  %v11341_v25 = vld [vmem:[%s20135_s6 + $0x10e] sm:$0xff] }
 0x3bf   : > { %18164 = vmatprep.mubr.msk.f32.mxu0 %vm447_vm0, %v10019_v27  ;;  %v4275_v26 = vld [vmem:[%s20135_s6 + $0x312] sm:$0xff] }
 0x3c0   : > { %v11342_v27 = vld [vmem:[%s20135_s6 + $0x116] sm:$0xff] }
 0x3c1   : > { %17231 = vmatmul.mubr.msk.f32.gmra.mrb[62].mxu1 %vm447_vm0, %v4244_v28  ;;  %v4276_v28 = vld [vmem:[%s20135_s6 + $0x31a] sm:$0xff] }
 0x3c2   : > { %18165 = vmatmul.mubr.msk.f32.gmra.mrb[130].mxu0 %vm447_vm0, %v10020_v29  ;;  %17233 = vmatprep.mubr.msk.f32.mxu1 %vm447_vm0, %v4245_v21  ;;  %v11343_v29 = vld [vmem:[%s20135_s6 + $0x11e] sm:$0xff] }
 0x3c3   : > { %18167 = vmatprep.mubr.msk.f32.mxu0 %vm447_vm0, %v10021_v30  ;;  %v4277_v21 = vld [vmem:[%s20135_s6 + $0x322] sm:$0xff] }
 0x3c4   : > { %v11344_v30 = vld [vmem:[%s20135_s6 + $0x126] sm:$0xff] }
 0x3c5   : > { %17234 = vmatmul.mubr.msk.f32.gmra.mrb[64].mxu1 %vm447_vm0, %v4246_v31  ;;  %v4278_v31 = vld [vmem:[%s20135_s6 + $0x32a] sm:$0xff] }
 0x3c6   : > { %18168 = vmatmul.mubr.msk.f32.gmra.mrb[132].mxu0 %vm447_vm0, %v10022_v32  ;;  %17236 = vmatprep.mubr.msk.f32.mxu1 %vm447_vm0, %v4247_v33  ;;  %v11345_v32 = vld [vmem:[%s20135_s6 + $0x12e] sm:$0xff] }
 0x3c7   : > { %18170 = vmatprep.mubr.msk.f32.mxu0 %vm447_vm0, %v10023_v34  ;;  %v4279_v33 = vld [vmem:[%s20135_s6 + $0x332] sm:$0xff] }
 0x3c8   : > { %v11346_v34 = vld [vmem:[%s20135_s6 + $0x136] sm:$0xff] }
 0x3c9   : > { %17237 = vmatmul.mubr.msk.f32.gmra.mrb[66].mxu1 %vm447_vm0, %v4248_v35  ;;  %v4280_v35 = vld [vmem:[%s20135_s6 + $0x33a] sm:$0xff] }
 0x3ca   : > { %18171 = vmatmul.mubr.msk.f32.gmra.mrb[134].mxu0 %vm447_vm0, %v10024_v36  ;;  %17239 = vmatprep.mubr.msk.f32.mxu1 %vm447_vm0, %v4249_v2  ;;  %v11347_v36 = vld [vmem:[%s20135_s6 + $0x13e] sm:$0xff] }
 0x3cb   : > { %18177 = vmatprep.mubr.msk.f32.mxu0 %vm447_vm0, %v11316_v37  ;;  %v4281_v2 = vld [vmem:[%s20135_s6 + $0x342] sm:$0xff] }
 0x3cc   : > { %v11348_v37 = vld [vmem:[%s20135_s6 + $0x146] sm:$0xff] }
 0x3cd   : > { %17240 = vmatmul.mubr.msk.f32.gmra.mrb[68].mxu1 %vm447_vm0, %v4250_v7  ;;  %v4282_v7 = vld [vmem:[%s20135_s6 + $0x34a] sm:$0xff] }
 0x3ce   : > { %18178 = vmatmul.mubr.msk.f32.vlgmr.msra.gmra.mrb[0].mxu0 %vm447_vm0, %v11317_v38  ;;  %17242 = vmatprep.mubr.msk.f32.mxu1 %vm447_vm0, %v4251_v39  ;;  %v11349_v38 = vld [vmem:[%s20135_s6 + $0x14e] sm:$0xff] }
 0x3cf   : > { %18180 = vmatprep.mubr.msk.f32.mxu0 %vm447_vm0, %v11318_v40  ;;  %v4283_v39 = vld [vmem:[%s20135_s6 + $0x352] sm:$0xff] }
 0x3d0   : > { %v11350_v40 = vld [vmem:[%s20135_s6 + $0x156] sm:$0xff] }
 0x3d1   : > { %17243 = vmatmul.mubr.msk.f32.gmra.mrb[70].mxu1 %vm447_vm0, %v4252_v42  ;;  %v4284_v42 = vld [vmem:[%s20135_s6 + $0x35a] sm:$0xff] }
 0x3d2   : > { %18181 = vmatmul.mubr.msk.f32.gmra.mrb[2].mxu0 %vm447_vm0, %v11319_v43  ;;  %17245 = vmatprep.mubr.msk.f32.mxu1 %vm447_vm0, %v4253_v44  ;;  %v11351_v43 = vld [vmem:[%s20135_s6 + $0x15e] sm:$0xff] }
 0x3d3   : > { %18183 = vmatprep.mubr.msk.f32.mxu0 %vm447_vm0, %v11320_v45  ;;  %v4285_v44 = vld [vmem:[%s20135_s6 + $0x362] sm:$0xff] }
 0x3d4   : > { %v11352_v45 = vld [vmem:[%s20135_s6 + $0x166] sm:$0xff] }
 0x3d5   : > { %17246 = vmatmul.mubr.msk.f32.gmra.mrb[72].mxu1 %vm447_vm0, %v4254_v46  ;;  %v4286_v46 = vld [vmem:[%s20135_s6 + $0x36a] sm:$0xff] }
 0x3d6   : > { %18184 = vmatmul.mubr.msk.f32.gmra.mrb[4].mxu0 %vm447_vm0, %v11321_v47  ;;  %17248 = vmatprep.mubr.msk.f32.mxu1 %vm447_vm0, %v4255_v48  ;;  %v11353_v47 = vld [vmem:[%s20135_s6 + $0x16e] sm:$0xff] }
 0x3d7   : > { %18186 = vmatprep.mubr.msk.f32.mxu0 %vm447_vm0, %v11322_v49  ;;  %v4287_v48 = vld [vmem:[%s20135_s6 + $0x372] sm:$0xff] }
 0x3d8   : > { %v11354_v49 = vld [vmem:[%s20135_s6 + $0x176] sm:$0xff] }
 0x3d9   : > { %17249 = vmatmul.mubr.msk.f32.gmra.mrb[74].mxu1 %vm447_vm0, %v4256_v50  ;;  %v4288_v50 = vld [vmem:[%s20135_s6 + $0x37a] sm:$0xff] }
 0x3da   : > { %18187 = vmatmul.mubr.msk.f32.gmra.mrb[6].mxu0 %vm447_vm0, %v11323_v41  ;;  %17251 = vmatprep.mubr.msk.f32.mxu1 %vm447_vm0, %v4257_v51  ;;  %v11355_v41 = vld [vmem:[%s20135_s6 + $0x17e] sm:$0xff] }
 0x3db   : > { %18189 = vmatprep.mubr.msk.f32.mxu0 %vm447_vm0, %v11324_v52  ;;  %v4289_v51 = vld [vmem:[%s20135_s6 + $0x382] sm:$0xff] }
 0x3dc   : > { %v11356_v52 = vld [vmem:[%s20135_s6 + $0x186] sm:$0xff] }
 0x3dd   : > { %17252 = vmatmul.mubr.msk.f32.gmra.mrb[76].mxu1 %vm447_vm0, %v4258_v53 }
 0x3de   : > { %18190 = vmatmul.mubr.msk.f32.gmra.mrb[8].mxu0 %vm447_vm0, %v11325_v54  ;;  %17254 = vmatprep.mubr.msk.f32.mxu1 %vm447_vm0, %v4259_v56  ;;  %v4290_v56 = vld [vmem:[%s20135_s6 + $0x38a] sm:$0xff] }
 0x3df   : > { %18192 = vmatprep.mubr.msk.f32.mxu0 %vm447_vm0, %v11326_v57  ;;  %v11357_v57 = vld [vmem:[%s20135_s6 + $0x18e] sm:$0xff] }
 0x3e1   : > { %17255 = vmatmul.mubr.msk.f32.gmra.mrb[78].mxu1 %vm447_vm0, %v4260_v58  ;;  %v4291_v58 = vld [vmem:[%s20135_s6 + $0x392] sm:$0xff] }
 0x3e2   : > { %18193 = vmatmul.mubr.msk.f32.gmra.mrb[10].mxu0 %vm447_vm0, %v11327_v59  ;;  %17257 = vmatprep.mubr.msk.f32.mxu1 %vm447_vm0, %v4261_v60  ;;  %v11358_v59 = vld [vmem:[%s20135_s6 + $0x196] sm:$0xff] }
 0x3e3   : > { %18195 = vmatprep.mubr.msk.f32.mxu0 %vm447_vm0, %v11328_v61 }
 0x3e5   : > { %17258 = vmatmul.mubr.msk.f32.gmra.mrb[80].mxu1 %vm447_vm0, %v4262_v62  ;;  %v4292_v62 = vld [vmem:[%s20135_s6 + $0x39a] sm:$0xff] }
 0x3e6   : > { %18196 = vmatmul.mubr.msk.f32.gmra.mrb[12].mxu0 %vm447_vm0, %v11329_v63  ;;  %17260 = vmatprep.mubr.msk.f32.mxu1 %vm447_vm0, %v4263_v0  ;;  %v11359_v63 = vld [vmem:[%s20135_s6 + $0x19e] sm:$0xff] }
 0x3e7   : > { %18198 = vmatprep.mubr.msk.f32.mxu0 %vm447_vm0, %v11330_v55  ;;  %v4293_v0 = vld [vmem:[%s20135_s6 + $0x3a2] sm:$0xff] }
 0x3e8   : > { %v11360_v55 = vld [vmem:[%s20135_s6 + $0x1a6] sm:$0xff] }
 0x3e9   : > { %17261 = vmatmul.mubr.msk.f32.gmra.mrb[82].mxu1 %vm447_vm0, %v4264_v1 }
 0x3ea   : > { %18199 = vmatmul.mubr.msk.f32.gmra.mrb[14].mxu0 %vm447_vm0, %v11331_v3  ;;  %17263 = vmatprep.mubr.msk.f32.mxu1 %vm447_vm0, %v4265_v4  ;;  %v4294_v4 = vld [vmem:[%s20135_s6 + $0x3aa] sm:$0xff] }
 0x3eb   : > { %18201 = vmatprep.mubr.msk.f32.mxu0 %vm447_vm0, %v11332_v5  ;;  %v11361_v5 = vld [vmem:[%s20135_s6 + $0x1ae] sm:$0xff] }
 0x3ed   : > { %17264 = vmatmul.mubr.msk.f32.gmra.mrb[84].mxu1 %vm447_vm0, %v4266_v8  ;;  %v4295_v8 = vld [vmem:[%s20135_s6 + $0x3b2] sm:$0xff] }
 0x3ee   : > { %18202 = vmatmul.mubr.msk.f32.gmra.mrb[16].mxu0 %vm447_vm0, %v11333_v9  ;;  %17266 = vmatprep.mubr.msk.f32.mxu1 %vm447_vm0, %v4267_v10  ;;  %v11362_v9 = vld [vmem:[%s20135_s6 + $0x1b6] sm:$0xff] }
 0x3ef   : > { %18204 = vmatprep.mubr.msk.f32.mxu0 %vm447_vm0, %v11334_v11 }
 0x3f1   : > { %17267 = vmatmul.mubr.msk.f32.gmra.mrb[86].mxu1 %vm447_vm0, %v4268_v12  ;;  %v4296_v12 = vld [vmem:[%s20135_s6 + $0x3ba] sm:$0xff] }
 0x3f2   : > { %18205 = vmatmul.mubr.msk.f32.gmra.mrb[18].mxu0 %vm447_vm0, %v11335_v13  ;;  %17269 = vmatprep.mubr.msk.f32.mxu1 %vm447_vm0, %v4269_v14  ;;  %v11363_v13 = vld [vmem:[%s20135_s6 + $0x1be] sm:$0xff] }
 0x3f3   : > { %18207 = vmatprep.mubr.msk.f32.mxu0 %vm447_vm0, %v11336_v15  ;;  %v4297_v14 = vld [vmem:[%s20135_s6 + $0x3c2] sm:$0xff] }
 0x3f4   : > { %v11364_v15 = vld [vmem:[%s20135_s6 + $0x1c6] sm:$0xff] }
 0x3f5   : > { %17270 = vmatmul.mubr.msk.f32.gmra.mrb[88].mxu1 %vm447_vm0, %v4270_v6 }
 0x3f6   : > { %18208 = vmatmul.mubr.msk.f32.gmra.mrb[20].mxu0 %vm447_vm0, %v11337_v16  ;;  %17272 = vmatprep.mubr.msk.f32.mxu1 %vm447_vm0, %v4271_v17  ;;  %v4298_v17 = vld [vmem:[%s20135_s6 + $0x3ca] sm:$0xff] }
 0x3f7   : > { %18210 = vmatprep.mubr.msk.f32.mxu0 %vm447_vm0, %v11338_v18  ;;  %v11365_v18 = vld [vmem:[%s20135_s6 + $0x1ce] sm:$0xff] }
 0x3f9   : > { %17273 = vmatmul.mubr.msk.f32.gmra.mrb[90].mxu1 %vm447_vm0, %v4272_v19  ;;  %v4299_v19 = vld [vmem:[%s20135_s6 + $0x3d2] sm:$0xff] }
 0x3fa   : > { %18211 = vmatmul.mubr.msk.f32.gmra.mrb[22].mxu0 %vm447_vm0, %v11339_v20  ;;  %17275 = vmatprep.mubr.msk.f32.mxu1 %vm447_vm0, %v4273_v22  ;;  %v11366_v20 = vld [vmem:[%s20135_s6 + $0x1d6] sm:$0xff] }
 0x3fb   : > { %18213 = vmatprep.mubr.msk.f32.mxu0 %vm447_vm0, %v11340_v23 }
 0x3fd   : > { %17276 = vmatmul.mubr.msk.f32.gmra.mrb[92].mxu1 %vm447_vm0, %v4274_v24  ;;  %v4300_v24 = vld [vmem:[%s20135_s6 + $0x3da] sm:$0xff] }
 0x3fe   : > { %18214 = vmatmul.mubr.msk.f32.gmra.mrb[24].mxu0 %vm447_vm0, %v11341_v25  ;;  %17278 = vmatprep.mubr.msk.f32.mxu1 %vm447_vm0, %v4275_v26  ;;  %v11367_v25 = vld [vmem:[%s20135_s6 + $0x1de] sm:$0xff] }
 0x3ff   : > { %18216 = vmatprep.mubr.msk.f32.mxu0 %vm447_vm0, %v11342_v27  ;;  %v4301_v26 = vld [vmem:[%s20135_s6 + $0x3e2] sm:$0xff] }
 0x400   : > { %v11368_v27 = vld [vmem:[%s20135_s6 + $0x1e6] sm:$0xff] }
 0x401   : > { %17279 = vmatmul.mubr.msk.f32.gmra.mrb[94].mxu1 %vm447_vm0, %v4276_v28 }
 0x402   : > { %18217 = vmatmul.mubr.msk.f32.gmra.mrb[26].mxu0 %vm447_vm0, %v11343_v29  ;;  %17281 = vmatprep.mubr.msk.f32.mxu1 %vm447_vm0, %v4277_v21  ;;  %v4302_v21 = vld [vmem:[%s20135_s6 + $0x3ea] sm:$0xff] }
 0x403   : > { %18219 = vmatprep.mubr.msk.f32.mxu0 %vm447_vm0, %v11344_v30  ;;  %v11369_v30 = vld [vmem:[%s20135_s6 + $0x1ee] sm:$0xff] }
 0x405   : > { %17282 = vmatmul.mubr.msk.f32.gmra.mrb[96].mxu1 %vm447_vm0, %v4278_v31  ;;  %v4303_v31 = vld [vmem:[%s20135_s6 + $0x3f2] sm:$0xff] }
 0x406   : > { %18220 = vmatmul.mubr.msk.f32.gmra.mrb[28].mxu0 %vm447_vm0, %v11345_v32  ;;  %17284 = vmatprep.mubr.msk.f32.mxu1 %vm447_vm0, %v4279_v33  ;;  %v11370_v32 = vld [vmem:[%s20135_s6 + $0x1f6] sm:$0xff] }
 0x407   : > { %18222 = vmatprep.mubr.msk.f32.mxu0 %vm447_vm0, %v11346_v34 }
 0x409   : > { %17285 = vmatmul.mubr.msk.f32.gmra.mrb[98].mxu1 %vm447_vm0, %v4280_v35  ;;  %v4304_v35 = vld [vmem:[%s20135_s6 + $0x3fa] sm:$0xff] }
 0x40a   : > { %18223 = vmatmul.mubr.msk.f32.gmra.mrb[30].mxu0 %vm447_vm0, %v11347_v36  ;;  %17287 = vmatprep.mubr.msk.f32.mxu1 %vm447_vm0, %v4281_v2  ;;  %v11371_v36 = vld [vmem:[%s20135_s6 + $0x1fe] sm:$0xff] }
 0x40b   : > { %18225 = vmatprep.mubr.msk.f32.mxu0 %vm447_vm0, %v11348_v37  ;;  %v4305_v2 = vld [vmem:[%s20135_s6 + $0x402] sm:$0xff] }
 0x40c   : > { %v11372_v37 = vld [vmem:[%s20135_s6 + $0x206] sm:$0xff] }
 0x40d   : > { %17288 = vmatmul.mubr.msk.f32.gmra.mrb[100].mxu1 %vm447_vm0, %v4282_v7 }
 0x40e   : > { %18226 = vmatmul.mubr.msk.f32.gmra.mrb[32].mxu0 %vm447_vm0, %v11349_v38  ;;  %17290 = vmatprep.mubr.msk.f32.mxu1 %vm447_vm0, %v4283_v39  ;;  %v4306_v39 = vld [vmem:[%s20135_s6 + $0x40a] sm:$0xff] }
 0x40f   : > { %18228 = vmatprep.mubr.msk.f32.mxu0 %vm447_vm0, %v11350_v40  ;;  %v11373_v40 = vld [vmem:[%s20135_s6 + $0x20e] sm:$0xff] }
 0x411   : > { %17291 = vmatmul.mubr.msk.f32.gmra.mrb[102].mxu1 %vm447_vm0, %v4284_v42  ;;  %v4307_v42 = vld [vmem:[%s20135_s6 + $0x412] sm:$0xff] }
 0x412   : > { %18229 = vmatmul.mubr.msk.f32.gmra.mrb[34].mxu0 %vm447_vm0, %v11351_v43  ;;  %17293 = vmatprep.mubr.msk.f32.mxu1 %vm447_vm0, %v4285_v44  ;;  %v11374_v43 = vld [vmem:[%s20135_s6 + $0x216] sm:$0xff] }
 0x413   : > { %18231 = vmatprep.mubr.msk.f32.mxu0 %vm447_vm0, %v11352_v45 }
 0x415   : > { %17294 = vmatmul.mubr.msk.f32.gmra.mrb[104].mxu1 %vm447_vm0, %v4286_v46  ;;  %v4308_v46 = vld [vmem:[%s20135_s6 + $0x41a] sm:$0xff] }
 0x416   : > { %18232 = vmatmul.mubr.msk.f32.gmra.mrb[36].mxu0 %vm447_vm0, %v11353_v47  ;;  %17296 = vmatprep.mubr.msk.f32.mxu1 %vm447_vm0, %v4287_v48  ;;  %v11375_v47 = vld [vmem:[%s20135_s6 + $0x21e] sm:$0xff] }
 0x417   : > { %18234 = vmatprep.mubr.msk.f32.mxu0 %vm447_vm0, %v11354_v49  ;;  %v4309_v48 = vld [vmem:[%s20135_s6 + $0x422] sm:$0xff] }
 0x418   : > { %v22253_v53 = vpop.f32.mrb[0].mxu1  ;;  %v11376_v49 = vld [vmem:[%s20135_s6 + $0x226] sm:$0xff] }
 0x419   : > { %v22255_v54 = vpop.f32.mrb[1].mxu1  ;;  %17297 = vmatmul.mubr.msk.f32.gmra.mrb[106].mxu1 %vm447_vm0, %v4288_v50 }
 0x41a   : > { %18235 = vmatmul.mubr.msk.f32.gmra.mrb[38].mxu0 %vm447_vm0, %v11355_v41  ;;  %17299 = vmatprep.mubr.msk.f32.mxu1 %vm447_vm0, %v4289_v51  ;;  %v4310_v51 = vld [vmem:[%s20135_s6 + $0x42a] sm:$0xff] }
 0x41b   : > { %18237 = vmatprep.mubr.msk.f32.mxu0 %vm447_vm0, %v11356_v52  ;;  %v11377_v52 = vld [vmem:[%s20135_s6 + $0x22e] sm:$0xff] }
 0x41c   : > { %v22265_v60 = vpop.f32.mrb[2].mxu1 }
 0x41d   : > { %v22267_v61 = vpop.f32.mrb[3].mxu1  ;;  %17300 = vmatmul.mubr.msk.f32.gmra.mrb[108].mxu1 %vm447_vm0, %v4290_v56  ;;  %v4311_v56 = vld [vmem:[%s20135_s6 + $0x432] sm:$0xff] }
 0x41e   : > { %18238 = vmatmul.mubr.msk.f32.gmra.mrb[40].mxu0 %vm447_vm0, %v11357_v57  ;;  %17302 = vmatprep.mubr.msk.f32.mxu1 %vm447_vm0, %v4291_v58  ;;  %v11378_v57 = vld [vmem:[%s20135_s6 + $0x236] sm:$0xff] }
 0x41f   : > { %18240 = vmatprep.mubr.msk.f32.mxu0 %vm447_vm0, %v11358_v59 }
 0x420   : > { %v22277_v1 = vpop.f32.mrb[4].mxu1 }
 0x421   : > { %v22279_v3 = vpop.f32.mrb[5].mxu1  ;;  %17303 = vmatmul.mubr.msk.f32.gmra.mrb[110].mxu1 %vm447_vm0, %v4292_v62  ;;  %v4312_v62 = vld [vmem:[%s20135_s6 + $0x43a] sm:$0xff] }
 0x422   : > { %18241 = vmatmul.mubr.msk.f32.gmra.mrb[42].mxu0 %vm447_vm0, %v11359_v63  ;;  %17305 = vmatprep.mubr.msk.f32.mxu1 %vm447_vm0, %v4293_v0  ;;  %v11379_v63 = vld [vmem:[%s20135_s6 + $0x23e] sm:$0xff] }
 0x423   : > { %18243 = vmatprep.mubr.msk.f32.mxu0 %vm447_vm0, %v11360_v55  ;;  %v4313_v0 = vld [vmem:[%s20135_s6 + $0x442] sm:$0xff] }
 0x424   : > { %v22289_v10 = vpop.f32.mrb[6].mxu1  ;;  %v11380_v55 = vld [vmem:[%s20135_s6 + $0x246] sm:$0xff] }
 0x425   : > { %v22291_v11 = vpop.f32.mrb[7].mxu1  ;;  %17306 = vmatmul.mubr.msk.f32.gmra.mrb[112].mxu1 %vm447_vm0, %v4294_v4 }
 0x426   : > { %18244 = vmatmul.mubr.msk.f32.gmra.mrb[44].mxu0 %vm447_vm0, %v11361_v5  ;;  %17308 = vmatprep.mubr.msk.f32.mxu1 %vm447_vm0, %v4295_v8  ;;  %v4314_v8 = vld [vmem:[%s20135_s6 + $0x44a] sm:$0xff] }
 0x427   : > { %18246 = vmatprep.mubr.msk.f32.mxu0 %vm447_vm0, %v11362_v9  ;;  %v11381_v9 = vld [vmem:[%s20135_s6 + $0x24e] sm:$0xff] }
 0x428   : > { %v22301_v6 = vpop.f32.mrb[8].mxu1 }
 0x429   : > { %v22303_v16 = vpop.f32.mrb[9].mxu1  ;;  %17309 = vmatmul.mubr.msk.f32.gmra.mrb[114].mxu1 %vm447_vm0, %v4296_v12  ;;  %v4315_v12 = vld [vmem:[%s20135_s6 + $0x452] sm:$0xff] }
 0x42a   : > { %18247 = vmatmul.mubr.msk.f32.gmra.mrb[46].mxu0 %vm447_vm0, %v11363_v13  ;;  %17311 = vmatprep.mubr.msk.f32.mxu1 %vm447_vm0, %v4297_v14  ;;  %v11382_v13 = vld [vmem:[%s20135_s6 + $0x256] sm:$0xff] }
 0x42b   : > { %18249 = vmatprep.mubr.msk.f32.mxu0 %vm447_vm0, %v11364_v15 }
 0x42c   : > { %v22313_v22 = vpop.f32.mrb[10].mxu1 }
 0x42d   : > { %v22315_v23 = vpop.f32.mrb[11].mxu1  ;;  %17312 = vmatmul.mubr.msk.f32.gmra.mrb[116].mxu1 %vm447_vm0, %v4298_v17  ;;  %v4316_v17 = vld [vmem:[%s20135_s6 + $0x45a] sm:$0x3f] }
 0x42e   : > { %18250 = vmatmul.mubr.msk.f32.gmra.mrb[48].mxu0 %vm447_vm0, %v11365_v18  ;;  %17314 = vmatprep.mubr.msk.f32.mxu1 %vm447_vm0, %v4299_v19  ;;  %v11383_v18 = vld [vmem:[%s20135_s6 + $0x25e] sm:$0xff] }
 0x42f   : > { %18252 = vmatprep.mubr.msk.f32.mxu0 %vm447_vm0, %v11366_v20  ;;  %v5676_v19 = vld [vmem:[%s20135_s6 + $0x243] sm:$0xff] }
 0x430   : > { %v22325_v28 = vpop.f32.mrb[12].mxu1  ;;  %v11384_v20 = vld [vmem:[%s20135_s6 + $0x266] sm:$0xff] }
 0x431   : > { %v22327_v29 = vpop.f32.mrb[13].mxu1  ;;  %17315 = vmatmul.mubr.msk.f32.gmra.mrb[118].mxu1 %vm447_vm0, %v4300_v24 }
 0x432   : > { %18253 = vmatmul.mubr.msk.f32.gmra.mrb[50].mxu0 %vm447_vm0, %v11367_v25  ;;  %17317 = vmatprep.mubr.msk.f32.mxu1 %vm447_vm0, %v4301_v26  ;;  %v5677_v26 = vld [vmem:[%s20135_s6 + $0x24b] sm:$0xff] }
 0x433   : > { %18255 = vmatprep.mubr.msk.f32.mxu0 %vm447_vm0, %v11368_v27  ;;  %v11385_v27 = vld [vmem:[%s20135_s6 + $0x26e] sm:$0xff] }
 0x434   : > { %v22337_v33 = vpop.f32.mrb[14].mxu1 }
 0x435   : > { %v22339_v34 = vpop.f32.mrb[15].mxu1  ;;  %17318 = vmatmul.mubr.msk.f32.gmra.mrb[120].mxu1 %vm447_vm0, %v4302_v21  ;;  %v5678_v21 = vld [vmem:[%s20135_s6 + $0x253] sm:$0xff] }
 0x436   : > { %18256 = vmatmul.mubr.msk.f32.gmra.mrb[52].mxu0 %vm447_vm0, %v11369_v30  ;;  %17320 = vmatprep.mubr.msk.f32.mxu1 %vm447_vm0, %v4303_v31  ;;  %v11386_v30 = vld [vmem:[%s20135_s6 + $0x276] sm:$0xff] }
 0x437   : > { %18258 = vmatprep.mubr.msk.f32.mxu0 %vm447_vm0, %v11370_v32 }
 0x438   : > { %v22349_v7 = vpop.f32.mrb[16].mxu1 }
 0x439   : > { %v22351_v38 = vpop.f32.mrb[17].mxu1  ;;  %17321 = vmatmul.mubr.msk.f32.gmra.mrb[122].mxu1 %vm447_vm0, %v4304_v35  ;;  %v5679_v35 = vld [vmem:[%s20135_s6 + $0x25b] sm:$0xff] }
 0x43a   : > { %18259 = vmatmul.mubr.msk.f32.gmra.mrb[54].mxu0 %vm447_vm0, %v11371_v36  ;;  %17323 = vmatprep.mubr.msk.f32.mxu1 %vm447_vm0, %v4305_v2  ;;  %v11387_v36 = vld [vmem:[%s20135_s6 + $0x27e] sm:$0xff] }
 0x43b   : > { %18261 = vmatprep.mubr.msk.f32.mxu0 %vm447_vm0, %v11372_v37  ;;  %v5680_v2 = vld [vmem:[%s20135_s6 + $0x263] sm:$0xff] }
 0x43c   : > { %v22361_v44 = vpop.f32.mrb[18].mxu1  ;;  %v11388_v37 = vld [vmem:[%s20135_s6 + $0x286] sm:$0xff] }
 0x43d   : > { %v22363_v45 = vpop.f32.mrb[19].mxu1  ;;  %17324 = vmatmul.mubr.msk.f32.gmra.mrb[124].mxu1 %vm447_vm0, %v4306_v39 }
 0x43e   : > { %18262 = vmatmul.mubr.msk.f32.gmra.mrb[56].mxu0 %vm447_vm0, %v11373_v40  ;;  %17326 = vmatprep.mubr.msk.f32.mxu1 %vm447_vm0, %v4307_v42  ;;  %v5681_v42 = vld [vmem:[%s20135_s6 + $0x26b] sm:$0xff] }
 0x43f   : > { %18264 = vmatprep.mubr.msk.f32.mxu0 %vm447_vm0, %v11374_v43  ;;  %v11389_v43 = vld [vmem:[%s20135_s6 + $0x28e] sm:$0xff] }
 0x440   : > { %v22373_v50 = vpop.f32.mrb[20].mxu1 }
 0x441   : > { %v22375_v41 = vpop.f32.mrb[21].mxu1  ;;  %17327 = vmatmul.mubr.msk.f32.gmra.mrb[126].mxu1 %vm447_vm0, %v4308_v46  ;;  %v5682_v46 = vld [vmem:[%s20135_s6 + $0x273] sm:$0xff] }
 0x442   : > { %18265 = vmatmul.mubr.msk.f32.gmra.mrb[58].mxu0 %vm447_vm0, %v11375_v47  ;;  %17329 = vmatprep.mubr.msk.f32.mxu1 %vm447_vm0, %v4309_v48  ;;  %v11390_v47 = vld [vmem:[%s20135_s6 + $0x296] sm:$0xff] }
 0x443   : > { %18267 = vmatprep.mubr.msk.f32.mxu0 %vm447_vm0, %v11376_v49 }
 0x444   : > { %v22385_v58 = vpop.f32.mrb[22].mxu1 }
 0x445   : > { %v22387_v59 = vpop.f32.mrb[23].mxu1  ;;  %17330 = vmatmul.mubr.msk.f32.gmra.mrb[128].mxu1 %vm447_vm0, %v4310_v51  ;;  %v5683_v51 = vld [vmem:[%s20135_s6 + $0x27b] sm:$0xff] }
 0x446   : > { %18268 = vmatmul.mubr.msk.f32.gmra.mrb[60].mxu0 %vm447_vm0, %v11377_v52  ;;  %17332 = vmatprep.mubr.msk.f32.mxu1 %vm447_vm0, %v4311_v56  ;;  %v11391_v52 = vld [vmem:[%s20135_s6 + $0x29e] sm:$0xff] }
 0x447   : > { %18270 = vmatprep.mubr.msk.f32.mxu0 %vm447_vm0, %v11378_v57  ;;  %v5684_v56 = vld [vmem:[%s20135_s6 + $0x283] sm:$0xff] }
 0x448   : > { %v22397_v4 = vpop.f32.mrb[24].mxu1  ;;  %v11392_v57 = vld [vmem:[%s20135_s6 + $0x2a6] sm:$0xff] }
 0x449   : > { %v22399_v5 = vpop.f32.mrb[25].mxu1  ;;  %17333 = vmatmul.mubr.msk.f32.gmra.mrb[130].mxu1 %vm447_vm0, %v4312_v62 }
 0x44a   : > { %18271 = vmatmul.mubr.msk.f32.gmra.mrb[62].mxu0 %vm447_vm0, %v11379_v63  ;;  %17335 = vmatprep.mubr.msk.f32.mxu1 %vm447_vm0, %v4313_v0  ;;  %v5685_v0 = vld [vmem:[%s20135_s6 + $0x28b] sm:$0xff] }
 0x44b   : > { %18273 = vmatprep.mubr.msk.f32.mxu0 %vm447_vm0, %v11380_v55  ;;  %v11393_v55 = vld [vmem:[%s20135_s6 + $0x2ae] sm:$0xff] }
 0x44c   : > { %v22409_v14 = vpop.f32.mrb[26].mxu1 }
 0x44d   : > { %v22411_v15 = vpop.f32.mrb[27].mxu1  ;;  %17336 = vmatmul.mubr.msk.f32.gmra.mrb[132].mxu1 %vm447_vm0, %v4314_v8  ;;  %v5686_v8 = vld [vmem:[%s20135_s6 + $0x293] sm:$0xff] }
 0x44e   : > { %18274 = vmatmul.mubr.msk.f32.gmra.mrb[64].mxu0 %vm447_vm0, %v11381_v9  ;;  %17338 = vmatprep.mubr.msk.f32.mxu1 %vm447_vm0, %v4315_v12  ;;  %v11394_v9 = vld [vmem:[%s20135_s6 + $0x2b6] sm:$0xff] }
 0x44f   : > { %18276 = vmatprep.mubr.msk.f32.mxu0 %vm447_vm0, %v11382_v13 }
 0x450   : > { %v22421_v24 = vpop.f32.mrb[28].mxu1 }
 0x451   : > { %v22423_v25 = vpop.f32.mrb[29].mxu1  ;;  %17339 = vmatmul.mubr.msk.f32.gmra.mrb[134].mxu1 %vm447_vm0, %v4316_v17  ;;  %v5687_v17 = vld [vmem:[%s20135_s6 + $0x29b] sm:$0xff] }
 0x452   : > { %18277 = vmatmul.mubr.msk.f32.gmra.mrb[66].mxu0 %vm447_vm0, %v11383_v18  ;;  %17447 = vmatprep.mubr.msk.f32.mxu1 %vm447_vm0, %v5676_v19  ;;  %v11395_v18 = vld [vmem:[%s20135_s6 + $0x2be] sm:$0xff] }
 0x453   : > { %18279 = vmatprep.mubr.msk.f32.mxu0 %vm447_vm0, %v11384_v20  ;;  %v5688_v19 = vld [vmem:[%s20135_s6 + $0x2a3] sm:$0xff] }
 0x454   : > { %v22433_v31 = vpop.f32.mrb[30].mxu1  ;;  %v11396_v20 = vld [vmem:[%s20135_s6 + $0x2c6] sm:$0xff] }
 0x455   : > { %v22435_v32 = vpop.f32.mrb[31].mxu1  ;;  %17448 = vmatmul.mubr.msk.f32.vlgmr.msra.gmra.mrb[68].mxu1 %vm447_vm0, %v5677_v26 }
 0x456   : > { %18280 = vmatmul.mubr.msk.f32.gmra.mrb[68].mxu0 %vm447_vm0, %v11385_v27  ;;  %17450 = vmatprep.mubr.msk.f32.mxu1 %vm447_vm0, %v5678_v21  ;;  %v5689_v21 = vld [vmem:[%s20135_s6 + $0x2ab] sm:$0xff] }
 0x457   : > { %18282 = vmatprep.mubr.msk.f32.mxu0 %vm447_vm0, %v11386_v30  ;;  %v11397_v30 = vld [vmem:[%s20135_s6 + $0x2ce] sm:$0xff] }
 0x458   : > { %v22445_v39 = vpop.f32.mrb[32].mxu1 }
 0x459   : > { %v22447_v40 = vpop.f32.mrb[33].mxu1  ;;  %17451 = vmatmul.mubr.msk.f32.gmra.mrb[70].mxu1 %vm447_vm0, %v5679_v35  ;;  %v5690_v35 = vld [vmem:[%s20135_s6 + $0x2b3] sm:$0xff] }
 0x45a   : > { %18283 = vmatmul.mubr.msk.f32.gmra.mrb[70].mxu0 %vm447_vm0, %v11387_v36  ;;  %17453 = vmatprep.mubr.msk.f32.mxu1 %vm447_vm0, %v5680_v2  ;;  %v11398_v36 = vld [vmem:[%s20135_s6 + $0x2d6] sm:$0xff] }
 0x45b   : > { %18285 = vmatprep.mubr.msk.f32.mxu0 %vm447_vm0, %v11388_v37 }
 0x45c   : > { %v22457_v48 = vpop.f32.mrb[34].mxu1 }
 0x45d   : > { %v22459_v49 = vpop.f32.mrb[35].mxu1  ;;  %17454 = vmatmul.mubr.msk.f32.gmra.mrb[72].mxu1 %vm447_vm0, %v5681_v42  ;;  %v5691_v42 = vld [vmem:[%s20135_s6 + $0x2bb] sm:$0xff] }
 0x45e   : > { %18286 = vmatmul.mubr.msk.f32.gmra.mrb[72].mxu0 %vm447_vm0, %v11389_v43  ;;  %17456 = vmatprep.mubr.msk.f32.mxu1 %vm447_vm0, %v5682_v46  ;;  %v11399_v43 = vld [vmem:[%s20135_s6 + $0x2de] sm:$0xff] }
 0x45f   : > { %18288 = vmatprep.mubr.msk.f32.mxu0 %vm447_vm0, %v11390_v47  ;;  %v5692_v46 = vld [vmem:[%s20135_s6 + $0x2c3] sm:$0xff] }
 0x460   : > { %v22469_v62 = vpop.f32.mrb[36].mxu1  ;;  %v11400_v47 = vld [vmem:[%s20135_s6 + $0x2e6] sm:$0xff] }
 0x461   : > { %v22471_v63 = vpop.f32.mrb[37].mxu1  ;;  %17457 = vmatmul.mubr.msk.f32.gmra.mrb[74].mxu1 %vm447_vm0, %v5683_v51 }
 0x462   : > { %18289 = vmatmul.mubr.msk.f32.gmra.mrb[74].mxu0 %vm447_vm0, %v11391_v52  ;;  %17459 = vmatprep.mubr.msk.f32.mxu1 %vm447_vm0, %v5684_v56  ;;  %v5693_v56 = vld [vmem:[%s20135_s6 + $0x2cb] sm:$0xff] }
 0x463   : > { %18291 = vmatprep.mubr.msk.f32.mxu0 %vm447_vm0, %v11392_v57  ;;  %v11401_v57 = vld [vmem:[%s20135_s6 + $0x2ee] sm:$0xff] }
 0x464   : > { %v22481_v12 = vpop.f32.mrb[38].mxu1 }
 0x465   : > { %v22483_v13 = vpop.f32.mrb[39].mxu1  ;;  %17460 = vmatmul.mubr.msk.f32.gmra.mrb[76].mxu1 %vm447_vm0, %v5685_v0  ;;  %v5694_v0 = vld [vmem:[%s20135_s6 + $0x2d3] sm:$0xff] }
 0x466   : > { %18292 = vmatmul.mubr.msk.f32.gmra.mrb[76].mxu0 %vm447_vm0, %v11393_v55  ;;  %17462 = vmatprep.mubr.msk.f32.mxu1 %vm447_vm0, %v5686_v8  ;;  %v11402_v55 = vld [vmem:[%s20135_s6 + $0x2f6] sm:$0xff] }
 0x467   : > { %18294 = vmatprep.mubr.msk.f32.mxu0 %vm447_vm0, %v11394_v9 }
 0x468   : > { %v22493_v26 = vpop.f32.mrb[40].mxu1 }
 0x469   : > { %v22495_v27 = vpop.f32.mrb[41].mxu1  ;;  %17463 = vmatmul.mubr.msk.f32.gmra.mrb[78].mxu1 %vm447_vm0, %v5687_v17  ;;  %v5695_v17 = vld [vmem:[%s20135_s6 + $0x2db] sm:$0xff] }
 0x46a   : > { %18295 = vmatmul.mubr.msk.f32.gmra.mrb[78].mxu0 %vm447_vm0, %v11395_v18  ;;  %17465 = vmatprep.mubr.msk.f32.mxu1 %vm447_vm0, %v5688_v19  ;;  %v11403_v18 = vld [vmem:[%s20135_s6 + $0x2fe] sm:$0xff] }
 0x46b   : > { %18297 = vmatprep.mubr.msk.f32.mxu0 %vm447_vm0, %v11396_v20  ;;  %v5696_v19 = vld [vmem:[%s20135_s6 + $0x2e3] sm:$0xff] }
 0x46c   : > { %v22505_v2 = vpop.f32.mrb[42].mxu1  ;;  %v11404_v20 = vld [vmem:[%s20135_s6 + $0x306] sm:$0xff] }
 0x46d   : > { %v22507_v37 = vpop.f32.mrb[43].mxu1  ;;  %17466 = vmatmul.mubr.msk.f32.gmra.mrb[80].mxu1 %vm447_vm0, %v5689_v21 }
 0x46e   : > { %18298 = vmatmul.mubr.msk.f32.gmra.mrb[80].mxu0 %vm447_vm0, %v11397_v30  ;;  %17468 = vmatprep.mubr.msk.f32.mxu1 %vm447_vm0, %v5690_v35  ;;  %v5697_v35 = vld [vmem:[%s20135_s6 + $0x2eb] sm:$0xff] }
 0x46f   : > { %18300 = vmatprep.mubr.msk.f32.mxu0 %vm447_vm0, %v11398_v36  ;;  %v11405_v36 = vld [vmem:[%s20135_s6 + $0x30e] sm:$0xff] }
 0x470   : > { %v22517_v51 = vpop.f32.mrb[44].mxu1 }
 0x471   : > { %v22519_v52 = vpop.f32.mrb[45].mxu1  ;;  %17469 = vmatmul.mubr.msk.f32.gmra.mrb[82].mxu1 %vm447_vm0, %v5691_v42  ;;  %v5698_v42 = vld [vmem:[%s20135_s6 + $0x2f3] sm:$0xff] }
 0x472   : > { %18301 = vmatmul.mubr.msk.f32.gmra.mrb[82].mxu0 %vm447_vm0, %v11399_v43  ;;  %17471 = vmatprep.mubr.msk.f32.mxu1 %vm447_vm0, %v5692_v46  ;;  %v11406_v43 = vld [vmem:[%s20135_s6 + $0x316] sm:$0xff] }
 0x473   : > { %18303 = vmatprep.mubr.msk.f32.mxu0 %vm447_vm0, %v11400_v47 }
 0x474   : > { %v22529_v8 = vpop.f32.mrb[46].mxu1 }
 0x475   : > { %v22531_v9 = vpop.f32.mrb[47].mxu1  ;;  %17472 = vmatmul.mubr.msk.f32.gmra.mrb[84].mxu1 %vm447_vm0, %v5693_v56  ;;  %v5699_v56 = vld [vmem:[%s20135_s6 + $0x2fb] sm:$0xff] }
 0x476   : > { %18304 = vmatmul.mubr.msk.f32.gmra.mrb[84].mxu0 %vm447_vm0, %v11401_v57  ;;  %17474 = vmatprep.mubr.msk.f32.mxu1 %vm447_vm0, %v5694_v0  ;;  %v11407_v57 = vld [vmem:[%s20135_s6 + $0x31e] sm:$0xff] }
 0x477   : > { %18306 = vmatprep.mubr.msk.f32.mxu0 %vm447_vm0, %v11402_v55  ;;  %v5700_v0 = vld [vmem:[%s20135_s6 + $0x303] sm:$0xff] }
 0x478   : > { %v22541_v21 = vpop.f32.mrb[48].mxu1  ;;  %v11408_v55 = vld [vmem:[%s20135_s6 + $0x326] sm:$0xff] }
 0x479   : > { %v22543_v30 = vpop.f32.mrb[49].mxu1  ;;  %17475 = vmatmul.mubr.msk.f32.gmra.mrb[86].mxu1 %vm447_vm0, %v5695_v17 }
 0x47a   : > { %18307 = vmatmul.mubr.msk.f32.gmra.mrb[86].mxu0 %vm447_vm0, %v11403_v18  ;;  %17477 = vmatprep.mubr.msk.f32.mxu1 %vm447_vm0, %v5696_v19  ;;  %v5701_v19 = vld [vmem:[%s20135_s6 + $0x30b] sm:$0xff] }
 0x47b   : > { %18309 = vmatprep.mubr.msk.f32.mxu0 %vm447_vm0, %v11404_v20  ;;  %v11409_v20 = vld [vmem:[%s20135_s6 + $0x32e] sm:$0xff] }
 0x47c   : > { %v22553_v46 = vpop.f32.mrb[50].mxu1 }
 0x47d   : > { %23277 = vst [vmem:[#allocation2_spill] sm:$0xff] %v22553_v46  ;;  %v22555_v47 = vpop.f32.mrb[51].mxu1  ;;  %17478 = vmatmul.mubr.msk.f32.gmra.mrb[88].mxu1 %vm447_vm0, %v5697_v35  ;;  %v5702_v35 = vld [vmem:[%s20135_s6 + $0x313] sm:$0xff] }
 0x47e   : > { %23278 = vst [vmem:[#allocation3_spill] sm:$0xff] %v22555_v47  ;;  %18310 = vmatmul.mubr.msk.f32.gmra.mrb[88].mxu0 %vm447_vm0, %v11405_v36  ;;  %17480 = vmatprep.mubr.msk.f32.mxu1 %vm447_vm0, %v5698_v42  ;;  %v11410_v36 = vld [vmem:[%s20135_s6 + $0x336] sm:$0xff] }
 0x47f   : > { %18312 = vmatprep.mubr.msk.f32.mxu0 %vm447_vm0, %v11406_v43  ;;  %v5718_v47 = vld [vmem:[%s20135_s6 + $0x393] sm:$0xff] }
 0x480   : > { %v22565_v17 = vpop.f32.mrb[52].mxu1  ;;  %v11426_v46 = vld [vmem:[%s20135_s6 + $0x3b6] sm:$0xff] }
 0x481   : > { %23279 = vst [vmem:[#allocation4_spill] sm:$0xff] %v22565_v17  ;;  %v22567_v18 = vpop.f32.mrb[53].mxu1  ;;  %17481 = vmatmul.mubr.msk.f32.gmra.mrb[90].mxu1 %vm447_vm0, %v5699_v56  ;;  %v5703_v56 = vld [vmem:[%s20135_s6 + $0x31b] sm:$0xff] }
 0x482   : > { %23280 = vst [vmem:[#allocation5_spill] sm:$0xff] %v22567_v18  ;;  %18313 = vmatmul.mubr.msk.f32.gmra.mrb[90].mxu0 %vm447_vm0, %v11407_v57  ;;  %17483 = vmatprep.mubr.msk.f32.mxu1 %vm447_vm0, %v5700_v0  ;;  %v11411_v57 = vld [vmem:[%s20135_s6 + $0x33e] sm:$0xff] }
 0x483   : > { %18315 = vmatprep.mubr.msk.f32.mxu0 %vm447_vm0, %v11408_v55  ;;  %v5704_v0 = vld [vmem:[%s20135_s6 + $0x323] sm:$0xff] }
 0x484   : > { %v22577_v42 = vpop.f32.mrb[54].mxu1  ;;  %v11412_v55 = vld [vmem:[%s20135_s6 + $0x346] sm:$0xff] }
 0x485   : > { %23281 = vst [vmem:[#allocation6_spill] sm:$0xff] %v22577_v42  ;;  %v22579_v43 = vpop.f32.mrb[55].mxu1  ;;  %17484 = vmatmul.mubr.msk.f32.gmra.mrb[92].mxu1 %vm447_vm0, %v5701_v19  ;;  %v5705_v19 = vld [vmem:[%s20135_s6 + $0x32b] sm:$0xff] }
 0x486   : > { %23282 = vst [vmem:[#allocation7_spill] sm:$0xff] %v22579_v43  ;;  %18316 = vmatmul.mubr.msk.f32.gmra.mrb[92].mxu0 %vm447_vm0, %v11409_v20  ;;  %17486 = vmatprep.mubr.msk.f32.mxu1 %vm447_vm0, %v5702_v35  ;;  %v11413_v20 = vld [vmem:[%s20135_s6 + $0x34e] sm:$0xff] }
 0x487   : > { %18318 = vmatprep.mubr.msk.f32.mxu0 %vm447_vm0, %v11410_v36  ;;  %v5706_v35 = vld [vmem:[%s20135_s6 + $0x333] sm:$0xff] }
 0x488   : > { %v22589_v18 = vpop.f32.mrb[56].mxu1  ;;  %v11414_v36 = vld [vmem:[%s20135_s6 + $0x356] sm:$0xff] }
 0x489   : > { %23283 = vst [vmem:[#allocation8_spill] sm:$0xff] %v22589_v18  ;;  %v22591_v42 = vpop.f32.mrb[57].mxu1  ;;  %17487 = vmatmul.mubr.msk.f32.gmra.mrb[94].mxu1 %vm447_vm0, %v5703_v56  ;;  %v5707_v56 = vld [vmem:[%s20135_s6 + $0x33b] sm:$0xff] }
 0x48a   : > { %23284 = vst [vmem:[#allocation9_spill] sm:$0xff] %v22591_v42  ;;  %18319 = vmatmul.mubr.msk.f32.gmra.mrb[94].mxu0 %vm447_vm0, %v11411_v57  ;;  %17489 = vmatprep.mubr.msk.f32.mxu1 %vm447_vm0, %v5704_v0  ;;  %v11415_v57 = vld [vmem:[%s20135_s6 + $0x35e] sm:$0xff] }
 0x48b   : > { %18321 = vmatprep.mubr.msk.f32.mxu0 %vm447_vm0, %v11412_v55  ;;  %v5708_v0 = vld [vmem:[%s20135_s6 + $0x343] sm:$0xff] }
 0x48c   : > { %v22601_v43 = vpop.f32.mrb[58].mxu1  ;;  %v11416_v55 = vld [vmem:[%s20135_s6 + $0x366] sm:$0xff] }
 0x48d   : > { %23285 = vst [vmem:[#allocation10_spill] sm:$0xff] %v22601_v43  ;;  %v22603_v18 = vpop.f32.mrb[59].mxu1  ;;  %17490 = vmatmul.mubr.msk.f32.gmra.mrb[96].mxu1 %vm447_vm0, %v5705_v19  ;;  %v5709_v19 = vld [vmem:[%s20135_s6 + $0x34b] sm:$0xff] }
 0x48e   : > { %23286 = vst [vmem:[#allocation11_spill] sm:$0xff] %v22603_v18  ;;  %18322 = vmatmul.mubr.msk.f32.gmra.mrb[96].mxu0 %vm447_vm0, %v11413_v20  ;;  %17492 = vmatprep.mubr.msk.f32.mxu1 %vm447_vm0, %v5706_v35  ;;  %v11417_v20 = vld [vmem:[%s20135_s6 + $0x36e] sm:$0xff] }
 0x48f   : > { %18324 = vmatprep.mubr.msk.f32.mxu0 %vm447_vm0, %v11414_v36  ;;  %v5710_v35 = vld [vmem:[%s20135_s6 + $0x353] sm:$0xff] }
 0x490   : > { %v22613_v42 = vpop.f32.mrb[60].mxu1  ;;  %v11418_v36 = vld [vmem:[%s20135_s6 + $0x376] sm:$0xff] }
 0x491   : > { %23287 = vst [vmem:[#allocation12_spill] sm:$0xff] %v22613_v42  ;;  %v22615_v43 = vpop.f32.mrb[61].mxu1  ;;  %17493 = vmatmul.mubr.msk.f32.gmra.mrb[98].mxu1 %vm447_vm0, %v5707_v56  ;;  %v5711_v56 = vld [vmem:[%s20135_s6 + $0x35b] sm:$0xff] }
 0x492   : > { %23288 = vst [vmem:[#allocation13_spill] sm:$0xff] %v22615_v43  ;;  %18325 = vmatmul.mubr.msk.f32.gmra.mrb[98].mxu0 %vm447_vm0, %v11415_v57  ;;  %17495 = vmatprep.mubr.msk.f32.mxu1 %vm447_vm0, %v5708_v0  ;;  %v11419_v57 = vld [vmem:[%s20135_s6 + $0x37e] sm:$0xff] }
 0x493   : > { %18327 = vmatprep.mubr.msk.f32.mxu0 %vm447_vm0, %v11416_v55  ;;  %v5712_v0 = vld [vmem:[%s20135_s6 + $0x363] sm:$0xff] }
 0x494   : > { %v22625_v18 = vpop.f32.mrb[62].mxu1  ;;  %v11420_v55 = vld [vmem:[%s20135_s6 + $0x386] sm:$0xff] }
 0x495   : > { %23289 = vst [vmem:[#allocation14_spill] sm:$0xff] %v22625_v18  ;;  %v22627_v42 = vpop.f32.mrb[63].mxu1  ;;  %17496 = vmatmul.mubr.msk.f32.gmra.mrb[100].mxu1 %vm447_vm0, %v5709_v19  ;;  %v5713_v19 = vld [vmem:[%s20135_s6 + $0x36b] sm:$0xff] }
 0x496   : > { %23290 = vst [vmem:[#allocation15_spill] sm:$0xff] %v22627_v42  ;;  %18328 = vmatmul.mubr.msk.f32.gmra.mrb[100].mxu0 %vm447_vm0, %v11417_v20  ;;  %17498 = vmatprep.mubr.msk.f32.mxu1 %vm447_vm0, %v5710_v35  ;;  %v11421_v20 = vld [vmem:[%s20135_s6 + $0x38e] sm:$0xff] }
 0x497   : > { %18330 = vmatprep.mubr.msk.f32.mxu0 %vm447_vm0, %v11418_v36  ;;  %v5714_v35 = vld [vmem:[%s20135_s6 + $0x373] sm:$0xff] }
 0x498   : > { %v22637_v43 = vpop.f32.mrb[64].mxu1  ;;  %v11422_v36 = vld [vmem:[%s20135_s6 + $0x396] sm:$0xff] }
 0x499   : > { %23291 = vst [vmem:[#allocation16_spill] sm:$0xff] %v22637_v43  ;;  %v22639_v18 = vpop.f32.mrb[65].mxu1  ;;  %17499 = vmatmul.mubr.msk.f32.gmra.mrb[102].mxu1 %vm447_vm0, %v5711_v56  ;;  %v5715_v56 = vld [vmem:[%s20135_s6 + $0x37b] sm:$0xff] }
 0x49a   : > { %23292 = vst [vmem:[#allocation17_spill] sm:$0xff] %v22639_v18  ;;  %18331 = vmatmul.mubr.msk.f32.gmra.mrb[102].mxu0 %vm447_vm0, %v11419_v57  ;;  %17501 = vmatprep.mubr.msk.f32.mxu1 %vm447_vm0, %v5712_v0  ;;  %v11423_v57 = vld [vmem:[%s20135_s6 + $0x39e] sm:$0xff] }
 0x49b   : > { %18333 = vmatprep.mubr.msk.f32.mxu0 %vm447_vm0, %v11420_v55  ;;  %v5716_v0 = vld [vmem:[%s20135_s6 + $0x383] sm:$0xff] }
 0x49c   : > { %v22649_v42 = vpop.f32.mrb[66].mxu1  ;;  %v11424_v55 = vld [vmem:[%s20135_s6 + $0x3a6] sm:$0xff] }
 0x49d   : > { %23293 = vst [vmem:[#allocation18_spill] sm:$0xff] %v22649_v42  ;;  %v22651_v43 = vpop.f32.mrb[67].mxu1  ;;  %17502 = vmatmul.mubr.msk.f32.gmra.mrb[104].mxu1 %vm447_vm0, %v5713_v19  ;;  %v11425_v42 = vld [vmem:[%s20135_s6 + $0x3ae] sm:$0xff] }
 0x49e   : > { %23294 = vst [vmem:[#allocation19_spill] sm:$0xff] %v22651_v43  ;;  %18334 = vmatmul.mubr.msk.f32.gmra.mrb[104].mxu0 %vm447_vm0, %v11421_v20  ;;  %17504 = vmatprep.mubr.msk.f32.mxu1 %vm447_vm0, %v5714_v35  ;;  %v22664_v43 = vld [vmem:[%s23275_s2] ss:$0 sm:$0xff] }
 0x49f   : > { %18336 = vmatprep.mubr.msk.f32.mxu0 %vm447_vm0, %v11422_v36  ;;  %v5717_v36 = vld [vmem:[%s20135_s6 + $0x38b] sm:$0xff] }
 0x4a1   : > { %v18179_v18 = vpop.f32.mrb[0].mxu0  ;;  %17505 = vmatmul.mubr.msk.f32.gmra.mrb[106].mxu1 %vm447_vm0, %v5715_v56 }
 0x4a2   : > { %v18419_v19 = vadd.f32 %v18179_v18, %v22253_v53  ;;  %v11928_v20 = vpop.f32.mrb[1].mxu0  ;;  %18337 = vmatmul.mubr.msk.f32.gmra.mrb[106].mxu0 %vm447_vm0, %v11423_v57  ;;  %17507 = vmatprep.mubr.msk.f32.mxu1 %vm447_vm0, %v5716_v0 }
 0x4a3   : > { %v18420_v35 = vadd.f32 %v11928_v20, %v22255_v54  ;;  %18339 = vmatprep.mubr.msk.f32.mxu0 %vm447_vm0, %v11424_v55  ;;  %v11427_v20 = vld [vmem:[%s20135_s6 + $0x3be] sm:$0xff] }
 0x4a4   : > { %v12751_v17 = vadd.f32 %v18419_v19, %v22664_v43  ;;  %v5719_v19 = vld [vmem:[%s20135_s6 + $0x39b] sm:$0xff] }
 0x4a5   : > { %v12750_v53 = vadd.f32 %v18420_v35, %v22664_v43  ;;  %v18182_v18 = vpop.f32.mrb[2].mxu0  ;;  %17508 = vmatmul.mubr.msk.f32.gmra.mrb[108].mxu1 %vm447_vm0, %v5717_v36  ;;  %v11428_v35 = vld [vmem:[%s20135_s6 + $0x3c6] sm:$0xff] }
 0x4a6   : > { %v15130_v56 = vmul.f32 -1.442695, %v12751_v17  ;;  %v18421_v54 = vadd.f32 %v18182_v18, %v22265_v60  ;;  %v11938_v57 = vpop.f32.mrb[3].mxu0  ;;  %18340 = vmatmul.mubr.msk.f32.gmra.mrb[108].mxu0 %vm447_vm0, %v11425_v42  ;;  %17510 = vmatprep.mubr.msk.f32.mxu1 %vm447_vm0, %v5718_v47  ;;  %v5720_v60 = vld [vmem:[%s20135_s6 + $0x3a3] sm:$0xff] }
 0x4a7   : > { %v15129_v0 = vmul.f32 -1.442695, %v12750_v53  ;;  %v18422_v55 = vadd.f32 %v11938_v57, %v22267_v61  ;;  %18342 = vmatprep.mubr.msk.f32.mxu0 %vm447_vm0, %v11426_v46 }
 0x4a8   : > { %19518 = vpow2.f32 %v15130_v56  ;;  %v12753_v17 = vadd.f32 %v18421_v54, %v22664_v43  ;;  %v5721_v56 = vld [vmem:[%s20135_s6 + $0x3ab] sm:$0xff] }
 0x4a9   : > { %19520 = vpow2.f32 %v15129_v0  ;;  %v12752_v42 = vadd.f32 %v18422_v55, %v22664_v43  ;;  %v18185_v36 = vpop.f32.mrb[4].mxu0  ;;  %17511 = vmatmul.mubr.msk.f32.gmra.mrb[110].mxu1 %vm447_vm0, %v5719_v19  ;;  %v11429_v54 = vld [vmem:[%s20135_s6 + $0x3ce] sm:$0xff]  ;;  %v11430_v0 = vld [vmem:[%s20135_s6 + $0x3d6] sm:$0xff] }
 0x4aa   : > { %v15132_v61 = vmul.f32 -1.442695, %v12753_v17  ;;  %v18423_v47 = vadd.f32 %v18185_v36, %v22277_v1  ;;  %v11948_v46 = vpop.f32.mrb[5].mxu0  ;;  %18343 = vmatmul.mubr.msk.f32.gmra.mrb[110].mxu0 %vm447_vm0, %v11427_v20  ;;  %17513 = vmatprep.mubr.msk.f32.mxu1 %vm447_vm0, %v5720_v60  ;;  %v5722_v1 = vld [vmem:[%s20135_s6 + $0x3b3] sm:$0xff]  ;;  %v11431_v36 = vld [vmem:[%s20135_s6 + $0x3de] sm:$0xff] }
 0x4ab   : > { %v15131_v53 = vmul.f32 -1.442695, %v12752_v42  ;;  %v18424_v18 = vadd.f32 %v11948_v46, %v22279_v3  ;;  %18345 = vmatprep.mubr.msk.f32.mxu0 %vm447_vm0, %v11428_v35  ;;  %v5723_v42 = vld [vmem:[%s20135_s6 + $0x3bb] sm:$0xff]  ;;  %v11432_v46 = vld [vmem:[%s20135_s6 + $0x3e6] sm:$0xff] }
 0x4ac   : > { %19522 = vpow2.f32 %v15132_v61  ;;  %v12755_v57 = vadd.f32 %v18423_v47, %v22664_v43  ;;  %v5724_v47 = vld [vmem:[%s20135_s6 + $0x3c3] sm:$0xff] }
 0x4ad   : > { %19524 = vpow2.f32 %v15131_v53  ;;  %v12754_v55 = vadd.f32 %v18424_v18, %v22664_v43  ;;  %v18188_v19 = vpop.f32.mrb[6].mxu0  ;;  %17514 = vmatmul.mubr.msk.f32.gmra.mrb[112].mxu1 %vm447_vm0, %v5721_v56 }
 0x4ae   : > { %v15134_v3 = vmul.f32 -1.442695, %v12755_v57  ;;  %v18425_v20 = vadd.f32 %v18188_v19, %v22289_v10  ;;  %v11958_v17 = vpop.f32.mrb[7].mxu0  ;;  %18346 = vmatmul.mubr.msk.f32.gmra.mrb[112].mxu0 %vm447_vm0, %v11429_v54  ;;  %17516 = vmatprep.mubr.msk.f32.mxu1 %vm447_vm0, %v5722_v1  ;;  %v5725_v19 = vld [vmem:[%s20135_s6 + $0x3cb] sm:$0xff] }
 0x4af   : > { %v15133_v60 = vmul.f32 -1.442695, %v12754_v55  ;;  %v18426_v35 = vadd.f32 %v11958_v17, %v22291_v11  ;;  %18348 = vmatprep.mubr.msk.f32.mxu0 %vm447_vm0, %v11430_v0  ;;  %v5726_v17 = vld [vmem:[%s20135_s6 + $0x3d3] sm:$0xff] }
 0x4b0   : > { %19526 = vpow2.f32 %v15134_v3  ;;  %v12757_v61 = vadd.f32 %v18425_v20, %v22664_v43  ;;  %v11433_v3 = vld [vmem:[%s20135_s6 + $0x3ee] sm:$0xff] }
 0x4b1   : > { %19528 = vpow2.f32 %v15133_v60  ;;  %v12756_v10 = vadd.f32 %v18426_v35, %v22664_v43  ;;  %v18191_v53 = vpop.f32.mrb[8].mxu0  ;;  %17517 = vmatmul.mubr.msk.f32.gmra.mrb[114].mxu1 %vm447_vm0, %v5723_v42  ;;  %v11434_v60 = vld [vmem:[%s20135_s6 + $0x3f6] sm:$0xff] }
 0x4b2   : > { %v19519_v18 = vpop.eup %19518  ;;  %v15136_v56 = vmul.f32 -1.442695, %v12757_v61  ;;  %v18427_v11 = vadd.f32 %v18191_v53, %v22301_v6  ;;  %v11968_v54 = vpop.f32.mrb[9].mxu0  ;;  %18349 = vmatmul.mubr.msk.f32.gmra.mrb[114].mxu0 %vm447_vm0, %v11431_v36  ;;  %17519 = vmatprep.mubr.msk.f32.mxu1 %vm447_vm0, %v5724_v47 }
 0x4b3   : > { %v19521_v57 = vpop.eup %19520  ;;  %v13295_v1 = vadd.f32 1.0, %v19519_v18  ;;  %v15135_v0 = vmul.f32 -1.442695, %v12756_v10  ;;  %v18428_v55 = vadd.f32 %v11968_v54, %v22303_v16  ;;  %18351 = vmatprep.mubr.msk.f32.mxu0 %vm447_vm0, %v11432_v46 }
 0x4b4   : > { %v13294_v20 = vadd.f32 1.0, %v19521_v57  ;;  %19530 = vpow2.f32 %v15136_v56  ;;  %v12759_v6 = vadd.f32 %v18427_v11, %v22664_v43  ;;  %v5727_v56 = vld [vmem:[%s20135_s6 + $0x3db] sm:$0xff]  ;;  %v5728_v57 = vld [vmem:[%s20135_s6 + $0x3e3] sm:$0xff] }
 0x4b5   : > { %19532 = vrcp.f32 %v13295_v1  ;;  %v12758_v35 = vadd.f32 %v18428_v55, %v22664_v43  ;;  %v18194_v42 = vpop.f32.mrb[10].mxu0  ;;  %17520 = vmatmul.mubr.msk.f32.gmra.mrb[116].mxu1 %vm447_vm0, %v5725_v19  ;;  %v11436_v1 = vld [vmem:[%s20135_s6 + $0x406] sm:$0xff] }
 0x4b6   : > { %v19523_v36 = vpop.eup %19522  ;;  %19534 = vrcp.f32 %v13294_v20  ;;  %v15138_v16 = vmul.f32 -1.442695, %v12759_v6  ;;  %v18429_v61 = vadd.f32 %v18194_v42, %v22313_v22  ;;  %v11978_v47 = vpop.f32.mrb[11].mxu0  ;;  %18352 = vmatmul.mubr.msk.f32.gmra.mrb[116].mxu0 %vm447_vm0, %v11433_v3  ;;  %17522 = vmatprep.mubr.msk.f32.mxu1 %vm447_vm0, %v5726_v17  ;;  %v11435_v22 = vld [vmem:[%s20135_s6 + $0x3fe] sm:$0xff]  ;;  %v5729_v42 = vld [vmem:[%s20135_s6 + $0x3eb] sm:$0xff] }
 0x4b7   : > { %v19525_v46 = vpop.eup %19524  ;;  %v13297_v10 = vadd.f32 1.0, %v19523_v36  ;;  %19536 = vpow2.f32 %v15135_v0  ;;  %v15137_v53 = vmul.f32 -1.442695, %v12758_v35  ;;  %v18430_v18 = vadd.f32 %v11978_v47, %v22315_v23  ;;  %18354 = vmatprep.mubr.msk.f32.mxu0 %vm447_vm0, %v11434_v60  ;;  %v11437_v36 = vld [vmem:[%s20135_s6 + $0x40e] sm:$0xff]  ;;  %v11438_v47 = vld [vmem:[%s20135_s6 + $0x416] sm:$0xff] }
 0x4b8   : > { %v13296_v11 = vadd.f32 1.0, %v19525_v46  ;;  %19538 = vpow2.f32 %v15138_v16  ;;  %v12761_v54 = vadd.f32 %v18429_v61, %v22664_v43  ;;  %v5730_v61 = vld [vmem:[%s20135_s6 + $0x3f3] sm:$0xff] }
 0x4b9   : > { %19540 = vrcp.f32 %v13297_v10  ;;  %v12760_v55 = vadd.f32 %v18430_v18, %v22664_v43  ;;  %v18197_v0 = vpop.f32.mrb[12].mxu0  ;;  %17523 = vmatmul.mubr.msk.f32.gmra.mrb[118].mxu1 %vm447_vm0, %v5727_v56 }
 0x4ba   : > { %v19527_v23 = vpop.eup %19526  ;;  %19542 = vrcp.f32 %v13296_v11  ;;  %v15140_v19 = vmul.f32 -1.442695, %v12761_v54  ;;  %v18431_v3 = vadd.f32 %v18197_v0, %v22325_v28  ;;  %v11988_v20 = vpop.f32.mrb[13].mxu0  ;;  %18355 = vmatmul.mubr.msk.f32.gmra.mrb[118].mxu0 %vm447_vm0, %v11435_v22  ;;  %17525 = vmatprep.mubr.msk.f32.mxu1 %vm447_vm0, %v5728_v57 }
 0x4bb   : > { %v19529_v6 = vpop.eup %19528  ;;  %v13299_v17 = vadd.f32 1.0, %v19527_v23  ;;  %19544 = vpow2.f32 %v15137_v53  ;;  %v15139_v60 = vmul.f32 -1.442695, %v12760_v55  ;;  %v18432_v35 = vadd.f32 %v11988_v20, %v22327_v29  ;;  %18357 = vmatprep.mubr.msk.f32.mxu0 %vm447_vm0, %v11436_v1  ;;  %v5731_v1 = vld [vmem:[%s20135_s6 + $0x3fb] sm:$0xff]  ;;  %v5732_v23 = vld [vmem:[%s20135_s6 + $0x403] sm:$0xff] }
 0x4bc   : > { %v13298_v28 = vadd.f32 1.0, %v19529_v6  ;;  %19546 = vpow2.f32 %v15140_v19  ;;  %v12763_v16 = vadd.f32 %v18431_v3, %v22664_v43  ;;  %v11440_v19 = vld [vmem:[%s20135_s6 + $0x426] sm:$0xff] }
 0x4bd   : > { %19548 = vrcp.f32 %v13299_v17  ;;  %v12762_v29 = vadd.f32 %v18432_v35, %v22664_v43  ;;  %v18200_v46 = vpop.f32.mrb[14].mxu0  ;;  %17526 = vmatmul.mubr.msk.f32.gmra.mrb[120].mxu1 %vm447_vm0, %v5729_v42 }
 0x4be   : > { %v19531_v10 = vpop.eup %19530  ;;  %19550 = vrcp.f32 %v13298_v28  ;;  %v15142_v53 = vmul.f32 -1.442695, %v12763_v16  ;;  %v18433_v18 = vadd.f32 %v18200_v46, %v22337_v33  ;;  %v11998_v56 = vpop.f32.mrb[15].mxu0  ;;  %18358 = vmatmul.mubr.msk.f32.gmra.mrb[120].mxu0 %vm447_vm0, %v11437_v36  ;;  %17528 = vmatprep.mubr.msk.f32.mxu1 %vm447_vm0, %v5730_v61  ;;  %v11439_v33 = vld [vmem:[%s20135_s6 + $0x41e] sm:$0xff] }
 0x4bf   : > { %v19533_v22 = vpop.eup %19532  ;;  %v13301_v11 = vadd.f32 1.0, %v19531_v10  ;;  %19552 = vpow2.f32 %v15139_v60  ;;  %v15141_v54 = vmul.f32 -1.442695, %v12762_v29  ;;  %v18434_v57 = vadd.f32 %v11998_v56, %v22339_v34  ;;  %18360 = vmatprep.mubr.msk.f32.mxu0 %vm447_vm0, %v11438_v47  ;;  %v5733_v47 = vld [vmem:[%s20135_s6 + $0x40b] sm:$0xff]  ;;  %v5734_v10 = vld [vmem:[%s20135_s6 + $0x413] sm:$0xff] }
 0x4c0   : > { %v19535_v55 = vpop.eup %19534  ;;  %13704 = vst.msk [vmem:[%s22753_s7 + $0x8] sm:$0xff] %vm13702_vm1, %v19533_v22  ;;  %19554 = vpow2.f32 %v15142_v53  ;;  %v12765_v0 = vadd.f32 %v18433_v18, %v22664_v43  ;;  %v11441_v29 = vld [vmem:[%s20135_s6 + $0x42e] sm:$0xff]  ;;  %v11442_v53 = vld [vmem:[%s20135_s6 + $0x436] sm:$0xff] }
 0x4c1   : > { %v19537_v3 = vpop.eup %19536  ;;  %13703 = vst.msk [vmem:[%s22753_s7] sm:$0xff] %vm13702_vm1, %v19535_v55  ;;  %19556 = vrcp.f32 %v13301_v11  ;;  %v12764_v34 = vadd.f32 %v18434_v57, %v22664_v43  ;;  %v18203_v20 = vpop.f32.mrb[16].mxu0  ;;  %17529 = vmatmul.mubr.msk.f32.gmra.mrb[122].mxu1 %vm447_vm0, %v5731_v1 }
 0x4c2   : > { %v19539_v6 = vpop.eup %19538  ;;  %v13300_v17 = vadd.f32 1.0, %v19537_v3  ;;  %19558 = vpow2.f32 %v15141_v54  ;;  %v15144_v60 = vmul.f32 -1.442695, %v12765_v0  ;;  %v18435_v35 = vadd.f32 %v18203_v20, %v22349_v7  ;;  %v12008_v42 = vpop.f32.mrb[17].mxu0  ;;  %18361 = vmatmul.mubr.msk.f32.gmra.mrb[122].mxu0 %vm447_vm0, %v11439_v33  ;;  %17531 = vmatprep.mubr.msk.f32.mxu1 %vm447_vm0, %v5732_v23  ;;  %v5736_v20 = vld [vmem:[%s20135_s6 + $0x423] sm:$0xff] }
 0x4c3   : > { %v19541_v36 = vpop.eup %19540  ;;  %v13303_v28 = vadd.f32 1.0, %v19539_v6  ;;  %v15143_v16 = vmul.f32 -1.442695, %v12764_v34  ;;  %v18436_v61 = vadd.f32 %v12008_v42, %v22351_v38  ;;  %18363 = vmatprep.mubr.msk.f32.mxu0 %vm447_vm0, %v11440_v19  ;;  %v5735_v19 = vld [vmem:[%s20135_s6 + $0x41b] sm:$0xff]  ;;  %v11444_v6 = vld [vmem:[%s20135_s6 + $0x446] sm:$0xff] }
 0x4c4   : > { %v19543_v7 = vpop.eup %19542  ;;  %13706 = vst.msk [vmem:[%s22753_s7 + $0x18] sm:$0xff] %vm13702_vm1, %v19541_v36  ;;  %19560 = vrcp.f32 %v13300_v17  ;;  %v12767_v46 = vadd.f32 %v18435_v35, %v22664_v43 }
 0x4c5   : > { %v19545_v18 = vpop.eup %19544  ;;  %13705 = vst.msk [vmem:[%s22753_s7 + $0x10] sm:$0xff] %vm13702_vm1, %v19543_v7  ;;  %19562 = vrcp.f32 %v13303_v28  ;;  %v12766_v38 = vadd.f32 %v18436_v61, %v22664_v43  ;;  %v18206_v56 = vpop.f32.mrb[18].mxu0  ;;  %17532 = vmatmul.mubr.msk.f32.gmra.mrb[124].mxu1 %vm447_vm0, %v5733_v47  ;;  %v5737_v7 = vld [vmem:[%s20135_s6 + $0x42b] sm:$0xff] }
 0x4c6   : > { %v19547_v22 = vpop.eup %19546  ;;  %v13302_v11 = vadd.f32 1.0, %v19545_v18  ;;  %19564 = vpow2.f32 %v15144_v60  ;;  %v15146_v54 = vmul.f32 -1.442695, %v12767_v46  ;;  %v18437_v57 = vadd.f32 %v18206_v56, %v22361_v44  ;;  %v12018_v1 = vpop.f32.mrb[19].mxu0  ;;  %18364 = vmatmul.mubr.msk.f32.gmra.mrb[124].mxu0 %vm447_vm0, %v11441_v29  ;;  %17534 = vmatprep.mubr.msk.f32.mxu1 %vm447_vm0, %v5734_v10  ;;  %v11443_v44 = vld [vmem:[%s20135_s6 + $0x43e] sm:$0xff]  ;;  %v11445_v46 = vld [vmem:[%s20135_s6 + $0x44e] sm:$0xff] }
 0x4c7   : > { %v19549_v33 = vpop.eup %19548  ;;  %v13305_v55 = vadd.f32 1.0, %v19547_v22  ;;  %19566 = vpow2.f32 %v15143_v16  ;;  %v15145_v0 = vmul.f32 -1.442695, %v12766_v38  ;;  %v18438_v23 = vadd.f32 %v12018_v1, %v22363_v45  ;;  %18366 = vmatprep.mubr.msk.f32.mxu0 %vm447_vm0, %v11442_v53  ;;  %v5738_v18 = vld [vmem:[%s20135_s6 + $0x433] sm:$0xff] }
 0x4c8   : > { %v19551_v3 = vpop.eup %19550  ;;  %13708 = vst.msk [vmem:[%s22753_s7 + $0x28] sm:$0xff] %vm13702_vm1, %v19549_v33  ;;  %19568 = vrcp.f32 %v13302_v11  ;;  %v12769_v34 = vadd.f32 %v18437_v57, %v22664_v43  ;;  %v11446_v38 = vld [vmem:[%s20135_s6 + $0x456] sm:$0xff] }
 0x4c9   : > { %v19553_v17 = vpop.eup %19552  ;;  %13707 = vst.msk [vmem:[%s22753_s7 + $0x20] sm:$0xff] %vm13702_vm1, %v19551_v3  ;;  %19570 = vrcp.f32 %v13305_v55  ;;  %v12768_v45 = vadd.f32 %v18438_v23, %v22664_v43  ;;  %v18209_v60 = vpop.f32.mrb[20].mxu0  ;;  %17535 = vmatmul.mubr.msk.f32.gmra.mrb[126].mxu1 %vm447_vm0, %v5735_v19  ;;  %v5739_v23 = vld [vmem:[%s20135_s6 + $0x43b] sm:$0xff]  ;;  %v5740_v3 = vld [vmem:[%s20135_s6 + $0x443] sm:$0xff] }
 0x4ca   : > { %v19555_v35 = vpop.eup %19554  ;;  %v13304_v42 = vadd.f32 1.0, %v19553_v17  ;;  %19572 = vpow2.f32 %v15146_v54  ;;  %v15148_v36 = vmul.f32 -1.442695, %v12769_v34  ;;  %v18439_v28 = vadd.f32 %v18209_v60, %v22373_v50  ;;  %v12028_v16 = vpop.f32.mrb[21].mxu0  ;;  %18367 = vmatmul.mubr.msk.f32.gmra.mrb[126].mxu0 %vm447_vm0, %v11443_v44  ;;  %17537 = vmatprep.mubr.msk.f32.mxu1 %vm447_vm0, %v5736_v20  ;;  %v11448_v34 = vld [vmem:[%s20135_s6 + $0x466] sm:$0xff] }
 0x4cb   : > { %v19557_v61 = vpop.eup %19556  ;;  %v13307_v47 = vadd.f32 1.0, %v19555_v35  ;;  %19574 = vpow2.f32 %v15145_v0  ;;  %v18440_v29 = vadd.f32 %v12028_v16, %v22375_v41  ;;  %18369 = vmatprep.mubr.msk.f32.mxu0 %vm447_vm0, %v11444_v6  ;;  %v15147_v50 = vmul.f32 -1.442695, %v12768_v45 }
 0x4cc   : > { %v19559_v10 = vpop.eup %19558  ;;  %13710 = vst.msk [vmem:[%s22753_s7 + $0x38] sm:$0xff] %vm13702_vm1, %v19557_v61  ;;  %19576 = vrcp.f32 %v13304_v42  ;;  %v12771_v53 = vadd.f32 %v18439_v28, %v22664_v43 }
 0x4cd   : > { %19578 = vrcp.f32 %v13307_v47  ;;  %v13306_v56 = vadd.f32 1.0, %v19559_v10  ;;  %v12770_v41 = vadd.f32 %v18440_v29, %v22664_v43  ;;  %v18212_v22 = vpop.f32.mrb[22].mxu0  ;;  %17538 = vmatmul.mubr.msk.f32.gmra.mrb[128].mxu1 %vm447_vm0, %v5737_v7  ;;  %v5741_v47 = vld [vmem:[%s20135_s6 + $0x44b] sm:$0xff]  ;;  %v11450_v10 = vld [vmem:[%s20135_s6 + $0x476] sm:$0xff] }
 0x4ce   : > { %v19561_v11 = vpop.eup %19560  ;;  %19580 = vpow2.f32 %v15148_v36  ;;  %v15150_v54 = vmul.f32 -1.442695, %v12771_v53  ;;  %v18441_v57 = vadd.f32 %v18212_v22, %v22385_v58  ;;  %v12038_v1 = vpop.f32.mrb[23].mxu0  ;;  %18370 = vmatmul.mubr.msk.f32.gmra.mrb[128].mxu0 %vm447_vm0, %v11445_v46  ;;  %17540 = vmatprep.mubr.msk.f32.mxu1 %vm447_vm0, %v5738_v18  ;;  %v11447_v58 = vld [vmem:[%s20135_s6 + $0x45e] sm:$0xff]  ;;  %v5742_v46 = vld [vmem:[%s20135_s6 + $0x453] sm:$0xff] }
 0x4cf   : > { %v19563_v33 = vpop.eup %19562  ;;  %13709 = vst.msk [vmem:[%s22753_s7 + $0x30] sm:$0xff] %vm13702_vm1, %v19561_v11  ;;  %19582 = vrcp.f32 %v13306_v56  ;;  %v15149_v55 = vmul.f32 -1.442695, %v12770_v41  ;;  %v18442_v0 = vadd.f32 %v12038_v1, %v22387_v59  ;;  %18372 = vmatprep.mubr.msk.f32.mxu0 %vm447_vm0, %v11446_v38 }
 0x4d0   : > { %v19565_v19 = vpop.eup %19564  ;;  %13712 = vst.msk [vmem:[%s22753_s7 + $0x48] sm:$0xff] %vm13702_vm1, %v19563_v33  ;;  %19584 = vpow2.f32 %v15147_v50  ;;  %v12773_v44 = vadd.f32 %v18441_v57, %v22664_v43  ;;  %v5743_v33 = vld [vmem:[%s20135_s6 + $0x45b] sm:$0x3f] }
 0x4d1   : > { %v19567_v20 = vpop.eup %19566  ;;  %v13309_v6 = vadd.f32 1.0, %v19565_v19  ;;  %19586 = vpow2.f32 %v15150_v54  ;;  %v12772_v59 = vadd.f32 %v18442_v0, %v22664_v43  ;;  %v18215_v17 = vpop.f32.mrb[24].mxu0  ;;  %17541 = vmatmul.mubr.msk.f32.gmra.mrb[130].mxu1 %vm447_vm0, %v5739_v23 }
 0x4d2   : > { %v19569_v45 = vpop.eup %19568  ;;  %v13308_v60 = vadd.f32 1.0, %v19567_v20  ;;  %19588 = vpow2.f32 %v15149_v55  ;;  %v15152_v35 = vmul.f32 -1.442695, %v12773_v44  ;;  %v18443_v42 = vadd.f32 %v18215_v17, %v22397_v4  ;;  %v12048_v36 = vpop.f32.mrb[25].mxu0  ;;  %18373 = vmatmul.mubr.msk.f32.gmra.mrb[130].mxu0 %vm447_vm0, %v11447_v58  ;;  %17543 = vmatprep.mubr.msk.f32.mxu1 %vm447_vm0, %v5740_v3  ;;  %v11449_v4 = vld [vmem:[%s20135_s6 + $0x46e] sm:$0xff] }
 0x4d3   : > { %v19571_v28 = vpop.eup %19570  ;;  %13711 = vst.msk [vmem:[%s22753_s7 + $0x40] sm:$0xff] %vm13702_vm1, %v19569_v45  ;;  %19590 = vrcp.f32 %v13309_v6  ;;  %v15151_v16 = vmul.f32 -1.442695, %v12772_v59  ;;  %v18444_v61 = vadd.f32 %v12048_v36, %v22399_v5  ;;  %18375 = vmatprep.mubr.msk.f32.mxu0 %vm447_vm0, %v11448_v34  ;;  %v11451_v55 = vld [vmem:[%s20135_s6 + $0x47e] sm:$0x3f] }
 0x4d4   : > { %v19573_v29 = vpop.eup %19572  ;;  %13714 = vst.msk [vmem:[%s22753_s7 + $0x58] sm:$0xff] %vm13702_vm1, %v19571_v28  ;;  %19592 = vrcp.f32 %v13308_v60  ;;  %v12775_v7 = vadd.f32 %v18443_v42, %v22664_v43 }
 0x4d5   : > { %v19575_v50 = vpop.eup %19574  ;;  %v13311_v53 = vadd.f32 1.0, %v19573_v29  ;;  %19594 = vpow2.f32 %v15152_v35  ;;  %v12774_v5 = vadd.f32 %v18444_v61, %v22664_v43  ;;  %v18218_v18 = vpop.f32.mrb[26].mxu0  ;;  %17544 = vmatmul.mubr.msk.f32.gmra.mrb[132].mxu1 %vm447_vm0, %v5741_v47 }
 0x4d6   : > { %v19577_v38 = vpop.eup %19576  ;;  %v13310_v56 = vadd.f32 1.0, %v19575_v50  ;;  %19596 = vpow2.f32 %v15151_v16  ;;  %v15154_v41 = vmul.f32 -1.442695, %v12775_v7  ;;  %v18445_v22 = vadd.f32 %v18218_v18, %v22409_v14  ;;  %v12058_v11 = vpop.f32.mrb[27].mxu0  ;;  %18376 = vmatmul.mubr.msk.f32.gmra.mrb[132].mxu0 %vm447_vm0, %v11449_v4  ;;  %17546 = vmatprep.mubr.msk.f32.mxu1 %vm447_vm0, %v5742_v46 }
 0x4d7   : > { %v19579_v54 = vpop.eup %19578  ;;  %13713 = vst.msk [vmem:[%s22753_s7 + $0x50] sm:$0xff] %vm13702_vm1, %v19577_v38  ;;  %19598 = vrcp.f32 %v13311_v53  ;;  %v15153_v57 = vmul.f32 -1.442695, %v12774_v5  ;;  %v18446_v1 = vadd.f32 %v12058_v11, %v22411_v15  ;;  %18378 = vmatprep.mubr.msk.f32.mxu0 %vm447_vm0, %v11450_v10 }
 0x4d8   : > { %v19581_v14 = vpop.eup %19580  ;;  %13716 = vst.msk [vmem:[%s22753_s7 + $0x68] sm:$0xff] %vm13702_vm1, %v19579_v54  ;;  %19600 = vrcp.f32 %v13310_v56  ;;  %v12777_v0 = vadd.f32 %v18445_v22, %v22664_v43 }
 0x4d9   : > { %v19583_v23 = vpop.eup %19582  ;;  %v13313_v58 = vadd.f32 1.0, %v19581_v14  ;;  %19602 = vpow2.f32 %v15154_v41  ;;  %v12776_v19 = vadd.f32 %v18446_v1, %v22664_v43  ;;  %v18221_v44 = vpop.f32.mrb[28].mxu0  ;;  %17547 = vmatmul.mubr.msk.f32.gmra.mrb[134].mxu1 %vm447_vm0, %v5743_v33 }
 0x4da   : > { %v19585_v3 = vpop.eup %19584  ;;  %13715 = vst.msk [vmem:[%s22753_s7 + $0x60] sm:$0xff] %vm13702_vm1, %v19583_v23  ;;  %19604 = vpow2.f32 %v15153_v57  ;;  %v15156_v15 = vmul.f32 -1.442695, %v12777_v0  ;;  %v18447_v34 = vadd.f32 %v18221_v44, %v22421_v24  ;;  %v12068_v20 = vpop.f32.mrb[29].mxu0  ;;  %18379 = vmatmul.mubr.msk.f32.gmra.mrb[134].mxu0 %vm447_vm0, %v11451_v55 }
 0x4db   : > { %v19587_v6 = vpop.eup %19586  ;;  %19606 = vrcp.f32 %v13313_v58  ;;  %v13312_v59 = vadd.f32 1.0, %v19585_v3  ;;  %v18448_v17 = vadd.f32 %v12068_v20, %v22423_v25  ;;  %v15155_v35 = vmul.f32 -1.442695, %v12776_v19 }
 0x4dc   : > { %v19589_v45 = vpop.eup %19588  ;;  %v13315_v60 = vadd.f32 1.0, %v19587_v6  ;;  %19608 = vpow2.f32 %v15156_v15  ;;  %v12779_v42 = vadd.f32 %v18447_v34, %v22664_v43 }
 0x4dd   : > { %v19591_v36 = vpop.eup %19590  ;;  %19610 = vrcp.f32 %v13312_v59  ;;  %v13314_v24 = vadd.f32 1.0, %v19589_v45  ;;  %v12778_v28 = vadd.f32 %v18448_v17, %v22664_v43  ;;  %v18224_v16 = vpop.f32.mrb[30].mxu0 }
 0x4de   : > { %v19593_v61 = vpop.eup %19592  ;;  %13718 = vst.msk [vmem:[%s22753_s7 + $0x78] sm:$0xff] %vm13702_vm1, %v19591_v36  ;;  %19612 = vrcp.f32 %v13315_v60  ;;  %v15158_v47 = vmul.f32 -1.442695, %v12779_v42  ;;  %v18449_v25 = vadd.f32 %v18224_v16, %v22433_v31  ;;  %v12078_v4 = vpop.f32.mrb[31].mxu0 }
 0x4df   : > { %v19595_v29 = vpop.eup %19594  ;;  %13717 = vst.msk [vmem:[%s22753_s7 + $0x70] sm:$0xff] %vm13702_vm1, %v19593_v61  ;;  %19614 = vrcp.f32 %v13314_v24  ;;  %v18450_v7 = vadd.f32 %v12078_v4, %v22435_v32  ;;  %v15157_v50 = vmul.f32 -1.442695, %v12778_v28 }
 0x4e0   : > { %v19597_v46 = vpop.eup %19596  ;;  %v13317_v10 = vadd.f32 1.0, %v19595_v29  ;;  %19616 = vpow2.f32 %v15155_v35  ;;  %v12781_v53 = vadd.f32 %v18449_v25, %v22664_v43 }
 0x4e1   : > { %v19599_v5 = vpop.eup %19598  ;;  %v13316_v18 = vadd.f32 1.0, %v19597_v46  ;;  %19618 = vpow2.f32 %v15158_v47  ;;  %v12780_v31 = vadd.f32 %v18450_v7, %v22664_v43  ;;  %v18227_v38 = vpop.f32.mrb[32].mxu0 }
 0x4e2   : > { %v19601_v56 = vpop.eup %19600  ;;  %13720 = vst.msk [vmem:[%s22753_s7 + $0x88] sm:$0xff] %vm13702_vm1, %v19599_v5  ;;  %19620 = vrcp.f32 %v13317_v10  ;;  %v15160_v41 = vmul.f32 -1.442695, %v12781_v53  ;;  %v18451_v32 = vadd.f32 %v18227_v38, %v22445_v39  ;;  %v12088_v22 = vpop.f32.mrb[33].mxu0 }
 0x4e3   : > { %v19603_v11 = vpop.eup %19602  ;;  %13719 = vst.msk [vmem:[%s22753_s7 + $0x80] sm:$0xff] %vm13702_vm1, %v19601_v56  ;;  %19622 = vrcp.f32 %v13316_v18  ;;  %v18452_v54 = vadd.f32 %v12088_v22, %v22447_v40  ;;  %v15159_v33 = vmul.f32 -1.442695, %v12780_v31 }
 0x4e4   : > { %v19605_v57 = vpop.eup %19604  ;;  %v13319_v1 = vadd.f32 1.0, %v19603_v11  ;;  %19624 = vpow2.f32 %v15157_v50  ;;  %v12783_v55 = vadd.f32 %v18451_v32, %v22664_v43 }
 0x4e5   : > { %v19607_v14 = vpop.eup %19606  ;;  %v13318_v0 = vadd.f32 1.0, %v19605_v57  ;;  %19626 = vpow2.f32 %v15160_v41  ;;  %v12782_v39 = vadd.f32 %v18452_v54, %v22664_v43  ;;  %v18230_v23 = vpop.f32.mrb[34].mxu0 }
 0x4e6   : > { %v19609_v58 = vpop.eup %19608  ;;  %13722 = vst.msk [vmem:[%s22753_s7 + $0x98] sm:$0xff] %vm13702_vm1, %v19607_v14  ;;  %19628 = vrcp.f32 %v13319_v1  ;;  %v15162_v19 = vmul.f32 -1.442695, %v12783_v55  ;;  %v18453_v40 = vadd.f32 %v18230_v23, %v22457_v48  ;;  %v12098_v44 = vpop.f32.mrb[35].mxu0 }
 0x4e7   : > { %v19611_v3 = vpop.eup %19610  ;;  %19630 = vrcp.f32 %v13318_v0  ;;  %v13321_v15 = vadd.f32 1.0, %v19609_v58  ;;  %v15161_v34 = vmul.f32 -1.442695, %v12782_v39  ;;  %v18454_v20 = vadd.f32 %v12098_v44, %v22459_v49 }
 0x4e8   : > { %v19613_v6 = vpop.eup %19612  ;;  %13721 = vst.msk [vmem:[%s22753_s7 + $0x90] sm:$0xff] %vm13702_vm1, %v19611_v3  ;;  %19632 = vpow2.f32 %v15159_v33  ;;  %v12785_v59 = vadd.f32 %v18453_v40, %v22664_v43 }
 0x4e9   : > { %v19615_v17 = vpop.eup %19614  ;;  %13724 = vst.msk [vmem:[%s22753_s7 + $0xa8] sm:$0xff] %vm13702_vm1, %v19613_v6  ;;  %19634 = vrcp.f32 %v13321_v15  ;;  %v12784_v48 = vadd.f32 %v18454_v20, %v22664_v43  ;;  %v18233_v45 = vpop.f32.mrb[36].mxu0 }
 0x4ea   : > { %v19617_v60 = vpop.eup %19616  ;;  %13723 = vst.msk [vmem:[%s22753_s7 + $0xa0] sm:$0xff] %vm13702_vm1, %v19615_v17  ;;  %19636 = vpow2.f32 %v15162_v19  ;;  %v15164_v35 = vmul.f32 -1.442695, %v12785_v59  ;;  %v18455_v49 = vadd.f32 %v18233_v45, %v22469_v62  ;;  %v12108_v42 = vpop.f32.mrb[37].mxu0 }
 0x4eb   : > { %v19619_v36 = vpop.eup %19618  ;;  %v13320_v24 = vadd.f32 1.0, %v19617_v60  ;;  %19638 = vpow2.f32 %v15161_v34  ;;  %v15163_v28 = vmul.f32 -1.442695, %v12784_v48  ;;  %v18456_v16 = vadd.f32 %v12108_v42, %v22471_v63 }
 0x4ec   : > { %v19621_v61 = vpop.eup %19620  ;;  %v13323_v47 = vadd.f32 1.0, %v19619_v36  ;;  %19640 = vpow2.f32 %v15164_v35  ;;  %v12787_v25 = vadd.f32 %v18455_v49, %v22664_v43 }
 0x4ed   : > { %v19623_v4 = vpop.eup %19622  ;;  %13726 = vst.msk [vmem:[%s22753_s7 + $0xb8] sm:$0xff] %vm13702_vm1, %v19621_v61  ;;  %19642 = vrcp.f32 %v13320_v24  ;;  %v12786_v29 = vadd.f32 %v18456_v16, %v22664_v43  ;;  %v18236_v62 = vpop.f32.mrb[38].mxu0 }
 0x4ee   : > { %v19625_v7 = vpop.eup %19624  ;;  %13725 = vst.msk [vmem:[%s22753_s7 + $0xb0] sm:$0xff] %vm13702_vm1, %v19623_v4  ;;  %19644 = vrcp.f32 %v13323_v47  ;;  %v15166_v46 = vmul.f32 -1.442695, %v12787_v25  ;;  %v18457_v63 = vadd.f32 %v18236_v62, %v22481_v12  ;;  %v12118_v10 = vpop.f32.mrb[39].mxu0 }
 0x4ef   : > { %v19627_v50 = vpop.eup %19626  ;;  %v13322_v53 = vadd.f32 1.0, %v19625_v7  ;;  %19646 = vpow2.f32 %v15163_v28  ;;  %v15165_v5 = vmul.f32 -1.442695, %v12786_v29  ;;  %v18458_v18 = vadd.f32 %v12118_v10, %v22483_v13 }
 0x4f0   : > { %v19629_v31 = vpop.eup %19628  ;;  %v13325_v38 = vadd.f32 1.0, %v19627_v50  ;;  %19648 = vpow2.f32 %v15166_v46  ;;  %v12789_v56 = vadd.f32 %v18457_v63, %v22664_v43 }
 0x4f1   : > { %v19631_v41 = vpop.eup %19630  ;;  %13728 = vst.msk [vmem:[%s22753_s7 + $0xc8] sm:$0xff] %vm13702_vm1, %v19629_v31  ;;  %19650 = vrcp.f32 %v13322_v53  ;;  %v12788_v12 = vadd.f32 %v18458_v18, %v22664_v43  ;;  %v18239_v32 = vpop.f32.mrb[40].mxu0 }
 0x4f2   : > { %v19633_v22 = vpop.eup %19632  ;;  %13727 = vst.msk [vmem:[%s22753_s7 + $0xc0] sm:$0xff] %vm13702_vm1, %v19631_v41  ;;  %19652 = vrcp.f32 %v13325_v38  ;;  %v15168_v11 = vmul.f32 -1.442695, %v12789_v56  ;;  %v18459_v13 = vadd.f32 %v18239_v32, %v22493_v26  ;;  %v12128_v54 = vpop.f32.mrb[41].mxu0 }
 0x4f3   : > { %v19635_v57 = vpop.eup %19634  ;;  %v13324_v1 = vadd.f32 1.0, %v19633_v22  ;;  %19654 = vpow2.f32 %v15165_v5  ;;  %v15167_v33 = vmul.f32 -1.442695, %v12788_v12  ;;  %v18460_v55 = vadd.f32 %v12128_v54, %v22495_v27 }
 0x4f4   : > { %v19637_v14 = vpop.eup %19636  ;;  %13730 = vst.msk [vmem:[%s22753_s7 + $0xd8] sm:$0xff] %vm13702_vm1, %v19635_v57  ;;  %19656 = vpow2.f32 %v15168_v11  ;;  %v12791_v0 = vadd.f32 %v18459_v13, %v22664_v43 }
 0x4f5   : > { %v19639_v39 = vpop.eup %19638  ;;  %19658 = vrcp.f32 %v13324_v1  ;;  %v13327_v23 = vadd.f32 1.0, %v19637_v14  ;;  %v12790_v58 = vadd.f32 %v18460_v55, %v22664_v43  ;;  %v18242_v26 = vpop.f32.mrb[42].mxu0 }
 0x4f6   : > { %v19641_v19 = vpop.eup %19640  ;;  %v13326_v40 = vadd.f32 1.0, %v19639_v39  ;;  %19660 = vpow2.f32 %v15167_v33  ;;  %v15170_v44 = vmul.f32 -1.442695, %v12791_v0  ;;  %v18461_v27 = vadd.f32 %v18242_v26, %v22505_v2  ;;  %v12138_v3 = vpop.f32.mrb[43].mxu0 }
 0x4f7   : > { %v19643_v15 = vpop.eup %19642  ;;  %19662 = vrcp.f32 %v13327_v23  ;;  %v13329_v34 = vadd.f32 1.0, %v19641_v19  ;;  %v15169_v20 = vmul.f32 -1.442695, %v12790_v58  ;;  %v18462_v6 = vadd.f32 %v12138_v3, %v22507_v37  ;;  %v23295_v23 = vld [vmem:[#allocation2_spill] sm:$0xff] }
 0x4f8   : > { %v19645_v59 = vpop.eup %19644  ;;  %13729 = vst.msk [vmem:[%s22753_s7 + $0xd0] sm:$0xff] %vm13702_vm1, %v19643_v15  ;;  %19664 = vrcp.f32 %v13326_v40  ;;  %v12793_v17 = vadd.f32 %v18461_v27, %v22664_v43  ;;  %v23296_v40 = vld [vmem:[#allocation3_spill] sm:$0xff] }
 0x4f9   : > { %v19647_v48 = vpop.eup %19646  ;;  %13732 = vst.msk [vmem:[%s22753_s7 + $0xe8] sm:$0xff] %vm13702_vm1, %v19645_v59  ;;  %19666 = vrcp.f32 %v13329_v34  ;;  %v12792_v2 = vadd.f32 %v18462_v6, %v22664_v43  ;;  %v18245_v45 = vpop.f32.mrb[44].mxu0 }
 0x4fa   : > { %v19649_v60 = vpop.eup %19648  ;;  %v13328_v35 = vadd.f32 1.0, %v19647_v48  ;;  %19668 = vpow2.f32 %v15170_v44  ;;  %v15172_v49 = vmul.f32 -1.442695, %v12793_v17  ;;  %v18463_v37 = vadd.f32 %v18245_v45, %v22517_v51  ;;  %v12148_v42 = vpop.f32.mrb[45].mxu0  ;;  %v22940_v51 = vld [vmem:[%s23275_s2] ss:$0 sm:$0xff] }
 0x4fb   : > { %v19651_v36 = vpop.eup %19650  ;;  %v13331_v24 = vadd.f32 1.0, %v19649_v60  ;;  %19670 = vpow2.f32 %v15169_v20  ;;  %v15171_v28 = vmul.f32 -1.442695, %v12792_v2  ;;  %v18464_v16 = vadd.f32 %v12148_v42, %v22519_v52  ;;  %v23297_v2 = vld [vmem:[#allocation4_spill] sm:$0xff] }
 0x4fc   : > { %v19653_v61 = vpop.eup %19652  ;;  %13731 = vst.msk [vmem:[%s22753_s7 + $0xe0] sm:$0xff] %vm13702_vm1, %v19651_v36  ;;  %19672 = vrcp.f32 %v13328_v35  ;;  %v12795_v47 = vadd.f32 %v18463_v37, %v22664_v43  ;;  %v23298_v37 = vld [vmem:[#allocation5_spill] sm:$0xff] }
 0x4fd   : > { %v19655_v25 = vpop.eup %19654  ;;  %13734 = vst.msk [vmem:[%s22753_s7 + $0xf8] sm:$0xff] %vm13702_vm1, %v19653_v61  ;;  %19674 = vrcp.f32 %v13331_v24  ;;  %v12794_v4 = vadd.f32 %v22940_v51, %v18464_v16  ;;  %v18248_v29 = vpop.f32.mrb[46].mxu0 }
 0x4fe   : > { %v19657_v52 = vpop.eup %19656  ;;  %v13330_v62 = vadd.f32 1.0, %v19655_v25  ;;  %19676 = vpow2.f32 %v15172_v49  ;;  %v15174_v7 = vmul.f32 -1.442695, %v12795_v47  ;;  %v18465_v46 = vadd.f32 %v18248_v29, %v22529_v8  ;;  %v12158_v43 = vpop.f32.mrb[47].mxu0  ;;  %v23299_v29 = vld [vmem:[#allocation6_spill] sm:$0xff] }
 0x4ff   : > { %v19659_v63 = vpop.eup %19658  ;;  %v13333_v10 = vadd.f32 1.0, %v19657_v52  ;;  %19678 = vpow2.f32 %v15171_v28  ;;  %v18466_v50 = vadd.f32 %v12158_v43, %v22531_v9  ;;  %v15173_v5 = vmul.f32 -1.442695, %v12794_v4  ;;  %v23300_v43 = vld [vmem:[#allocation7_spill] sm:$0xff] }
 0x500   : > { %v19661_v53 = vpop.eup %19660  ;;  %13733 = vst.msk [vmem:[%s22753_s7 + $0xf0] sm:$0xff] %vm13702_vm1, %v19659_v63  ;;  %19680 = vrcp.f32 %v13330_v62  ;;  %v12797_v18 = vadd.f32 %v22940_v51, %v18465_v46 }
 0x501   : > { %v19663_v31 = vpop.eup %19662  ;;  %19682 = vrcp.f32 %v13333_v10  ;;  %v13332_v38 = vadd.f32 1.0, %v19661_v53  ;;  %v12796_v8 = vadd.f32 %v22940_v51, %v18466_v50  ;;  %v18251_v56 = vpop.f32.mrb[48].mxu0 }
 0x502   : > { %v19665_v41 = vpop.eup %19664  ;;  %13736 = vst.msk [vmem:[%s22753_s7 + $0x108] sm:$0xff] %vm13702_vm1, %v19663_v31  ;;  %19684 = vpow2.f32 %v15174_v7  ;;  %v15176_v9 = vmul.f32 -1.442695, %v12797_v18  ;;  %v18467_v12 = vadd.f32 %v18251_v56, %v22541_v21  ;;  %v12168_v32 = vpop.f32.mrb[49].mxu0 }
 0x503   : > { %v19667_v22 = vpop.eup %19666  ;;  %13735 = vst.msk [vmem:[%s22753_s7 + $0x100] sm:$0xff] %vm13702_vm1, %v19665_v41  ;;  %19686 = vrcp.f32 %v13332_v38  ;;  %v15175_v11 = vmul.f32 -1.442695, %v12796_v8  ;;  %v18468_v13 = vadd.f32 %v12168_v32, %v22543_v30 }
 0x504   : > { %v19669_v54 = vpop.eup %19668  ;;  %13738 = vst.msk [vmem:[%s22753_s7 + $0x118] sm:$0xff] %vm13702_vm1, %v19667_v22  ;;  %19688 = vpow2.f32 %v15173_v5  ;;  %v12799_v57 = vadd.f32 %v22940_v51, %v18467_v12 }
 0x505   : > { %v19671_v1 = vpop.eup %19670  ;;  %v13335_v33 = vadd.f32 1.0, %v19669_v54  ;;  %19690 = vpow2.f32 %v15176_v9  ;;  %v12798_v21 = vadd.f32 %v22940_v51, %v18468_v13  ;;  %v18254_v55 = vpop.f32.mrb[50].mxu0  ;;  %v23301_v9 = vld [vmem:[#allocation8_spill] sm:$0xff] }
 0x506   : > { %v19673_v14 = vpop.eup %19672  ;;  %v13334_v0 = vadd.f32 1.0, %v19671_v1  ;;  %19692 = vpow2.f32 %v15175_v11  ;;  %v15178_v39 = vmul.f32 -1.442695, %v12799_v57  ;;  %v18469_v30 = vadd.f32 %v18254_v55, %v23295_v23  ;;  %v12178_v58 = vpop.f32.mrb[51].mxu0  ;;  %v23302_v11 = vld [vmem:[#allocation9_spill] sm:$0xff] }
 0x507   : > { %v19675_v26 = vpop.eup %19674  ;;  %13737 = vst.msk [vmem:[%s22753_s7 + $0x110] sm:$0xff] %vm13702_vm1, %v19673_v14  ;;  %19694 = vrcp.f32 %v13335_v33  ;;  %v15177_v19 = vmul.f32 -1.442695, %v12798_v21  ;;  %v18470_v44 = vadd.f32 %v12178_v58, %v23296_v40  ;;  %v23304_v40 = vld [vmem:[#allocation11_spill] sm:$0xff] }
 0x508   : > { %v19677_v27 = vpop.eup %19676  ;;  %13740 = vst.msk [vmem:[%s22753_s7 + $0x128] sm:$0xff] %vm13702_vm1, %v19675_v26  ;;  %19696 = vrcp.f32 %v13334_v0  ;;  %v12801_v3 = vadd.f32 %v22940_v51, %v18469_v30  ;;  %v23303_v30 = vld [vmem:[#allocation10_spill] sm:$0xff] }
 0x509   : > { %v19679_v15 = vpop.eup %19678  ;;  %v13337_v34 = vadd.f32 1.0, %v19677_v27  ;;  %19698 = vpow2.f32 %v15178_v39  ;;  %v12800_v20 = vadd.f32 %v22940_v51, %v18470_v44  ;;  %v18257_v6 = vpop.f32.mrb[52].mxu0 }
 0x50a   : > { %v19681_v59 = vpop.eup %19680  ;;  %v13336_v17 = vadd.f32 1.0, %v19679_v15  ;;  %19700 = vpow2.f32 %v15177_v19  ;;  %v15180_v48 = vmul.f32 -1.442695, %v12801_v3  ;;  %v18471_v45 = vadd.f32 %v18257_v6, %v23297_v2  ;;  %v12188_v60 = vpop.f32.mrb[53].mxu0 }
 0x50b   : > { %v19683_v35 = vpop.eup %19682  ;;  %13739 = vst.msk [vmem:[%s22753_s7 + $0x120] sm:$0xff] %vm13702_vm1, %v19681_v59  ;;  %19702 = vrcp.f32 %v13337_v34  ;;  %v15179_v49 = vmul.f32 -1.442695, %v12800_v20  ;;  %v18472_v42 = vadd.f32 %v12188_v60, %v23298_v37 }
 0x50c   : > { %v19685_v36 = vpop.eup %19684  ;;  %13742 = vst.msk [vmem:[%s22753_s7 + $0x138] sm:$0xff] %vm13702_vm1, %v19683_v35  ;;  %19704 = vrcp.f32 %v13336_v17  ;;  %v12803_v24 = vadd.f32 %v22940_v51, %v18471_v45  ;;  %v23305_v45 = vld [vmem:[#allocation12_spill] sm:$0xff] }
 0x50d   : > { %v19687_v28 = vpop.eup %19686  ;;  %v13339_v16 = vadd.f32 1.0, %v19685_v36  ;;  %19706 = vpow2.f32 %v15180_v48  ;;  %v12802_v61 = vadd.f32 %v22940_v51, %v18472_v42  ;;  %v18260_v47 = vpop.f32.mrb[54].mxu0  ;;  %v23306_v36 = vld [vmem:[#allocation13_spill] sm:$0xff] }
 0x50e   : > { %v19689_v25 = vpop.eup %19688  ;;  %13741 = vst.msk [vmem:[%s22753_s7 + $0x130] sm:$0xff] %vm13702_vm1, %v19687_v28  ;;  %19708 = vpow2.f32 %v15179_v49  ;;  %v15182_v4 = vmul.f32 -1.442695, %v12803_v24  ;;  %v18473_v52 = vadd.f32 %v18260_v47, %v23299_v29  ;;  %v12198_v62 = vpop.f32.mrb[55].mxu0 }
 0x50f   : > { %v19691_v7 = vpop.eup %19690  ;;  %19710 = vrcp.f32 %v13339_v16  ;;  %v13338_v46 = vadd.f32 1.0, %v19689_v25  ;;  %v18474_v63 = vadd.f32 %v12198_v62, %v23300_v43  ;;  %v15181_v53 = vmul.f32 -1.442695, %v12802_v61 }
 0x510   : > { %v19693_v10 = vpop.eup %19692  ;;  %v13341_v50 = vadd.f32 1.0, %v19691_v7  ;;  %19712 = vpow2.f32 %v15182_v4  ;;  %v12805_v5 = vadd.f32 %v22940_v51, %v18473_v52  ;;  %v23307_v52 = vld [vmem:[#allocation14_spill] sm:$0xff] }
 0x511   : > { %v19695_v18 = vpop.eup %19694  ;;  %19714 = vrcp.f32 %v13338_v46  ;;  %v13340_v31 = vadd.f32 1.0, %v19693_v10  ;;  %v12804_v38 = vadd.f32 %v22940_v51, %v18474_v63  ;;  %v18263_v8 = vpop.f32.mrb[56].mxu0  ;;  %v23308_v10 = vld [vmem:[#allocation15_spill] sm:$0xff] }
 0x512   : > { %v19697_v56 = vpop.eup %19696  ;;  %13744 = vst.msk [vmem:[%s22753_s7 + $0x148] sm:$0xff] %vm13702_vm1, %v19695_v18  ;;  %19716 = vrcp.f32 %v13341_v50  ;;  %v15184_v41 = vmul.f32 -1.442695, %v12805_v5  ;;  %v18475_v12 = vadd.f32 %v18263_v8, %v23301_v9  ;;  %v12208_v32 = vpop.f32.mrb[57].mxu0  ;;  %v23309_v9 = vld [vmem:[#allocation16_spill] sm:$0xff] }
 0x513   : > { %v19699_v22 = vpop.eup %19698  ;;  %13743 = vst.msk [vmem:[%s22753_s7 + $0x140] sm:$0xff] %vm13702_vm1, %v19697_v56  ;;  %19718 = vrcp.f32 %v13340_v31  ;;  %v18476_v13 = vadd.f32 %v12208_v32, %v23302_v11  ;;  %v15183_v1 = vmul.f32 -1.442695, %v12804_v38 }
 0x514   : > { %v19701_v54 = vpop.eup %19700  ;;  %v13343_v57 = vadd.f32 1.0, %v19699_v22  ;;  %19720 = vpow2.f32 %v15181_v53  ;;  %v12807_v33 = vadd.f32 %v22940_v51, %v18475_v12 }
 0x515   : > { %v19703_v21 = vpop.eup %19702  ;;  %v13342_v55 = vadd.f32 1.0, %v19701_v54  ;;  %19722 = vpow2.f32 %v15184_v41  ;;  %v12806_v14 = vadd.f32 %v22940_v51, %v18476_v13  ;;  %v18266_v0 = vpop.f32.mrb[58].mxu0  ;;  %v23310_v54 = vld [vmem:[#allocation17_spill] sm:$0xff] }
 0x516   : > { %v19705_v39 = vpop.eup %19704  ;;  %13746 = vst.msk [vmem:[%s22753_s7 + $0x158] sm:$0xff] %vm13702_vm1, %v19703_v21  ;;  %19724 = vrcp.f32 %v13343_v57  ;;  %v15186_v23 = vmul.f32 -1.442695, %v12807_v33  ;;  %v18477_v58 = vadd.f32 %v18266_v0, %v23303_v30  ;;  %v12218_v26 = vpop.f32.mrb[59].mxu0  ;;  %v23311_v30 = vld [vmem:[#allocation18_spill] sm:$0xff] }
 0x517   : > { %v19707_v19 = vpop.eup %19706  ;;  %13745 = vst.msk [vmem:[%s22753_s7 + $0x150] sm:$0xff] %vm13702_vm1, %v19705_v39  ;;  %19726 = vrcp.f32 %v13342_v55  ;;  %v18478_v44 = vadd.f32 %v12218_v26, %v23304_v40  ;;  %v15185_v15 = vmul.f32 -1.442695, %v12806_v14 }
 0x518   : > { %v19709_v27 = vpop.eup %19708  ;;  %v13345_v3 = vadd.f32 1.0, %v19707_v19  ;;  %19728 = vpow2.f32 %v15183_v1  ;;  %v12809_v34 = vadd.f32 %v22940_v51, %v18477_v58 }
 0x519   : > { %v19711_v20 = vpop.eup %19710  ;;  %v13344_v6 = vadd.f32 1.0, %v19709_v27  ;;  %19730 = vpow2.f32 %v15186_v23  ;;  %v12808_v59 = vadd.f32 %v22940_v51, %v18478_v44  ;;  %v18269_v17 = vpop.f32.mrb[60].mxu0  ;;  %v23312_v27 = vld [vmem:[#allocation19_spill] sm:$0xff] }
 0x51a   : > { %v19713_v48 = vpop.eup %19712  ;;  %13748 = vst.msk [vmem:[%s22753_s7 + $0x168] sm:$0xff] %vm13702_vm1, %v19711_v20  ;;  %19732 = vrcp.f32 %v13345_v3  ;;  %v15188_v2 = vmul.f32 -1.442695, %v12809_v34  ;;  %v18479_v60 = vadd.f32 %v18269_v17, %v23305_v45  ;;  %v12228_v35 = vpop.f32.mrb[61].mxu0 }
 0x51b   : > { %v19715_v49 = vpop.eup %19714  ;;  %19734 = vrcp.f32 %v13344_v6  ;;  %v13347_v37 = vadd.f32 1.0, %v19713_v48  ;;  %v15187_v42 = vmul.f32 -1.442695, %v12808_v59  ;;  %v18480_v24 = vadd.f32 %v12228_v35, %v23306_v36 }
 0x51c   : > { %v19717_v28 = vpop.eup %19716  ;;  %13747 = vst.msk [vmem:[%s22753_s7 + $0x160] sm:$0xff] %vm13702_vm1, %v19715_v49  ;;  %19736 = vpow2.f32 %v15185_v15  ;;  %v12811_v16 = vadd.f32 %v22940_v51, %v18479_v60 }
 0x51d   : > { %v19719_v61 = vpop.eup %19718  ;;  %13750 = vst.msk [vmem:[%s22753_s7 + $0x178] sm:$0xff] %vm13702_vm1, %v19717_v28  ;;  %19738 = vrcp.f32 %v13347_v37  ;;  %v12810_v47 = vadd.f32 %v22940_v51, %v18480_v24  ;;  %v18272_v25 = vpop.f32.mrb[62].mxu0 }
 0x51e   : > { %v19721_v4 = vpop.eup %19720  ;;  %13749 = vst.msk [vmem:[%s22753_s7 + $0x170] sm:$0xff] %vm13702_vm1, %v19719_v61  ;;  %19740 = vpow2.f32 %v15188_v2  ;;  %v15190_v29 = vmul.f32 -1.442695, %v12811_v16  ;;  %v18481_v62 = vadd.f32 %v18272_v25, %v23307_v52  ;;  %v12238_v7 = vpop.f32.mrb[63].mxu0 }
 0x51f   : > { %v19723_v46 = vpop.eup %19722  ;;  %v13346_v43 = vadd.f32 1.0, %v19721_v4  ;;  %19742 = vpow2.f32 %v15187_v42  ;;  %v15189_v63 = vmul.f32 -1.442695, %v12810_v47  ;;  %v18482_v50 = vadd.f32 %v12238_v7, %v23308_v10 }
 0x520   : > { %v19725_v53 = vpop.eup %19724  ;;  %v13349_v5 = vadd.f32 1.0, %v19723_v46  ;;  %19744 = vpow2.f32 %v15190_v29  ;;  %v12813_v18 = vadd.f32 %v22940_v51, %v18481_v62 }
 0x521   : > { %v19727_v31 = vpop.eup %19726  ;;  %13752 = vst.msk [vmem:[%s22753_s7 + $0x188] sm:$0xff] %vm13702_vm1, %v19725_v53  ;;  %19746 = vrcp.f32 %v13346_v43  ;;  %v12812_v38 = vadd.f32 %v22940_v51, %v18482_v50  ;;  %v18275_v8 = vpop.f32.mrb[64].mxu0 }
 0x522   : > { %v19729_v56 = vpop.eup %19728  ;;  %13751 = vst.msk [vmem:[%s22753_s7 + $0x180] sm:$0xff] %vm13702_vm1, %v19727_v31  ;;  %19748 = vrcp.f32 %v13349_v5  ;;  %v15192_v41 = vmul.f32 -1.442695, %v12813_v18  ;;  %v18483_v12 = vadd.f32 %v18275_v8, %v23309_v9  ;;  %v12248_v32 = vpop.f32.mrb[65].mxu0 }
 0x523   : > { %v19731_v22 = vpop.eup %19730  ;;  %v13348_v11 = vadd.f32 1.0, %v19729_v56  ;;  %19750 = vpow2.f32 %v15189_v63  ;;  %v15191_v13 = vmul.f32 -1.442695, %v12812_v38  ;;  %v18484_v57 = vadd.f32 %v12248_v32, %v23310_v54 }
 0x524   : > { %v19733_v1 = vpop.eup %19732  ;;  %v13351_v33 = vadd.f32 1.0, %v19731_v22  ;;  %19752 = vpow2.f32 %v15192_v41  ;;  %v12815_v21 = vadd.f32 %v22940_v51, %v18483_v12 }
 0x525   : > { %v19735_v55 = vpop.eup %19734  ;;  %13754 = vst.msk [vmem:[%s22753_s7 + $0x198] sm:$0xff] %vm13702_vm1, %v19733_v1  ;;  %19754 = vrcp.f32 %v13348_v11  ;;  %v12814_v14 = vadd.f32 %v22940_v51, %v18484_v57  ;;  %v18278_v0 = vpop.f32.mrb[66].mxu0 }
 0x526   : > { %v19737_v39 = vpop.eup %19736  ;;  %13753 = vst.msk [vmem:[%s22753_s7 + $0x190] sm:$0xff] %vm13702_vm1, %v19735_v55  ;;  %19756 = vrcp.f32 %v13351_v33  ;;  %v15194_v23 = vmul.f32 -1.442695, %v12815_v21  ;;  %v18485_v58 = vadd.f32 %v18278_v0, %v23311_v30  ;;  %v12258_v26 = vpop.f32.mrb[67].mxu0 }
 0x527   : > { %v19739_v19 = vpop.eup %19738  ;;  %v13350_v40 = vadd.f32 1.0, %v19737_v39  ;;  %19758 = vpow2.f32 %v15191_v13  ;;  %v15193_v44 = vmul.f32 -1.442695, %v12814_v14  ;;  %v18486_v3 = vadd.f32 %v12258_v26, %v23312_v27 }
 0x528   : > { %v19741_v15 = vpop.eup %19740  ;;  %13756 = vst.msk [vmem:[%s22753_s7 + $0x1a8] sm:$0xff] %vm13702_vm1, %v19739_v19  ;;  %19760 = vpow2.f32 %v15194_v23  ;;  %v12817_v34 = vadd.f32 %v22940_v51, %v18485_v58  ;;  %v17449_v17 = vpop.f32.mrb[68].mxu1 }
 0x529   : > { %v19743_v20 = vpop.eup %19742  ;;  %19762 = vrcp.f32 %v13350_v40  ;;  %v13353_v6 = vadd.f32 1.0, %v19741_v15  ;;  %v12816_v59 = vadd.f32 %v22940_v51, %v18486_v3  ;;  %v18281_v48 = vpop.f32.mrb[68].mxu0 }
 0x52a   : > { %v19745_v2 = vpop.eup %19744  ;;  %v13352_v45 = vadd.f32 1.0, %v19743_v20  ;;  %19764 = vpow2.f32 %v15193_v44  ;;  %v15196_v60 = vmul.f32 -1.442695, %v12817_v34  ;;  %v18487_v35 = vadd.f32 %v18281_v48, %v17449_v17  ;;  %v6560_v49 = vpop.f32.mrb[69].mxu1 }
 0x52b   : > { %v12268_v37 = vpop.f32.mrb[69].mxu0  ;;  %v19747_v42 = vpop.eup %19746  ;;  %19766 = vrcp.f32 %v13353_v6  ;;  %v13355_v36 = vadd.f32 1.0, %v19745_v2  ;;  %v15195_v24 = vmul.f32 -1.442695, %v12816_v59 }
 0x52c   : > { %v18488_v28 = vadd.f32 %v12268_v37, %v6560_v49  ;;  %v19749_v16 = vpop.eup %19748  ;;  %13755 = vst.msk [vmem:[%s22753_s7 + $0x1a0] sm:$0xff] %vm13702_vm1, %v19747_v42  ;;  %19768 = vrcp.f32 %v13352_v45  ;;  %v12819_v61 = vadd.f32 %v22940_v51, %v18487_v35  ;;  %v17452_v4 = vpop.f32.mrb[70].mxu1 }
 0x52d   : > { %v19751_v47 = vpop.eup %19750  ;;  %13758 = vst.msk [vmem:[%s22753_s7 + $0x1b8] sm:$0xff] %vm13702_vm1, %v19749_v16  ;;  %19770 = vrcp.f32 %v13355_v36  ;;  %v18284_v29 = vpop.f32.mrb[70].mxu0 }
 0x52e   : > { %v12818_v25 = vadd.f32 %v22940_v51, %v18488_v28  ;;  %v19753_v52 = vpop.eup %19752  ;;  %v13354_v62 = vadd.f32 1.0, %v19751_v47  ;;  %19772 = vpow2.f32 %v15196_v60  ;;  %v15198_v7 = vmul.f32 -1.442695, %v12819_v61  ;;  %v6570_v43 = vpop.f32.mrb[71].mxu1 }
 0x52f   : > { %v18489_v46 = vadd.f32 %v18284_v29, %v17452_v4  ;;  %v12278_v63 = vpop.f32.mrb[71].mxu0  ;;  %v19755_v10 = vpop.eup %19754  ;;  %v13357_v50 = vadd.f32 1.0, %v19753_v52  ;;  %19774 = vpow2.f32 %v15195_v24 }
 0x530   : > { %v15197_v53 = vmul.f32 -1.442695, %v12818_v25  ;;  %v18490_v5 = vadd.f32 %v12278_v63, %v6570_v43  ;;  %v19757_v18 = vpop.eup %19756  ;;  %13757 = vst.msk [vmem:[%s22753_s7 + $0x1b0] sm:$0xff] %vm13702_vm1, %v19755_v10  ;;  %19776 = vrcp.f32 %v13354_v62  ;;  %v17455_v56 = vpop.f32.mrb[72].mxu1 }
 0x531   : > { %v12821_v31 = vadd.f32 %v22940_v51, %v18489_v46  ;;  %v19759_v38 = vpop.eup %19758  ;;  %13760 = vst.msk [vmem:[%s22753_s7 + $0x1c8] sm:$0xff] %vm13702_vm1, %v19757_v18  ;;  %19778 = vrcp.f32 %v13357_v50  ;;  %v18287_v41 = vpop.f32.mrb[72].mxu0 }
 0x532   : > { %v12820_v8 = vadd.f32 %v22940_v51, %v18490_v5  ;;  %v19761_v9 = vpop.eup %19760  ;;  %v13356_v12 = vadd.f32 1.0, %v19759_v38  ;;  %19780 = vpow2.f32 %v15198_v7  ;;  %v18491_v22 = vadd.f32 %v18287_v41, %v17455_v56  ;;  %v6580_v11 = vpop.f32.mrb[73].mxu1 }
 0x533   : > { %v15200_v32 = vmul.f32 -1.442695, %v12821_v31  ;;  %v12288_v13 = vpop.f32.mrb[73].mxu0  ;;  %v19763_v54 = vpop.eup %19762  ;;  %v13359_v57 = vadd.f32 1.0, %v19761_v9  ;;  %19782 = vpow2.f32 %v15197_v53 }
 0x534   : > { %v18492_v1 = vadd.f32 %v12288_v13, %v6580_v11  ;;  %v19765_v33 = vpop.eup %19764  ;;  %13759 = vst.msk [vmem:[%s22753_s7 + $0x1c0] sm:$0xff] %vm13702_vm1, %v19763_v54  ;;  %19784 = vrcp.f32 %v13356_v12  ;;  %v15199_v21 = vmul.f32 -1.442695, %v12820_v8  ;;  %v12823_v55 = vadd.f32 %v22940_v51, %v18491_v22  ;;  %v17458_v23 = vpop.f32.mrb[74].mxu1 }
 0x535   : > { %v19767_v14 = vpop.eup %19766  ;;  %19786 = vrcp.f32 %v13359_v57  ;;  %v13358_v0 = vadd.f32 1.0, %v19765_v33  ;;  %v18290_v30 = vpop.f32.mrb[74].mxu0 }
 0x536   : > { %v12822_v39 = vadd.f32 %v22940_v51, %v18492_v1  ;;  %v19769_v58 = vpop.eup %19768  ;;  %13762 = vst.msk [vmem:[%s22753_s7 + $0x1d8] sm:$0xff] %vm13702_vm1, %v19767_v14  ;;  %19788 = vpow2.f32 %v15200_v32  ;;  %v15202_v26 = vmul.f32 -1.442695, %v12823_v55  ;;  %v18493_v19 = vadd.f32 %v18290_v30, %v17458_v23  ;;  %v6590_v40 = vpop.f32.mrb[75].mxu1 }
 0x537   : > { %v12298_v44 = vpop.f32.mrb[75].mxu0  ;;  %v19771_v27 = vpop.eup %19770  ;;  %13761 = vst.msk [vmem:[%s22753_s7 + $0x1d0] sm:$0xff] %vm13702_vm1, %v19769_v58  ;;  %19790 = vrcp.f32 %v13358_v0 }
 0x538   : > { %v15201_v3 = vmul.f32 -1.442695, %v12822_v39  ;;  %v18494_v15 = vadd.f32 %v12298_v44, %v6590_v40  ;;  %v19773_v34 = vpop.eup %19772  ;;  %13764 = vst.msk [vmem:[%s22753_s7 + $0x1e8] sm:$0xff] %vm13702_vm1, %v19771_v27  ;;  %19792 = vpow2.f32 %v15199_v21  ;;  %v12825_v20 = vadd.f32 %v22940_v51, %v18493_v19  ;;  %v17461_v48 = vpop.f32.mrb[76].mxu1 }
 0x539   : > { %v19775_v6 = vpop.eup %19774  ;;  %v13361_v59 = vadd.f32 1.0, %v19773_v34  ;;  %19794 = vpow2.f32 %v15202_v26  ;;  %v18293_v2 = vpop.f32.mrb[76].mxu0 }
 0x53a   : > { %v12824_v17 = vadd.f32 %v22940_v51, %v18494_v15  ;;  %v19777_v45 = vpop.eup %19776  ;;  %v13360_v60 = vadd.f32 1.0, %v19775_v6  ;;  %19796 = vpow2.f32 %v15201_v3  ;;  %v15204_v35 = vmul.f32 -1.442695, %v12825_v20  ;;  %v6600_v37 = vpop.f32.mrb[77].mxu1 }
 0x53b   : > { %v18495_v49 = vadd.f32 %v18293_v2, %v17461_v48  ;;  %v12308_v42 = vpop.f32.mrb[77].mxu0  ;;  %v19779_v36 = vpop.eup %19778  ;;  %13763 = vst.msk [vmem:[%s22753_s7 + $0x1e0] sm:$0xff] %vm13702_vm1, %v19777_v45  ;;  %19798 = vrcp.f32 %v13361_v59 }
 0x53c   : > { %v15203_v24 = vmul.f32 -1.442695, %v12824_v17  ;;  %v18496_v28 = vadd.f32 %v12308_v42, %v6600_v37  ;;  %v19781_v16 = vpop.eup %19780  ;;  %13766 = vst.msk [vmem:[%s22753_s7 + $0x1f8] sm:$0xff] %vm13702_vm1, %v19779_v36  ;;  %19800 = vrcp.f32 %v13360_v60  ;;  %v17464_v29 = vpop.f32.mrb[78].mxu1 }
 0x53d   : > { %v12827_v61 = vadd.f32 %v22940_v51, %v18495_v49  ;;  %v19783_v47 = vpop.eup %19782  ;;  %v13363_v25 = vadd.f32 1.0, %v19781_v16  ;;  %19802 = vpow2.f32 %v15204_v35  ;;  %v18296_v52 = vpop.f32.mrb[78].mxu0 }
 0x53e   : > { %v12826_v4 = vadd.f32 %v22940_v51, %v18496_v28  ;;  %v19785_v62 = vpop.eup %19784  ;;  %v13362_v7 = vadd.f32 1.0, %v19783_v47  ;;  %19804 = vpow2.f32 %v15203_v24  ;;  %v18497_v43 = vadd.f32 %v18296_v52, %v17464_v29  ;;  %v6610_v63 = vpop.f32.mrb[79].mxu1 }
 0x53f   : > { %v15206_v46 = vmul.f32 -1.442695, %v12827_v61  ;;  %v12318_v10 = vpop.f32.mrb[79].mxu0  ;;  %v19787_v50 = vpop.eup %19786  ;;  %13765 = vst.msk [vmem:[%s22753_s7 + $0x1f0] sm:$0xff] %vm13702_vm1, %v19785_v62  ;;  %19806 = vrcp.f32 %v13363_v25 }
 0x540   : > { %v15205_v53 = vmul.f32 -1.442695, %v12826_v4  ;;  %v18498_v5 = vadd.f32 %v12318_v10, %v6610_v63  ;;  %v19789_v18 = vpop.eup %19788  ;;  %13768 = vst.msk [vmem:[%s22753_s7 + $0x208] sm:$0xff] %vm13702_vm1, %v19787_v50  ;;  %19808 = vrcp.f32 %v13362_v7  ;;  %v12829_v31 = vadd.f32 %v22940_v51, %v18497_v43  ;;  %v17467_v41 = vpop.f32.mrb[80].mxu1 }
 0x541   : > { %v19791_v38 = vpop.eup %19790  ;;  %v13365_v8 = vadd.f32 1.0, %v19789_v18  ;;  %19810 = vpow2.f32 %v15206_v46  ;;  %v18299_v9 = vpop.f32.mrb[80].mxu0 }
 0x542   : > { %v12828_v56 = vadd.f32 %v22940_v51, %v18498_v5  ;;  %v19793_v12 = vpop.eup %19792  ;;  %13767 = vst.msk [vmem:[%s22753_s7 + $0x200] sm:$0xff] %vm13702_vm1, %v19791_v38  ;;  %19812 = vpow2.f32 %v15205_v53  ;;  %v15208_v32 = vmul.f32 -1.442695, %v12829_v31  ;;  %v18499_v22 = vadd.f32 %v18299_v9, %v17467_v41  ;;  %v6620_v11 = vpop.f32.mrb[81].mxu1 }
 0x543   : > { %v12328_v13 = vpop.f32.mrb[81].mxu0  ;;  %v19795_v54 = vpop.eup %19794  ;;  %19814 = vrcp.f32 %v13365_v8  ;;  %v13364_v57 = vadd.f32 1.0, %v19793_v12 }
 0x544   : > { %v18500_v1 = vadd.f32 %v12328_v13, %v6620_v11  ;;  %v19797_v33 = vpop.eup %19796  ;;  %v13367_v21 = vadd.f32 1.0, %v19795_v54  ;;  %19816 = vpow2.f32 %v15208_v32  ;;  %v15207_v55 = vmul.f32 -1.442695, %v12828_v56  ;;  %v17470_v30 = vpop.f32.mrb[82].mxu1 }
 0x545   : > { %v12831_v14 = vadd.f32 %v22940_v51, %v18499_v22  ;;  %v19799_v0 = vpop.eup %19798  ;;  %19818 = vrcp.f32 %v13364_v57  ;;  %v13366_v39 = vadd.f32 1.0, %v19797_v33  ;;  %v18302_v58 = vpop.f32.mrb[82].mxu0  ;;  %v20072_v32 = vmov 0.0  }
 0x546   : > { %v12830_v23 = vadd.f32 %v22940_v51, %v18500_v1  ;;  %v19801_v26 = vpop.eup %19800  ;;  %13770 = vst.msk [vmem:[%s22753_s7 + $0x218] sm:$0xff] %vm13702_vm1, %v19799_v0  ;;  %19820 = vrcp.f32 %v13367_v21  ;;  %v18501_v40 = vadd.f32 %v18302_v58, %v17470_v30  ;;  %v6630_v44 = vpop.f32.mrb[83].mxu1 }
 0x547   : > { %v15210_v19 = vmul.f32 -1.442695, %v12831_v14  ;;  %v12338_v27 = vpop.f32.mrb[83].mxu0  ;;  %v19803_v3 = vpop.eup %19802  ;;  %13769 = vst.msk [vmem:[%s22753_s7 + $0x210] sm:$0xff] %vm13702_vm1, %v19801_v26  ;;  %19822 = vrcp.f32 %v13366_v39 }
 0x548   : > { %v18502_v15 = vadd.f32 %v12338_v27, %v6630_v44  ;;  %v19805_v34 = vpop.eup %19804  ;;  %v13369_v20 = vadd.f32 1.0, %v19803_v3  ;;  %19824 = vpow2.f32 %v15207_v55  ;;  %v15209_v6 = vmul.f32 -1.442695, %v12830_v23  ;;  %v17473_v45 = vpop.f32.mrb[84].mxu1  ;;  %13841 = vst.msk [vmem:[%s22753_s7 + $0x43e] sm:$0x3] %vm13840_vm2, %v20072_v32 }
 0x549   : > { %v12833_v59 = vadd.f32 %v22940_v51, %v18501_v40  ;;  %v19807_v17 = vpop.eup %19806  ;;  %v13368_v48 = vadd.f32 1.0, %v19805_v34  ;;  %19826 = vpow2.f32 %v15210_v19  ;;  %v18305_v60 = vpop.f32.mrb[84].mxu0 }
 0x54a   : > { %v12832_v2 = vadd.f32 %v22940_v51, %v18502_v15  ;;  %v19809_v35 = vpop.eup %19808  ;;  %13772 = vst.msk [vmem:[%s22753_s7 + $0x228] sm:$0xff] %vm13702_vm1, %v19807_v17  ;;  %19828 = vrcp.f32 %v13369_v20  ;;  %v18503_v37 = vadd.f32 %v18305_v60, %v17473_v45  ;;  %v6640_v42 = vpop.f32.mrb[85].mxu1 }
 0x54b   : > { %v15212_v49 = vmul.f32 -1.442695, %v12833_v59  ;;  %v12348_v36 = vpop.f32.mrb[85].mxu0  ;;  %v19811_v24 = vpop.eup %19810  ;;  %13771 = vst.msk [vmem:[%s22753_s7 + $0x220] sm:$0xff] %vm13702_vm1, %v19809_v35  ;;  %19830 = vrcp.f32 %v13368_v48 }
 0x54c   : > { %v18504_v28 = vadd.f32 %v12348_v36, %v6640_v42  ;;  %v19813_v16 = vpop.eup %19812  ;;  %v13371_v61 = vadd.f32 1.0, %v19811_v24  ;;  %19832 = vpow2.f32 %v15209_v6  ;;  %v15211_v47 = vmul.f32 -1.442695, %v12832_v2  ;;  %v17476_v62 = vpop.f32.mrb[86].mxu1 }
 0x54d   : > { %v12835_v25 = vadd.f32 %v22940_v51, %v18503_v37  ;;  %v19815_v4 = vpop.eup %19814  ;;  %v13370_v29 = vadd.f32 1.0, %v19813_v16  ;;  %19834 = vpow2.f32 %v15212_v49  ;;  %v18308_v7 = vpop.f32.mrb[86].mxu0 }
 0x54e   : > { %v12834_v52 = vadd.f32 %v22940_v51, %v18504_v28  ;;  %v19817_v46 = vpop.eup %19816  ;;  %13774 = vst.msk [vmem:[%s22753_s7 + $0x238] sm:$0xff] %vm13702_vm1, %v19815_v4  ;;  %19836 = vrcp.f32 %v13371_v61  ;;  %v18505_v63 = vadd.f32 %v18308_v7, %v17476_v62  ;;  %v6650_v10 = vpop.f32.mrb[87].mxu1 }
 0x54f   : > { %v15214_v43 = vmul.f32 -1.442695, %v12835_v25  ;;  %v12358_v50 = vpop.f32.mrb[87].mxu0  ;;  %v19819_v53 = vpop.eup %19818  ;;  %19838 = vrcp.f32 %v13370_v29  ;;  %v13373_v5 = vadd.f32 1.0, %v19817_v46 }
 0x550   : > { %v15213_v18 = vmul.f32 -1.442695, %v12834_v52  ;;  %v18506_v31 = vadd.f32 %v12358_v50, %v6650_v10  ;;  %v19821_v38 = vpop.eup %19820  ;;  %13773 = vst.msk [vmem:[%s22753_s7 + $0x230] sm:$0xff] %vm13702_vm1, %v19819_v53  ;;  %19840 = vpow2.f32 %v15211_v47  ;;  %v12837_v8 = vadd.f32 %v22940_v51, %v18505_v63  ;;  %v17479_v9 = vpop.f32.mrb[88].mxu1 }
 0x551   : > { %v19823_v56 = vpop.eup %19822  ;;  %13776 = vst.msk [vmem:[%s22753_s7 + $0x248] sm:$0xff] %vm13702_vm1, %v19821_v38  ;;  %19842 = vrcp.f32 %v13373_v5  ;;  %v18311_v12 = vpop.f32.mrb[88].mxu0 }
 0x552   : > { %v12836_v41 = vadd.f32 %v22940_v51, %v18506_v31  ;;  %v19825_v22 = vpop.eup %19824  ;;  %13775 = vst.msk [vmem:[%s22753_s7 + $0x240] sm:$0xff] %vm13702_vm1, %v19823_v56  ;;  %19844 = vpow2.f32 %v15214_v43  ;;  %v15216_v11 = vmul.f32 -1.442695, %v12837_v8  ;;  %v18507_v13 = vadd.f32 %v18311_v12, %v17479_v9  ;;  %v6660_v54 = vpop.f32.mrb[89].mxu1 }
 0x553   : > { %v12368_v57 = vpop.f32.mrb[89].mxu0  ;;  %v19827_v1 = vpop.eup %19826  ;;  %v13372_v33 = vadd.f32 1.0, %v19825_v22  ;;  %19846 = vpow2.f32 %v15213_v18 }
 0x554   : > { %v15215_v21 = vmul.f32 -1.442695, %v12836_v41  ;;  %v18508_v55 = vadd.f32 %v12368_v57, %v6660_v54  ;;  %v19829_v14 = vpop.eup %19828  ;;  %v13375_v0 = vadd.f32 1.0, %v19827_v1  ;;  %19848 = vpow2.f32 %v15216_v11  ;;  %v17482_v58 = vpop.f32.mrb[90].mxu1 }
 0x555   : > { %v12839_v39 = vadd.f32 %v22940_v51, %v18507_v13  ;;  %v19831_v23 = vpop.eup %19830  ;;  %13778 = vst.msk [vmem:[%s22753_s7 + $0x258] sm:$0xff] %vm13702_vm1, %v19829_v14  ;;  %19850 = vrcp.f32 %v13372_v33  ;;  %v18314_v26 = vpop.f32.mrb[90].mxu0 }
 0x556   : > { %v12838_v30 = vadd.f32 %v22940_v51, %v18508_v55  ;;  %v19833_v19 = vpop.eup %19832  ;;  %13777 = vst.msk [vmem:[%s22753_s7 + $0x250] sm:$0xff] %vm13702_vm1, %v19831_v23  ;;  %19852 = vrcp.f32 %v13375_v0  ;;  %v18509_v44 = vadd.f32 %v18314_v26, %v17482_v58  ;;  %v6670_v27 = vpop.f32.mrb[91].mxu1 }
 0x557   : > { %v15218_v40 = vmul.f32 -1.442695, %v12839_v39  ;;  %v12378_v3 = vpop.f32.mrb[91].mxu0  ;;  %v19835_v15 = vpop.eup %19834  ;;  %v13374_v34 = vadd.f32 1.0, %v19833_v19  ;;  %19854 = vpow2.f32 %v15215_v21 }
 0x558   : > { %v15217_v20 = vmul.f32 -1.442695, %v12838_v30  ;;  %v18510_v6 = vadd.f32 %v12378_v3, %v6670_v27  ;;  %v19837_v59 = vpop.eup %19836  ;;  %v13377_v17 = vadd.f32 1.0, %v19835_v15  ;;  %v12841_v48 = vadd.f32 %v22940_v51, %v18509_v44  ;;  %v17485_v60 = vpop.f32.mrb[92].mxu1 }
 0x559   : > { %19856 = vpow2.f32 %v15218_v40  ;;  %v19839_v2 = vpop.eup %19838  ;;  %13780 = vst.msk [vmem:[%s22753_s7 + $0x268] sm:$0xff] %vm13702_vm1, %v19837_v59  ;;  %v18317_v35 = vpop.f32.mrb[92].mxu0 }
 0x55a   : > { %19858 = vrcp.f32 %v13374_v34  ;;  %v12840_v45 = vadd.f32 %v22940_v51, %v18510_v6  ;;  %v19841_v49 = vpop.eup %19840  ;;  %13779 = vst.msk [vmem:[%s22753_s7 + $0x260] sm:$0xff] %vm13702_vm1, %v19839_v2  ;;  %v15220_v37 = vmul.f32 -1.442695, %v12841_v48  ;;  %v18511_v42 = vadd.f32 %v18317_v35, %v17485_v60  ;;  %v6680_v36 = vpop.f32.mrb[93].mxu1 }
 0x55b   : > { %19860 = vrcp.f32 %v13377_v17  ;;  %v12388_v24 = vpop.f32.mrb[93].mxu0  ;;  %v19843_v28 = vpop.eup %19842  ;;  %v13376_v16 = vadd.f32 1.0, %v19841_v49 }
 0x55c   : > { %19862 = vpow2.f32 %v15217_v20  ;;  %v15219_v61 = vmul.f32 -1.442695, %v12840_v45  ;;  %v18512_v47 = vadd.f32 %v12388_v24, %v6680_v36  ;;  %v19845_v25 = vpop.eup %19844  ;;  %13782 = vst.msk [vmem:[%s22753_s7 + $0x278] sm:$0xff] %vm13702_vm1, %v19843_v28  ;;  %v12843_v4 = vadd.f32 %v22940_v51, %v18511_v42  ;;  %v17488_v7 = vpop.f32.mrb[94].mxu1 }
 0x55d   : > { %19864 = vpow2.f32 %v15220_v37  ;;  %v19847_v29 = vpop.eup %19846  ;;  %v13379_v52 = vadd.f32 1.0, %v19845_v25  ;;  %v18320_v46 = vpop.f32.mrb[94].mxu0 }
 0x55e   : > { %19866 = vrcp.f32 %v13376_v16  ;;  %v12842_v62 = vadd.f32 %v22940_v51, %v18512_v47  ;;  %v19849_v43 = vpop.eup %19848  ;;  %v13378_v63 = vadd.f32 1.0, %v19847_v29  ;;  %v15222_v10 = vmul.f32 -1.442695, %v12843_v4  ;;  %v6690_v53 = vpop.f32.mrb[95].mxu1  ;;  %v23115_v51 = vld [vmem:[%s23275_s2] ss:$0 sm:$0xff] }
 0x55f   : > { %19868 = vpow2.f32 %v15219_v61  ;;  %v18513_v50 = vadd.f32 %v18320_v46, %v17488_v7  ;;  %v12398_v5 = vpop.f32.mrb[95].mxu0  ;;  %v19851_v18 = vpop.eup %19850  ;;  %v13381_v31 = vadd.f32 1.0, %v19849_v43 }
 0x560   : > { %19870 = vrcp.f32 %v13379_v52  ;;  %v15221_v38 = vmul.f32 -1.442695, %v12842_v62  ;;  %v18514_v8 = vadd.f32 %v12398_v5, %v6690_v53  ;;  %v19853_v56 = vpop.eup %19852  ;;  %13781 = vst.msk [vmem:[%s22753_s7 + $0x270] sm:$0xff] %vm13702_vm1, %v19851_v18  ;;  %v17491_v32 = vpop.f32.mrb[96].mxu1 }
 0x561   : > { %19872 = vrcp.f32 %v13378_v63  ;;  %v12845_v41 = vadd.f32 %v23115_v51, %v18513_v50  ;;  %v19855_v9 = vpop.eup %19854  ;;  %13784 = vst.msk [vmem:[%s22753_s7 + $0x288] sm:$0xff] %vm13702_vm1, %v19853_v56  ;;  %v18323_v22 = vpop.f32.mrb[96].mxu0 }
 0x562   : > { %19874 = vrcp.f32 %v13381_v31  ;;  %v12844_v12 = vadd.f32 %v23115_v51, %v18514_v8  ;;  %v13380_v13 = vadd.f32 1.0, %v19855_v9  ;;  %v18515_v57 = vadd.f32 %v18323_v22, %v17491_v32  ;;  %v6700_v1 = vpop.f32.mrb[97].mxu1  ;;  %v12408_v33 = vpop.f32.mrb[97].mxu0 }
 0x563   : > { %v19857_v11 = vpop.eup %19856  ;;  %19876 = vpow2.f32 %v15222_v10  ;;  %v15224_v54 = vmul.f32 -1.442695, %v12845_v41  ;;  %v18516_v0 = vadd.f32 %v12408_v33, %v6700_v1 }
 0x564   : > { %v19859_v21 = vpop.eup %19858  ;;  %v13383_v55 = vadd.f32 1.0, %v19857_v11  ;;  %19878 = vpow2.f32 %v15221_v38  ;;  %v15223_v14 = vmul.f32 -1.442695, %v12844_v12  ;;  %v12847_v23 = vadd.f32 %v23115_v51, %v18515_v57  ;;  %v17494_v26 = vpop.f32.mrb[98].mxu1 }
 0x565   : > { %v19861_v39 = vpop.eup %19860  ;;  %13783 = vst.msk [vmem:[%s22753_s7 + $0x280] sm:$0xff] %vm13702_vm1, %v19859_v21  ;;  %19880 = vrcp.f32 %v13380_v13  ;;  %v12846_v58 = vadd.f32 %v23115_v51, %v18516_v0  ;;  %v18326_v19 = vpop.f32.mrb[98].mxu0 }
 0x566   : > { %v19863_v30 = vpop.eup %19862  ;;  %13786 = vst.msk [vmem:[%s22753_s7 + $0x298] sm:$0xff] %vm13702_vm1, %v19861_v39  ;;  %19882 = vrcp.f32 %v13383_v55  ;;  %v15226_v27 = vmul.f32 -1.442695, %v12847_v23  ;;  %v18517_v3 = vadd.f32 %v18326_v19, %v17494_v26  ;;  %v6710_v15 = vpop.f32.mrb[99].mxu1 }
 0x567   : > { %v19865_v40 = vpop.eup %19864  ;;  %v13382_v44 = vadd.f32 1.0, %v19863_v30  ;;  %19884 = vpow2.f32 %v15224_v54  ;;  %v12418_v34 = vpop.f32.mrb[99].mxu0  ;;  %v15225_v48 = vmul.f32 -1.442695, %v12846_v58 }
 0x568   : > { %v19867_v20 = vpop.eup %19866  ;;  %v13385_v6 = vadd.f32 1.0, %v19865_v40  ;;  %19886 = vpow2.f32 %v15223_v14  ;;  %v18518_v59 = vadd.f32 %v12418_v34, %v6710_v15  ;;  %v12849_v2 = vadd.f32 %v23115_v51, %v18517_v3  ;;  %v17497_v49 = vpop.f32.mrb[100].mxu1 }
 0x569   : > { %v19869_v17 = vpop.eup %19868  ;;  %13785 = vst.msk [vmem:[%s22753_s7 + $0x290] sm:$0xff] %vm13702_vm1, %v19867_v20  ;;  %19888 = vrcp.f32 %v13382_v44  ;;  %v18329_v37 = vpop.f32.mrb[100].mxu0 }
 0x56a   : > { %v19871_v45 = vpop.eup %19870  ;;  %19890 = vrcp.f32 %v13385_v6  ;;  %v13384_v60 = vadd.f32 1.0, %v19869_v17  ;;  %v12848_v35 = vadd.f32 %v23115_v51, %v18518_v59  ;;  %v15228_v36 = vmul.f32 -1.442695, %v12849_v2  ;;  %v6720_v28 = vpop.f32.mrb[101].mxu1 }
 0x56b   : > { %v19873_v42 = vpop.eup %19872  ;;  %13788 = vst.msk [vmem:[%s22753_s7 + $0x2a8] sm:$0xff] %vm13702_vm1, %v19871_v45  ;;  %19892 = vpow2.f32 %v15226_v27  ;;  %v18519_v24 = vadd.f32 %v18329_v37, %v17497_v49  ;;  %v12428_v16 = vpop.f32.mrb[101].mxu0 }
 0x56c   : > { %v19875_v61 = vpop.eup %19874  ;;  %13787 = vst.msk [vmem:[%s22753_s7 + $0x2a0] sm:$0xff] %vm13702_vm1, %v19873_v42  ;;  %19894 = vrcp.f32 %v13384_v60  ;;  %v15227_v47 = vmul.f32 -1.442695, %v12848_v35  ;;  %v18520_v25 = vadd.f32 %v12428_v16, %v6720_v28  ;;  %v17500_v46 = vpop.f32.mrb[102].mxu1 }
 0x56d   : > { %v19877_v4 = vpop.eup %19876  ;;  %13790 = vst.msk [vmem:[%s22753_s7 + $0x2b8] sm:$0xff] %vm13702_vm1, %v19875_v61  ;;  %19896 = vpow2.f32 %v15225_v48  ;;  %v12851_v29 = vadd.f32 %v23115_v51, %v18519_v24  ;;  %v18332_v43 = vpop.f32.mrb[102].mxu0 }
 0x56e   : > { %v19879_v52 = vpop.eup %19878  ;;  %v13387_v62 = vadd.f32 1.0, %v19877_v4  ;;  %19898 = vpow2.f32 %v15228_v36  ;;  %v12850_v7 = vadd.f32 %v23115_v51, %v18520_v25  ;;  %v18521_v53 = vadd.f32 %v18332_v43, %v17500_v46  ;;  %v6730_v5 = vpop.f32.mrb[103].mxu1 }
 0x56f   : > { %v19881_v63 = vpop.eup %19880  ;;  %v13386_v10 = vadd.f32 1.0, %v19879_v52  ;;  %19900 = vpow2.f32 %v15227_v47  ;;  %v15230_v50 = vmul.f32 -1.442695, %v12851_v29  ;;  %v12438_v18 = vpop.f32.mrb[103].mxu0 }
 0x570   : > { %v19883_v31 = vpop.eup %19882  ;;  %13789 = vst.msk [vmem:[%s22753_s7 + $0x2b0] sm:$0xff] %vm13702_vm1, %v19881_v63  ;;  %19902 = vrcp.f32 %v13387_v62  ;;  %v15229_v38 = vmul.f32 -1.442695, %v12850_v7  ;;  %v18522_v8 = vadd.f32 %v12438_v18, %v6730_v5  ;;  %v12853_v41 = vadd.f32 %v23115_v51, %v18521_v53  ;;  %v17503_v22 = vpop.f32.mrb[104].mxu1 }
 0x571   : > { %v19885_v56 = vpop.eup %19884  ;;  %13792 = vst.msk [vmem:[%s22753_s7 + $0x2c8] sm:$0xff] %vm13702_vm1, %v19883_v31  ;;  %19904 = vrcp.f32 %v13386_v10  ;;  %v18335_v11 = vpop.f32.mrb[104].mxu0 }
 0x572   : > { %v19887_v9 = vpop.eup %19886  ;;  %v13389_v12 = vadd.f32 1.0, %v19885_v56  ;;  %19906 = vpow2.f32 %v15230_v50  ;;  %v12852_v32 = vadd.f32 %v23115_v51, %v18522_v8  ;;  %v15232_v57 = vmul.f32 -1.442695, %v12853_v41  ;;  %v6740_v33 = vpop.f32.mrb[105].mxu1 }
 0x573   : > { %v19889_v13 = vpop.eup %19888  ;;  %v13388_v54 = vadd.f32 1.0, %v19887_v9  ;;  %19908 = vpow2.f32 %v15229_v38  ;;  %v18523_v1 = vadd.f32 %v18335_v11, %v17503_v22  ;;  %v12448_v21 = vpop.f32.mrb[105].mxu0 }
 0x574   : > { %v19891_v55 = vpop.eup %19890  ;;  %13791 = vst.msk [vmem:[%s22753_s7 + $0x2c0] sm:$0xff] %vm13702_vm1, %v19889_v13  ;;  %19910 = vrcp.f32 %v13389_v12  ;;  %v15231_v14 = vmul.f32 -1.442695, %v12852_v32  ;;  %v18524_v0 = vadd.f32 %v12448_v21, %v6740_v33  ;;  %v17506_v19 = vpop.f32.mrb[106].mxu1 }
 0x575   : > { %v19893_v39 = vpop.eup %19892  ;;  %13794 = vst.msk [vmem:[%s22753_s7 + $0x2d8] sm:$0xff] %vm13702_vm1, %v19891_v55  ;;  %19912 = vrcp.f32 %v13388_v54  ;;  %v12855_v23 = vadd.f32 %v23115_v51, %v18523_v1  ;;  %v18338_v40 = vpop.f32.mrb[106].mxu0 }
 0x576   : > { %v19895_v30 = vpop.eup %19894  ;;  %v13391_v58 = vadd.f32 1.0, %v19893_v39  ;;  %19914 = vpow2.f32 %v15232_v57  ;;  %v12854_v26 = vadd.f32 %v23115_v51, %v18524_v0  ;;  %v18525_v3 = vadd.f32 %v18338_v40, %v17506_v19  ;;  %v6750_v15 = vpop.f32.mrb[107].mxu1 }
 0x577   : > { %v19897_v44 = vpop.eup %19896  ;;  %13793 = vst.msk [vmem:[%s22753_s7 + $0x2d0] sm:$0xff] %vm13702_vm1, %v19895_v30  ;;  %19916 = vpow2.f32 %v15231_v14  ;;  %v15234_v27 = vmul.f32 -1.442695, %v12855_v23  ;;  %v12458_v34 = vpop.f32.mrb[107].mxu0 }
 0x578   : > { %v19899_v20 = vpop.eup %19898  ;;  %19918 = vrcp.f32 %v13391_v58  ;;  %v13390_v6 = vadd.f32 1.0, %v19897_v44  ;;  %v18526_v59 = vadd.f32 %v12458_v34, %v6750_v15  ;;  %v15233_v2 = vmul.f32 -1.442695, %v12854_v26  ;;  %v17509_v37 = vpop.f32.mrb[108].mxu1 }
 0x579   : > { %v19901_v17 = vpop.eup %19900  ;;  %v13393_v48 = vadd.f32 1.0, %v19899_v20  ;;  %19920 = vpow2.f32 %v15234_v27  ;;  %v12857_v45 = vadd.f32 %v23115_v51, %v18525_v3  ;;  %v18341_v42 = vpop.f32.mrb[108].mxu0 }
 0x57a   : > { %v19903_v60 = vpop.eup %19902  ;;  %19922 = vrcp.f32 %v13390_v6  ;;  %v13392_v35 = vadd.f32 1.0, %v19901_v17  ;;  %v12856_v49 = vadd.f32 %v23115_v51, %v18526_v59  ;;  %v18527_v28 = vadd.f32 %v18341_v42, %v17509_v37  ;;  %v6760_v16 = vpop.f32.mrb[109].mxu1 }
 0x57b   : > { %v19905_v36 = vpop.eup %19904  ;;  %13796 = vst.msk [vmem:[%s22753_s7 + $0x2e8] sm:$0xff] %vm13702_vm1, %v19903_v60  ;;  %19924 = vrcp.f32 %v13393_v48  ;;  %v15236_v24 = vmul.f32 -1.442695, %v12857_v45  ;;  %v12468_v61 = vpop.f32.mrb[109].mxu0 }
 0x57c   : > { %v19907_v47 = vpop.eup %19906  ;;  %13795 = vst.msk [vmem:[%s22753_s7 + $0x2e0] sm:$0xff] %vm13702_vm1, %v19905_v36  ;;  %19926 = vrcp.f32 %v13392_v35  ;;  %v18528_v25 = vadd.f32 %v12468_v61, %v6760_v16  ;;  %v15235_v52 = vmul.f32 -1.442695, %v12856_v49  ;;  %v12859_v62 = vadd.f32 %v23115_v51, %v18527_v28  ;;  %v17512_v63 = vpop.f32.mrb[110].mxu1 }
 0x57d   : > { %v19909_v4 = vpop.eup %19908  ;;  %v13395_v29 = vadd.f32 1.0, %v19907_v47  ;;  %19928 = vpow2.f32 %v15233_v2  ;;  %v18344_v10 = vpop.f32.mrb[110].mxu0 }
 0x57e   : > { %v19911_v7 = vpop.eup %19910  ;;  %v13394_v46 = vadd.f32 1.0, %v19909_v4  ;;  %19930 = vpow2.f32 %v15236_v24  ;;  %v12858_v43 = vadd.f32 %v23115_v51, %v18528_v25  ;;  %v15238_v53 = vmul.f32 -1.442695, %v12859_v62  ;;  %v6770_v18 = vpop.f32.mrb[111].mxu1 }
 0x57f   : > { %v19913_v50 = vpop.eup %19912  ;;  %13798 = vst.msk [vmem:[%s22753_s7 + $0x2f8] sm:$0xff] %vm13702_vm1, %v19911_v7  ;;  %19932 = vrcp.f32 %v13395_v29  ;;  %v18529_v5 = vadd.f32 %v18344_v10, %v17512_v63  ;;  %v12478_v31 = vpop.f32.mrb[111].mxu0 }
 0x580   : > { %v19915_v38 = vpop.eup %19914  ;;  %13797 = vst.msk [vmem:[%s22753_s7 + $0x2f0] sm:$0xff] %vm13702_vm1, %v19913_v50  ;;  %19934 = vrcp.f32 %v13394_v46  ;;  %v18530_v8 = vadd.f32 %v12478_v31, %v6770_v18  ;;  %v15237_v9 = vmul.f32 -1.442695, %v12858_v43  ;;  %v17515_v13 = vpop.f32.mrb[112].mxu1 }
 0x581   : > { %v19917_v56 = vpop.eup %19916  ;;  %v13397_v41 = vadd.f32 1.0, %v19915_v38  ;;  %19936 = vpow2.f32 %v15235_v52  ;;  %v12861_v12 = vadd.f32 %v23115_v51, %v18529_v5  ;;  %v18347_v54 = vpop.f32.mrb[112].mxu0 }
 0x582   : > { %v19919_v32 = vpop.eup %19918  ;;  %v13396_v22 = vadd.f32 1.0, %v19917_v56  ;;  %19938 = vpow2.f32 %v15238_v53  ;;  %v12860_v11 = vadd.f32 %v23115_v51, %v18530_v8  ;;  %v18531_v33 = vadd.f32 %v18347_v54, %v17515_v13  ;;  %v6780_v21 = vpop.f32.mrb[113].mxu1 }
 0x583   : > { %v19921_v57 = vpop.eup %19920  ;;  %13800 = vst.msk [vmem:[%s22753_s7 + $0x308] sm:$0xff] %vm13702_vm1, %v19919_v32  ;;  %19940 = vrcp.f32 %v13397_v41  ;;  %v15240_v1 = vmul.f32 -1.442695, %v12861_v12  ;;  %v12488_v55 = vpop.f32.mrb[113].mxu0 }
 0x584   : > { %v19923_v14 = vpop.eup %19922  ;;  %19942 = vrcp.f32 %v13396_v22  ;;  %v13399_v0 = vadd.f32 1.0, %v19921_v57  ;;  %v15239_v39 = vmul.f32 -1.442695, %v12860_v11  ;;  %v18532_v23 = vadd.f32 %v12488_v55, %v6780_v21  ;;  %v17518_v40 = vpop.f32.mrb[114].mxu1 }
 0x585   : > { %v19925_v30 = vpop.eup %19924  ;;  %13799 = vst.msk [vmem:[%s22753_s7 + $0x300] sm:$0xff] %vm13702_vm1, %v19923_v14  ;;  %19944 = vpow2.f32 %v15237_v9  ;;  %v12863_v58 = vadd.f32 %v23115_v51, %v18531_v33  ;;  %v18350_v44 = vpop.f32.mrb[114].mxu0 }
 0x586   : > { %v19927_v26 = vpop.eup %19926  ;;  %13802 = vst.msk [vmem:[%s22753_s7 + $0x318] sm:$0xff] %vm13702_vm1, %v19925_v30  ;;  %19946 = vrcp.f32 %v13399_v0  ;;  %v12862_v19 = vadd.f32 %v23115_v51, %v18532_v23  ;;  %v18533_v15 = vadd.f32 %v18350_v44, %v17518_v40  ;;  %v6790_v34 = vpop.f32.mrb[115].mxu1 }
 0x587   : > { %v19929_v27 = vpop.eup %19928  ;;  %13801 = vst.msk [vmem:[%s22753_s7 + $0x310] sm:$0xff] %vm13702_vm1, %v19927_v26  ;;  %19948 = vpow2.f32 %v15240_v1  ;;  %v15242_v3 = vmul.f32 -1.442695, %v12863_v58  ;;  %v12498_v20 = vpop.f32.mrb[115].mxu0 }
 0x588   : > { %v19931_v6 = vpop.eup %19930  ;;  %v13398_v59 = vadd.f32 1.0, %v19929_v27  ;;  %19950 = vpow2.f32 %v15239_v39  ;;  %v15241_v17 = vmul.f32 -1.442695, %v12862_v19  ;;  %v18534_v48 = vadd.f32 %v12498_v20, %v6790_v34  ;;  %v17521_v37 = vpop.f32.mrb[116].mxu1 }
 0x589   : > { %v19933_v2 = vpop.eup %19932  ;;  %v13401_v45 = vadd.f32 1.0, %v19931_v6  ;;  %19952 = vpow2.f32 %v15242_v3  ;;  %v12865_v60 = vadd.f32 %v23115_v51, %v18533_v15  ;;  %v18353_v42 = vpop.f32.mrb[116].mxu0 }
 0x58a   : > { %v19935_v35 = vpop.eup %19934  ;;  %13804 = vst.msk [vmem:[%s22753_s7 + $0x328] sm:$0xff] %vm13702_vm1, %v19933_v2  ;;  %19954 = vrcp.f32 %v13398_v59  ;;  %v12864_v49 = vadd.f32 %v23115_v51, %v18534_v48  ;;  %v18535_v28 = vadd.f32 %v18353_v42, %v17521_v37  ;;  %v6800_v16 = vpop.f32.mrb[117].mxu1 }
 0x58b   : > { %v19937_v36 = vpop.eup %19936  ;;  %13803 = vst.msk [vmem:[%s22753_s7 + $0x320] sm:$0xff] %vm13702_vm1, %v19935_v35  ;;  %19956 = vrcp.f32 %v13401_v45  ;;  %v15244_v24 = vmul.f32 -1.442695, %v12865_v60  ;;  %v12508_v61 = vpop.f32.mrb[117].mxu0 }
 0x58c   : > { %v19939_v47 = vpop.eup %19938  ;;  %v13400_v25 = vadd.f32 1.0, %v19937_v36  ;;  %19958 = vpow2.f32 %v15241_v17  ;;  %v15243_v4 = vmul.f32 -1.442695, %v12864_v49  ;;  %v18536_v29 = vadd.f32 %v12508_v61, %v6800_v16  ;;  %v17524_v63 = vpop.f32.mrb[118].mxu1 }
 0x58d   : > { %v19941_v52 = vpop.eup %19940  ;;  %v13403_v62 = vadd.f32 1.0, %v19939_v47  ;;  %19960 = vpow2.f32 %v15244_v24  ;;  %v12867_v7 = vadd.f32 %v23115_v51, %v18535_v28  ;;  %v18356_v10 = vpop.f32.mrb[118].mxu0 }
 0x58e   : > { %v19943_v46 = vpop.eup %19942  ;;  %13806 = vst.msk [vmem:[%s22753_s7 + $0x338] sm:$0xff] %vm13702_vm1, %v19941_v52  ;;  %19962 = vrcp.f32 %v13400_v25  ;;  %v12866_v43 = vadd.f32 %v23115_v51, %v18536_v29  ;;  %v18537_v5 = vadd.f32 %v18356_v10, %v17524_v63  ;;  %v6810_v18 = vpop.f32.mrb[119].mxu1 }
 0x58f   : > { %v19945_v50 = vpop.eup %19944  ;;  %13805 = vst.msk [vmem:[%s22753_s7 + $0x330] sm:$0xff] %vm13702_vm1, %v19943_v46  ;;  %19964 = vrcp.f32 %v13403_v62  ;;  %v15246_v53 = vmul.f32 -1.442695, %v12867_v7  ;;  %v12518_v31 = vpop.f32.mrb[119].mxu0 }
 0x590   : > { %v19947_v38 = vpop.eup %19946  ;;  %v13402_v8 = vadd.f32 1.0, %v19945_v50  ;;  %19966 = vpow2.f32 %v15243_v4  ;;  %v15245_v56 = vmul.f32 -1.442695, %v12866_v43  ;;  %v18538_v41 = vadd.f32 %v12518_v31, %v6810_v18  ;;  %v17527_v13 = vpop.f32.mrb[120].mxu1 }
 0x591   : > { %v19949_v9 = vpop.eup %19948  ;;  %13808 = vst.msk [vmem:[%s22753_s7 + $0x348] sm:$0xff] %vm13702_vm1, %v19947_v38  ;;  %19968 = vpow2.f32 %v15246_v53  ;;  %v12869_v12 = vadd.f32 %v23115_v51, %v18537_v5  ;;  %v18359_v54 = vpop.f32.mrb[120].mxu0 }
 0x592   : > { %v19951_v32 = vpop.eup %19950  ;;  %19970 = vrcp.f32 %v13402_v8  ;;  %v13405_v22 = vadd.f32 1.0, %v19949_v9  ;;  %v12868_v11 = vadd.f32 %v23115_v51, %v18538_v41  ;;  %v18539_v21 = vadd.f32 %v18359_v54, %v17527_v13  ;;  %v6820_v55 = vpop.f32.mrb[121].mxu1 }
 0x593   : > { %v19953_v57 = vpop.eup %19952  ;;  %v13404_v1 = vadd.f32 1.0, %v19951_v32  ;;  %19972 = vpow2.f32 %v15245_v56  ;;  %v15248_v33 = vmul.f32 -1.442695, %v12869_v12  ;;  %v12528_v14 = vpop.f32.mrb[121].mxu0 }
 0x594   : > { %v19955_v0 = vpop.eup %19954  ;;  %19974 = vrcp.f32 %v13405_v22  ;;  %v13407_v39 = vadd.f32 1.0, %v19953_v57  ;;  %v15247_v23 = vmul.f32 -1.442695, %v12868_v11  ;;  %v18540_v30 = vadd.f32 %v12528_v14, %v6820_v55  ;;  %v17530_v44 = vpop.f32.mrb[122].mxu1 }
 0x595   : > { %v19957_v58 = vpop.eup %19956  ;;  %13807 = vst.msk [vmem:[%s22753_s7 + $0x340] sm:$0xff] %vm13702_vm1, %v19955_v0  ;;  %19976 = vrcp.f32 %v13404_v1  ;;  %v12871_v26 = vadd.f32 %v23115_v51, %v18539_v21  ;;  %v18362_v27 = vpop.f32.mrb[122].mxu0 }
 0x596   : > { %v19959_v19 = vpop.eup %19958  ;;  %13810 = vst.msk [vmem:[%s22753_s7 + $0x358] sm:$0xff] %vm13702_vm1, %v19957_v58  ;;  %19978 = vrcp.f32 %v13407_v39  ;;  %v12870_v40 = vadd.f32 %v23115_v51, %v18540_v30  ;;  %v18541_v20 = vadd.f32 %v18362_v27, %v17530_v44  ;;  %v6830_v6 = vpop.f32.mrb[123].mxu1 }
 0x597   : > { %v19961_v3 = vpop.eup %19960  ;;  %v13406_v15 = vadd.f32 1.0, %v19959_v19  ;;  %19980 = vpow2.f32 %v15248_v33  ;;  %v15250_v34 = vmul.f32 -1.442695, %v12871_v26  ;;  %v12538_v59 = vpop.f32.mrb[123].mxu0 }
 0x598   : > { %v19963_v17 = vpop.eup %19962  ;;  %v13409_v48 = vadd.f32 1.0, %v19961_v3  ;;  %19982 = vpow2.f32 %v15247_v23  ;;  %v15249_v2 = vmul.f32 -1.442695, %v12870_v40  ;;  %v18542_v45 = vadd.f32 %v12538_v59, %v6830_v6  ;;  %v17533_v42 = vpop.f32.mrb[124].mxu1 }
 0x599   : > { %v19965_v60 = vpop.eup %19964  ;;  %13809 = vst.msk [vmem:[%s22753_s7 + $0x350] sm:$0xff] %vm13702_vm1, %v19963_v17  ;;  %19984 = vrcp.f32 %v13406_v15  ;;  %v12873_v35 = vadd.f32 %v23115_v51, %v18541_v20  ;;  %v18365_v36 = vpop.f32.mrb[124].mxu0 }
 0x59a   : > { %v19967_v49 = vpop.eup %19966  ;;  %13812 = vst.msk [vmem:[%s22753_s7 + $0x368] sm:$0xff] %vm13702_vm1, %v19965_v60  ;;  %19986 = vrcp.f32 %v13409_v48  ;;  %v12872_v37 = vadd.f32 %v23115_v51, %v18542_v45  ;;  %v18543_v61 = vadd.f32 %v18365_v36, %v17533_v42  ;;  %v6840_v47 = vpop.f32.mrb[125].mxu1 }
 0x59b   : > { %v19969_v24 = vpop.eup %19968  ;;  %v13408_v28 = vadd.f32 1.0, %v19967_v49  ;;  %19988 = vpow2.f32 %v15250_v34  ;;  %v15252_v16 = vmul.f32 -1.442695, %v12873_v35  ;;  %v12548_v25 = vpop.f32.mrb[125].mxu0 }
 0x59c   : > { %v19971_v4 = vpop.eup %19970  ;;  %v13411_v29 = vadd.f32 1.0, %v19969_v24  ;;  %19990 = vpow2.f32 %v15249_v2  ;;  %v18544_v52 = vadd.f32 %v12548_v25, %v6840_v47  ;;  %v15251_v7 = vmul.f32 -1.442695, %v12872_v37  ;;  %v17536_v50 = vpop.f32.mrb[126].mxu1 }
 0x59d   : > { %v19973_v62 = vpop.eup %19972  ;;  %13811 = vst.msk [vmem:[%s22753_s7 + $0x360] sm:$0xff] %vm13702_vm1, %v19971_v4  ;;  %19992 = vrcp.f32 %v13408_v28  ;;  %v12875_v46 = vadd.f32 %v23115_v51, %v18543_v61  ;;  %v18368_v53 = vpop.f32.mrb[126].mxu0 }
 0x59e   : > { %v19975_v43 = vpop.eup %19974  ;;  %19994 = vrcp.f32 %v13411_v29  ;;  %v13410_v63 = vadd.f32 1.0, %v19973_v62  ;;  %v12874_v10 = vadd.f32 %v23115_v51, %v18544_v52  ;;  %v18545_v31 = vadd.f32 %v18368_v53, %v17536_v50  ;;  %v6850_v38 = vpop.f32.mrb[127].mxu1 }
 0x59f   : > { %v19977_v5 = vpop.eup %19976  ;;  %13814 = vst.msk [vmem:[%s22753_s7 + $0x378] sm:$0xff] %vm13702_vm1, %v19975_v43  ;;  %19996 = vpow2.f32 %v15252_v16  ;;  %v15254_v18 = vmul.f32 -1.442695, %v12875_v46  ;;  %v12558_v8 = vpop.f32.mrb[127].mxu0 }
 0x5a0   : > { %v19979_v56 = vpop.eup %19978  ;;  %13813 = vst.msk [vmem:[%s22753_s7 + $0x370] sm:$0xff] %vm13702_vm1, %v19977_v5  ;;  %19998 = vrcp.f32 %v13410_v63  ;;  %v15253_v41 = vmul.f32 -1.442695, %v12874_v10  ;;  %v18546_v9 = vadd.f32 %v12558_v8, %v6850_v38  ;;  %v12877_v32 = vadd.f32 %v23115_v51, %v18545_v31  ;;  %v17539_v54 = vpop.f32.mrb[128].mxu1 }
 0x5a1   : > { %v19981_v12 = vpop.eup %19980  ;;  %13816 = vst.msk [vmem:[%s22753_s7 + $0x388] sm:$0xff] %vm13702_vm1, %v19979_v56  ;;  %20000 = vpow2.f32 %v15251_v7  ;;  %v18371_v57 = vpop.f32.mrb[128].mxu0 }
 0x5a2   : > { %v19983_v22 = vpop.eup %19982  ;;  %v13413_v11 = vadd.f32 1.0, %v19981_v12  ;;  %20002 = vpow2.f32 %v15254_v18  ;;  %v12876_v13 = vadd.f32 %v23115_v51, %v18546_v9  ;;  %v15256_v21 = vmul.f32 -1.442695, %v12877_v32  ;;  %v6860_v14 = vpop.f32.mrb[129].mxu1 }
 0x5a3   : > { %v19985_v1 = vpop.eup %19984  ;;  %v13412_v33 = vadd.f32 1.0, %v19983_v22  ;;  %20004 = vpow2.f32 %v15253_v41  ;;  %v18547_v55 = vadd.f32 %v18371_v57, %v17539_v54  ;;  %v12568_v0 = vpop.f32.mrb[129].mxu0 }
 0x5a4   : > { %v19987_v39 = vpop.eup %19986  ;;  %13815 = vst.msk [vmem:[%s22753_s7 + $0x380] sm:$0xff] %vm13702_vm1, %v19985_v1  ;;  %20006 = vrcp.f32 %v13413_v11  ;;  %v15255_v23 = vmul.f32 -1.442695, %v12876_v13  ;;  %v18548_v30 = vadd.f32 %v12568_v0, %v6860_v14  ;;  %v17542_v27 = vpop.f32.mrb[130].mxu1 }
 0x5a5   : > { %v19989_v58 = vpop.eup %19988  ;;  %13818 = vst.msk [vmem:[%s22753_s7 + $0x398] sm:$0xff] %vm13702_vm1, %v19987_v39  ;;  %20008 = vrcp.f32 %v13412_v33  ;;  %v12879_v26 = vadd.f32 %v23115_v51, %v18547_v55  ;;  %v18374_v3 = vpop.f32.mrb[130].mxu0 }
 0x5a6   : > { %v19991_v19 = vpop.eup %19990  ;;  %v13415_v40 = vadd.f32 1.0, %v19989_v58  ;;  %20010 = vpow2.f32 %v15256_v21  ;;  %v12878_v44 = vadd.f32 %v23115_v51, %v18548_v30  ;;  %v18549_v6 = vadd.f32 %v18374_v3, %v17542_v27  ;;  %v6870_v59 = vpop.f32.mrb[131].mxu1 }
 0x5a7   : > { %v19993_v15 = vpop.eup %19992  ;;  %v13414_v34 = vadd.f32 1.0, %v19991_v19  ;;  %20012 = vpow2.f32 %v15255_v23  ;;  %v15258_v20 = vmul.f32 -1.442695, %v12879_v26  ;;  %v12578_v17 = vpop.f32.mrb[131].mxu0 }
 0x5a8   : > { %v19995_v48 = vpop.eup %19994  ;;  %13817 = vst.msk [vmem:[%s22753_s7 + $0x390] sm:$0xff] %vm13702_vm1, %v19993_v15  ;;  %20014 = vrcp.f32 %v13415_v40  ;;  %v15257_v2 = vmul.f32 -1.442695, %v12878_v44  ;;  %v18550_v45 = vadd.f32 %v12578_v17, %v6870_v59  ;;  %v12881_v35 = vadd.f32 %v23115_v51, %v18549_v6  ;;  %v17545_v36 = vpop.f32.mrb[132].mxu1 }
 0x5a9   : > { %v19997_v60 = vpop.eup %19996  ;;  %13820 = vst.msk [vmem:[%s22753_s7 + $0x3a8] sm:$0xff] %vm13702_vm1, %v19995_v48  ;;  %20016 = vrcp.f32 %v13414_v34  ;;  %v18377_v24 = vpop.f32.mrb[132].mxu0 }
 0x5aa   : > { %v19999_v49 = vpop.eup %19998  ;;  %v13417_v37 = vadd.f32 1.0, %v19997_v60  ;;  %20018 = vpow2.f32 %v15258_v20  ;;  %v12880_v42 = vadd.f32 %v23115_v51, %v18550_v45  ;;  %v15260_v16 = vmul.f32 -1.442695, %v12881_v35  ;;  %v6880_v47 = vpop.f32.mrb[133].mxu1 }
 0x5ab   : > { %v20001_v28 = vpop.eup %20000  ;;  %13819 = vst.msk [vmem:[%s22753_s7 + $0x3a0] sm:$0xff] %vm13702_vm1, %v19999_v49  ;;  %20020 = vpow2.f32 %v15257_v2  ;;  %v18551_v61 = vadd.f32 %v18377_v24, %v17545_v36  ;;  %v12588_v25 = vpop.f32.mrb[133].mxu0 }
 0x5ac   : > { %v20003_v4 = vpop.eup %20002  ;;  %20022 = vrcp.f32 %v13417_v37  ;;  %v13416_v29 = vadd.f32 1.0, %v20001_v28  ;;  %v18552_v52 = vadd.f32 %v12588_v25, %v6880_v47  ;;  %v15259_v46 = vmul.f32 -1.442695, %v12880_v42  ;;  %v17548_v53 = vpop.f32.mrb[134].mxu1 }
 0x5ad   : > { %v20005_v62 = vpop.eup %20004  ;;  %v13419_v7 = vadd.f32 1.0, %v20003_v4  ;;  %20024 = vpow2.f32 %v15260_v16  ;;  %v12883_v43 = vadd.f32 %v23115_v51, %v18551_v61  ;;  %v18380_v5 = vpop.f32.mrb[134].mxu0 }
 0x5ae   : > { %v20007_v63 = vpop.eup %20006  ;;  %20026 = vrcp.f32 %v13416_v29  ;;  %v13418_v10 = vadd.f32 1.0, %v20005_v62  ;;  %v12882_v50 = vadd.f32 %v23115_v51, %v18552_v52  ;;  %v18553_v38 = vadd.f32 %v18380_v5, %v17548_v53  ;;  %v6890_v8 = vpop.f32.mrb[135].mxu1 }
 0x5af   : > { %v20009_v18 = vpop.eup %20008  ;;  %13822 = vst.msk [vmem:[%s22753_s7 + $0x3b8] sm:$0xff] %vm13702_vm1, %v20007_v63  ;;  %20028 = vrcp.f32 %v13419_v7  ;;  %v15262_v31 = vmul.f32 -1.442695, %v12883_v43  ;;  %v12598_v56 = vpop.f32.mrb[135].mxu0 }
 0x5b0   : > { %v20011_v41 = vpop.eup %20010  ;;  %13821 = vst.msk [vmem:[%s22753_s7 + $0x3b0] sm:$0xff] %vm13702_vm1, %v20009_v18  ;;  %20030 = vrcp.f32 %v13418_v10  ;;  %v18554_v9 = vadd.f32 %v12598_v56, %v6890_v8  ;;  %v15261_v22 = vmul.f32 -1.442695, %v12882_v50  ;;  %v12885_v11 = vadd.f32 %v23115_v51, %v18553_v38 }
 0x5b1   : > { %v20013_v12 = vpop.eup %20012  ;;  %v13421_v32 = vadd.f32 1.0, %v20011_v41  ;;  %20032 = vpow2.f32 %v15259_v46 }
 0x5b2   : > { %v20015_v13 = vpop.eup %20014  ;;  %v13420_v54 = vadd.f32 1.0, %v20013_v12  ;;  %20034 = vpow2.f32 %v15262_v31  ;;  %v12884_v57 = vadd.f32 %v23115_v51, %v18554_v9  ;;  %v15264_v33 = vmul.f32 -1.442695, %v12885_v11 }
 0x5b3   : > { %v20017_v1 = vpop.eup %20016  ;;  %13824 = vst.msk [vmem:[%s22753_s7 + $0x3c8] sm:$0xff] %vm13702_vm1, %v20015_v13  ;;  %20036 = vrcp.f32 %v13421_v32 }
 0x5b4   : > { %v20019_v21 = vpop.eup %20018  ;;  %13823 = vst.msk [vmem:[%s22753_s7 + $0x3c0] sm:$0xff] %vm13702_vm1, %v20017_v1  ;;  %20038 = vrcp.f32 %v13420_v54  ;;  %v15263_v0 = vmul.f32 -1.442695, %v12884_v57 }
 0x5b5   : > { %v20021_v55 = vpop.eup %20020  ;;  %v13423_v14 = vadd.f32 1.0, %v20019_v21  ;;  %20040 = vpow2.f32 %v15261_v22 }
 0x5b6   : > { %v20023_v39 = vpop.eup %20022  ;;  %v13422_v23 = vadd.f32 1.0, %v20021_v55  ;;  %20042 = vpow2.f32 %v15264_v33 }
 0x5b7   : > { %v20025_v51 = vpop.eup %20024  ;;  %13826 = vst.msk [vmem:[%s22753_s7 + $0x3d8] sm:$0xff] %vm13702_vm1, %v20023_v39  ;;  %20044 = vrcp.f32 %v13423_v14 }
 0x5b8   : > { %v20027_v30 = vpop.eup %20026  ;;  %20046 = vrcp.f32 %v13422_v23  ;;  %v13425_v58 = vadd.f32 1.0, %v20025_v51 }
 0x5b9   : > { %v20029_v26 = vpop.eup %20028  ;;  %13825 = vst.msk [vmem:[%s22753_s7 + $0x3d0] sm:$0xff] %vm13702_vm1, %v20027_v30  ;;  %20048 = vpow2.f32 %v15263_v0 }
 0x5ba   : > { %v20031_v19 = vpop.eup %20030  ;;  %13828 = vst.msk [vmem:[%s22753_s7 + $0x3e8] sm:$0xff] %vm13702_vm1, %v20029_v26  ;;  %20050 = vrcp.f32 %v13425_v58 }
 0x5bb   : > { %v20033_v40 = vpop.eup %20032  ;;  %13827 = vst.msk [vmem:[%s22753_s7 + $0x3e0] sm:$0xff] %vm13702_vm1, %v20031_v19 }
 0x5bc   : > { %v20035_v44 = vpop.eup %20034  ;;  %v13424_v27 = vadd.f32 1.0, %v20033_v40 }
 0x5bd   : > { %v20037_v3 = vpop.eup %20036  ;;  %v13427_v15 = vadd.f32 1.0, %v20035_v44 }
 0x5be   : > { %v20039_v34 = vpop.eup %20038  ;;  %13830 = vst.msk [vmem:[%s22753_s7 + $0x3f8] sm:$0xff] %vm13702_vm1, %v20037_v3  ;;  %20052 = vrcp.f32 %v13424_v27 }
 0x5bf   : > { %v20041_v20 = vpop.eup %20040  ;;  %13829 = vst.msk [vmem:[%s22753_s7 + $0x3f0] sm:$0xff] %vm13702_vm1, %v20039_v34  ;;  %20054 = vrcp.f32 %v13427_v15 }
 0x5c0   : > { %v20043_v6 = vpop.eup %20042  ;;  %v13426_v59 = vadd.f32 1.0, %v20041_v20 }
 0x5c1   : > { %v20045_v17 = vpop.eup %20044  ;;  %v13429_v48 = vadd.f32 1.0, %v20043_v6 }
 0x5c2   : > { %v20047_v2 = vpop.eup %20046  ;;  %13832 = vst.msk [vmem:[%s22753_s7 + $0x408] sm:$0xff] %vm13702_vm1, %v20045_v17  ;;  %20056 = vrcp.f32 %v13426_v59 }
 0x5c3   : > { %v20049_v45 = vpop.eup %20048  ;;  %13831 = vst.msk [vmem:[%s22753_s7 + $0x400] sm:$0xff] %vm13702_vm1, %v20047_v2  ;;  %20058 = vrcp.f32 %v13429_v48 }
 0x5c4   : > { %v20051_v60 = vpop.eup %20050  ;;  %v13428_v35 = vadd.f32 1.0, %v20049_v45 }
 0x5c5   : > { %13834 = vst.msk [vmem:[%s22753_s7 + $0x418] sm:$0xff] %vm13702_vm1, %v20051_v60 }
 0x5c6   : > { %20060 = vrcp.f32 %v13428_v35 }
 0x5c8   : > { %v20053_v49 = vpop.eup %20052 }
 0x5c9   : > { %v20055_v37 = vpop.eup %20054  ;;  %13833 = vst.msk [vmem:[%s22753_s7 + $0x410] sm:$0xff] %vm13702_vm1, %v20053_v49 }
 0x5ca   : > { %13836 = vst.msk [vmem:[%s22753_s7 + $0x428] sm:$0xff] %vm13702_vm1, %v20055_v37 }
 0x5cc   : > { %v20057_v42 = vpop.eup %20056 }
 0x5cd   : > { %v20059_v36 = vpop.eup %20058  ;;  %13835 = vst.msk [vmem:[%s22753_s7 + $0x420] sm:$0xff] %vm13702_vm1, %v20057_v42 }
 0x5ce   : > { %13839 = vst.msk [vmem:[%s22753_s7 + $0x438] sm:$0x3f] %vm13838_vm3, %v20059_v36 }
 0x5d0   : > { %v20061_v24 = vpop.eup %20060 }
 0x5d1   : > { %13837 = vst.msk [vmem:[%s22753_s7 + $0x430] sm:$0xff] %vm13702_vm1, %v20061_v24 }
 0x5d2 PF: > { %s13_s12 = sadd.s32 1, %s20070_s12  }
 0x5d3   : > { %p10_p4 = scmp.ge.s32.totalorder %s13_s12, 4  }
 0x5d5   :  { %12 = sbr.rel (!%p10_p4) target bundleno = 1 (0x1), region = 62 }

</bundles_post_ra>
